<compile_context>
chip_gen: v7x
topology: tpu7x:2x2x1
jax: 0.10.0
libtpu: 0.0.40
codegen_flags: <defaults>
</compile_context>

<pallas_src>
import jax
import jax.numpy as jnp
from jax import lax
from jax.experimental import pallas as pl
from jax.experimental.pallas import tpu as pltpu

EPS = 1e-3  # BatchNorm eps from the PyTorch module


# ----------------------------------------------------------------------------
# Fused (im2col-matmul) Conv + BatchNorm(train-mode batch stats) + ReLU kernel
# K-tiled grid with f32 accumulator; BN+ReLU epilogue on the last K tile.
# ----------------------------------------------------------------------------
def _matmul_bn_relu_kernel(x_ref, w_ref, g_ref, b_ref, o_ref, acc_ref):
    k = pl.program_id(0)

    @pl.when(k == 0)
    def _():
        acc_ref[...] = jnp.zeros_like(acc_ref)

    acc_ref[...] += jnp.dot(x_ref[...], w_ref[...],
                            preferred_element_type=jnp.float32)

    @pl.when(k == pl.num_programs(0) - 1)
    def _():
        y = acc_ref[...]                                   # (M, C) f32
        m = y.shape[0]
        inv_m = 1.0 / float(m)
        s1 = jnp.sum(y, axis=0, keepdims=True)             # (1, C)
        s2 = jnp.sum(y * y, axis=0, keepdims=True)         # (1, C)
        mean = s1 * inv_m
        var = jnp.maximum(s2 * inv_m - mean * mean, 0.0)   # biased batch var
        scale = g_ref[...] * lax.rsqrt(var + EPS)
        shift = b_ref[...] - mean * scale
        o_ref[...] = jnp.maximum(y * scale + shift, 0.0)


def _matmul_bn_relu(x2d, w2d, gamma, beta, tk=512):
    M, K = x2d.shape
    Kw, C = w2d.shape
    assert K == Kw

    # bf16 MXU inputs (halves HBM weight traffic; f32 accumulate in-kernel).
    x_bf = x2d.astype(jnp.bfloat16)
    w_bf = w2d.astype(jnp.bfloat16)

    # Pad K to a multiple of the K tile (zero padding is exact for the matmul).
    Kp = ((K + tk - 1) // tk) * tk
    if Kp != K:
        x_bf = jnp.pad(x_bf, ((0, 0), (0, Kp - K)))
        w_bf = jnp.pad(w_bf, ((0, Kp - K), (0, 0)))
    nk = Kp // tk

    return pl.pallas_call(
        _matmul_bn_relu_kernel,
        out_shape=jax.ShapeDtypeStruct((M, C), jnp.float32),
        grid=(nk,),
        in_specs=[
            pl.BlockSpec((M, tk), lambda k: (0, k)),   # im2col patches
            pl.BlockSpec((tk, C), lambda k: (k, 0)),   # weight K-tile (pipelined)
            pl.BlockSpec((1, C), lambda k: (0, 0)),    # gamma
            pl.BlockSpec((1, C), lambda k: (0, 0)),    # beta
        ],
        out_specs=pl.BlockSpec((M, C), lambda k: (0, 0)),
        scratch_shapes=[pltpu.VMEM((M, C), jnp.float32)],
        compiler_params=pltpu.CompilerParams(
            dimension_semantics=("arbitrary",)),
    )(x_bf, w_bf, gamma.reshape(1, C), beta.reshape(1, C))


def _im2col(x_nhwc, kh, kw, sh, sw, ph, pw):
    """Patch extraction (pads + strided slices); last axis order (i, j, c_in)."""
    N, H, W, C = x_nhwc.shape
    Ho = (H + 2 * ph - kh) // sh + 1
    Wo = (W + 2 * pw - kw) // sw + 1
    xp = jnp.pad(x_nhwc, ((0, 0), (ph, ph), (pw, pw), (0, 0)))
    cols = []
    for i in range(kh):
        for j in range(kw):
            cols.append(xp[:, i:i + sh * (Ho - 1) + 1:sh,
                           j:j + sw * (Wo - 1) + 1:sw, :])
    patches = jnp.concatenate(cols, axis=-1) if len(cols) > 1 else cols[0]
    return patches.reshape(N * Ho * Wo, kh * kw * C), (N, Ho, Wo)


def conv_bn_relu(x_nhwc, w_oihw, gamma, beta, stride=(1, 1), padding=(0, 0)):
    """BasicConv2d: Conv2d(bias=False) + BatchNorm2d(train stats) + ReLU."""
    Cout, Cin, kh, kw = w_oihw.shape
    assert x_nhwc.shape[-1] == Cin
    x2d, (N, Ho, Wo) = _im2col(x_nhwc, kh, kw, stride[0], stride[1],
                               padding[0], padding[1])
    w2d = jnp.transpose(w_oihw, (2, 3, 1, 0)).reshape(kh * kw * Cin, Cout)
    y = _matmul_bn_relu(x2d, w2d, gamma, beta)
    return y.reshape(N, Ho, Wo, Cout)


# ----------------------------------------------------------------------------
# MaxPool2d(3, stride=2, padding=0) kernel: max over 9 pre-sliced taps.
# ----------------------------------------------------------------------------
def _max9_kernel(t_ref, o_ref):
    acc = t_ref[0]
    for i in range(1, 9):
        acc = jnp.maximum(acc, t_ref[i])
    o_ref[...] = acc


def maxpool3_s2(x_nhwc):
    N, H, W, C = x_nhwc.shape
    Ho = (H - 3) // 2 + 1
    Wo = (W - 3) // 2 + 1
    taps = []
    for i in range(3):
        for j in range(3):
            taps.append(x_nhwc[:, i:i + 2 * (Ho - 1) + 1:2,
                               j:j + 2 * (Wo - 1) + 1:2, :])
    t = jnp.stack(taps, axis=0).reshape(9, N * Ho * Wo, C)
    M = N * Ho * Wo
    out = pl.pallas_call(
        _max9_kernel,
        out_shape=jax.ShapeDtypeStruct((M, C), x_nhwc.dtype),
        grid=(1,),
        in_specs=[pl.BlockSpec((9, M, C), lambda i: (0, 0, 0))],
        out_specs=pl.BlockSpec((M, C), lambda i: (0, 0)),
    )(t)
    return out.reshape(N, Ho, Wo, C)


# ----------------------------------------------------------------------------
# Parameters (deterministic synthetic init) and forward pass
# ----------------------------------------------------------------------------
_CONV_DEFS = {
    # name: (Cin, Cout, kh, kw)
    "block0_0": (1024, 192, 1, 1),
    "block0_1": (192, 192, 3, 3),
    "block1_0": (1024, 256, 1, 1),
    "block1_1": (256, 256, 1, 7),
    "block1_2": (256, 320, 7, 1),
    "block1_3": (320, 320, 3, 3),
}


def init_params(key):
    params = {}
    for idx, (name, (cin, cout, kh, kw)) in enumerate(sorted(_CONV_DEFS.items())):
        kw_, kg, kb = jax.random.split(jax.random.fold_in(key, idx), 3)
        fan_in = cin * kh * kw
        w = jax.random.normal(kw_, (cout, cin, kh, kw), jnp.float32) / jnp.sqrt(
            jnp.float32(fan_in))
        gamma = 1.0 + 0.1 * jax.random.normal(kg, (cout,), jnp.float32)
        beta = 0.1 * jax.random.normal(kb, (cout,), jnp.float32)
        params[name] = (w, gamma, beta)
    return params


def reduction_b_forward(x_nchw, params):
    x = jnp.transpose(x_nchw, (0, 2, 3, 1))  # NCHW -> NHWC

    # Fuse the two 1x1 stems that share the same input (exact: BN is per-channel).
    w0, g0, b0 = params["block0_0"]
    w1, g1, b1 = params["block1_0"]
    w_f = jnp.concatenate([w0, w1], axis=0)          # (448, 1024, 1, 1)
    g_f = jnp.concatenate([g0, g1], axis=0)
    b_f = jnp.concatenate([b0, b1], axis=0)
    stem = conv_bn_relu(x, w_f, g_f, b_f)            # (N, H, W, 448)
    x0 = stem[..., :192]
    x1 = stem[..., 192:]

    # block0 tail: 3x3 stride-2, no padding.
    w, g, b = params["block0_1"]
    x0 = conv_bn_relu(x0, w, g, b, stride=(2, 2), padding=(0, 0))

    # block1 tail: (1,7) pad (0,3) -> (7,1) pad (3,0) -> 3x3 stride-2.
    w, g, b = params["block1_1"]
    x1 = conv_bn_relu(x1, w, g, b, stride=(1, 1), padding=(0, 3))
    w, g, b = params["block1_2"]
    x1 = conv_bn_relu(x1, w, g, b, stride=(1, 1), padding=(3, 0))
    w, g, b = params["block1_3"]
    x1 = conv_bn_relu(x1, w, g, b, stride=(2, 2), padding=(0, 0))

    # block2: MaxPool2d(3, stride=2).
    x2 = maxpool3_s2(x)

    out = jnp.concatenate([x0, x1, x2], axis=-1)     # torch.cat channel order
    return jnp.transpose(out, (0, 3, 1, 2))          # NHWC -> NCHW


if __name__ == "__main__":
    key = jax.random.PRNGKey(0)
    pkey, xkey = jax.random.split(key)
    params = init_params(pkey)

    # Reduction_B requires 1024 input channels; small batch / spatial size.
    N, C, H, W = 2, 1024, 9, 9
    x = jax.random.normal(xkey, (N, C, H, W), jnp.float32)

    fwd = jax.jit(reduction_b_forward)
    out = fwd(x, params)
    out = jax.block_until_ready(out)

    Ho = (H - 3) // 2 + 1
    Wo = (W - 3) // 2 + 1
    assert out.shape == (N, 192 + 320 + 1024, Ho, Wo), out.shape
    assert out.dtype == jnp.float32
    assert bool(jnp.all(jnp.isfinite(out)))
    print("KERNEL_OK")
</pallas_src>

<mosaic_0001>
module attributes {stable_mosaic.version = 11 : i64} {
  func.func @_matmul_bn_relu_kernel(%arg0: i32, %arg1: memref<162x512xbf16, #tpu.memory_space<vmem>>, %arg2: memref<512x448xbf16, #tpu.memory_space<vmem>>, %arg3: memref<1x448xf32, #tpu.memory_space<vmem>>, %arg4: memref<1x448xf32, #tpu.memory_space<vmem>>, %arg5: memref<162x448xf32, #tpu.memory_space<vmem>>, %arg6: memref<162x448xf32, #tpu.memory_space<vmem>>) attributes {dimension_semantics = [#tpu.dimension_semantics<arbitrary>], iteration_bounds = array<i64: 2>, scalar_prefetch = 0 : i64, scratch_operands = 1 : i64, tpu.core_type = #tpu.core_type<tc>, window_params = [{transform_indices = @transform_0, window_bounds = array<i64: 162, 512>}, {transform_indices = @transform_1, window_bounds = array<i64: 512, 448>}, {pipeline_mode = #tpu.pipeline_mode<synchronous>, transform_indices = @transform_2, window_bounds = array<i64: 1, 448>}, {pipeline_mode = #tpu.pipeline_mode<synchronous>, transform_indices = @transform_3, window_bounds = array<i64: 1, 448>}, {pipeline_mode = #tpu.pipeline_mode<synchronous>, transform_indices = @transform_4, window_bounds = array<i64: 162, 448>}]} {
    %c0_i32 = arith.constant 0 : i32
    %0 = arith.cmpi eq, %arg0, %c0_i32 : i32
    %1 = arith.extui %0 : i1 to i32
    %c0_i32_0 = arith.constant 0 : i32
    %2 = arith.cmpi ne, %1, %c0_i32_0 : i32
    scf.if %2 {
      %cst_9 = arith.constant 0.000000e+00 : f32
      %12 = vector.broadcast %cst_9 : f32 to vector<162x448xf32>
      %c0_10 = arith.constant 0 : index
      %c0_11 = arith.constant 0 : index
      %13 = vector.load %arg6[%c0_10, %c0_11] : memref<162x448xf32, #tpu.memory_space<vmem>>, vector<162x448xf32>
      tpu.vector_store %arg6[%c0_10, %c0_11], %12 {strides = array<i32>} : memref<162x448xf32, #tpu.memory_space<vmem>>, vector<162x448xf32>,
    } else {
    }
    %c0 = arith.constant 0 : index
    %c0_1 = arith.constant 0 : index
    %3 = vector.load %arg6[%c0, %c0_1] : memref<162x448xf32, #tpu.memory_space<vmem>>, vector<162x448xf32>
    %c0_2 = arith.constant 0 : index
    %c0_3 = arith.constant 0 : index
    %4 = vector.load %arg1[%c0_2, %c0_3] : memref<162x512xbf16, #tpu.memory_space<vmem>>, vector<162x512xbf16>
    %c0_4 = arith.constant 0 : index
    %c0_5 = arith.constant 0 : index
    %5 = vector.load %arg2[%c0_4, %c0_5] : memref<512x448xbf16, #tpu.memory_space<vmem>>, vector<512x448xbf16>
    %cst = arith.constant dense<0.000000e+00> : vector<162x448xf32>
    %6 = tpu.matmul %4, %5, %cst {dimension_numbers = #tpu.dot_dimension_numbers<[1], [0], [0], [1], [0, 0, 1, 1], [], []>} : vector<162x512xbf16>, vector<512x448xbf16>, vector<162x448xf32> -> vector<162x448xf32>
    %7 = arith.addf %3, %6 : vector<162x448xf32>
    %c0_6 = arith.constant 0 : index
    %c0_7 = arith.constant 0 : index
    %8 = vector.load %arg6[%c0_6, %c0_7] : memref<162x448xf32, #tpu.memory_space<vmem>>, vector<162x448xf32>
    tpu.vector_store %arg6[%c0_6, %c0_7], %7 {strides = array<i32>} : memref<162x448xf32, #tpu.memory_space<vmem>>, vector<162x448xf32>,
    %c1_i32 = arith.constant 1 : i32
    %9 = arith.cmpi eq, %arg0, %c1_i32 : i32
    %10 = arith.extui %9 : i1 to i32
    %c0_i32_8 = arith.constant 0 : i32
    %11 = arith.cmpi ne, %10, %c0_i32_8 : i32
    scf.if %11 {
      %c0_9 = arith.constant 0 : index
      %c0_10 = arith.constant 0 : index
      %12 = vector.load %arg6[%c0_9, %c0_10] : memref<162x448xf32, #tpu.memory_space<vmem>>, vector<162x448xf32>
      %cst_11 = arith.constant dense<0.000000e+00> : vector<448xf32>
      %13 = vector.multi_reduction <add>, %12, %cst_11 [0] : vector<162x448xf32> to vector<448xf32>
      %14 = vector.shape_cast %13 : vector<448xf32> to vector<1x448xf32>
      %15 = arith.mulf %12, %12 : vector<162x448xf32>
      %cst_12 = arith.constant dense<0.000000e+00> : vector<448xf32>
      %16 = vector.multi_reduction <add>, %15, %cst_12 [0] : vector<162x448xf32> to vector<448xf32>
      %17 = vector.shape_cast %16 : vector<448xf32> to vector<1x448xf32>
      %cst_13 = arith.constant 0.00617283955 : f32
      %18 = vector.broadcast %cst_13 : f32 to vector<1x448xf32>
      %19 = arith.mulf %14, %18 : vector<1x448xf32>
      %cst_14 = arith.constant 0.00617283955 : f32
      %20 = vector.broadcast %cst_14 : f32 to vector<1x448xf32>
      %21 = arith.mulf %17, %20 : vector<1x448xf32>
      %22 = arith.mulf %19, %19 : vector<1x448xf32>
      %23 = arith.subf %21, %22 : vector<1x448xf32>
      %cst_15 = arith.constant 0.000000e+00 : f32
      %24 = vector.broadcast %cst_15 : f32 to vector<1x448xf32>
      %25 = arith.maximumf %23, %24 : vector<1x448xf32>
      %c0_16 = arith.constant 0 : index
      %c0_17 = arith.constant 0 : index
      %26 = vector.load %arg3[%c0_16, %c0_17] : memref<1x448xf32, #tpu.memory_space<vmem>>, vector<1x448xf32>
      %cst_18 = arith.constant 1.000000e-03 : f32
      %27 = vector.broadcast %cst_18 : f32 to vector<1x448xf32>
      %28 = arith.addf %25, %27 : vector<1x448xf32>
      %29 = math.rsqrt %28 : vector<1x448xf32>
      %30 = arith.mulf %26, %29 : vector<1x448xf32>
      %c0_19 = arith.constant 0 : index
      %c0_20 = arith.constant 0 : index
      %31 = vector.load %arg4[%c0_19, %c0_20] : memref<1x448xf32, #tpu.memory_space<vmem>>, vector<1x448xf32>
      %32 = arith.mulf %19, %30 : vector<1x448xf32>
      %33 = arith.subf %31, %32 : vector<1x448xf32>
      %34 = vector.broadcast %30 : vector<1x448xf32> to vector<162x448xf32>
      %35 = arith.mulf %12, %34 : vector<162x448xf32>
      %36 = vector.broadcast %33 : vector<1x448xf32> to vector<162x448xf32>
      %37 = arith.addf %35, %36 : vector<162x448xf32>
      %cst_21 = arith.constant 0.000000e+00 : f32
      %38 = vector.broadcast %cst_21 : f32 to vector<162x448xf32>
      %39 = arith.maximumf %37, %38 : vector<162x448xf32>
      %c0_22 = arith.constant 0 : index
      %c0_23 = arith.constant 0 : index
      %40 = vector.load %arg5[%c0_22, %c0_23] : memref<162x448xf32, #tpu.memory_space<vmem>>, vector<162x448xf32>
      tpu.vector_store %arg5[%c0_22, %c0_23], %39 {strides = array<i32>} : memref<162x448xf32, #tpu.memory_space<vmem>>, vector<162x448xf32>,
    } else {
    }
    return
  }
  func.func @transform_0(%arg0: i32) -> (i32, i32) {
    %c0_i32 = arith.constant 0 : i32
    %c0_i32_0 = arith.constant 0 : i32
    return %c0_i32, %arg0 : i32, i32
  }
  func.func @transform_1(%arg0: i32) -> (i32, i32) {
    %c0_i32 = arith.constant 0 : i32
    %c0_i32_0 = arith.constant 0 : i32
    return %arg0, %c0_i32 : i32, i32
  }
  func.func @transform_2(%arg0: i32) -> (i32, i32) {
    %c0_i32 = arith.constant 0 : i32
    %c0_i32_0 = arith.constant 0 : i32
    %c0_i32_1 = arith.constant 0 : i32
    return %c0_i32, %c0_i32_0 : i32, i32
  }
  func.func @transform_3(%arg0: i32) -> (i32, i32) {
    %c0_i32 = arith.constant 0 : i32
    %c0_i32_0 = arith.constant 0 : i32
    %c0_i32_1 = arith.constant 0 : i32
    return %c0_i32, %c0_i32_0 : i32, i32
  }
  func.func @transform_4(%arg0: i32) -> (i32, i32) {
    %c0_i32 = arith.constant 0 : i32
    %c0_i32_0 = arith.constant 0 : i32
    %c0_i32_1 = arith.constant 0 : i32
    return %c0_i32, %c0_i32_0 : i32, i32
  }
}

module attributes {stable_mosaic.version = 11 : i64} {
  func.func @_matmul_bn_relu_kernel(%arg0: i32, %arg1: memref<32x512xbf16, #tpu.memory_space<vmem>>, %arg2: memref<512x192xbf16, #tpu.memory_space<vmem>>, %arg3: memref<1x192xf32, #tpu.memory_space<vmem>>, %arg4: memref<1x192xf32, #tpu.memory_space<vmem>>, %arg5: memref<32x192xf32, #tpu.memory_space<vmem>>, %arg6: memref<32x192xf32, #tpu.memory_space<vmem>>) attributes {dimension_semantics = [#tpu.dimension_semantics<arbitrary>], iteration_bounds = array<i64: 4>, scalar_prefetch = 0 : i64, scratch_operands = 1 : i64, tpu.core_type = #tpu.core_type<tc>, window_params = [{transform_indices = @transform_0, window_bounds = array<i64: 32, 512>}, {transform_indices = @transform_1, window_bounds = array<i64: 512, 192>}, {pipeline_mode = #tpu.pipeline_mode<synchronous>, transform_indices = @transform_2, window_bounds = array<i64: 1, 192>}, {pipeline_mode = #tpu.pipeline_mode<synchronous>, transform_indices = @transform_3, window_bounds = array<i64: 1, 192>}, {pipeline_mode = #tpu.pipeline_mode<synchronous>, transform_indices = @transform_4, window_bounds = array<i64: 32, 192>}]} {
    %c0_i32 = arith.constant 0 : i32
    %0 = arith.cmpi eq, %arg0, %c0_i32 : i32
    %1 = arith.extui %0 : i1 to i32
    %c0_i32_0 = arith.constant 0 : i32
    %2 = arith.cmpi ne, %1, %c0_i32_0 : i32
    scf.if %2 {
      %cst_9 = arith.constant 0.000000e+00 : f32
      %12 = vector.broadcast %cst_9 : f32 to vector<32x192xf32>
      %c0_10 = arith.constant 0 : index
      %c0_11 = arith.constant 0 : index
      %13 = vector.load %arg6[%c0_10, %c0_11] : memref<32x192xf32, #tpu.memory_space<vmem>>, vector<32x192xf32>
      tpu.vector_store %arg6[%c0_10, %c0_11], %12 {strides = array<i32>} : memref<32x192xf32, #tpu.memory_space<vmem>>, vector<32x192xf32>,
    } else {
    }
    %c0 = arith.constant 0 : index
    %c0_1 = arith.constant 0 : index
    %3 = vector.load %arg6[%c0, %c0_1] : memref<32x192xf32, #tpu.memory_space<vmem>>, vector<32x192xf32>
    %c0_2 = arith.constant 0 : index
    %c0_3 = arith.constant 0 : index
    %4 = vector.load %arg1[%c0_2, %c0_3] : memref<32x512xbf16, #tpu.memory_space<vmem>>, vector<32x512xbf16>
    %c0_4 = arith.constant 0 : index
    %c0_5 = arith.constant 0 : index
    %5 = vector.load %arg2[%c0_4, %c0_5] : memref<512x192xbf16, #tpu.memory_space<vmem>>, vector<512x192xbf16>
    %cst = arith.constant dense<0.000000e+00> : vector<32x192xf32>
    %6 = tpu.matmul %4, %5, %cst {dimension_numbers = #tpu.dot_dimension_numbers<[1], [0], [0], [1], [0, 0, 1, 1], [], []>} : vector<32x512xbf16>, vector<512x192xbf16>, vector<32x192xf32> -> vector<32x192xf32>
    %7 = arith.addf %3, %6 : vector<32x192xf32>
    %c0_6 = arith.constant 0 : index
    %c0_7 = arith.constant 0 : index
    %8 = vector.load %arg6[%c0_6, %c0_7] : memref<32x192xf32, #tpu.memory_space<vmem>>, vector<32x192xf32>
    tpu.vector_store %arg6[%c0_6, %c0_7], %7 {strides = array<i32>} : memref<32x192xf32, #tpu.memory_space<vmem>>, vector<32x192xf32>,
    %c3_i32 = arith.constant 3 : i32
    %9 = arith.cmpi eq, %arg0, %c3_i32 : i32
    %10 = arith.extui %9 : i1 to i32
    %c0_i32_8 = arith.constant 0 : i32
    %11 = arith.cmpi ne, %10, %c0_i32_8 : i32
    scf.if %11 {
      %c0_9 = arith.constant 0 : index
      %c0_10 = arith.constant 0 : index
      %12 = vector.load %arg6[%c0_9, %c0_10] : memref<32x192xf32, #tpu.memory_space<vmem>>, vector<32x192xf32>
      %cst_11 = arith.constant dense<0.000000e+00> : vector<192xf32>
      %13 = vector.multi_reduction <add>, %12, %cst_11 [0] : vector<32x192xf32> to vector<192xf32>
      %14 = vector.shape_cast %13 : vector<192xf32> to vector<1x192xf32>
      %15 = arith.mulf %12, %12 : vector<32x192xf32>
      %cst_12 = arith.constant dense<0.000000e+00> : vector<192xf32>
      %16 = vector.multi_reduction <add>, %15, %cst_12 [0] : vector<32x192xf32> to vector<192xf32>
      %17 = vector.shape_cast %16 : vector<192xf32> to vector<1x192xf32>
      %cst_13 = arith.constant 3.125000e-02 : f32
      %18 = vector.broadcast %cst_13 : f32 to vector<1x192xf32>
      %19 = arith.mulf %14, %18 : vector<1x192xf32>
      %cst_14 = arith.constant 3.125000e-02 : f32
      %20 = vector.broadcast %cst_14 : f32 to vector<1x192xf32>
      %21 = arith.mulf %17, %20 : vector<1x192xf32>
      %22 = arith.mulf %19, %19 : vector<1x192xf32>
      %23 = arith.subf %21, %22 : vector<1x192xf32>
      %cst_15 = arith.constant 0.000000e+00 : f32
      %24 = vector.broadcast %cst_15 : f32 to vector<1x192xf32>
      %25 = arith.maximumf %23, %24 : vector<1x192xf32>
      %c0_16 = arith.constant 0 : index
      %c0_17 = arith.constant 0 : index
      %26 = vector.load %arg3[%c0_16, %c0_17] : memref<1x192xf32, #tpu.memory_space<vmem>>, vector<1x192xf32>
      %cst_18 = arith.constant 1.000000e-03 : f32
      %27 = vector.broadcast %cst_18 : f32 to vector<1x192xf32>
      %28 = arith.addf %25, %27 : vector<1x192xf32>
      %29 = math.rsqrt %28 : vector<1x192xf32>
      %30 = arith.mulf %26, %29 : vector<1x192xf32>
      %c0_19 = arith.constant 0 : index
      %c0_20 = arith.constant 0 : index
      %31 = vector.load %arg4[%c0_19, %c0_20] : memref<1x192xf32, #tpu.memory_space<vmem>>, vector<1x192xf32>
      %32 = arith.mulf %19, %30 : vector<1x192xf32>
      %33 = arith.subf %31, %32 : vector<1x192xf32>
      %34 = vector.broadcast %30 : vector<1x192xf32> to vector<32x192xf32>
      %35 = arith.mulf %12, %34 : vector<32x192xf32>
      %36 = vector.broadcast %33 : vector<1x192xf32> to vector<32x192xf32>
      %37 = arith.addf %35, %36 : vector<32x192xf32>
      %cst_21 = arith.constant 0.000000e+00 : f32
      %38 = vector.broadcast %cst_21 : f32 to vector<32x192xf32>
      %39 = arith.maximumf %37, %38 : vector<32x192xf32>
      %c0_22 = arith.constant 0 : index
      %c0_23 = arith.constant 0 : index
      %40 = vector.load %arg5[%c0_22, %c0_23] : memref<32x192xf32, #tpu.memory_space<vmem>>, vector<32x192xf32>
      tpu.vector_store %arg5[%c0_22, %c0_23], %39 {strides = array<i32>} : memref<32x192xf32, #tpu.memory_space<vmem>>, vector<32x192xf32>,
    } else {
    }
    return
  }
  func.func @transform_0(%arg0: i32) -> (i32, i32) {
    %c0_i32 = arith.constant 0 : i32
    %c0_i32_0 = arith.constant 0 : i32
    return %c0_i32, %arg0 : i32, i32
  }
  func.func @transform_1(%arg0: i32) -> (i32, i32) {
    %c0_i32 = arith.constant 0 : i32
    %c0_i32_0 = arith.constant 0 : i32
    return %arg0, %c0_i32 : i32, i32
  }
  func.func @transform_2(%arg0: i32) -> (i32, i32) {
    %c0_i32 = arith.constant 0 : i32
    %c0_i32_0 = arith.constant 0 : i32
    %c0_i32_1 = arith.constant 0 : i32
    return %c0_i32, %c0_i32_0 : i32, i32
  }
  func.func @transform_3(%arg0: i32) -> (i32, i32) {
    %c0_i32 = arith.constant 0 : i32
    %c0_i32_0 = arith.constant 0 : i32
    %c0_i32_1 = arith.constant 0 : i32
    return %c0_i32, %c0_i32_0 : i32, i32
  }
  func.func @transform_4(%arg0: i32) -> (i32, i32) {
    %c0_i32 = arith.constant 0 : i32
    %c0_i32_0 = arith.constant 0 : i32
    %c0_i32_1 = arith.constant 0 : i32
    return %c0_i32, %c0_i32_0 : i32, i32
  }
}

module attributes {stable_mosaic.version = 11 : i64} {
  func.func @_matmul_bn_relu_kernel(%arg0: i32, %arg1: memref<162x512xbf16, #tpu.memory_space<vmem>>, %arg2: memref<512x256xbf16, #tpu.memory_space<vmem>>, %arg3: memref<1x256xf32, #tpu.memory_space<vmem>>, %arg4: memref<1x256xf32, #tpu.memory_space<vmem>>, %arg5: memref<162x256xf32, #tpu.memory_space<vmem>>, %arg6: memref<162x256xf32, #tpu.memory_space<vmem>>) attributes {dimension_semantics = [#tpu.dimension_semantics<arbitrary>], iteration_bounds = array<i64: 4>, scalar_prefetch = 0 : i64, scratch_operands = 1 : i64, tpu.core_type = #tpu.core_type<tc>, window_params = [{transform_indices = @transform_0, window_bounds = array<i64: 162, 512>}, {transform_indices = @transform_1, window_bounds = array<i64: 512, 256>}, {pipeline_mode = #tpu.pipeline_mode<synchronous>, transform_indices = @transform_2, window_bounds = array<i64: 1, 256>}, {pipeline_mode = #tpu.pipeline_mode<synchronous>, transform_indices = @transform_3, window_bounds = array<i64: 1, 256>}, {pipeline_mode = #tpu.pipeline_mode<synchronous>, transform_indices = @transform_4, window_bounds = array<i64: 162, 256>}]} {
    %c0_i32 = arith.constant 0 : i32
    %0 = arith.cmpi eq, %arg0, %c0_i32 : i32
    %1 = arith.extui %0 : i1 to i32
    %c0_i32_0 = arith.constant 0 : i32
    %2 = arith.cmpi ne, %1, %c0_i32_0 : i32
    scf.if %2 {
      %cst_9 = arith.constant 0.000000e+00 : f32
      %12 = vector.broadcast %cst_9 : f32 to vector<162x256xf32>
      %c0_10 = arith.constant 0 : index
      %c0_11 = arith.constant 0 : index
      %13 = vector.load %arg6[%c0_10, %c0_11] : memref<162x256xf32, #tpu.memory_space<vmem>>, vector<162x256xf32>
      tpu.vector_store %arg6[%c0_10, %c0_11], %12 {strides = array<i32>} : memref<162x256xf32, #tpu.memory_space<vmem>>, vector<162x256xf32>,
    } else {
    }
    %c0 = arith.constant 0 : index
    %c0_1 = arith.constant 0 : index
    %3 = vector.load %arg6[%c0, %c0_1] : memref<162x256xf32, #tpu.memory_space<vmem>>, vector<162x256xf32>
    %c0_2 = arith.constant 0 : index
    %c0_3 = arith.constant 0 : index
    %4 = vector.load %arg1[%c0_2, %c0_3] : memref<162x512xbf16, #tpu.memory_space<vmem>>, vector<162x512xbf16>
    %c0_4 = arith.constant 0 : index
    %c0_5 = arith.constant 0 : index
    %5 = vector.load %arg2[%c0_4, %c0_5] : memref<512x256xbf16, #tpu.memory_space<vmem>>, vector<512x256xbf16>
    %cst = arith.constant dense<0.000000e+00> : vector<162x256xf32>
    %6 = tpu.matmul %4, %5, %cst {dimension_numbers = #tpu.dot_dimension_numbers<[1], [0], [0], [1], [0, 0, 1, 1], [], []>} : vector<162x512xbf16>, vector<512x256xbf16>, vector<162x256xf32> -> vector<162x256xf32>
    %7 = arith.addf %3, %6 : vector<162x256xf32>
    %c0_6 = arith.constant 0 : index
    %c0_7 = arith.constant 0 : index
    %8 = vector.load %arg6[%c0_6, %c0_7] : memref<162x256xf32, #tpu.memory_space<vmem>>, vector<162x256xf32>
    tpu.vector_store %arg6[%c0_6, %c0_7], %7 {strides = array<i32>} : memref<162x256xf32, #tpu.memory_space<vmem>>, vector<162x256xf32>,
    %c3_i32 = arith.constant 3 : i32
    %9 = arith.cmpi eq, %arg0, %c3_i32 : i32
    %10 = arith.extui %9 : i1 to i32
    %c0_i32_8 = arith.constant 0 : i32
    %11 = arith.cmpi ne, %10, %c0_i32_8 : i32
    scf.if %11 {
      %c0_9 = arith.constant 0 : index
      %c0_10 = arith.constant 0 : index
      %12 = vector.load %arg6[%c0_9, %c0_10] : memref<162x256xf32, #tpu.memory_space<vmem>>, vector<162x256xf32>
      %cst_11 = arith.constant dense<0.000000e+00> : vector<256xf32>
      %13 = vector.multi_reduction <add>, %12, %cst_11 [0] : vector<162x256xf32> to vector<256xf32>
      %14 = vector.shape_cast %13 : vector<256xf32> to vector<1x256xf32>
      %15 = arith.mulf %12, %12 : vector<162x256xf32>
      %cst_12 = arith.constant dense<0.000000e+00> : vector<256xf32>
      %16 = vector.multi_reduction <add>, %15, %cst_12 [0] : vector<162x256xf32> to vector<256xf32>
      %17 = vector.shape_cast %16 : vector<256xf32> to vector<1x256xf32>
      %cst_13 = arith.constant 0.00617283955 : f32
      %18 = vector.broadcast %cst_13 : f32 to vector<1x256xf32>
      %19 = arith.mulf %14, %18 : vector<1x256xf32>
      %cst_14 = arith.constant 0.00617283955 : f32
      %20 = vector.broadcast %cst_14 : f32 to vector<1x256xf32>
      %21 = arith.mulf %17, %20 : vector<1x256xf32>
      %22 = arith.mulf %19, %19 : vector<1x256xf32>
      %23 = arith.subf %21, %22 : vector<1x256xf32>
      %cst_15 = arith.constant 0.000000e+00 : f32
      %24 = vector.broadcast %cst_15 : f32 to vector<1x256xf32>
      %25 = arith.maximumf %23, %24 : vector<1x256xf32>
      %c0_16 = arith.constant 0 : index
      %c0_17 = arith.constant 0 : index
      %26 = vector.load %arg3[%c0_16, %c0_17] : memref<1x256xf32, #tpu.memory_space<vmem>>, vector<1x256xf32>
      %cst_18 = arith.constant 1.000000e-03 : f32
      %27 = vector.broadcast %cst_18 : f32 to vector<1x256xf32>
      %28 = arith.addf %25, %27 : vector<1x256xf32>
      %29 = math.rsqrt %28 : vector<1x256xf32>
      %30 = arith.mulf %26, %29 : vector<1x256xf32>
      %c0_19 = arith.constant 0 : index
      %c0_20 = arith.constant 0 : index
      %31 = vector.load %arg4[%c0_19, %c0_20] : memref<1x256xf32, #tpu.memory_space<vmem>>, vector<1x256xf32>
      %32 = arith.mulf %19, %30 : vector<1x256xf32>
      %33 = arith.subf %31, %32 : vector<1x256xf32>
      %34 = vector.broadcast %30 : vector<1x256xf32> to vector<162x256xf32>
      %35 = arith.mulf %12, %34 : vector<162x256xf32>
      %36 = vector.broadcast %33 : vector<1x256xf32> to vector<162x256xf32>
      %37 = arith.addf %35, %36 : vector<162x256xf32>
      %cst_21 = arith.constant 0.000000e+00 : f32
      %38 = vector.broadcast %cst_21 : f32 to vector<162x256xf32>
      %39 = arith.maximumf %37, %38 : vector<162x256xf32>
      %c0_22 = arith.constant 0 : index
      %c0_23 = arith.constant 0 : index
      %40 = vector.load %arg5[%c0_22, %c0_23] : memref<162x256xf32, #tpu.memory_space<vmem>>, vector<162x256xf32>
      tpu.vector_store %arg5[%c0_22, %c0_23], %39 {strides = array<i32>} : memref<162x256xf32, #tpu.memory_space<vmem>>, vector<162x256xf32>,
    } else {
    }
    return
  }
  func.func @transform_0(%arg0: i32) -> (i32, i32) {
    %c0_i32 = arith.constant 0 : i32
    %c0_i32_0 = arith.constant 0 : i32
    return %c0_i32, %arg0 : i32, i32
  }
  func.func @transform_1(%arg0: i32) -> (i32, i32) {
    %c0_i32 = arith.constant 0 : i32
    %c0_i32_0 = arith.constant 0 : i32
    return %arg0, %c0_i32 : i32, i32
  }
  func.func @transform_2(%arg0: i32) -> (i32, i32) {
    %c0_i32 = arith.constant 0 : i32
    %c0_i32_0 = arith.constant 0 : i32
    %c0_i32_1 = arith.constant 0 : i32
    return %c0_i32, %c0_i32_0 : i32, i32
  }
  func.func @transform_3(%arg0: i32) -> (i32, i32) {
    %c0_i32 = arith.constant 0 : i32
    %c0_i32_0 = arith.constant 0 : i32
    %c0_i32_1 = arith.constant 0 : i32
    return %c0_i32, %c0_i32_0 : i32, i32
  }
  func.func @transform_4(%arg0: i32) -> (i32, i32) {
    %c0_i32 = arith.constant 0 : i32
    %c0_i32_0 = arith.constant 0 : i32
    %c0_i32_1 = arith.constant 0 : i32
    return %c0_i32, %c0_i32_0 : i32, i32
  }
}

module attributes {stable_mosaic.version = 11 : i64} {
  func.func @_matmul_bn_relu_kernel(%arg0: i32, %arg1: memref<162x512xbf16, #tpu.memory_space<vmem>>, %arg2: memref<512x320xbf16, #tpu.memory_space<vmem>>, %arg3: memref<1x320xf32, #tpu.memory_space<vmem>>, %arg4: memref<1x320xf32, #tpu.memory_space<vmem>>, %arg5: memref<162x320xf32, #tpu.memory_space<vmem>>, %arg6: memref<162x320xf32, #tpu.memory_space<vmem>>) attributes {dimension_semantics = [#tpu.dimension_semantics<arbitrary>], iteration_bounds = array<i64: 4>, scalar_prefetch = 0 : i64, scratch_operands = 1 : i64, tpu.core_type = #tpu.core_type<tc>, window_params = [{transform_indices = @transform_0, window_bounds = array<i64: 162, 512>}, {transform_indices = @transform_1, window_bounds = array<i64: 512, 320>}, {pipeline_mode = #tpu.pipeline_mode<synchronous>, transform_indices = @transform_2, window_bounds = array<i64: 1, 320>}, {pipeline_mode = #tpu.pipeline_mode<synchronous>, transform_indices = @transform_3, window_bounds = array<i64: 1, 320>}, {pipeline_mode = #tpu.pipeline_mode<synchronous>, transform_indices = @transform_4, window_bounds = array<i64: 162, 320>}]} {
    %c0_i32 = arith.constant 0 : i32
    %0 = arith.cmpi eq, %arg0, %c0_i32 : i32
    %1 = arith.extui %0 : i1 to i32
    %c0_i32_0 = arith.constant 0 : i32
    %2 = arith.cmpi ne, %1, %c0_i32_0 : i32
    scf.if %2 {
      %cst_9 = arith.constant 0.000000e+00 : f32
      %12 = vector.broadcast %cst_9 : f32 to vector<162x320xf32>
      %c0_10 = arith.constant 0 : index
      %c0_11 = arith.constant 0 : index
      %13 = vector.load %arg6[%c0_10, %c0_11] : memref<162x320xf32, #tpu.memory_space<vmem>>, vector<162x320xf32>
      tpu.vector_store %arg6[%c0_10, %c0_11], %12 {strides = array<i32>} : memref<162x320xf32, #tpu.memory_space<vmem>>, vector<162x320xf32>,
    } else {
    }
    %c0 = arith.constant 0 : index
    %c0_1 = arith.constant 0 : index
    %3 = vector.load %arg6[%c0, %c0_1] : memref<162x320xf32, #tpu.memory_space<vmem>>, vector<162x320xf32>
    %c0_2 = arith.constant 0 : index
    %c0_3 = arith.constant 0 : index
    %4 = vector.load %arg1[%c0_2, %c0_3] : memref<162x512xbf16, #tpu.memory_space<vmem>>, vector<162x512xbf16>
    %c0_4 = arith.constant 0 : index
    %c0_5 = arith.constant 0 : index
    %5 = vector.load %arg2[%c0_4, %c0_5] : memref<512x320xbf16, #tpu.memory_space<vmem>>, vector<512x320xbf16>
    %cst = arith.constant dense<0.000000e+00> : vector<162x320xf32>
    %6 = tpu.matmul %4, %5, %cst {dimension_numbers = #tpu.dot_dimension_numbers<[1], [0], [0], [1], [0, 0, 1, 1], [], []>} : vector<162x512xbf16>, vector<512x320xbf16>, vector<162x320xf32> -> vector<162x320xf32>
    %7 = arith.addf %3, %6 : vector<162x320xf32>
    %c0_6 = arith.constant 0 : index
    %c0_7 = arith.constant 0 : index
    %8 = vector.load %arg6[%c0_6, %c0_7] : memref<162x320xf32, #tpu.memory_space<vmem>>, vector<162x320xf32>
    tpu.vector_store %arg6[%c0_6, %c0_7], %7 {strides = array<i32>} : memref<162x320xf32, #tpu.memory_space<vmem>>, vector<162x320xf32>,
    %c3_i32 = arith.constant 3 : i32
    %9 = arith.cmpi eq, %arg0, %c3_i32 : i32
    %10 = arith.extui %9 : i1 to i32
    %c0_i32_8 = arith.constant 0 : i32
    %11 = arith.cmpi ne, %10, %c0_i32_8 : i32
    scf.if %11 {
      %c0_9 = arith.constant 0 : index
      %c0_10 = arith.constant 0 : index
      %12 = vector.load %arg6[%c0_9, %c0_10] : memref<162x320xf32, #tpu.memory_space<vmem>>, vector<162x320xf32>
      %cst_11 = arith.constant dense<0.000000e+00> : vector<320xf32>
      %13 = vector.multi_reduction <add>, %12, %cst_11 [0] : vector<162x320xf32> to vector<320xf32>
      %14 = vector.shape_cast %13 : vector<320xf32> to vector<1x320xf32>
      %15 = arith.mulf %12, %12 : vector<162x320xf32>
      %cst_12 = arith.constant dense<0.000000e+00> : vector<320xf32>
      %16 = vector.multi_reduction <add>, %15, %cst_12 [0] : vector<162x320xf32> to vector<320xf32>
      %17 = vector.shape_cast %16 : vector<320xf32> to vector<1x320xf32>
      %cst_13 = arith.constant 0.00617283955 : f32
      %18 = vector.broadcast %cst_13 : f32 to vector<1x320xf32>
      %19 = arith.mulf %14, %18 : vector<1x320xf32>
      %cst_14 = arith.constant 0.00617283955 : f32
      %20 = vector.broadcast %cst_14 : f32 to vector<1x320xf32>
      %21 = arith.mulf %17, %20 : vector<1x320xf32>
      %22 = arith.mulf %19, %19 : vector<1x320xf32>
      %23 = arith.subf %21, %22 : vector<1x320xf32>
      %cst_15 = arith.constant 0.000000e+00 : f32
      %24 = vector.broadcast %cst_15 : f32 to vector<1x320xf32>
      %25 = arith.maximumf %23, %24 : vector<1x320xf32>
      %c0_16 = arith.constant 0 : index
      %c0_17 = arith.constant 0 : index
      %26 = vector.load %arg3[%c0_16, %c0_17] : memref<1x320xf32, #tpu.memory_space<vmem>>, vector<1x320xf32>
      %cst_18 = arith.constant 1.000000e-03 : f32
      %27 = vector.broadcast %cst_18 : f32 to vector<1x320xf32>
      %28 = arith.addf %25, %27 : vector<1x320xf32>
      %29 = math.rsqrt %28 : vector<1x320xf32>
      %30 = arith.mulf %26, %29 : vector<1x320xf32>
      %c0_19 = arith.constant 0 : index
      %c0_20 = arith.constant 0 : index
      %31 = vector.load %arg4[%c0_19, %c0_20] : memref<1x320xf32, #tpu.memory_space<vmem>>, vector<1x320xf32>
      %32 = arith.mulf %19, %30 : vector<1x320xf32>
      %33 = arith.subf %31, %32 : vector<1x320xf32>
      %34 = vector.broadcast %30 : vector<1x320xf32> to vector<162x320xf32>
      %35 = arith.mulf %12, %34 : vector<162x320xf32>
      %36 = vector.broadcast %33 : vector<1x320xf32> to vector<162x320xf32>
      %37 = arith.addf %35, %36 : vector<162x320xf32>
      %cst_21 = arith.constant 0.000000e+00 : f32
      %38 = vector.broadcast %cst_21 : f32 to vector<162x320xf32>
      %39 = arith.maximumf %37, %38 : vector<162x320xf32>
      %c0_22 = arith.constant 0 : index
      %c0_23 = arith.constant 0 : index
      %40 = vector.load %arg5[%c0_22, %c0_23] : memref<162x320xf32, #tpu.memory_space<vmem>>, vector<162x320xf32>
      tpu.vector_store %arg5[%c0_22, %c0_23], %39 {strides = array<i32>} : memref<162x320xf32, #tpu.memory_space<vmem>>, vector<162x320xf32>,
    } else {
    }
    return
  }
  func.func @transform_0(%arg0: i32) -> (i32, i32) {
    %c0_i32 = arith.constant 0 : i32
    %c0_i32_0 = arith.constant 0 : i32
    return %c0_i32, %arg0 : i32, i32
  }
  func.func @transform_1(%arg0: i32) -> (i32, i32) {
    %c0_i32 = arith.constant 0 : i32
    %c0_i32_0 = arith.constant 0 : i32
    return %arg0, %c0_i32 : i32, i32
  }
  func.func @transform_2(%arg0: i32) -> (i32, i32) {
    %c0_i32 = arith.constant 0 : i32
    %c0_i32_0 = arith.constant 0 : i32
    %c0_i32_1 = arith.constant 0 : i32
    return %c0_i32, %c0_i32_0 : i32, i32
  }
  func.func @transform_3(%arg0: i32) -> (i32, i32) {
    %c0_i32 = arith.constant 0 : i32
    %c0_i32_0 = arith.constant 0 : i32
    %c0_i32_1 = arith.constant 0 : i32
    return %c0_i32, %c0_i32_0 : i32, i32
  }
  func.func @transform_4(%arg0: i32) -> (i32, i32) {
    %c0_i32 = arith.constant 0 : i32
    %c0_i32_0 = arith.constant 0 : i32
    %c0_i32_1 = arith.constant 0 : i32
    return %c0_i32, %c0_i32_0 : i32, i32
  }
}

module attributes {stable_mosaic.version = 11 : i64} {
  func.func @_matmul_bn_relu_kernel(%arg0: i32, %arg1: memref<32x512xbf16, #tpu.memory_space<vmem>>, %arg2: memref<512x320xbf16, #tpu.memory_space<vmem>>, %arg3: memref<1x320xf32, #tpu.memory_space<vmem>>, %arg4: memref<1x320xf32, #tpu.memory_space<vmem>>, %arg5: memref<32x320xf32, #tpu.memory_space<vmem>>, %arg6: memref<32x320xf32, #tpu.memory_space<vmem>>) attributes {dimension_semantics = [#tpu.dimension_semantics<arbitrary>], iteration_bounds = array<i64: 6>, scalar_prefetch = 0 : i64, scratch_operands = 1 : i64, tpu.core_type = #tpu.core_type<tc>, window_params = [{transform_indices = @transform_0, window_bounds = array<i64: 32, 512>}, {transform_indices = @transform_1, window_bounds = array<i64: 512, 320>}, {pipeline_mode = #tpu.pipeline_mode<synchronous>, transform_indices = @transform_2, window_bounds = array<i64: 1, 320>}, {pipeline_mode = #tpu.pipeline_mode<synchronous>, transform_indices = @transform_3, window_bounds = array<i64: 1, 320>}, {pipeline_mode = #tpu.pipeline_mode<synchronous>, transform_indices = @transform_4, window_bounds = array<i64: 32, 320>}]} {
    %c0_i32 = arith.constant 0 : i32
    %0 = arith.cmpi eq, %arg0, %c0_i32 : i32
    %1 = arith.extui %0 : i1 to i32
    %c0_i32_0 = arith.constant 0 : i32
    %2 = arith.cmpi ne, %1, %c0_i32_0 : i32
    scf.if %2 {
      %cst_9 = arith.constant 0.000000e+00 : f32
      %12 = vector.broadcast %cst_9 : f32 to vector<32x320xf32>
      %c0_10 = arith.constant 0 : index
      %c0_11 = arith.constant 0 : index
      %13 = vector.load %arg6[%c0_10, %c0_11] : memref<32x320xf32, #tpu.memory_space<vmem>>, vector<32x320xf32>
      tpu.vector_store %arg6[%c0_10, %c0_11], %12 {strides = array<i32>} : memref<32x320xf32, #tpu.memory_space<vmem>>, vector<32x320xf32>,
    } else {
    }
    %c0 = arith.constant 0 : index
    %c0_1 = arith.constant 0 : index
    %3 = vector.load %arg6[%c0, %c0_1] : memref<32x320xf32, #tpu.memory_space<vmem>>, vector<32x320xf32>
    %c0_2 = arith.constant 0 : index
    %c0_3 = arith.constant 0 : index
    %4 = vector.load %arg1[%c0_2, %c0_3] : memref<32x512xbf16, #tpu.memory_space<vmem>>, vector<32x512xbf16>
    %c0_4 = arith.constant 0 : index
    %c0_5 = arith.constant 0 : index
    %5 = vector.load %arg2[%c0_4, %c0_5] : memref<512x320xbf16, #tpu.memory_space<vmem>>, vector<512x320xbf16>
    %cst = arith.constant dense<0.000000e+00> : vector<32x320xf32>
    %6 = tpu.matmul %4, %5, %cst {dimension_numbers = #tpu.dot_dimension_numbers<[1], [0], [0], [1], [0, 0, 1, 1], [], []>} : vector<32x512xbf16>, vector<512x320xbf16>, vector<32x320xf32> -> vector<32x320xf32>
    %7 = arith.addf %3, %6 : vector<32x320xf32>
    %c0_6 = arith.constant 0 : index
    %c0_7 = arith.constant 0 : index
    %8 = vector.load %arg6[%c0_6, %c0_7] : memref<32x320xf32, #tpu.memory_space<vmem>>, vector<32x320xf32>
    tpu.vector_store %arg6[%c0_6, %c0_7], %7 {strides = array<i32>} : memref<32x320xf32, #tpu.memory_space<vmem>>, vector<32x320xf32>,
    %c5_i32 = arith.constant 5 : i32
    %9 = arith.cmpi eq, %arg0, %c5_i32 : i32
    %10 = arith.extui %9 : i1 to i32
    %c0_i32_8 = arith.constant 0 : i32
    %11 = arith.cmpi ne, %10, %c0_i32_8 : i32
    scf.if %11 {
      %c0_9 = arith.constant 0 : index
      %c0_10 = arith.constant 0 : index
      %12 = vector.load %arg6[%c0_9, %c0_10] : memref<32x320xf32, #tpu.memory_space<vmem>>, vector<32x320xf32>
      %cst_11 = arith.constant dense<0.000000e+00> : vector<320xf32>
      %13 = vector.multi_reduction <add>, %12, %cst_11 [0] : vector<32x320xf32> to vector<320xf32>
      %14 = vector.shape_cast %13 : vector<320xf32> to vector<1x320xf32>
      %15 = arith.mulf %12, %12 : vector<32x320xf32>
      %cst_12 = arith.constant dense<0.000000e+00> : vector<320xf32>
      %16 = vector.multi_reduction <add>, %15, %cst_12 [0] : vector<32x320xf32> to vector<320xf32>
      %17 = vector.shape_cast %16 : vector<320xf32> to vector<1x320xf32>
      %cst_13 = arith.constant 3.125000e-02 : f32
      %18 = vector.broadcast %cst_13 : f32 to vector<1x320xf32>
      %19 = arith.mulf %14, %18 : vector<1x320xf32>
      %cst_14 = arith.constant 3.125000e-02 : f32
      %20 = vector.broadcast %cst_14 : f32 to vector<1x320xf32>
      %21 = arith.mulf %17, %20 : vector<1x320xf32>
      %22 = arith.mulf %19, %19 : vector<1x320xf32>
      %23 = arith.subf %21, %22 : vector<1x320xf32>
      %cst_15 = arith.constant 0.000000e+00 : f32
      %24 = vector.broadcast %cst_15 : f32 to vector<1x320xf32>
      %25 = arith.maximumf %23, %24 : vector<1x320xf32>
      %c0_16 = arith.constant 0 : index
      %c0_17 = arith.constant 0 : index
      %26 = vector.load %arg3[%c0_16, %c0_17] : memref<1x320xf32, #tpu.memory_space<vmem>>, vector<1x320xf32>
      %cst_18 = arith.constant 1.000000e-03 : f32
      %27 = vector.broadcast %cst_18 : f32 to vector<1x320xf32>
      %28 = arith.addf %25, %27 : vector<1x320xf32>
      %29 = math.rsqrt %28 : vector<1x320xf32>
      %30 = arith.mulf %26, %29 : vector<1x320xf32>
      %c0_19 = arith.constant 0 : index
      %c0_20 = arith.constant 0 : index
      %31 = vector.load %arg4[%c0_19, %c0_20] : memref<1x320xf32, #tpu.memory_space<vmem>>, vector<1x320xf32>
      %32 = arith.mulf %19, %30 : vector<1x320xf32>
      %33 = arith.subf %31, %32 : vector<1x320xf32>
      %34 = vector.broadcast %30 : vector<1x320xf32> to vector<32x320xf32>
      %35 = arith.mulf %12, %34 : vector<32x320xf32>
      %36 = vector.broadcast %33 : vector<1x320xf32> to vector<32x320xf32>
      %37 = arith.addf %35, %36 : vector<32x320xf32>
      %cst_21 = arith.constant 0.000000e+00 : f32
      %38 = vector.broadcast %cst_21 : f32 to vector<32x320xf32>
      %39 = arith.maximumf %37, %38 : vector<32x320xf32>
      %c0_22 = arith.constant 0 : index
      %c0_23 = arith.constant 0 : index
      %40 = vector.load %arg5[%c0_22, %c0_23] : memref<32x320xf32, #tpu.memory_space<vmem>>, vector<32x320xf32>
      tpu.vector_store %arg5[%c0_22, %c0_23], %39 {strides = array<i32>} : memref<32x320xf32, #tpu.memory_space<vmem>>, vector<32x320xf32>,
    } else {
    }
    return
  }
  func.func @transform_0(%arg0: i32) -> (i32, i32) {
    %c0_i32 = arith.constant 0 : i32
    %c0_i32_0 = arith.constant 0 : i32
    return %c0_i32, %arg0 : i32, i32
  }
  func.func @transform_1(%arg0: i32) -> (i32, i32) {
    %c0_i32 = arith.constant 0 : i32
    %c0_i32_0 = arith.constant 0 : i32
    return %arg0, %c0_i32 : i32, i32
  }
  func.func @transform_2(%arg0: i32) -> (i32, i32) {
    %c0_i32 = arith.constant 0 : i32
    %c0_i32_0 = arith.constant 0 : i32
    %c0_i32_1 = arith.constant 0 : i32
    return %c0_i32, %c0_i32_0 : i32, i32
  }
  func.func @transform_3(%arg0: i32) -> (i32, i32) {
    %c0_i32 = arith.constant 0 : i32
    %c0_i32_0 = arith.constant 0 : i32
    %c0_i32_1 = arith.constant 0 : i32
    return %c0_i32, %c0_i32_0 : i32, i32
  }
  func.func @transform_4(%arg0: i32) -> (i32, i32) {
    %c0_i32 = arith.constant 0 : i32
    %c0_i32_0 = arith.constant 0 : i32
    %c0_i32_1 = arith.constant 0 : i32
    return %c0_i32, %c0_i32_0 : i32, i32
  }
}

module attributes {stable_mosaic.version = 11 : i64} {
  func.func @_max9_kernel(%arg0: i32, %arg1: memref<9x32x1024xf32, #tpu.memory_space<vmem>>, %arg2: memref<32x1024xf32, #tpu.memory_space<vmem>>) attributes {dimension_semantics = [#tpu.dimension_semantics<arbitrary>], iteration_bounds = array<i64: 1>, scalar_prefetch = 0 : i64, scratch_operands = 0 : i64, tpu.core_type = #tpu.core_type<tc>, window_params = [{pipeline_mode = #tpu.pipeline_mode<synchronous>, transform_indices = @transform_0, window_bounds = array<i64: 9, 32, 1024>}, {pipeline_mode = #tpu.pipeline_mode<synchronous>, transform_indices = @transform_1, window_bounds = array<i64: 32, 1024>}]} {
    %c0 = arith.constant 0 : index
    %c0_0 = arith.constant 0 : index
    %c0_1 = arith.constant 0 : index
    %0 = vector.load %arg1[%c0, %c0_0, %c0_1] : memref<9x32x1024xf32, #tpu.memory_space<vmem>>, vector<1x32x1024xf32>
    %1 = vector.shape_cast %0 : vector<1x32x1024xf32> to vector<32x1024xf32>
    %c1 = arith.constant 1 : index
    %c0_2 = arith.constant 0 : index
    %c0_3 = arith.constant 0 : index
    %2 = vector.load %arg1[%c1, %c0_2, %c0_3] : memref<9x32x1024xf32, #tpu.memory_space<vmem>>, vector<1x32x1024xf32>
    %3 = vector.shape_cast %2 : vector<1x32x1024xf32> to vector<32x1024xf32>
    %4 = arith.maximumf %1, %3 : vector<32x1024xf32>
    %c2 = arith.constant 2 : index
    %c0_4 = arith.constant 0 : index
    %c0_5 = arith.constant 0 : index
    %5 = vector.load %arg1[%c2, %c0_4, %c0_5] : memref<9x32x1024xf32, #tpu.memory_space<vmem>>, vector<1x32x1024xf32>
    %6 = vector.shape_cast %5 : vector<1x32x1024xf32> to vector<32x1024xf32>
    %7 = arith.maximumf %4, %6 : vector<32x1024xf32>
    %c3 = arith.constant 3 : index
    %c0_6 = arith.constant 0 : index
    %c0_7 = arith.constant 0 : index
    %8 = vector.load %arg1[%c3, %c0_6, %c0_7] : memref<9x32x1024xf32, #tpu.memory_space<vmem>>, vector<1x32x1024xf32>
    %9 = vector.shape_cast %8 : vector<1x32x1024xf32> to vector<32x1024xf32>
    %10 = arith.maximumf %7, %9 : vector<32x1024xf32>
    %c4 = arith.constant 4 : index
    %c0_8 = arith.constant 0 : index
    %c0_9 = arith.constant 0 : index
    %11 = vector.load %arg1[%c4, %c0_8, %c0_9] : memref<9x32x1024xf32, #tpu.memory_space<vmem>>, vector<1x32x1024xf32>
    %12 = vector.shape_cast %11 : vector<1x32x1024xf32> to vector<32x1024xf32>
    %13 = arith.maximumf %10, %12 : vector<32x1024xf32>
    %c5 = arith.constant 5 : index
    %c0_10 = arith.constant 0 : index
    %c0_11 = arith.constant 0 : index
    %14 = vector.load %arg1[%c5, %c0_10, %c0_11] : memref<9x32x1024xf32, #tpu.memory_space<vmem>>, vector<1x32x1024xf32>
    %15 = vector.shape_cast %14 : vector<1x32x1024xf32> to vector<32x1024xf32>
    %16 = arith.maximumf %13, %15 : vector<32x1024xf32>
    %c6 = arith.constant 6 : index
    %c0_12 = arith.constant 0 : index
    %c0_13 = arith.constant 0 : index
    %17 = vector.load %arg1[%c6, %c0_12, %c0_13] : memref<9x32x1024xf32, #tpu.memory_space<vmem>>, vector<1x32x1024xf32>
    %18 = vector.shape_cast %17 : vector<1x32x1024xf32> to vector<32x1024xf32>
    %19 = arith.maximumf %16, %18 : vector<32x1024xf32>
    %c7 = arith.constant 7 : index
    %c0_14 = arith.constant 0 : index
    %c0_15 = arith.constant 0 : index
    %20 = vector.load %arg1[%c7, %c0_14, %c0_15] : memref<9x32x1024xf32, #tpu.memory_space<vmem>>, vector<1x32x1024xf32>
    %21 = vector.shape_cast %20 : vector<1x32x1024xf32> to vector<32x1024xf32>
    %22 = arith.maximumf %19, %21 : vector<32x1024xf32>
    %c8 = arith.constant 8 : index
    %c0_16 = arith.constant 0 : index
    %c0_17 = arith.constant 0 : index
    %23 = vector.load %arg1[%c8, %c0_16, %c0_17] : memref<9x32x1024xf32, #tpu.memory_space<vmem>>, vector<1x32x1024xf32>
    %24 = vector.shape_cast %23 : vector<1x32x1024xf32> to vector<32x1024xf32>
    %25 = arith.maximumf %22, %24 : vector<32x1024xf32>
    %c0_18 = arith.constant 0 : index
    %c0_19 = arith.constant 0 : index
    %26 = vector.load %arg2[%c0_18, %c0_19] : memref<32x1024xf32, #tpu.memory_space<vmem>>, vector<32x1024xf32>
    tpu.vector_store %arg2[%c0_18, %c0_19], %25 {strides = array<i32>} : memref<32x1024xf32, #tpu.memory_space<vmem>>, vector<32x1024xf32>,
    return
  }
  func.func @transform_0(%arg0: i32) -> (i32, i32, i32) {
    %c0_i32 = arith.constant 0 : i32
    %c0_i32_0 = arith.constant 0 : i32
    %c0_i32_1 = arith.constant 0 : i32
    %c0_i32_2 = arith.constant 0 : i32
    return %c0_i32, %c0_i32_0, %c0_i32_1 : i32, i32, i32
  }
  func.func @transform_1(%arg0: i32) -> (i32, i32) {
    %c0_i32 = arith.constant 0 : i32
    %c0_i32_0 = arith.constant 0 : i32
    %c0_i32_1 = arith.constant 0 : i32
    return %c0_i32, %c0_i32_0 : i32, i32
  }
}

</mosaic_0001>

<bundles_post_ra>
// kernel: reduction_b_forward.6
= control target key start
LH: loop header
LB: loop body
LE: loop exit
PB: predicated region body
PF: predicated region fallthrough
CT: control target
= control target key end

     0   :  { %s3843_s15 = smov 0   ;;  %s3845_s16 = smov 0   ;;  %s5589_s0 = inlined_call_operand.vmem [shape: bf16[162,1024], index: 0, kind: input, shape index: {}]   ;;  %s5590_s1 = inlined_call_operand.vmem [shape: bf16[1024,448], index: 1, kind: input, shape index: {}]   ;;  %s5591_s2 = inlined_call_operand.vmem [shape: f32[1,448], index: 2, kind: input, shape index: {}]   ;;  %s5592_s3 = inlined_call_operand.vmem [shape: f32[1,448], index: 3, kind: input, shape index: {}]   ;;  %s5593_s4 = inlined_call_operand.vmem [shape: f32[162,448], index: 4, kind: output, shape index: {}]  }
   0x1   :  { %s3847_s17 = smov 0  }
   0x2 LB: > { %s3859_s18 = sadd.s32 4294967295, %s3814_s17   ;;  %s3862_s19 = sadd.s32 1, %s3814_s17   ;;  %s3814_s17 = sphi %s3847_s17, %s5849_s17   ;;  %s3810_s16 = sphi %s3845_s16, %s5848_s16   ;;  %s3806_s15 = sphi %s3843_s15, %s5847_s15  }
   0x3   : > { %s18_s20 = ssub.s32 %s3814_s17, %s3862_s19  ;;  %s21_s21 = sadd.s32 1, %s3810_s16 }
   0x4   : > { %p19_p0 = scmp.eq.s32.totalorder %s18_s20, 0  ;;  %p28_p1 = scmp.ne.s32.totalorder %s3810_s16, %s3806_s15 }
   0x5   : > { %p29_p2 = scmp.eq.s32.totalorder %s3814_s17, 0  ;;  %p3192_p4 = scmp.ge.s32.totalorder %s3814_s17, 2 }
   0x6   : > { %s3871_s22 = scalar_select %p19_p0, %s3810_s16, %s21_s21  }
   0x7   : > { %p30_p3 = por %p29_p2, %p28_p1  ;;  %149 = sbr.rel (%p3192_p4) target bundleno = 39 (0x27), region = 24 }
   0xe   : > { %152 = sbr.rel (!%p30_p3) target bundleno = 39 (0x27), region = 28  ;;  %s154_s23 = sand.u32 (%p30_p3), 1, %s3810_s16  }
   0xf   : > { %s3375_s24 = sshll.u32 (%p30_p3), %s3814_s17, 4  ;;  %s3457_s25 = smul.u32 (%p30_p3), 336, %s154_s23 }
  0x10   : > { %s3879_s28 = scalar_lea.vmem (%p30_p3), %s5589_s0, %s3375_s24 }
  0x11   : > { %v172_v0 = vld [vmem:[%s3879_s28] sm:$0xff] (%p30_p3)  ;;  %v174_v1 = vld [vmem:[%s3879_s28 + $0x8] sm:$0xff] (%p30_p3)  ;;  %s3887_s29 = scalar_lea.vmem (%p30_p3), [#allocation3], %s3457_s25 }
  0x12   : > { %v176_v2 = vld [vmem:[%s3879_s28 + $0x20] sm:$0xff] (%p30_p3)  ;;  %v178_v3 = vld [vmem:[%s3879_s28 + $0x28] sm:$0xff] (%p30_p3)  ;;  %173 = vst [vmem:[%s3887_s29] sm:$0xff] (%p30_p3), %v172_v0  ;;  %175 = vst [vmem:[%s3887_s29 + $0x8] sm:$0xff] (%p30_p3), %v174_v1 }
  0x13   : > { %v180_v4 = vld [vmem:[%s3879_s28 + $0x40] sm:$0xff] (%p30_p3)  ;;  %v182_v5 = vld [vmem:[%s3879_s28 + $0x48] sm:$0xff] (%p30_p3)  ;;  %177 = vst [vmem:[%s3887_s29 + $0x10] sm:$0xff] (%p30_p3), %v176_v2  ;;  %179 = vst [vmem:[%s3887_s29 + $0x18] sm:$0xff] (%p30_p3), %v178_v3 }
  0x14   : > { %181 = vst [vmem:[%s3887_s29 + $0x20] sm:$0xff] (%p30_p3), %v180_v4  ;;  %183 = vst [vmem:[%s3887_s29 + $0x28] sm:$0xff] (%p30_p3), %v182_v5  ;;  %v184_v6 = vld [vmem:[%s3879_s28 + $0x60] sm:$0xff] (%p30_p3)  ;;  %v186_v7 = vld [vmem:[%s3879_s28 + $0x68] sm:$0xff] (%p30_p3) }
  0x15   : > { %v188_v8 = vld [vmem:[%s3879_s28 + $0x80] sm:$0xff]  ;;  %185 = vst [vmem:[%s3887_s29 + $0x30] sm:$0xff] %v184_v6  ;;  %187 = vst [vmem:[%s3887_s29 + $0x38] sm:$0xff] %v186_v7  ;;  %v190_v9 = vld [vmem:[%s3879_s28 + $0x88] sm:$0xff] }
  0x16   : > { %189 = vst [vmem:[%s3887_s29 + $0x40] sm:$0xff] %v188_v8  ;;  %v192_v10 = vld [vmem:[%s3879_s28 + $0xa0] sm:$0xff]  ;;  %v194_v11 = vld [vmem:[%s3879_s28 + $0xa8] sm:$0xff]  ;;  %191 = vst [vmem:[%s3887_s29 + $0x48] sm:$0xff] %v190_v9 }
  0x17   : > { %193 = vst [vmem:[%s3887_s29 + $0x50] sm:$0xff] %v192_v10  ;;  %195 = vst [vmem:[%s3887_s29 + $0x58] sm:$0xff] %v194_v11  ;;  %v196_v12 = vld [vmem:[%s3879_s28 + $0xc0] sm:$0xff]  ;;  %v198_v13 = vld [vmem:[%s3879_s28 + $0xc8] sm:$0xff] }
  0x18   : > { %v200_v14 = vld [vmem:[%s3879_s28 + $0xe0] sm:$0xff]  ;;  %197 = vst [vmem:[%s3887_s29 + $0x60] sm:$0xff] %v196_v12  ;;  %199 = vst [vmem:[%s3887_s29 + $0x68] sm:$0xff] %v198_v13  ;;  %v202_v15 = vld [vmem:[%s3879_s28 + $0xe8] sm:$0xff] }
  0x19   : > { %201 = vst [vmem:[%s3887_s29 + $0x70] sm:$0xff] %v200_v14  ;;  %v204_v16 = vld [vmem:[%s3879_s28 + $0x100] sm:$0xff]  ;;  %v206_v17 = vld [vmem:[%s3879_s28 + $0x108] sm:$0xff]  ;;  %203 = vst [vmem:[%s3887_s29 + $0x78] sm:$0xff] %v202_v15 }
  0x1a   : > { %205 = vst [vmem:[%s3887_s29 + $0x80] sm:$0xff] %v204_v16  ;;  %207 = vst [vmem:[%s3887_s29 + $0x88] sm:$0xff] %v206_v17  ;;  %v208_v18 = vld [vmem:[%s3879_s28 + $0x120] sm:$0xff]  ;;  %v210_v19 = vld [vmem:[%s3879_s28 + $0x128] sm:$0xff] }
  0x1b   : > { %v212_v20 = vld [vmem:[%s3879_s28 + $0x140] sm:$0xff]  ;;  %209 = vst [vmem:[%s3887_s29 + $0x90] sm:$0xff] %v208_v18  ;;  %211 = vst [vmem:[%s3887_s29 + $0x98] sm:$0xff] %v210_v19  ;;  %v214_v21 = vld [vmem:[%s3879_s28 + $0x148] sm:$0xff] }
  0x1c   : > { %213 = vst [vmem:[%s3887_s29 + $0xa0] sm:$0xff] %v212_v20  ;;  %v216_v22 = vld [vmem:[%s3879_s28 + $0x160] sm:$0xff]  ;;  %v218_v23 = vld [vmem:[%s3879_s28 + $0x168] sm:$0xff]  ;;  %215 = vst [vmem:[%s3887_s29 + $0xa8] sm:$0xff] %v214_v21 }
  0x1d   : > { %217 = vst [vmem:[%s3887_s29 + $0xb0] sm:$0xff] %v216_v22  ;;  %219 = vst [vmem:[%s3887_s29 + $0xb8] sm:$0xff] %v218_v23  ;;  %v220_v24 = vld [vmem:[%s3879_s28 + $0x180] sm:$0xff]  ;;  %v222_v25 = vld [vmem:[%s3879_s28 + $0x188] sm:$0xff] }
  0x1e   : > { %v224_v26 = vld [vmem:[%s3879_s28 + $0x1a0] sm:$0xff]  ;;  %221 = vst [vmem:[%s3887_s29 + $0xc0] sm:$0xff] %v220_v24  ;;  %223 = vst [vmem:[%s3887_s29 + $0xc8] sm:$0xff] %v222_v25  ;;  %v226_v27 = vld [vmem:[%s3879_s28 + $0x1a8] sm:$0xff] }
  0x1f   : > { %225 = vst [vmem:[%s3887_s29 + $0xd0] sm:$0xff] %v224_v26  ;;  %v228_v28 = vld [vmem:[%s3879_s28 + $0x1c0] sm:$0xff]  ;;  %v230_v29 = vld [vmem:[%s3879_s28 + $0x1c8] sm:$0xff]  ;;  %227 = vst [vmem:[%s3887_s29 + $0xd8] sm:$0xff] %v226_v27 }
  0x20   : > { %229 = vst [vmem:[%s3887_s29 + $0xe0] sm:$0xff] %v228_v28  ;;  %231 = vst [vmem:[%s3887_s29 + $0xe8] sm:$0xff] %v230_v29  ;;  %v232_v30 = vld [vmem:[%s3879_s28 + $0x1e0] sm:$0xff]  ;;  %v234_v31 = vld [vmem:[%s3879_s28 + $0x1e8] sm:$0xff] }
  0x21   : > { %v236_v32 = vld [vmem:[%s3879_s28 + $0x200] sm:$0xff]  ;;  %233 = vst [vmem:[%s3887_s29 + $0xf0] sm:$0xff] %v232_v30  ;;  %235 = vst [vmem:[%s3887_s29 + $0xf8] sm:$0xff] %v234_v31  ;;  %v238_v33 = vld [vmem:[%s3879_s28 + $0x208] sm:$0xff] }
  0x22   : > { %237 = vst [vmem:[%s3887_s29 + $0x100] sm:$0xff] %v236_v32  ;;  %v240_v34 = vld [vmem:[%s3879_s28 + $0x220] sm:$0xff]  ;;  %v242_v35 = vld [vmem:[%s3879_s28 + $0x228] sm:$0xff]  ;;  %239 = vst [vmem:[%s3887_s29 + $0x108] sm:$0xff] %v238_v33 }
  0x23   : > { %241 = vst [vmem:[%s3887_s29 + $0x110] sm:$0xff] %v240_v34  ;;  %243 = vst [vmem:[%s3887_s29 + $0x118] sm:$0xff] %v242_v35  ;;  %v244_v36 = vld [vmem:[%s3879_s28 + $0x240] sm:$0xff]  ;;  %v246_v37 = vld [vmem:[%s3879_s28 + $0x248] sm:$0xff] }
  0x24   : > { %v248_v38 = vld [vmem:[%s3879_s28 + $0x260] sm:$0xff]  ;;  %245 = vst [vmem:[%s3887_s29 + $0x120] sm:$0xff] %v244_v36  ;;  %247 = vst [vmem:[%s3887_s29 + $0x128] sm:$0xff] %v246_v37  ;;  %v250_v39 = vld [vmem:[%s3879_s28 + $0x268] sm:$0xff] }
  0x25   : > { %249 = vst [vmem:[%s3887_s29 + $0x130] sm:$0xff] %v248_v38  ;;  %v252_v40 = vld [vmem:[%s3879_s28 + $0x280] sm:$0xff]  ;;  %v254_v41 = vld [vmem:[%s3879_s28 + $0x288] sm:$0xff]  ;;  %251 = vst [vmem:[%s3887_s29 + $0x138] sm:$0xff] %v250_v39 }
  0x26   : > { %253 = vst [vmem:[%s3887_s29 + $0x140] sm:$0xff] %v252_v40  ;;  %255 = vst [vmem:[%s3887_s29 + $0x148] sm:$0xff] %v254_v41 }
  0x27 PF: > { %p3195_p5 = scmp.ge.s32.totalorder %s3814_s17, 1  ;;  %p270_p6 = scmp.lt.s32.totalorder %s3814_s17, 3 }
  0x29   : > { %p271_p7 = pnand %p3195_p5, %p270_p6 }
  0x2a   : > { %s277_s30 = sand.u32 (!%p271_p7), 1, %s3806_s15   ;;  %s3196_s5 = sshll.u32 (!%p271_p7), %s3859_s18, 6 }
  0x2b   : > { %274 = sbr.rel (%p271_p7) target bundleno = 758 (0x2f6), region = 55  ;;  %p305_p8 = scmp.lt.s32.totalorder (!%p271_p7), %s3196_s5, 127 }
  0x2c   : > { %s3458_s6 = smul.u32 (!%p271_p7), 336, %s277_s30  ;;  %p3199_p9 = scmp.ne.s32.totalorder (!%p271_p7), %s3859_s18, 0 }
  0x2e   : > { %s3976_s11 = scalar_lea.vmem (!%p271_p7), [#allocation3], %s3458_s6 }
  0x32   : > { %s5851_s5 = smov (!%p305_p8, %s3196_s5), 127  ;;  %314 = sbr.rel (%p3199_p9) target bundleno = 95 (0x5f), region = 63 }
  0x33   : > { %s3376_s7 = sshll.u32 %s5851_s5, 4  ;;  %vm318_vm0 = vcmask (!%p3199_p9), 523264   ;;  %vm399_vm1 = vcmask (!%p3199_p9), 517120   ;;  %v3816_v42 = vmov (!%p3199_p9), 0.0  }
  0x34   : > { %s3974_s10 = scalar_lea.vmem %s5590_s1, %s3376_s7  ;;  %315 = vst [vmem:[#allocation2] sm:$0xff] (!%p3199_p9), %v3816_v42  ;;  %316 = vst [vmem:[#allocation2 + $0x8] sm:$0xff] (!%p3199_p9), %v3816_v42 }
  0x35   : > { %317 = vst [vmem:[#allocation2 + $0x10] sm:$0xff] (!%p3199_p9), %v3816_v42  ;;  %320 = vst [vmem:[#allocation2 + $0x20] sm:$0xff] (!%p3199_p9), %v3816_v42 }
  0x36   : > { %321 = vst [vmem:[#allocation2 + $0x28] sm:$0xff] (!%p3199_p9), %v3816_v42  ;;  %322 = vst [vmem:[#allocation2 + $0x30] sm:$0xff] (!%p3199_p9), %v3816_v42 }
  0x37   : > { %324 = vst [vmem:[#allocation2 + $0x40] sm:$0xff] (!%p3199_p9), %v3816_v42  ;;  %325 = vst [vmem:[#allocation2 + $0x48] sm:$0xff] (!%p3199_p9), %v3816_v42 }
  0x38   : > { %326 = vst [vmem:[#allocation2 + $0x50] sm:$0xff] (!%p3199_p9), %v3816_v42  ;;  %328 = vst [vmem:[#allocation2 + $0x60] sm:$0xff] (!%p3199_p9), %v3816_v42 }
  0x39   : > { %329 = vst [vmem:[#allocation2 + $0x68] sm:$0xff] %v3816_v42  ;;  %330 = vst [vmem:[#allocation2 + $0x70] sm:$0xff] %v3816_v42 }
  0x3a   : > { %332 = vst [vmem:[#allocation2 + $0x80] sm:$0xff] %v3816_v42  ;;  %333 = vst [vmem:[#allocation2 + $0x88] sm:$0xff] %v3816_v42 }
  0x3b   : > { %334 = vst [vmem:[#allocation2 + $0x90] sm:$0xff] %v3816_v42  ;;  %336 = vst [vmem:[#allocation2 + $0xa0] sm:$0xff] %v3816_v42 }
  0x3c   : > { %337 = vst [vmem:[#allocation2 + $0xa8] sm:$0xff] %v3816_v42  ;;  %338 = vst [vmem:[#allocation2 + $0xb0] sm:$0xff] %v3816_v42 }
  0x3d   : > { %340 = vst [vmem:[#allocation2 + $0xc0] sm:$0xff] %v3816_v42  ;;  %341 = vst [vmem:[#allocation2 + $0xc8] sm:$0xff] %v3816_v42 }
  0x3e   : > { %342 = vst [vmem:[#allocation2 + $0xd0] sm:$0xff] %v3816_v42  ;;  %344 = vst [vmem:[#allocation2 + $0xe0] sm:$0xff] %v3816_v42 }
  0x3f   : > { %345 = vst [vmem:[#allocation2 + $0xe8] sm:$0xff] %v3816_v42  ;;  %346 = vst [vmem:[#allocation2 + $0xf0] sm:$0xff] %v3816_v42 }
  0x40   : > { %348 = vst [vmem:[#allocation2 + $0x100] sm:$0xff] %v3816_v42  ;;  %349 = vst [vmem:[#allocation2 + $0x108] sm:$0xff] %v3816_v42 }
  0x41   : > { %350 = vst [vmem:[#allocation2 + $0x110] sm:$0xff] %v3816_v42  ;;  %352 = vst [vmem:[#allocation2 + $0x120] sm:$0xff] %v3816_v42 }
  0x42   : > { %353 = vst [vmem:[#allocation2 + $0x128] sm:$0xff] %v3816_v42  ;;  %354 = vst [vmem:[#allocation2 + $0x130] sm:$0xff] %v3816_v42 }
  0x43   : > { %356 = vst [vmem:[#allocation2 + $0x140] sm:$0xff] %v3816_v42  ;;  %357 = vst [vmem:[#allocation2 + $0x148] sm:$0xff] %v3816_v42 }
  0x44   : > { %358 = vst [vmem:[#allocation2 + $0x150] sm:$0xff] %v3816_v42  ;;  %360 = vst [vmem:[#allocation2 + $0x160] sm:$0xff] %v3816_v42 }
  0x45   : > { %361 = vst [vmem:[#allocation2 + $0x168] sm:$0xff] %v3816_v42  ;;  %362 = vst [vmem:[#allocation2 + $0x170] sm:$0xff] %v3816_v42 }
  0x46   : > { %364 = vst [vmem:[#allocation2 + $0x180] sm:$0xff] %v3816_v42  ;;  %365 = vst [vmem:[#allocation2 + $0x188] sm:$0xff] %v3816_v42 }
  0x47   : > { %366 = vst [vmem:[#allocation2 + $0x190] sm:$0xff] %v3816_v42  ;;  %368 = vst [vmem:[#allocation2 + $0x1a0] sm:$0xff] %v3816_v42 }
  0x48   : > { %369 = vst [vmem:[#allocation2 + $0x1a8] sm:$0xff] %v3816_v42  ;;  %370 = vst [vmem:[#allocation2 + $0x1b0] sm:$0xff] %v3816_v42 }
  0x49   : > { %372 = vst [vmem:[#allocation2 + $0x1c0] sm:$0xff] %v3816_v42  ;;  %373 = vst [vmem:[#allocation2 + $0x1c8] sm:$0xff] %v3816_v42 }
  0x4a   : > { %374 = vst [vmem:[#allocation2 + $0x1d0] sm:$0xff] %v3816_v42  ;;  %376 = vst [vmem:[#allocation2 + $0x1e0] sm:$0xff] %v3816_v42 }
  0x4b   : > { %377 = vst [vmem:[#allocation2 + $0x1e8] sm:$0xff] %v3816_v42  ;;  %378 = vst [vmem:[#allocation2 + $0x1f0] sm:$0xff] %v3816_v42 }
  0x4c   : > { %380 = vst [vmem:[#allocation2 + $0x200] sm:$0xff] %v3816_v42  ;;  %381 = vst [vmem:[#allocation2 + $0x208] sm:$0xff] %v3816_v42 }
  0x4d   : > { %382 = vst [vmem:[#allocation2 + $0x210] sm:$0xff] %v3816_v42  ;;  %384 = vst [vmem:[#allocation2 + $0x220] sm:$0xff] %v3816_v42 }
  0x4e   : > { %385 = vst [vmem:[#allocation2 + $0x228] sm:$0xff] %v3816_v42  ;;  %386 = vst [vmem:[#allocation2 + $0x230] sm:$0xff] %v3816_v42 }
  0x4f   : > { %388 = vst [vmem:[#allocation2 + $0x240] sm:$0xff] %v3816_v42  ;;  %389 = vst [vmem:[#allocation2 + $0x248] sm:$0xff] %v3816_v42 }
  0x50   : > { %390 = vst [vmem:[#allocation2 + $0x250] sm:$0xff] %v3816_v42  ;;  %392 = vst [vmem:[#allocation2 + $0x260] sm:$0xff] %v3816_v42 }
  0x51   : > { %393 = vst [vmem:[#allocation2 + $0x268] sm:$0xff] %v3816_v42  ;;  %394 = vst [vmem:[#allocation2 + $0x270] sm:$0xff] %v3816_v42 }
  0x52   : > { %396 = vst [vmem:[#allocation2 + $0x280] sm:$0x3] %v3816_v42  ;;  %397 = vst [vmem:[#allocation2 + $0x288] sm:$0x3] %v3816_v42 }
  0x53   : > { %398 = vst [vmem:[#allocation2 + $0x290] sm:$0x3] %v3816_v42  ;;  %319 = vst.msk [vmem:[#allocation2 + $0x18] sm:$0xff] %vm318_vm0, %v3816_v42 }
  0x54   : > { %323 = vst.msk [vmem:[#allocation2 + $0x38] sm:$0xff] %vm318_vm0, %v3816_v42  ;;  %327 = vst.msk [vmem:[#allocation2 + $0x58] sm:$0xff] %vm318_vm0, %v3816_v42 }
  0x55   : > { %331 = vst.msk [vmem:[#allocation2 + $0x78] sm:$0xff] %vm318_vm0, %v3816_v42  ;;  %335 = vst.msk [vmem:[#allocation2 + $0x98] sm:$0xff] %vm318_vm0, %v3816_v42 }
  0x56   : > { %339 = vst.msk [vmem:[#allocation2 + $0xb8] sm:$0xff] %vm318_vm0, %v3816_v42  ;;  %343 = vst.msk [vmem:[#allocation2 + $0xd8] sm:$0xff] %vm318_vm0, %v3816_v42 }
  0x57   : > { %347 = vst.msk [vmem:[#allocation2 + $0xf8] sm:$0xff] %vm318_vm0, %v3816_v42  ;;  %351 = vst.msk [vmem:[#allocation2 + $0x118] sm:$0xff] %vm318_vm0, %v3816_v42 }
  0x58   : > { %355 = vst.msk [vmem:[#allocation2 + $0x138] sm:$0xff] %vm318_vm0, %v3816_v42  ;;  %359 = vst.msk [vmem:[#allocation2 + $0x158] sm:$0xff] %vm318_vm0, %v3816_v42 }
  0x59   : > { %363 = vst.msk [vmem:[#allocation2 + $0x178] sm:$0xff] %vm318_vm0, %v3816_v42  ;;  %367 = vst.msk [vmem:[#allocation2 + $0x198] sm:$0xff] %vm318_vm0, %v3816_v42 }
  0x5a   : > { %371 = vst.msk [vmem:[#allocation2 + $0x1b8] sm:$0xff] %vm318_vm0, %v3816_v42  ;;  %375 = vst.msk [vmem:[#allocation2 + $0x1d8] sm:$0xff] %vm318_vm0, %v3816_v42 }
  0x5b   : > { %379 = vst.msk [vmem:[#allocation2 + $0x1f8] sm:$0xff] %vm318_vm0, %v3816_v42  ;;  %383 = vst.msk [vmem:[#allocation2 + $0x218] sm:$0xff] %vm318_vm0, %v3816_v42 }
  0x5c   : > { %387 = vst.msk [vmem:[#allocation2 + $0x238] sm:$0xff] %vm318_vm0, %v3816_v42  ;;  %391 = vst.msk [vmem:[#allocation2 + $0x258] sm:$0xff] %vm318_vm0, %v3816_v42 }
  0x5d   : > { %395 = vst.msk [vmem:[#allocation2 + $0x278] sm:$0xff] %vm318_vm0, %v3816_v42 }
  0x5e   : > { %400 = vst.msk [vmem:[#allocation2 + $0x298] sm:$0x3] %vm399_vm1, %v3816_v42 }
  0x5f PF: > { %v3485_v43 = vld [vmem:[%s3974_s10 + $0x4] ss:$16 sps:$4 sm:$0xff]   ;;  %v3487_v44 = vld [vmem:[%s3974_s10 + $0xc] ss:$16 sps:$4 sm:$0xff]   ;;  %v3489_v45 = vld [vmem:[%s3974_s10] ss:$16 sps:$4 sm:$0xff]  }
  0x60   : > { %1509 = vmatprep.subr.bf16.mxu0 %v3485_v43  ;;  %v3490_v46 = vld [vmem:[%s3974_s10 + $0x8] ss:$16 sps:$4 sm:$0xff]   ;;  %1791 = vmatprep.subr.bf16.mxu1 %v3487_v44  ;;  %v3491_v47 = vld [vmem:[%s3974_s10 + $0x24] ss:$16 sps:$4 sm:$0xff]   ;;  %v3493_v48 = vld [vmem:[%s3974_s10 + $0x2c] ss:$16 sps:$4 sm:$0xff]  }
  0x61   : > { %1510 = vmatpush1.bf16.msra.mxu0 %v3489_v45  ;;  %1792 = vmatpush1.bf16.msra.mxu1 %v3490_v46  ;;  %v3495_v49 = vld [vmem:[%s3974_s10 + $0x20] ss:$16 sps:$4 sm:$0xff]   ;;  %v3496_v50 = vld [vmem:[%s3974_s10 + $0x28] ss:$16 sps:$4 sm:$0xff]   ;;  %v3497_v51 = vld [vmem:[%s3974_s10 + $0x44] ss:$16 sps:$4 sm:$0xff]  }
  0x62   : > { %1511 = vmatprep.subr.bf16.mxu0 %v3491_v47  ;;  %1793 = vmatprep.subr.bf16.mxu1 %v3493_v48  ;;  %v3499_v52 = vld [vmem:[%s3974_s10 + $0x4c] ss:$16 sps:$4 sm:$0xff]   ;;  %v3501_v53 = vld [vmem:[%s3974_s10 + $0x40] ss:$16 sps:$4 sm:$0xff]   ;;  %v3502_v54 = vld [vmem:[%s3974_s10 + $0x48] ss:$16 sps:$4 sm:$0xff]  }
  0x63   : > { %v3503_v55 = vld [vmem:[%s3974_s10 + $0x64] ss:$16 sps:$4 sm:$0xff]   ;;  %v3505_v56 = vld [vmem:[%s3974_s10 + $0x6c] ss:$16 sps:$4 sm:$0xff]   ;;  %v3507_v57 = vld [vmem:[%s3974_s10 + $0x60] ss:$16 sps:$4 sm:$0xff]  }
  0x64   : > { %v3508_v58 = vld [vmem:[%s3974_s10 + $0x68] ss:$16 sps:$4 sm:$0xff]   ;;  %v3509_v59 = vld [vmem:[%s3974_s10 + $0x84] ss:$16 sps:$4 sm:$0xff]   ;;  %v3511_v60 = vld [vmem:[%s3974_s10 + $0x8c] ss:$16 sps:$4 sm:$0xff]  }
  0x65   : > { %1512 = vmatpush1.bf16.msra.mxu0 %v3495_v49  ;;  %1794 = vmatpush1.bf16.msra.mxu1 %v3496_v50  ;;  %v3513_v61 = vld [vmem:[%s3974_s10 + $0x80] ss:$16 sps:$4 sm:$0xff]   ;;  %v3514_v62 = vld [vmem:[%s3974_s10 + $0x88] ss:$16 sps:$4 sm:$0xff]   ;;  %v3515_v63 = vld [vmem:[%s3974_s10 + $0xa4] ss:$16 sps:$4 sm:$0xff]  }
  0x66   : > { %1513 = vmatprep.subr.bf16.mxu0 %v3497_v51  ;;  %1795 = vmatprep.subr.bf16.mxu1 %v3499_v52  ;;  %v3517_v0 = vld [vmem:[%s3974_s10 + $0xac] ss:$16 sps:$4 sm:$0xff]   ;;  %v3519_v1 = vld [vmem:[%s3974_s10 + $0xa0] ss:$16 sps:$4 sm:$0xff]   ;;  %v3520_v2 = vld [vmem:[%s3974_s10 + $0xa8] ss:$16 sps:$4 sm:$0xff]  }
  0x67   : > { %v3521_v3 = vld [vmem:[%s3974_s10 + $0xc4] ss:$16 sps:$4 sm:$0xff]   ;;  %v3523_v4 = vld [vmem:[%s3974_s10 + $0xcc] ss:$16 sps:$4 sm:$0xff]   ;;  %v3525_v5 = vld [vmem:[%s3974_s10 + $0xc0] ss:$16 sps:$4 sm:$0xff]  }
  0x68   : > { %v3526_v6 = vld [vmem:[%s3974_s10 + $0xc8] ss:$16 sps:$4 sm:$0xff]   ;;  %v3527_v7 = vld [vmem:[%s3974_s10 + $0xe4] ss:$16 sps:$4 sm:$0xff]   ;;  %v3529_v8 = vld [vmem:[%s3974_s10 + $0xec] ss:$16 sps:$4 sm:$0xff]  }
  0x69   : > { %1514 = vmatpush1.bf16.msra.mxu0 %v3501_v53  ;;  %1796 = vmatpush1.bf16.msra.mxu1 %v3502_v54  ;;  %v3531_v9 = vld [vmem:[%s3974_s10 + $0xe0] ss:$16 sps:$4 sm:$0xff]   ;;  %v3532_v10 = vld [vmem:[%s3974_s10 + $0xe8] ss:$16 sps:$4 sm:$0xff]   ;;  %v3533_v11 = vld [vmem:[%s3974_s10 + $0x104] ss:$16 sps:$4 sm:$0xff]  }
  0x6a   : > { %1515 = vmatprep.subr.bf16.mxu0 %v3503_v55  ;;  %1797 = vmatprep.subr.bf16.mxu1 %v3505_v56  ;;  %v3535_v12 = vld [vmem:[%s3974_s10 + $0x10c] ss:$16 sps:$4 sm:$0xff]   ;;  %v3537_v13 = vld [vmem:[%s3974_s10 + $0x100] ss:$16 sps:$4 sm:$0xff]   ;;  %v3538_v14 = vld [vmem:[%s3974_s10 + $0x108] ss:$16 sps:$4 sm:$0xff]  }
  0x6b   : > { %v3539_v15 = vld [vmem:[%s3974_s10 + $0x124] ss:$16 sps:$4 sm:$0xff]   ;;  %v3541_v16 = vld [vmem:[%s3974_s10 + $0x12c] ss:$16 sps:$4 sm:$0xff]   ;;  %v3543_v17 = vld [vmem:[%s3974_s10 + $0x120] ss:$16 sps:$4 sm:$0xff]  }
  0x6c   : > { %v3544_v18 = vld [vmem:[%s3974_s10 + $0x128] ss:$16 sps:$4 sm:$0xff]   ;;  %v3545_v19 = vld [vmem:[%s3974_s10 + $0x144] ss:$16 sps:$4 sm:$0xff]   ;;  %v3547_v20 = vld [vmem:[%s3974_s10 + $0x14c] ss:$16 sps:$4 sm:$0xff]  }
  0x6d   : > { %1516 = vmatpush1.bf16.msra.mxu0 %v3507_v57  ;;  %1798 = vmatpush1.bf16.msra.mxu1 %v3508_v58  ;;  %v3549_v21 = vld [vmem:[%s3974_s10 + $0x140] ss:$16 sps:$4 sm:$0xff]   ;;  %v3550_v22 = vld [vmem:[%s3974_s10 + $0x148] ss:$16 sps:$4 sm:$0xff]   ;;  %v3551_v23 = vld [vmem:[%s3974_s10 + $0x164] ss:$16 sps:$4 sm:$0xff]  }
  0x6e   : > { %1517 = vmatprep.subr.bf16.mxu0 %v3509_v59  ;;  %1799 = vmatprep.subr.bf16.mxu1 %v3511_v60  ;;  %v3553_v24 = vld [vmem:[%s3974_s10 + $0x16c] ss:$16 sps:$4 sm:$0xff]   ;;  %v3555_v25 = vld [vmem:[%s3974_s10 + $0x160] ss:$16 sps:$4 sm:$0xff]   ;;  %v3556_v26 = vld [vmem:[%s3974_s10 + $0x168] ss:$16 sps:$4 sm:$0xff]  }
  0x6f   : > { %v3583_v27 = vld [vmem:[%s3976_s11 + $0x4] ss:$16 sps:$4 sm:$0xff]   ;;  %v3559_v29 = vld [vmem:[%s3974_s10 + $0x18c] ss:$16 sps:$4 sm:$0xff]   ;;  %v3561_v30 = vld [vmem:[%s3974_s10 + $0x180] ss:$16 sps:$4 sm:$0xff]  }
  0x70   : > { %v3557_v28 = vld [vmem:[%s3974_s10 + $0x184] ss:$16 sps:$4 sm:$0xff]   ;;  %1541 = vmatprep.mubr.bf16.mxu0 %v3583_v27  ;;  %1823 = vmatprep.mubr.bf16.mxu1 %v3583_v27  ;;  %v3562_v31 = vld [vmem:[%s3974_s10 + $0x188] ss:$16 sps:$4 sm:$0xff]   ;;  %v3565_v33 = vld [vmem:[%s3974_s10 + $0x1ac] ss:$16 sps:$4 sm:$0xff]  }
  0x71   : > { %1518 = vmatpush1.bf16.msra.mxu0 %v3513_v61  ;;  %1800 = vmatpush1.bf16.msra.mxu1 %v3514_v62  ;;  %v3563_v32 = vld [vmem:[%s3974_s10 + $0x1a4] ss:$16 sps:$4 sm:$0xff]   ;;  %v3567_v34 = vld [vmem:[%s3974_s10 + $0x1a0] ss:$16 sps:$4 sm:$0xff]   ;;  %v3568_v35 = vld [vmem:[%s3974_s10 + $0x1a8] ss:$16 sps:$4 sm:$0xff]  }
  0x72   : > { %1519 = vmatprep.subr.bf16.mxu0 %v3515_v63  ;;  %1801 = vmatprep.subr.bf16.mxu1 %v3517_v0  ;;  %v3569_v36 = vld [vmem:[%s3974_s10 + $0x1c4] ss:$16 sps:$4 sm:$0xff]   ;;  %v3571_v37 = vld [vmem:[%s3974_s10 + $0x1cc] ss:$16 sps:$4 sm:$0xff]   ;;  %v3573_v38 = vld [vmem:[%s3974_s10 + $0x1c0] ss:$16 sps:$4 sm:$0xff]  }
  0x73   : > { %v3574_v39 = vld [vmem:[%s3974_s10 + $0x1c8] ss:$16 sps:$4 sm:$0xff]   ;;  %v3575_v40 = vld [vmem:[%s3974_s10 + $0x1e4] ss:$16 sps:$4 sm:$0xff]   ;;  %v3577_v41 = vld [vmem:[%s3974_s10 + $0x1ec] ss:$16 sps:$4 sm:$0xff]  }
  0x74   : > { %v3579_v42 = vld [vmem:[%s3974_s10 + $0x1e0] ss:$16 sps:$4 sm:$0xff]   ;;  %v3580_v43 = vld [vmem:[%s3974_s10 + $0x1e8] ss:$16 sps:$4 sm:$0xff]   ;;  %v3586_v44 = vld [vmem:[%s3974_s10 + $0x204] ss:$16 sps:$4 sm:$0xff]  }
  0x75   : > { %1520 = vmatpush1.bf16.msra.mxu0 %v3519_v1  ;;  %1802 = vmatpush1.bf16.msra.mxu1 %v3520_v2  ;;  %v3589_v45 = vld [vmem:[%s3974_s10 + $0x20c] ss:$16 sps:$4 sm:$0xff]   ;;  %v3581_v46 = vld [vmem:[%s3976_s11] ss:$16 sps:$4 sm:$0xff]   ;;  %v3587_v48 = vld [vmem:[%s3974_s10 + $0x208] ss:$16 sps:$4 sm:$0xff]  }
  0x76   : > { %1521 = vmatprep.subr.bf16.mxu0 %v3521_v3  ;;  %1803 = vmatprep.subr.bf16.mxu1 %v3523_v4  ;;  %v3584_v47 = vld [vmem:[%s3974_s10 + $0x200] ss:$16 sps:$4 sm:$0xff]   ;;  %v3592_v49 = vld [vmem:[%s3974_s10 + $0x224] ss:$16 sps:$4 sm:$0xff]   ;;  %v3595_v50 = vld [vmem:[%s3974_s10 + $0x22c] ss:$16 sps:$4 sm:$0xff]  }
  0x77   : > { %v3596_v51 = vld [vmem:[%s3976_s11 + $0x24] ss:$16 sps:$4 sm:$0xff]   ;;  %v3590_v52 = vld [vmem:[%s3974_s10 + $0x220] ss:$16 sps:$4 sm:$0xff]   ;;  %v3593_v53 = vld [vmem:[%s3974_s10 + $0x228] ss:$16 sps:$4 sm:$0xff]  }
  0x78   : > { %v3601_v54 = vld [vmem:[%s3974_s10 + $0x244] ss:$16 sps:$4 sm:$0xff]   ;;  %v3604_v55 = vld [vmem:[%s3974_s10 + $0x24c] ss:$16 sps:$4 sm:$0xff]   ;;  %v3598_v56 = vld [vmem:[%s3976_s11 + $0x20] ss:$16 sps:$4 sm:$0xff]  }
  0x79   : > { %1522 = vmatpush1.bf16.msra.mxu0 %v3525_v5  ;;  %1804 = vmatpush1.bf16.msra.mxu1 %v3526_v6  ;;  %v3599_v57 = vld [vmem:[%s3974_s10 + $0x240] ss:$16 sps:$4 sm:$0xff]   ;;  %v3602_v58 = vld [vmem:[%s3974_s10 + $0x248] ss:$16 sps:$4 sm:$0xff]   ;;  %v3605_v59 = vld [vmem:[%s3976_s11 + $0x44] ss:$16 sps:$4 sm:$0xff]  }
  0x7a   : > { %1523 = vmatprep.subr.bf16.mxu0 %v3527_v7  ;;  %1805 = vmatprep.subr.bf16.mxu1 %v3529_v8  ;;  %v3610_v60 = vld [vmem:[%s3974_s10 + $0x264] ss:$16 sps:$4 sm:$0xff]   ;;  %v3613_v61 = vld [vmem:[%s3974_s10 + $0x26c] ss:$16 sps:$4 sm:$0xff]   ;;  %v3608_v62 = vld [vmem:[%s3974_s10 + $0x260] ss:$16 sps:$4 sm:$0xff]  }
  0x7b   : > { %v3611_v63 = vld [vmem:[%s3974_s10 + $0x268] ss:$16 sps:$4 sm:$0xff]   ;;  %v3616_v0 = vld [vmem:[%s3974_s10 + $0x284] ss:$16 sps:$4 sm:$0xff]   ;;  %v3619_v1 = vld [vmem:[%s3974_s10 + $0x28c] ss:$16 sps:$4 sm:$0xff]  }
  0x7c   : > { %v3607_v2 = vld [vmem:[%s3976_s11 + $0x40] ss:$16 sps:$4 sm:$0xff]   ;;  %v3620_v4 = vld [vmem:[%s3976_s11 + $0x64] ss:$16 sps:$4 sm:$0xff]   ;;  %v3617_v5 = vld [vmem:[%s3974_s10 + $0x288] ss:$16 sps:$4 sm:$0xff]  }
  0x7d   : > { %1524 = vmatpush1.bf16.msra.mxu0 %v3531_v9  ;;  %1806 = vmatpush1.bf16.msra.mxu1 %v3532_v10  ;;  %v3614_v3 = vld [vmem:[%s3974_s10 + $0x280] ss:$16 sps:$4 sm:$0xff]   ;;  %v3625_v6 = vld [vmem:[%s3974_s10 + $0x2a4] ss:$16 sps:$4 sm:$0xff]   ;;  %v3628_v7 = vld [vmem:[%s3974_s10 + $0x2ac] ss:$16 sps:$4 sm:$0xff]  }
  0x7e   : > { %1525 = vmatprep.subr.bf16.mxu0 %v3533_v11  ;;  %1807 = vmatprep.subr.bf16.mxu1 %v3535_v12  ;;  %v3623_v8 = vld [vmem:[%s3974_s10 + $0x2a0] ss:$16 sps:$4 sm:$0xff]   ;;  %v3626_v9 = vld [vmem:[%s3974_s10 + $0x2a8] ss:$16 sps:$4 sm:$0xff]   ;;  %v3634_v10 = vld [vmem:[%s3974_s10 + $0x2c4] ss:$16 sps:$4 sm:$0xff]  }
  0x7f   : > { %v3637_v11 = vld [vmem:[%s3974_s10 + $0x2cc] ss:$16 sps:$4 sm:$0xff]   ;;  %v3622_v12 = vld [vmem:[%s3976_s11 + $0x60] ss:$16 sps:$4 sm:$0xff]   ;;  %vm2160_vm2 = vcmask 523264   ;;  %vm2241_vm3 = vcmask 517120  }
  0x80   : > { %v3661_v27 = vld [vmem:[%s3974_s10 + $0x32c] ss:$16 sps:$4 sm:$0xff]   ;;  %p3372_p10 = scmp.ne.s32.totalorder %s3859_s18, 1 }
  0x81   : > { %1526 = vmatpush1.bf16.msra.mxu0 %v3537_v13  ;;  %1808 = vmatpush1.bf16.msra.mxu1 %v3538_v14  ;;  %v3629_v13 = vld [vmem:[%s3976_s11 + $0x84] ss:$16 sps:$4 sm:$0xff]   ;;  %v3632_v14 = vld [vmem:[%s3974_s10 + $0x2c0] ss:$16 sps:$4 sm:$0xff]  }
  0x82   : > { %1527 = vmatprep.subr.bf16.mxu0 %v3539_v15  ;;  %1809 = vmatprep.subr.bf16.mxu1 %v3541_v16  ;;  %v3635_v15 = vld [vmem:[%s3974_s10 + $0x2c8] ss:$16 sps:$4 sm:$0xff]   ;;  %v3642_v16 = vld [vmem:[%s3974_s10 + $0x2e4] ss:$16 sps:$4 sm:$0xff]  }
  0x85   : > { %1528 = vmatpush1.bf16.msra.mxu0 %v3543_v17  ;;  %1810 = vmatpush1.bf16.msra.mxu1 %v3544_v18  ;;  %v3645_v17 = vld [vmem:[%s3974_s10 + $0x2ec] ss:$16 sps:$4 sm:$0xff]   ;;  %v3640_v18 = vld [vmem:[%s3974_s10 + $0x2e0] ss:$16 sps:$4 sm:$0xff]  }
  0x86   : > { %1529 = vmatprep.subr.bf16.mxu0 %v3545_v19  ;;  %1811 = vmatprep.subr.bf16.mxu1 %v3547_v20  ;;  %v3643_v19 = vld [vmem:[%s3974_s10 + $0x2e8] ss:$16 sps:$4 sm:$0xff]   ;;  %v3649_v20 = vld [vmem:[%s3974_s10 + $0x304] ss:$16 sps:$4 sm:$0xff]  }
  0x89   : > { %1530 = vmatpush1.bf16.msra.mxu0 %v3549_v21  ;;  %1812 = vmatpush1.bf16.msra.mxu1 %v3550_v22  ;;  %v3652_v21 = vld [vmem:[%s3974_s10 + $0x30c] ss:$16 sps:$4 sm:$0xff]   ;;  %v3631_v22 = vld [vmem:[%s3976_s11 + $0x80] ss:$16 sps:$4 sm:$0xff]  }
  0x8a   : > { %1531 = vmatprep.subr.bf16.mxu0 %v3551_v23  ;;  %1813 = vmatprep.subr.bf16.mxu1 %v3553_v24  ;;  %v3638_v23 = vld [vmem:[%s3976_s11 + $0xa4] ss:$16 sps:$4 sm:$0xff]   ;;  %v3647_v24 = vld [vmem:[%s3974_s10 + $0x300] ss:$16 sps:$4 sm:$0xff]  }
  0x8d   : > { %1532 = vmatpush1.bf16.msra.mxu0 %v3555_v25  ;;  %1814 = vmatpush1.bf16.msra.mxu1 %v3556_v26  ;;  %v3650_v25 = vld [vmem:[%s3974_s10 + $0x308] ss:$16 sps:$4 sm:$0xff]   ;;  %v3658_v26 = vld [vmem:[%s3974_s10 + $0x324] ss:$16 sps:$4 sm:$0xff]  }
  0x8e   : > { %1533 = vmatprep.subr.bf16.mxu0 %v3557_v28  ;;  %1815 = vmatprep.subr.bf16.mxu1 %v3559_v29  ;;  %v3656_v28 = vld [vmem:[%s3974_s10 + $0x320] ss:$16 sps:$4 sm:$0xff]   ;;  %v3659_v29 = vld [vmem:[%s3974_s10 + $0x328] ss:$16 sps:$4 sm:$0xff]  }
  0x91   : > { %1534 = vmatpush1.bf16.msra.mxu0 %v3561_v30  ;;  %1816 = vmatpush1.bf16.msra.mxu1 %v3562_v31  ;;  %v3666_v30 = vld [vmem:[%s3974_s10 + $0x344] ss:$16 sps:$4 sm:$0xff]   ;;  %v3669_v31 = vld [vmem:[%s3974_s10 + $0x34c] ss:$16 sps:$4 sm:$0xff]  }
  0x92   : > { %1535 = vmatprep.subr.bf16.mxu0 %v3563_v32  ;;  %1817 = vmatprep.subr.bf16.mxu1 %v3565_v33  ;;  %v3646_v32 = vld [vmem:[%s3976_s11 + $0xa0] ss:$16 sps:$4 sm:$0xff]   ;;  %v3653_v33 = vld [vmem:[%s3976_s11 + $0xc4] ss:$16 sps:$4 sm:$0xff]  }
  0x95   : > { %1536 = vmatpush1.bf16.msra.mxu0 %v3567_v34  ;;  %1818 = vmatpush1.bf16.msra.mxu1 %v3568_v35  ;;  %v3664_v34 = vld [vmem:[%s3974_s10 + $0x340] ss:$16 sps:$4 sm:$0xff]   ;;  %v3667_v35 = vld [vmem:[%s3974_s10 + $0x348] ss:$16 sps:$4 sm:$0xff]  }
  0x96   : > { %1537 = vmatprep.subr.bf16.mxu0 %v3569_v36  ;;  %1819 = vmatprep.subr.bf16.mxu1 %v3571_v37  ;;  %v3673_v36 = vld [vmem:[%s3974_s10 + $0x364] ss:$16 sps:$4 sm:$0xff]   ;;  %v3676_v37 = vld [vmem:[%s3974_s10 + $0x36c] ss:$16 sps:$4 sm:$0xff]  }
  0x99   : > { %1538 = vmatpush1.bf16.msra.mxu0 %v3573_v38  ;;  %1820 = vmatpush1.bf16.msra.mxu1 %v3574_v39  ;;  %v3671_v38 = vld [vmem:[%s3974_s10 + $0x360] ss:$16 sps:$4 sm:$0xff]   ;;  %v3674_v39 = vld [vmem:[%s3974_s10 + $0x368] ss:$16 sps:$4 sm:$0xff]  }
  0x9a   : > { %1539 = vmatprep.subr.bf16.mxu0 %v3575_v40  ;;  %1821 = vmatprep.subr.bf16.mxu1 %v3577_v41  ;;  %v3682_v40 = vld [vmem:[%s3974_s10 + $0x384] ss:$16 sps:$4 sm:$0xff]   ;;  %v3685_v41 = vld [vmem:[%s3974_s10 + $0x38c] ss:$16 sps:$4 sm:$0xff]  }
  0x9d   : > { %1540 = vmatpush1.bf16.msra.mxu0 %v3579_v42  ;;  %1822 = vmatpush1.bf16.msra.mxu1 %v3580_v43  ;;  %v3655_v42 = vld [vmem:[%s3976_s11 + $0xc0] ss:$16 sps:$4 sm:$0xff]   ;;  %v3662_v43 = vld [vmem:[%s3976_s11 + $0xe4] ss:$16 sps:$4 sm:$0xff]  }
  0x9e   : > { %1650 = vmatprep.subr.bf16.mxu0 %v3586_v44  ;;  %1932 = vmatprep.subr.bf16.mxu1 %v3589_v45  ;;  %v3680_v44 = vld [vmem:[%s3974_s10 + $0x380] ss:$16 sps:$4 sm:$0xff]   ;;  %v3683_v45 = vld [vmem:[%s3974_s10 + $0x388] ss:$16 sps:$4 sm:$0xff]  }
  0xa0   : > { %1542 = vmatmul.mubr.bf16.vlgmr.msra.gmra.mrb[0].mxu0 %v3581_v46  ;;  %1824 = vmatmul.mubr.bf16.vlgmr.msra.gmra.mrb[0].mxu1 %v3581_v46  ;;  %v3691_v46 = vld [vmem:[%s3974_s10 + $0x3a4] ss:$16 sps:$4 sm:$0xff]  }
  0xa1   : > { %1651 = vmatpush1.bf16.msra.mxu0 %v3584_v47  ;;  %1933 = vmatpush1.bf16.msra.mxu1 %v3587_v48  ;;  %v3694_v47 = vld [vmem:[%s3974_s10 + $0x3ac] ss:$16 sps:$4 sm:$0xff]   ;;  %v3689_v48 = vld [vmem:[%s3974_s10 + $0x3a0] ss:$16 sps:$4 sm:$0xff]  }
  0xa2   : > { %1652 = vmatprep.subr.bf16.mxu0 %v3592_v49  ;;  %1934 = vmatprep.subr.bf16.mxu1 %v3595_v50  ;;  %v3692_v49 = vld [vmem:[%s3974_s10 + $0x3a8] ss:$16 sps:$4 sm:$0xff]   ;;  %v3697_v50 = vld [vmem:[%s3974_s10 + $0x3c4] ss:$16 sps:$4 sm:$0xff]  }
  0xa3   : > { %1551 = vmatprep.mubr.bf16.mxu0 %v3596_v51  ;;  %1833 = vmatprep.mubr.bf16.mxu1 %v3596_v51  ;;  %v3700_v51 = vld [vmem:[%s3974_s10 + $0x3cc] ss:$16 sps:$4 sm:$0xff]  }
  0xa5   : > { %1653 = vmatpush1.bf16.msra.mxu0 %v3590_v52  ;;  %1935 = vmatpush1.bf16.msra.mxu1 %v3593_v53  ;;  %v3670_v52 = vld [vmem:[%s3976_s11 + $0xe0] ss:$16 sps:$4 sm:$0xff]   ;;  %v3677_v53 = vld [vmem:[%s3976_s11 + $0x104] ss:$16 sps:$4 sm:$0xff]  }
  0xa6   : > { %1654 = vmatprep.subr.bf16.mxu0 %v3601_v54  ;;  %1936 = vmatprep.subr.bf16.mxu1 %v3604_v55  ;;  %v3695_v54 = vld [vmem:[%s3974_s10 + $0x3c0] ss:$16 sps:$4 sm:$0xff]   ;;  %v3698_v55 = vld [vmem:[%s3974_s10 + $0x3c8] ss:$16 sps:$4 sm:$0xff]  }
  0xa8   : > { %1552 = vmatmul.mubr.bf16.gmra.mrb[4].mxu0 %v3598_v56  ;;  %1834 = vmatmul.mubr.bf16.gmra.mrb[4].mxu1 %v3598_v56  ;;  %v3705_v56 = vld [vmem:[%s3974_s10 + $0x3e4] ss:$16 sps:$4 sm:$0xff]  }
  0xa9   : > { %1655 = vmatpush1.bf16.msra.mxu0 %v3599_v57  ;;  %1937 = vmatpush1.bf16.msra.mxu1 %v3602_v58  ;;  %v3708_v57 = vld [vmem:[%s3974_s10 + $0x3ec] ss:$16 sps:$4 sm:$0xff]   ;;  %v3703_v58 = vld [vmem:[%s3974_s10 + $0x3e0] ss:$16 sps:$4 sm:$0xff]  }
  0xaa   : > { %1561 = vmatprep.mubr.bf16.mxu0 %v3605_v59  ;;  %1843 = vmatprep.mubr.bf16.mxu1 %v3605_v59  ;;  %v3706_v59 = vld [vmem:[%s3974_s10 + $0x3e8] ss:$16 sps:$4 sm:$0xff]  }
  0xab   : > { %1656 = vmatprep.subr.bf16.mxu0 %v3610_v60  ;;  %1938 = vmatprep.subr.bf16.mxu1 %v3613_v61  ;;  %v3679_v60 = vld [vmem:[%s3976_s11 + $0x100] ss:$16 sps:$4 sm:$0xff]   ;;  %v3686_v61 = vld [vmem:[%s3976_s11 + $0x124] ss:$16 sps:$4 sm:$0xff]  }
  0xad   : > { %1657 = vmatpush1.bf16.msra.mxu0 %v3608_v62  ;;  %1939 = vmatpush1.bf16.msra.mxu1 %v3611_v63  ;;  %v525_v62 = vld [vmem:[%s3976_s11 + $0x140] sm:$0x11] }
  0xae   : > { %1658 = vmatprep.subr.bf16.mxu0 %v3616_v0  ;;  %1940 = vmatprep.subr.bf16.mxu1 %v3619_v1  ;;  %v3688_v63 = vld [vmem:[%s3976_s11 + $0x120] ss:$16 sps:$4 sm:$0xff]   ;;  %v3241_v0 = vcombine.high %v525_v62, %v525_v62  ;;  %v3240_v1 = vcombine.low %v525_v62, %v525_v62 }
  0xb0   : > { %1562 = vmatmul.mubr.bf16.gmra.mrb[8].mxu0 %v3607_v2  ;;  %1844 = vmatmul.mubr.bf16.gmra.mrb[8].mxu1 %v3607_v2  ;;  %v3711_v2 = vld [vmem:[%s3976_s11 + $0xc] ss:$16 sps:$4 sm:$0xff]  }
  0xb1   : > { %1571 = vmatprep.mubr.bf16.mxu0 %v3620_v4  ;;  %1659 = vmatpush1.bf16.msra.mxu0 %v3614_v3  ;;  %v3709_v3 = vld [vmem:[%s3976_s11 + $0x8] ss:$16 sps:$4 sm:$0xff]  }
  0xb2   : > { %1853 = vmatprep.mubr.bf16.mxu1 %v3620_v4  ;;  %1941 = vmatpush1.bf16.msra.mxu1 %v3617_v5  ;;  %v3712_v4 = vld [vmem:[%s3976_s11 + $0x2c] ss:$16 sps:$4 sm:$0xff]   ;;  %v3714_v5 = vld [vmem:[%s3976_s11 + $0x28] ss:$16 sps:$4 sm:$0xff]  }
  0xb3   : > { %1660 = vmatprep.subr.bf16.mxu0 %v3625_v6  ;;  %1942 = vmatprep.subr.bf16.mxu1 %v3628_v7  ;;  %v3715_v6 = vld [vmem:[%s3976_s11 + $0x4c] ss:$16 sps:$4 sm:$0xff]   ;;  %v3717_v7 = vld [vmem:[%s3976_s11 + $0x48] ss:$16 sps:$4 sm:$0xff]  }
  0xb5   : > { %1661 = vmatpush1.bf16.msra.mxu0 %v3623_v8  ;;  %v3718_v8 = vld [vmem:[%s3976_s11 + $0x6c] ss:$16 sps:$4 sm:$0xff]  }
  0xb6   : > { %1943 = vmatpush1.bf16.msra.mxu1 %v3626_v9  ;;  %1662 = vmatprep.subr.bf16.mxu0 %v3634_v10  ;;  %v3720_v9 = vld [vmem:[%s3976_s11 + $0x68] ss:$16 sps:$4 sm:$0xff]   ;;  %v3721_v10 = vld [vmem:[%s3976_s11 + $0x8c] ss:$16 sps:$4 sm:$0xff]  }
  0xb7   : > { %1944 = vmatprep.subr.bf16.mxu1 %v3637_v11  ;;  %v3723_v11 = vld [vmem:[%s3976_s11 + $0x88] ss:$16 sps:$4 sm:$0xff]  }
  0xb8   : > { %1572 = vmatmul.mubr.bf16.gmra.mrb[12].mxu0 %v3622_v12  ;;  %1854 = vmatmul.mubr.bf16.gmra.mrb[12].mxu1 %v3622_v12  ;;  %v3724_v12 = vld [vmem:[%s3976_s11 + $0xac] ss:$16 sps:$4 sm:$0xff]  }
  0xb9   : > { %1581 = vmatprep.mubr.bf16.mxu0 %v3629_v13  ;;  %1863 = vmatprep.mubr.bf16.mxu1 %v3629_v13  ;;  %v3726_v13 = vld [vmem:[%s3976_s11 + $0xa8] ss:$16 sps:$4 sm:$0xff]  }
  0xba   : > { %1663 = vmatpush1.bf16.msra.mxu0 %v3632_v14  ;;  %1945 = vmatpush1.bf16.msra.mxu1 %v3635_v15  ;;  %v3727_v14 = vld [vmem:[%s3976_s11 + $0xcc] ss:$16 sps:$4 sm:$0xff]   ;;  %v3729_v15 = vld [vmem:[%s3976_s11 + $0xc8] ss:$16 sps:$4 sm:$0xff]  }
  0xbb   : > { %1664 = vmatprep.subr.bf16.mxu0 %v3642_v16  ;;  %1946 = vmatprep.subr.bf16.mxu1 %v3645_v17  ;;  %v3730_v16 = vld [vmem:[%s3976_s11 + $0xec] ss:$16 sps:$4 sm:$0xff]   ;;  %v3732_v17 = vld [vmem:[%s3976_s11 + $0xe8] ss:$16 sps:$4 sm:$0xff]  }
  0xbe   : > { %1665 = vmatpush1.bf16.msra.mxu0 %v3640_v18  ;;  %1947 = vmatpush1.bf16.msra.mxu1 %v3643_v19  ;;  %v3733_v18 = vld [vmem:[%s3976_s11 + $0x10c] ss:$16 sps:$4 sm:$0xff]   ;;  %v3735_v19 = vld [vmem:[%s3976_s11 + $0x108] ss:$16 sps:$4 sm:$0xff]  }
  0xbf   : > { %1666 = vmatprep.subr.bf16.mxu0 %v3649_v20  ;;  %1948 = vmatprep.subr.bf16.mxu1 %v3652_v21  ;;  %v3736_v20 = vld [vmem:[%s3976_s11 + $0x12c] ss:$16 sps:$4 sm:$0xff]  }
  0xc0   : > { %1582 = vmatmul.mubr.bf16.gmra.mrb[16].mxu0 %v3631_v22  ;;  %1864 = vmatmul.mubr.bf16.gmra.mrb[16].mxu1 %v3631_v22  ;;  %v526_v21 = vld [vmem:[%s3976_s11 + $0x148] sm:$0x11] }
  0xc1   : > { %1591 = vmatprep.mubr.bf16.mxu0 %v3638_v23  ;;  %1873 = vmatprep.mubr.bf16.mxu1 %v3638_v23  ;;  %v3738_v22 = vld [vmem:[%s3976_s11 + $0x128] ss:$16 sps:$4 sm:$0xff]   ;;  %v3243_v23 = vcombine.high %v526_v21, %v526_v21 }
  0xc2   : > { %1667 = vmatpush1.bf16.msra.mxu0 %v3647_v24  ;;  %1949 = vmatpush1.bf16.msra.mxu1 %v3650_v25  ;;  %v3242_v24 = vcombine.low %v526_v21, %v526_v21 }
  0xc3   : > { %1668 = vmatprep.subr.bf16.mxu0 %v3658_v26  ;;  %1950 = vmatprep.subr.bf16.mxu1 %v3661_v27 }
  0xc6   : > { %1669 = vmatpush1.bf16.msra.mxu0 %v3656_v28  ;;  %1951 = vmatpush1.bf16.msra.mxu1 %v3659_v29 }
  0xc7   : > { %1670 = vmatprep.subr.bf16.mxu0 %v3666_v30  ;;  %1952 = vmatprep.subr.bf16.mxu1 %v3669_v31 }
  0xc8   : > { %1592 = vmatmul.mubr.bf16.gmra.mrb[20].mxu0 %v3646_v32  ;;  %1874 = vmatmul.mubr.bf16.gmra.mrb[20].mxu1 %v3646_v32 }
  0xc9   : > { %1601 = vmatprep.mubr.bf16.mxu0 %v3653_v33  ;;  %1883 = vmatprep.mubr.bf16.mxu1 %v3653_v33  ;;  %v401_v33 = vld [vmem:[#allocation2] sm:$0xff] }
  0xca   : > { %1671 = vmatpush1.bf16.msra.mxu0 %v3664_v34  ;;  %1953 = vmatpush1.bf16.msra.mxu1 %v3667_v35  ;;  %v403_v34 = vld [vmem:[#allocation2 + $0x10] sm:$0xff]  ;;  %v402_v35 = vld [vmem:[#allocation2 + $0x8] sm:$0xff] }
  0xcb   : > { %1672 = vmatprep.subr.bf16.mxu0 %v3673_v36  ;;  %1954 = vmatprep.subr.bf16.mxu1 %v3676_v37  ;;  %v404_v36 = vld [vmem:[#allocation2 + $0x18] sm:$0xff] }
  0xce   : > { %1673 = vmatpush1.bf16.msra.mxu0 %v3671_v38  ;;  %1955 = vmatpush1.bf16.msra.mxu1 %v3674_v39  ;;  %v405_v39 = vld [vmem:[#allocation2 + $0x20] sm:$0xff] }
  0xcf   : > { %1674 = vmatprep.subr.bf16.mxu0 %v3682_v40  ;;  %1956 = vmatprep.subr.bf16.mxu1 %v3685_v41  ;;  %v407_v40 = vld [vmem:[#allocation2 + $0x30] sm:$0xff] }
  0xd0   : > { %1602 = vmatmul.mubr.bf16.gmra.mrb[24].mxu0 %v3655_v42  ;;  %1884 = vmatmul.mubr.bf16.gmra.mrb[24].mxu1 %v3655_v42 }
  0xd1   : > { %1611 = vmatprep.mubr.bf16.mxu0 %v3662_v43  ;;  %1893 = vmatprep.mubr.bf16.mxu1 %v3662_v43 }
  0xd2   : > { %1675 = vmatpush1.bf16.msra.mxu0 %v3680_v44  ;;  %1957 = vmatpush1.bf16.msra.mxu1 %v3683_v45  ;;  %v406_v45 = vld [vmem:[#allocation2 + $0x28] sm:$0xff] }
  0xd3   : > { %1676 = vmatprep.subr.bf16.mxu0 %v3691_v46  ;;  %1958 = vmatprep.subr.bf16.mxu1 %v3694_v47  ;;  %v408_v46 = vld [vmem:[#allocation2 + $0x38] sm:$0xff] }
  0xd6   : > { %1677 = vmatpush1.bf16.msra.mxu0 %v3689_v48  ;;  %1959 = vmatpush1.bf16.msra.mxu1 %v3692_v49 }
  0xd7   : > { %1678 = vmatprep.subr.bf16.mxu0 %v3697_v50  ;;  %1960 = vmatprep.subr.bf16.mxu1 %v3700_v51 }
  0xd8   : > { %1612 = vmatmul.mubr.bf16.gmra.mrb[28].mxu0 %v3670_v52  ;;  %1894 = vmatmul.mubr.bf16.gmra.mrb[28].mxu1 %v3670_v52 }
  0xd9   : > { %1621 = vmatprep.mubr.bf16.mxu0 %v3677_v53  ;;  %1903 = vmatprep.mubr.bf16.mxu1 %v3677_v53 }
  0xda   : > { %1679 = vmatpush1.bf16.msra.mxu0 %v3695_v54  ;;  %1961 = vmatpush1.bf16.msra.mxu1 %v3698_v55 }
  0xdb   : > { %1680 = vmatprep.subr.bf16.mxu0 %v3705_v56  ;;  %1962 = vmatprep.subr.bf16.mxu1 %v3708_v57  ;;  %v409_v57 = vld [vmem:[#allocation2 + $0x40] sm:$0xff] }
  0xde   : > { %1681 = vmatpush1.bf16.msra.mxu0 %v3703_v58  ;;  %1963 = vmatpush1.bf16.msra.mxu1 %v3706_v59  ;;  %v411_v58 = vld [vmem:[#allocation2 + $0x50] sm:$0xff]  ;;  %v410_v59 = vld [vmem:[#allocation2 + $0x48] sm:$0xff] }
  0xe0   : > { %1622 = vmatmul.mubr.bf16.gmra.mrb[32].mxu0 %v3679_v60  ;;  %1904 = vmatmul.mubr.bf16.gmra.mrb[32].mxu1 %v3679_v60  ;;  %v412_v60 = vld [vmem:[#allocation2 + $0x58] sm:$0xff] }
  0xe1   : > { %1631 = vmatprep.mubr.bf16.mxu0 %v3686_v61  ;;  %1913 = vmatprep.mubr.bf16.mxu1 %v3686_v61 }
  0xe8   : > { %1632 = vmatmul.mubr.bf16.gmra.mrb[36].mxu0 %v3688_v63  ;;  %1914 = vmatmul.mubr.bf16.gmra.mrb[36].mxu1 %v3688_v63  ;;  %v413_v63 = vld [vmem:[#allocation2 + $0x60] sm:$0xff] }
  0xe9   : > { %1641 = vmatprep.mubr.bf16.mxu0 %v3241_v0  ;;  %1923 = vmatprep.mubr.bf16.mxu1 %v3241_v0  ;;  %v415_v0 = vld [vmem:[#allocation2 + $0x70] sm:$0xff] }
  0xf0   : > { %1642 = vmatmul.mubr.bf16.gmra.mrb[40].mxu0 %v3240_v1  ;;  %1924 = vmatmul.mubr.bf16.gmra.mrb[40].mxu1 %v3240_v1 }
  0xf1   : > { %1682 = vmatprep.mubr.bf16.mxu0 %v3711_v2  ;;  %1964 = vmatprep.mubr.bf16.mxu1 %v3711_v2 }
  0xf8   : > { %1683 = vmatmul.mubr.bf16.vlgmr.msra.gmra.mrb[0].mxu0 %v3709_v3  ;;  %1965 = vmatmul.mubr.bf16.vlgmr.msra.gmra.mrb[0].mxu1 %v3709_v3 }
  0xf9   : > { %1692 = vmatprep.mubr.bf16.mxu0 %v3712_v4  ;;  %1974 = vmatprep.mubr.bf16.mxu1 %v3712_v4 }
 0x100   : > { %1693 = vmatmul.mubr.bf16.gmra.mrb[4].mxu0 %v3714_v5  ;;  %1975 = vmatmul.mubr.bf16.gmra.mrb[4].mxu1 %v3714_v5  ;;  %v414_v5 = vld [vmem:[#allocation2 + $0x68] sm:$0xff] }
 0x101   : > { %1702 = vmatprep.mubr.bf16.mxu0 %v3715_v6  ;;  %1984 = vmatprep.mubr.bf16.mxu1 %v3715_v6  ;;  %v416_v6 = vld [vmem:[#allocation2 + $0x78] sm:$0xff] }
 0x108   : > { %1703 = vmatmul.mubr.bf16.gmra.mrb[8].mxu0 %v3717_v7  ;;  %1985 = vmatmul.mubr.bf16.gmra.mrb[8].mxu1 %v3717_v7 }
 0x109   : > { %1712 = vmatprep.mubr.bf16.mxu0 %v3718_v8  ;;  %1994 = vmatprep.mubr.bf16.mxu1 %v3718_v8 }
 0x110   : > { %1713 = vmatmul.mubr.bf16.gmra.mrb[12].mxu0 %v3720_v9  ;;  %1995 = vmatmul.mubr.bf16.gmra.mrb[12].mxu1 %v3720_v9 }
 0x111   : > { %1722 = vmatprep.mubr.bf16.mxu0 %v3721_v10  ;;  %2004 = vmatprep.mubr.bf16.mxu1 %v3721_v10 }
 0x118   : > { %1723 = vmatmul.mubr.bf16.gmra.mrb[16].mxu0 %v3723_v11  ;;  %2005 = vmatmul.mubr.bf16.gmra.mrb[16].mxu1 %v3723_v11 }
 0x119   : > { %1732 = vmatprep.mubr.bf16.mxu0 %v3724_v12  ;;  %2014 = vmatprep.mubr.bf16.mxu1 %v3724_v12 }
 0x120   : > { %1733 = vmatmul.mubr.bf16.gmra.mrb[20].mxu0 %v3726_v13  ;;  %2015 = vmatmul.mubr.bf16.gmra.mrb[20].mxu1 %v3726_v13 }
 0x121   : > { %1742 = vmatprep.mubr.bf16.mxu0 %v3727_v14  ;;  %2024 = vmatprep.mubr.bf16.mxu1 %v3727_v14 }
 0x128   : > { %1743 = vmatmul.mubr.bf16.gmra.mrb[24].mxu0 %v3729_v15  ;;  %2025 = vmatmul.mubr.bf16.gmra.mrb[24].mxu1 %v3729_v15 }
 0x129   : > { %1752 = vmatprep.mubr.bf16.mxu0 %v3730_v16  ;;  %2034 = vmatprep.mubr.bf16.mxu1 %v3730_v16 }
 0x130   : > { %1753 = vmatmul.mubr.bf16.gmra.mrb[28].mxu0 %v3732_v17  ;;  %2035 = vmatmul.mubr.bf16.gmra.mrb[28].mxu1 %v3732_v17  ;;  %v417_v17 = vld [vmem:[#allocation2 + $0x80] sm:$0xff] }
 0x131   : > { %1762 = vmatprep.mubr.bf16.mxu0 %v3733_v18  ;;  %2044 = vmatprep.mubr.bf16.mxu1 %v3733_v18  ;;  %v419_v18 = vld [vmem:[#allocation2 + $0x90] sm:$0xff] }
 0x138   : > { %1763 = vmatmul.mubr.bf16.gmra.mrb[32].mxu0 %v3735_v19  ;;  %2045 = vmatmul.mubr.bf16.gmra.mrb[32].mxu1 %v3735_v19  ;;  %v418_v19 = vld [vmem:[#allocation2 + $0x88] sm:$0xff] }
 0x139   : > { %1772 = vmatprep.mubr.bf16.mxu0 %v3736_v20  ;;  %2054 = vmatprep.mubr.bf16.mxu1 %v3736_v20  ;;  %v420_v20 = vld [vmem:[#allocation2 + $0x98] sm:$0xff] }
 0x140   : > { %1773 = vmatmul.mubr.bf16.gmra.mrb[36].mxu0 %v3738_v22  ;;  %2055 = vmatmul.mubr.bf16.gmra.mrb[36].mxu1 %v3738_v22 }
 0x141   : > { %1782 = vmatprep.mubr.bf16.mxu0 %v3243_v23  ;;  %2064 = vmatprep.mubr.bf16.mxu1 %v3243_v23  ;;  %v421_v23 = vld [vmem:[#allocation2 + $0xa0] sm:$0xff] }
 0x148   : > { %1783 = vmatmul.mubr.bf16.gmra.mrb[44].mxu0 %v3242_v24  ;;  %2065 = vmatmul.mubr.bf16.gmra.mrb[44].mxu1 %v3242_v24  ;;  %v423_v24 = vld [vmem:[#allocation2 + $0xb0] sm:$0xff] }
 0x1c3   : > { %v4254_v25 = vpop.f32.mrb[40].mxu0  ;;  %v4256_v26 = vpop.f32.mrb[40].mxu1 }
 0x1c4   : > { %v4258_v27 = vpop.f32.mrb[41].mxu0  ;;  %v4260_v28 = vpop.f32.mrb[41].mxu1 }
 0x1c5   : > { %v1647_v29 = vpop.f32.mrb[42].mxu0  ;;  %v1929_v30 = vpop.f32.mrb[42].mxu1 }
 0x1c6   : > { %v1648_v31 = vpop.f32.mrb[43].mxu0  ;;  %v1930_v32 = vpop.f32.mrb[43].mxu1 }
 0x1cb   : > { %v1684_v37 = vpop.f32.mrb[0].mxu0  ;;  %v1966_v38 = vpop.f32.mrb[0].mxu1 }
 0x1cc   : > { %v2073_v41 = vadd.f32 %v1684_v37, %v401_v33  ;;  %v2075_v42 = vadd.f32 %v1966_v38, %v403_v34  ;;  %v1686_v43 = vpop.f32.mrb[1].mxu0  ;;  %v1968_v44 = vpop.f32.mrb[1].mxu1  ;;  %v422_v33 = vld [vmem:[#allocation2 + $0xa8] sm:$0xff]  ;;  %v424_v34 = vld [vmem:[#allocation2 + $0xb8] sm:$0xff] }
 0x1cd   : > { %v2074_v47 = vadd.f32 %v1686_v43, %v402_v35  ;;  %v2076_v48 = vadd.f32 %v1968_v44, %v404_v36  ;;  %v1688_v49 = vpop.f32.mrb[2].mxu0  ;;  %v1970_v50 = vpop.f32.mrb[2].mxu1 }
 0x1ce   : > { %2157 = vst [vmem:[#allocation2] sm:$0xff] %v2073_v41  ;;  %2159 = vst [vmem:[#allocation2 + $0x10] sm:$0xff] %v2075_v42  ;;  %v2077_v51 = vadd.f32 %v1688_v49, %v405_v39  ;;  %v2079_v52 = vadd.f32 %v1970_v50, %v407_v40  ;;  %v1690_v53 = vpop.f32.mrb[3].mxu0  ;;  %v1972_v54 = vpop.f32.mrb[3].mxu1 }
 0x1cf   : > { %2158 = vst [vmem:[#allocation2 + $0x8] sm:$0xff] %v2074_v47  ;;  %2161 = vst.msk [vmem:[#allocation2 + $0x18] sm:$0xff] %vm2160_vm2, %v2076_v48  ;;  %v2078_v55 = vadd.f32 %v1690_v53, %v406_v45  ;;  %v2080_v56 = vadd.f32 %v1972_v54, %v408_v46  ;;  %v425_v45 = vld [vmem:[#allocation2 + $0xc0] sm:$0xff]  ;;  %v427_v46 = vld [vmem:[#allocation2 + $0xd0] sm:$0xff] }
 0x1d0   : > { %2162 = vst [vmem:[#allocation2 + $0x20] sm:$0xff] %v2077_v51  ;;  %2164 = vst [vmem:[#allocation2 + $0x30] sm:$0xff] %v2079_v52  ;;  %v426_v47 = vld [vmem:[#allocation2 + $0xc8] sm:$0xff]  ;;  %v428_v48 = vld [vmem:[#allocation2 + $0xd8] sm:$0xff] }
 0x1d1   : > { %2163 = vst [vmem:[#allocation2 + $0x28] sm:$0xff] %v2078_v55  ;;  %2165 = vst.msk [vmem:[#allocation2 + $0x38] sm:$0xff] %vm2160_vm2, %v2080_v56  ;;  %v429_v51 = vld [vmem:[#allocation2 + $0xe0] sm:$0xff]  ;;  %v431_v52 = vld [vmem:[#allocation2 + $0xf0] sm:$0xff] }
 0x1d3   : > { %v1694_v61 = vpop.f32.mrb[4].mxu0  ;;  %v1976_v62 = vpop.f32.mrb[4].mxu1 }
 0x1d4   : > { %v2081_v1 = vadd.f32 %v1694_v61, %v409_v57  ;;  %v2083_v2 = vadd.f32 %v1976_v62, %v411_v58  ;;  %v1696_v3 = vpop.f32.mrb[5].mxu0  ;;  %v1978_v4 = vpop.f32.mrb[5].mxu1  ;;  %v430_v57 = vld [vmem:[#allocation2 + $0xe8] sm:$0xff]  ;;  %v432_v58 = vld [vmem:[#allocation2 + $0xf8] sm:$0xff] }
 0x1d5   : > { %v2082_v7 = vadd.f32 %v1696_v3, %v410_v59  ;;  %v2084_v8 = vadd.f32 %v1978_v4, %v412_v60  ;;  %v1698_v9 = vpop.f32.mrb[6].mxu0  ;;  %v1980_v10 = vpop.f32.mrb[6].mxu1 }
 0x1d6   : > { %2166 = vst [vmem:[#allocation2 + $0x40] sm:$0xff] %v2081_v1  ;;  %2168 = vst [vmem:[#allocation2 + $0x50] sm:$0xff] %v2083_v2  ;;  %v2085_v11 = vadd.f32 %v1698_v9, %v413_v63  ;;  %v2087_v12 = vadd.f32 %v1980_v10, %v415_v0  ;;  %v1700_v13 = vpop.f32.mrb[7].mxu0  ;;  %v1982_v14 = vpop.f32.mrb[7].mxu1 }
 0x1d7   : > { %2167 = vst [vmem:[#allocation2 + $0x48] sm:$0xff] %v2082_v7  ;;  %2169 = vst.msk [vmem:[#allocation2 + $0x58] sm:$0xff] %vm2160_vm2, %v2084_v8  ;;  %v2086_v15 = vadd.f32 %v1700_v13, %v414_v5  ;;  %v2088_v16 = vadd.f32 %v1982_v14, %v416_v6  ;;  %v433_v5 = vld [vmem:[#allocation2 + $0x100] sm:$0xff]  ;;  %v435_v6 = vld [vmem:[#allocation2 + $0x110] sm:$0xff] }
 0x1d8   : > { %2170 = vst [vmem:[#allocation2 + $0x60] sm:$0xff] %v2085_v11  ;;  %2172 = vst [vmem:[#allocation2 + $0x70] sm:$0xff] %v2087_v12  ;;  %v434_v7 = vld [vmem:[#allocation2 + $0x108] sm:$0xff]  ;;  %v436_v8 = vld [vmem:[#allocation2 + $0x118] sm:$0xff] }
 0x1d9   : > { %2171 = vst [vmem:[#allocation2 + $0x68] sm:$0xff] %v2086_v15  ;;  %2173 = vst.msk [vmem:[#allocation2 + $0x78] sm:$0xff] %vm2160_vm2, %v2088_v16  ;;  %v437_v11 = vld [vmem:[#allocation2 + $0x120] sm:$0xff]  ;;  %v439_v12 = vld [vmem:[#allocation2 + $0x130] sm:$0xff] }
 0x1db   : > { %v1704_v21 = vpop.f32.mrb[8].mxu0  ;;  %v1986_v22 = vpop.f32.mrb[8].mxu1 }
 0x1dc   : > { %v2089_v29 = vadd.f32 %v1704_v21, %v417_v17  ;;  %v2091_v30 = vadd.f32 %v1986_v22, %v419_v18  ;;  %v1706_v31 = vpop.f32.mrb[9].mxu0  ;;  %v1988_v32 = vpop.f32.mrb[9].mxu1  ;;  %v438_v17 = vld [vmem:[#allocation2 + $0x128] sm:$0xff]  ;;  %v440_v18 = vld [vmem:[#allocation2 + $0x138] sm:$0xff] }
 0x1dd   : > { %v2090_v35 = vadd.f32 %v1706_v31, %v418_v19  ;;  %v2092_v36 = vadd.f32 %v1988_v32, %v420_v20  ;;  %v1708_v37 = vpop.f32.mrb[10].mxu0  ;;  %v1990_v38 = vpop.f32.mrb[10].mxu1 }
 0x1de   : > { %2174 = vst [vmem:[#allocation2 + $0x80] sm:$0xff] %v2089_v29  ;;  %2176 = vst [vmem:[#allocation2 + $0x90] sm:$0xff] %v2091_v30  ;;  %v2093_v39 = vadd.f32 %v1708_v37, %v421_v23  ;;  %v2095_v40 = vadd.f32 %v1990_v38, %v423_v24  ;;  %v1710_v41 = vpop.f32.mrb[11].mxu0  ;;  %v1992_v42 = vpop.f32.mrb[11].mxu1 }
 0x1df   : > { %2175 = vst [vmem:[#allocation2 + $0x88] sm:$0xff] %v2090_v35  ;;  %2177 = vst.msk [vmem:[#allocation2 + $0x98] sm:$0xff] %vm2160_vm2, %v2092_v36  ;;  %v2094_v43 = vadd.f32 %v1710_v41, %v422_v33  ;;  %v2096_v44 = vadd.f32 %v1992_v42, %v424_v34  ;;  %v441_v33 = vld [vmem:[#allocation2 + $0x140] sm:$0xff]  ;;  %v443_v34 = vld [vmem:[#allocation2 + $0x150] sm:$0xff] }
 0x1e0   : > { %2178 = vst [vmem:[#allocation2 + $0xa0] sm:$0xff] %v2093_v39  ;;  %2180 = vst [vmem:[#allocation2 + $0xb0] sm:$0xff] %v2095_v40  ;;  %v442_v35 = vld [vmem:[#allocation2 + $0x148] sm:$0xff]  ;;  %v444_v36 = vld [vmem:[#allocation2 + $0x158] sm:$0xff] }
 0x1e1   : > { %2179 = vst [vmem:[#allocation2 + $0xa8] sm:$0xff] %v2094_v43  ;;  %2181 = vst.msk [vmem:[#allocation2 + $0xb8] sm:$0xff] %vm2160_vm2, %v2096_v44  ;;  %v445_v39 = vld [vmem:[#allocation2 + $0x160] sm:$0xff]  ;;  %v447_v40 = vld [vmem:[#allocation2 + $0x170] sm:$0xff] }
 0x1e3   : > { %v1714_v49 = vpop.f32.mrb[12].mxu0  ;;  %v1996_v50 = vpop.f32.mrb[12].mxu1 }
 0x1e4   : > { %v2097_v53 = vadd.f32 %v1714_v49, %v425_v45  ;;  %v2099_v54 = vadd.f32 %v1996_v50, %v427_v46  ;;  %v1716_v55 = vpop.f32.mrb[13].mxu0  ;;  %v1998_v56 = vpop.f32.mrb[13].mxu1  ;;  %v446_v45 = vld [vmem:[#allocation2 + $0x168] sm:$0xff]  ;;  %v448_v46 = vld [vmem:[#allocation2 + $0x178] sm:$0xff] }
 0x1e5   : > { %v2098_v59 = vadd.f32 %v1716_v55, %v426_v47  ;;  %v2100_v60 = vadd.f32 %v1998_v56, %v428_v48  ;;  %v1718_v61 = vpop.f32.mrb[14].mxu0  ;;  %v2000_v62 = vpop.f32.mrb[14].mxu1 }
 0x1e6   : > { %2182 = vst [vmem:[#allocation2 + $0xc0] sm:$0xff] %v2097_v53  ;;  %2184 = vst [vmem:[#allocation2 + $0xd0] sm:$0xff] %v2099_v54  ;;  %v2101_v63 = vadd.f32 %v1718_v61, %v429_v51  ;;  %v2103_v0 = vadd.f32 %v2000_v62, %v431_v52  ;;  %v1720_v1 = vpop.f32.mrb[15].mxu0  ;;  %v2002_v2 = vpop.f32.mrb[15].mxu1 }
 0x1e7   : > { %2183 = vst [vmem:[#allocation2 + $0xc8] sm:$0xff] %v2098_v59  ;;  %2185 = vst.msk [vmem:[#allocation2 + $0xd8] sm:$0xff] %vm2160_vm2, %v2100_v60  ;;  %v2102_v3 = vadd.f32 %v1720_v1, %v430_v57  ;;  %v2104_v4 = vadd.f32 %v2002_v2, %v432_v58  ;;  %v449_v57 = vld [vmem:[#allocation2 + $0x180] sm:$0xff]  ;;  %v451_v58 = vld [vmem:[#allocation2 + $0x190] sm:$0xff] }
 0x1e8   : > { %2186 = vst [vmem:[#allocation2 + $0xe0] sm:$0xff] %v2101_v63  ;;  %2188 = vst [vmem:[#allocation2 + $0xf0] sm:$0xff] %v2103_v0  ;;  %v450_v59 = vld [vmem:[#allocation2 + $0x188] sm:$0xff]  ;;  %v452_v60 = vld [vmem:[#allocation2 + $0x198] sm:$0xff] }
 0x1e9   : > { %2187 = vst [vmem:[#allocation2 + $0xe8] sm:$0xff] %v2102_v3  ;;  %2189 = vst.msk [vmem:[#allocation2 + $0xf8] sm:$0xff] %vm2160_vm2, %v2104_v4  ;;  %v453_v63 = vld [vmem:[#allocation2 + $0x1a0] sm:$0xff]  ;;  %v455_v0 = vld [vmem:[#allocation2 + $0x1b0] sm:$0xff] }
 0x1eb   : > { %v1724_v9 = vpop.f32.mrb[16].mxu0  ;;  %v2006_v10 = vpop.f32.mrb[16].mxu1 }
 0x1ec   : > { %v2105_v13 = vadd.f32 %v1724_v9, %v433_v5  ;;  %v2107_v14 = vadd.f32 %v2006_v10, %v435_v6  ;;  %v1726_v15 = vpop.f32.mrb[17].mxu0  ;;  %v2008_v16 = vpop.f32.mrb[17].mxu1  ;;  %v454_v5 = vld [vmem:[#allocation2 + $0x1a8] sm:$0xff]  ;;  %v456_v6 = vld [vmem:[#allocation2 + $0x1b8] sm:$0xff] }
 0x1ed   : > { %v2106_v19 = vadd.f32 %v1726_v15, %v434_v7  ;;  %v2108_v20 = vadd.f32 %v2008_v16, %v436_v8  ;;  %v1728_v21 = vpop.f32.mrb[18].mxu0  ;;  %v2010_v22 = vpop.f32.mrb[18].mxu1 }
 0x1ee   : > { %2190 = vst [vmem:[#allocation2 + $0x100] sm:$0xff] %v2105_v13  ;;  %2192 = vst [vmem:[#allocation2 + $0x110] sm:$0xff] %v2107_v14  ;;  %v2109_v23 = vadd.f32 %v1728_v21, %v437_v11  ;;  %v2111_v24 = vadd.f32 %v2010_v22, %v439_v12  ;;  %v1730_v29 = vpop.f32.mrb[19].mxu0  ;;  %v2012_v30 = vpop.f32.mrb[19].mxu1 }
 0x1ef   : > { %2191 = vst [vmem:[#allocation2 + $0x108] sm:$0xff] %v2106_v19  ;;  %2193 = vst.msk [vmem:[#allocation2 + $0x118] sm:$0xff] %vm2160_vm2, %v2108_v20  ;;  %v2110_v31 = vadd.f32 %v1730_v29, %v438_v17  ;;  %v2112_v32 = vadd.f32 %v2012_v30, %v440_v18  ;;  %v457_v17 = vld [vmem:[#allocation2 + $0x1c0] sm:$0xff]  ;;  %v459_v18 = vld [vmem:[#allocation2 + $0x1d0] sm:$0xff] }
 0x1f0   : > { %2194 = vst [vmem:[#allocation2 + $0x120] sm:$0xff] %v2109_v23  ;;  %2196 = vst [vmem:[#allocation2 + $0x130] sm:$0xff] %v2111_v24  ;;  %v458_v19 = vld [vmem:[#allocation2 + $0x1c8] sm:$0xff]  ;;  %v460_v20 = vld [vmem:[#allocation2 + $0x1d8] sm:$0xff] }
 0x1f1   : > { %2195 = vst [vmem:[#allocation2 + $0x128] sm:$0xff] %v2110_v31  ;;  %2197 = vst.msk [vmem:[#allocation2 + $0x138] sm:$0xff] %vm2160_vm2, %v2112_v32  ;;  %v461_v23 = vld [vmem:[#allocation2 + $0x1e0] sm:$0xff]  ;;  %v463_v24 = vld [vmem:[#allocation2 + $0x1f0] sm:$0xff] }
 0x1f3   : > { %v1734_v37 = vpop.f32.mrb[20].mxu0  ;;  %v2016_v38 = vpop.f32.mrb[20].mxu1 }
 0x1f4   : > { %v2113_v41 = vadd.f32 %v1734_v37, %v441_v33  ;;  %v2115_v42 = vadd.f32 %v2016_v38, %v443_v34  ;;  %v1736_v43 = vpop.f32.mrb[21].mxu0  ;;  %v2018_v44 = vpop.f32.mrb[21].mxu1  ;;  %v462_v33 = vld [vmem:[#allocation2 + $0x1e8] sm:$0xff]  ;;  %v464_v34 = vld [vmem:[#allocation2 + $0x1f8] sm:$0xff] }
 0x1f5   : > { %v2114_v47 = vadd.f32 %v1736_v43, %v442_v35  ;;  %v2116_v48 = vadd.f32 %v2018_v44, %v444_v36  ;;  %v1738_v49 = vpop.f32.mrb[22].mxu0  ;;  %v2020_v50 = vpop.f32.mrb[22].mxu1 }
 0x1f6   : > { %2198 = vst [vmem:[#allocation2 + $0x140] sm:$0xff] %v2113_v41  ;;  %2200 = vst [vmem:[#allocation2 + $0x150] sm:$0xff] %v2115_v42  ;;  %v2117_v51 = vadd.f32 %v1738_v49, %v445_v39  ;;  %v2119_v52 = vadd.f32 %v2020_v50, %v447_v40  ;;  %v1740_v53 = vpop.f32.mrb[23].mxu0  ;;  %v2022_v54 = vpop.f32.mrb[23].mxu1 }
 0x1f7   : > { %2199 = vst [vmem:[#allocation2 + $0x148] sm:$0xff] %v2114_v47  ;;  %2201 = vst.msk [vmem:[#allocation2 + $0x158] sm:$0xff] %vm2160_vm2, %v2116_v48  ;;  %v2118_v55 = vadd.f32 %v1740_v53, %v446_v45  ;;  %v2120_v56 = vadd.f32 %v2022_v54, %v448_v46  ;;  %v465_v45 = vld [vmem:[#allocation2 + $0x200] sm:$0xff]  ;;  %v467_v46 = vld [vmem:[#allocation2 + $0x210] sm:$0xff] }
 0x1f8   : > { %2202 = vst [vmem:[#allocation2 + $0x160] sm:$0xff] %v2117_v51  ;;  %2204 = vst [vmem:[#allocation2 + $0x170] sm:$0xff] %v2119_v52  ;;  %v466_v47 = vld [vmem:[#allocation2 + $0x208] sm:$0xff]  ;;  %v468_v48 = vld [vmem:[#allocation2 + $0x218] sm:$0xff] }
 0x1f9   : > { %2203 = vst [vmem:[#allocation2 + $0x168] sm:$0xff] %v2118_v55  ;;  %2205 = vst.msk [vmem:[#allocation2 + $0x178] sm:$0xff] %vm2160_vm2, %v2120_v56  ;;  %v469_v51 = vld [vmem:[#allocation2 + $0x220] sm:$0xff]  ;;  %v471_v52 = vld [vmem:[#allocation2 + $0x230] sm:$0xff] }
 0x1fb   : > { %v1744_v61 = vpop.f32.mrb[24].mxu0  ;;  %v2026_v62 = vpop.f32.mrb[24].mxu1 }
 0x1fc   : > { %v2121_v1 = vadd.f32 %v1744_v61, %v449_v57  ;;  %v2123_v2 = vadd.f32 %v2026_v62, %v451_v58  ;;  %v1746_v3 = vpop.f32.mrb[25].mxu0  ;;  %v2028_v4 = vpop.f32.mrb[25].mxu1  ;;  %v470_v57 = vld [vmem:[#allocation2 + $0x228] sm:$0xff]  ;;  %v472_v58 = vld [vmem:[#allocation2 + $0x238] sm:$0xff] }
 0x1fd   : > { %v2122_v7 = vadd.f32 %v1746_v3, %v450_v59  ;;  %v2124_v8 = vadd.f32 %v2028_v4, %v452_v60  ;;  %v1748_v9 = vpop.f32.mrb[26].mxu0  ;;  %v2030_v10 = vpop.f32.mrb[26].mxu1 }
 0x1fe   : > { %2206 = vst [vmem:[#allocation2 + $0x180] sm:$0xff] %v2121_v1  ;;  %2208 = vst [vmem:[#allocation2 + $0x190] sm:$0xff] %v2123_v2  ;;  %v2125_v11 = vadd.f32 %v1748_v9, %v453_v63  ;;  %v2127_v12 = vadd.f32 %v2030_v10, %v455_v0  ;;  %v1750_v13 = vpop.f32.mrb[27].mxu0  ;;  %v2032_v14 = vpop.f32.mrb[27].mxu1 }
 0x1ff   : > { %2207 = vst [vmem:[#allocation2 + $0x188] sm:$0xff] %v2122_v7  ;;  %2209 = vst.msk [vmem:[#allocation2 + $0x198] sm:$0xff] %vm2160_vm2, %v2124_v8  ;;  %v2126_v15 = vadd.f32 %v1750_v13, %v454_v5  ;;  %v2128_v16 = vadd.f32 %v2032_v14, %v456_v6  ;;  %v473_v5 = vld [vmem:[#allocation2 + $0x240] sm:$0xff]  ;;  %v475_v6 = vld [vmem:[#allocation2 + $0x250] sm:$0xff] }
 0x200   : > { %2210 = vst [vmem:[#allocation2 + $0x1a0] sm:$0xff] %v2125_v11  ;;  %2212 = vst [vmem:[#allocation2 + $0x1b0] sm:$0xff] %v2127_v12  ;;  %v474_v7 = vld [vmem:[#allocation2 + $0x248] sm:$0xff]  ;;  %v476_v8 = vld [vmem:[#allocation2 + $0x258] sm:$0xff] }
 0x201   : > { %2211 = vst [vmem:[#allocation2 + $0x1a8] sm:$0xff] %v2126_v15  ;;  %2213 = vst.msk [vmem:[#allocation2 + $0x1b8] sm:$0xff] %vm2160_vm2, %v2128_v16  ;;  %v477_v11 = vld [vmem:[#allocation2 + $0x260] sm:$0xff]  ;;  %v479_v12 = vld [vmem:[#allocation2 + $0x270] sm:$0xff] }
 0x203   : > { %v1754_v21 = vpop.f32.mrb[28].mxu0  ;;  %v2036_v22 = vpop.f32.mrb[28].mxu1 }
 0x204   : > { %v2129_v29 = vadd.f32 %v1754_v21, %v457_v17  ;;  %v2131_v30 = vadd.f32 %v2036_v22, %v459_v18  ;;  %v1756_v31 = vpop.f32.mrb[29].mxu0  ;;  %v2038_v32 = vpop.f32.mrb[29].mxu1  ;;  %v478_v17 = vld [vmem:[#allocation2 + $0x268] sm:$0xff]  ;;  %v480_v18 = vld [vmem:[#allocation2 + $0x278] sm:$0xff] }
 0x205   : > { %v2130_v35 = vadd.f32 %v1756_v31, %v458_v19  ;;  %v2132_v36 = vadd.f32 %v2038_v32, %v460_v20  ;;  %v1758_v37 = vpop.f32.mrb[30].mxu0  ;;  %v2040_v38 = vpop.f32.mrb[30].mxu1 }
 0x206   : > { %2214 = vst [vmem:[#allocation2 + $0x1c0] sm:$0xff] %v2129_v29  ;;  %2216 = vst [vmem:[#allocation2 + $0x1d0] sm:$0xff] %v2131_v30  ;;  %v2133_v39 = vadd.f32 %v1758_v37, %v461_v23  ;;  %v2135_v40 = vadd.f32 %v2040_v38, %v463_v24  ;;  %v1760_v41 = vpop.f32.mrb[31].mxu0  ;;  %v2042_v42 = vpop.f32.mrb[31].mxu1 }
 0x207   : > { %2215 = vst [vmem:[#allocation2 + $0x1c8] sm:$0xff] %v2130_v35  ;;  %2217 = vst.msk [vmem:[#allocation2 + $0x1d8] sm:$0xff] %vm2160_vm2, %v2132_v36  ;;  %v2134_v43 = vadd.f32 %v1760_v41, %v462_v33  ;;  %v2136_v44 = vadd.f32 %v2042_v42, %v464_v34  ;;  %v481_v33 = vld [vmem:[#allocation2 + $0x280] sm:$0x3]  ;;  %v483_v35 = vld [vmem:[#allocation2 + $0x290] sm:$0x3] }
 0x208   : > { %2218 = vst [vmem:[#allocation2 + $0x1e0] sm:$0xff] %v2133_v39  ;;  %2220 = vst [vmem:[#allocation2 + $0x1f0] sm:$0xff] %v2135_v40  ;;  %v482_v39 = vld [vmem:[#allocation2 + $0x288] sm:$0x3]  ;;  %v484_v41 = vld [vmem:[#allocation2 + $0x298] sm:$0x3] }
 0x209   : > { %2219 = vst [vmem:[#allocation2 + $0x1e8] sm:$0xff] %v2134_v43  ;;  %2221 = vst.msk [vmem:[#allocation2 + $0x1f8] sm:$0xff] %vm2160_vm2, %v2136_v44 }
 0x20b   : > { %v1764_v49 = vpop.f32.mrb[32].mxu0  ;;  %v2046_v50 = vpop.f32.mrb[32].mxu1 }
 0x20c   : > { %v2137_v53 = vadd.f32 %v1764_v49, %v465_v45  ;;  %v2139_v54 = vadd.f32 %v2046_v50, %v467_v46  ;;  %v1766_v55 = vpop.f32.mrb[33].mxu0  ;;  %v2048_v56 = vpop.f32.mrb[33].mxu1 }
 0x20d   : > { %v2138_v59 = vadd.f32 %v1766_v55, %v466_v47  ;;  %v2140_v60 = vadd.f32 %v2048_v56, %v468_v48  ;;  %v1768_v61 = vpop.f32.mrb[34].mxu0  ;;  %v2050_v62 = vpop.f32.mrb[34].mxu1 }
 0x20e   : > { %2222 = vst [vmem:[#allocation2 + $0x200] sm:$0xff] %v2137_v53  ;;  %2224 = vst [vmem:[#allocation2 + $0x210] sm:$0xff] %v2139_v54  ;;  %v2141_v63 = vadd.f32 %v1768_v61, %v469_v51  ;;  %v2143_v0 = vadd.f32 %v2050_v62, %v471_v52  ;;  %v1770_v1 = vpop.f32.mrb[35].mxu0  ;;  %v2052_v2 = vpop.f32.mrb[35].mxu1 }
 0x20f   : > { %2223 = vst [vmem:[#allocation2 + $0x208] sm:$0xff] %v2138_v59  ;;  %2225 = vst.msk [vmem:[#allocation2 + $0x218] sm:$0xff] %vm2160_vm2, %v2140_v60  ;;  %v2142_v3 = vadd.f32 %v1770_v1, %v470_v57  ;;  %v2144_v4 = vadd.f32 %v2052_v2, %v472_v58 }
 0x210   : > { %2226 = vst [vmem:[#allocation2 + $0x220] sm:$0xff] %v2141_v63  ;;  %2228 = vst [vmem:[#allocation2 + $0x230] sm:$0xff] %v2143_v0 }
 0x211   : > { %2227 = vst [vmem:[#allocation2 + $0x228] sm:$0xff] %v2142_v3  ;;  %2229 = vst.msk [vmem:[#allocation2 + $0x238] sm:$0xff] %vm2160_vm2, %v2144_v4 }
 0x213   : > { %v1774_v9 = vpop.f32.mrb[36].mxu0  ;;  %v2056_v10 = vpop.f32.mrb[36].mxu1 }
 0x214   : > { %v2145_v13 = vadd.f32 %v1774_v9, %v473_v5  ;;  %v2147_v14 = vadd.f32 %v2056_v10, %v475_v6  ;;  %v1776_v15 = vpop.f32.mrb[37].mxu0  ;;  %v2058_v16 = vpop.f32.mrb[37].mxu1 }
 0x215   : > { %v2146_v19 = vadd.f32 %v1776_v15, %v474_v7  ;;  %v2148_v20 = vadd.f32 %v2058_v16, %v476_v8  ;;  %v1778_v21 = vpop.f32.mrb[38].mxu0  ;;  %v2060_v22 = vpop.f32.mrb[38].mxu1 }
 0x216   : > { %2230 = vst [vmem:[#allocation2 + $0x240] sm:$0xff] %v2145_v13  ;;  %2232 = vst [vmem:[#allocation2 + $0x250] sm:$0xff] %v2147_v14  ;;  %v2149_v23 = vadd.f32 %v1778_v21, %v477_v11  ;;  %v2151_v24 = vadd.f32 %v2060_v22, %v479_v12  ;;  %v1780_v29 = vpop.f32.mrb[39].mxu0  ;;  %v2062_v30 = vpop.f32.mrb[39].mxu1 }
 0x217   : > { %2231 = vst [vmem:[#allocation2 + $0x248] sm:$0xff] %v2146_v19  ;;  %2233 = vst.msk [vmem:[#allocation2 + $0x258] sm:$0xff] %vm2160_vm2, %v2148_v20  ;;  %v2150_v31 = vadd.f32 %v1780_v29, %v478_v17  ;;  %v2152_v32 = vadd.f32 %v2062_v30, %v480_v18 }
 0x218   : > { %2234 = vst [vmem:[#allocation2 + $0x260] sm:$0xff] %v2149_v23  ;;  %2236 = vst [vmem:[#allocation2 + $0x270] sm:$0xff] %v2151_v24 }
 0x219   : > { %2235 = vst [vmem:[#allocation2 + $0x268] sm:$0xff] %v2150_v31  ;;  %2237 = vst.msk [vmem:[#allocation2 + $0x278] sm:$0xff] %vm2160_vm2, %v2152_v32 }
 0x21b   : > { %v1784_v34 = vpop.f32.mrb[44].mxu0  ;;  %v2066_v36 = vpop.f32.mrb[44].mxu1  ;;  %2246 = sbr.rel (%p3372_p10) target bundleno = 758 (0x2f6), region = 67 }
 0x21c   : > { %v1785_v37 = vadd.f32 %v1784_v34, %v4254_v25  ;;  %v2067_v38 = vadd.f32 %v2066_v36, %v4256_v26  ;;  %v1786_v40 = vpop.f32.mrb[45].mxu0  ;;  %v2068_v42 = vpop.f32.mrb[45].mxu1 }
 0x21d   : > { %v1787_v43 = vadd.f32 %v1786_v40, %v4258_v27  ;;  %v2069_v44 = vadd.f32 %v2068_v42, %v4260_v28  ;;  %v1788_v45 = vpop.f32.mrb[46].mxu0  ;;  %v2070_v46 = vpop.f32.mrb[46].mxu1 }
 0x21e   : > { %v2153_v47 = vadd.f32 %v1785_v37, %v481_v33  ;;  %v2155_v48 = vadd.f32 %v2067_v38, %v483_v35  ;;  %v1789_v49 = vpop.f32.mrb[47].mxu0  ;;  %v2071_v50 = vpop.f32.mrb[47].mxu1 }
 0x21f   : > { %v2154_v51 = vadd.f32 %v1787_v43, %v482_v39  ;;  %v2156_v52 = vadd.f32 %v2069_v44, %v484_v41 }
 0x220   : > { %2238 = vst [vmem:[#allocation2 + $0x280] sm:$0x3] %v2153_v47  ;;  %2240 = vst [vmem:[#allocation2 + $0x290] sm:$0x3] %v2155_v48 }
 0x221   : > { %2239 = vst [vmem:[#allocation2 + $0x288] sm:$0x3] %v2154_v51  ;;  %2242 = vst.msk [vmem:[#allocation2 + $0x298] sm:$0x3] %vm2241_vm3, %v2156_v52 }
 0x222   : > { %v4288_v25 = vld [vmem:[#allocation2] sm:$0xff]  ;;  %v4290_v26 = vld [vmem:[#allocation2 + $0x8] sm:$0xff]  ;;  %v4292_v27 = vld [vmem:[#allocation2 + $0x10] sm:$0xff]  ;;  %vm2350_vm4 = vcmask 1041408  }
 0x223   : > { %5671 = vst [vmem:[#allocation4_spill] sm:$0xff] %v4288_v25  ;;  %5672 = vst [vmem:[#allocation5_spill] sm:$0xff] %v4290_v26  ;;  %v4294_v28 = vld [vmem:[#allocation2 + $0x18] sm:$0xff]  ;;  %v4296_v53 = vld [vmem:[#allocation2 + $0x20] sm:$0xff] }
 0x224   : > { %5673 = vst [vmem:[#allocation6_spill] sm:$0xff] %v4292_v27  ;;  %5674 = vst [vmem:[#allocation7_spill] sm:$0xff] %v4294_v28  ;;  %v4298_v54 = vld [vmem:[#allocation2 + $0x28] sm:$0xff]  ;;  %v4300_v55 = vld [vmem:[#allocation2 + $0x30] sm:$0xff]  ;;  %v2331_v58 = vadd.f32 %v4296_v53, %v4288_v25  ;;  %v2413_v60 = vsel %vm2160_vm2, %v4294_v28, 0.0 }
 0x225   : > { %5675 = vst [vmem:[#allocation8_spill] sm:$0xff] %v4296_v53  ;;  %5676 = vst [vmem:[#allocation9_spill] sm:$0xff] %v4298_v54  ;;  %v4302_v56 = vld [vmem:[#allocation2 + $0x38] sm:$0xff]  ;;  %v4304_v57 = vld [vmem:[#allocation2 + $0x40] sm:$0xff]  ;;  %v2359_v59 = vadd.f32 %v4298_v54, %v4290_v26  ;;  %v2386_v0 = vadd.f32 %v4300_v55, %v4292_v27 }
 0x226   : > { %5677 = vst [vmem:[#allocation10_spill] sm:$0xff] %v4300_v55  ;;  %5678 = vst [vmem:[#allocation11_spill] sm:$0xff] %v4302_v56  ;;  %v4312_v61 = vld [vmem:[#allocation2 + $0x48] sm:$0xff]  ;;  %v4314_v62 = vld [vmem:[#allocation2 + $0x50] sm:$0xff]  ;;  %v2414_v1 = vsel %vm2160_vm2, %v4302_v56, 0.0  ;;  %v2332_v5 = vadd.f32 %v2331_v58, %v4304_v57 }
 0x227   : > { %5679 = vst [vmem:[#allocation12_spill] sm:$0xff] %v4304_v57  ;;  %5680 = vst [vmem:[#allocation13_spill] sm:$0xff] %v4312_v61  ;;  %v4316_v63 = vld [vmem:[#allocation2 + $0x58] sm:$0xff]  ;;  %v4322_v2 = vld [vmem:[#allocation2 + $0x60] sm:$0xff]  ;;  %v2360_v6 = vadd.f32 %v2359_v59, %v4312_v61  ;;  %v2415_v7 = vadd.f32 %v2414_v1, %v2413_v60  ;;  %v2387_v12 = vadd.f32 %v2386_v0, %v4314_v62 }
 0x228   : > { %5681 = vst [vmem:[#allocation14_spill] sm:$0xff] %v4314_v62  ;;  %5682 = vst [vmem:[#allocation15_spill] sm:$0xff] %v4316_v63  ;;  %v4324_v3 = vld [vmem:[#allocation2 + $0x68] sm:$0xff]  ;;  %v4326_v4 = vld [vmem:[#allocation2 + $0x70] sm:$0xff]  ;;  %v2416_v8 = vsel %vm2160_vm2, %v4316_v63, 0.0  ;;  %v2333_v15 = vadd.f32 %v2332_v5, %v4322_v2 }
 0x229   : > { %5683 = vst [vmem:[#allocation16_spill] sm:$0xff] %v4322_v2  ;;  %5684 = vst [vmem:[#allocation17_spill] sm:$0xff] %v4324_v3  ;;  %v4332_v9 = vld [vmem:[#allocation2 + $0x78] sm:$0xff]  ;;  %v4334_v10 = vld [vmem:[#allocation2 + $0x80] sm:$0xff]  ;;  %v2361_v16 = vadd.f32 %v2360_v6, %v4324_v3  ;;  %v2417_v17 = vadd.f32 %v2416_v8, %v2415_v7  ;;  %v2388_v22 = vadd.f32 %v2387_v12, %v4326_v4 }
 0x22a   : > { %5685 = vst [vmem:[#allocation18_spill] sm:$0xff] %v4326_v4  ;;  %5686 = vst [vmem:[#allocation19_spill] sm:$0xff] %v4332_v9  ;;  %v4336_v11 = vld [vmem:[#allocation2 + $0x88] sm:$0xff]  ;;  %v4339_v13 = vld [vmem:[#allocation2 + $0x90] sm:$0xff]  ;;  %v2418_v18 = vsel %vm2160_vm2, %v4332_v9, 0.0  ;;  %v2334_v29 = vadd.f32 %v2333_v15, %v4334_v10 }
 0x22b   : > { %5687 = vst [vmem:[#allocation20_spill] sm:$0xff] %v4334_v10  ;;  %5688 = vst [vmem:[#allocation21_spill] sm:$0xff] %v4336_v11  ;;  %v4341_v14 = vld [vmem:[#allocation2 + $0x98] sm:$0xff]  ;;  %v4347_v19 = vld [vmem:[#allocation2 + $0xa0] sm:$0xff]  ;;  %v2362_v30 = vadd.f32 %v2361_v16, %v4336_v11  ;;  %v2419_v31 = vadd.f32 %v2418_v18, %v2417_v17  ;;  %v2389_v35 = vadd.f32 %v2388_v22, %v4339_v13 }
 0x22c   : > { %5689 = vst [vmem:[#allocation22_spill] sm:$0xff] %v4339_v13  ;;  %5690 = vst [vmem:[#allocation23_spill] sm:$0xff] %v4341_v14  ;;  %v4349_v20 = vld [vmem:[#allocation2 + $0xa8] sm:$0xff]  ;;  %v4351_v21 = vld [vmem:[#allocation2 + $0xb8] sm:$0xff]  ;;  %v2420_v23 = vsel %vm2160_vm2, %v4341_v14, 0.0  ;;  %v2335_v39 = vadd.f32 %v2334_v29, %v4347_v19 }
 0x22d   : > { %5691 = vst [vmem:[#allocation24_spill] sm:$0xff] %v4347_v19  ;;  %5692 = vst [vmem:[#allocation25_spill] sm:$0xff] %v4349_v20  ;;  %v4356_v24 = vld [vmem:[#allocation2 + $0xb0] sm:$0xff]  ;;  %v4360_v32 = vld [vmem:[#allocation2 + $0xc0] sm:$0xff]  ;;  %v2422_v36 = vsel %vm2160_vm2, %v4351_v21, 0.0  ;;  %v2363_v40 = vadd.f32 %v2362_v30, %v4349_v20  ;;  %v2421_v41 = vadd.f32 %v2420_v23, %v2419_v31 }
 0x22e   : > { %5693 = vst [vmem:[#allocation26_spill] sm:$0xff] %v4351_v21  ;;  %5694 = vst [vmem:[#allocation27_spill] sm:$0xff] %v4356_v24  ;;  %v4362_v33 = vld [vmem:[#allocation2 + $0xc8] sm:$0xff]  ;;  %v4364_v34 = vld [vmem:[#allocation2 + $0xd8] sm:$0xff]  ;;  %v2390_v44 = vadd.f32 %v2389_v35, %v4356_v24  ;;  %v2336_v48 = vadd.f32 %v2335_v39, %v4360_v32 }
 0x22f   : > { %5695 = vst [vmem:[#allocation28_spill] sm:$0xff] %v4360_v32  ;;  %5696 = vst [vmem:[#allocation29_spill] sm:$0xff] %v4362_v33  ;;  %v4369_v37 = vld [vmem:[#allocation2 + $0xd0] sm:$0xff]  ;;  %v4371_v38 = vld [vmem:[#allocation2 + $0xf8] sm:$0xff]  ;;  %v2424_v45 = vsel %vm2160_vm2, %v4364_v34, 0.0  ;;  %v2364_v49 = vadd.f32 %v2363_v40, %v4362_v33  ;;  %v2423_v50 = vadd.f32 %v2422_v36, %v2421_v41 }
 0x230   : > { %5697 = vst [vmem:[#allocation30_spill] sm:$0xff] %v4364_v34  ;;  %5698 = vst [vmem:[#allocation31_spill] sm:$0xff] %v4369_v37  ;;  %v4375_v42 = vld [vmem:[#allocation2 + $0xe0] sm:$0xff]  ;;  %v4377_v43 = vld [vmem:[#allocation2 + $0xe8] sm:$0xff]  ;;  %v2391_v58 = vadd.f32 %v2390_v44, %v4369_v37  ;;  %v2426_v59 = vsel %vm2160_vm2, %v4371_v38, 0.0 }
 0x231   : > { %5699 = vst [vmem:[#allocation32_spill] sm:$0xff] %v4371_v38  ;;  %5700 = vst [vmem:[#allocation33_spill] sm:$0xff] %v4375_v42  ;;  %v4382_v46 = vld [vmem:[#allocation2 + $0xf0] sm:$0xff]  ;;  %v4384_v47 = vld [vmem:[#allocation2 + $0x118] sm:$0xff]  ;;  %v2337_v1 = vadd.f32 %v2336_v48, %v4375_v42  ;;  %v2365_v5 = vadd.f32 %v2364_v49, %v4377_v43  ;;  %v2425_v6 = vadd.f32 %v2424_v45, %v2423_v50 }
 0x232   : > { %5701 = vst [vmem:[#allocation34_spill] sm:$0xff] %v4377_v43  ;;  %5702 = vst [vmem:[#allocation35_spill] sm:$0xff] %v4382_v46  ;;  %v4388_v51 = vld [vmem:[#allocation2 + $0x100] sm:$0xff]  ;;  %v4390_v52 = vld [vmem:[#allocation2 + $0x108] sm:$0xff]  ;;  %v2392_v12 = vadd.f32 %v2391_v58, %v4382_v46  ;;  %v2428_v15 = vsel %vm2160_vm2, %v4384_v47, 0.0 }
 0x233   : > { %5703 = vst [vmem:[#allocation36_spill] sm:$0xff] %v4384_v47  ;;  %5704 = vst [vmem:[#allocation37_spill] sm:$0xff] %v4388_v51  ;;  %v4395_v60 = vld [vmem:[#allocation2 + $0x110] sm:$0xff]  ;;  %v4397_v0 = vld [vmem:[#allocation2 + $0x138] sm:$0xff]  ;;  %v2338_v18 = vadd.f32 %v2337_v1, %v4388_v51  ;;  %v2366_v22 = vadd.f32 %v2365_v5, %v4390_v52  ;;  %v2427_v23 = vadd.f32 %v2426_v59, %v2425_v6 }
 0x234   : > { %5705 = vst [vmem:[#allocation38_spill] sm:$0xff] %v4390_v52  ;;  %5706 = vst [vmem:[#allocation39_spill] sm:$0xff] %v4395_v60  ;;  %v4401_v7 = vld [vmem:[#allocation2 + $0x120] sm:$0xff]  ;;  %v4403_v8 = vld [vmem:[#allocation2 + $0x128] sm:$0xff]  ;;  %v2393_v31 = vadd.f32 %v2392_v12, %v4395_v60  ;;  %v2430_v35 = vsel %vm2160_vm2, %v4397_v0, 0.0 }
 0x235   : > { %5707 = vst [vmem:[#allocation40_spill] sm:$0xff] %v4397_v0  ;;  %5708 = vst [vmem:[#allocation41_spill] sm:$0xff] %v4401_v7  ;;  %v4408_v16 = vld [vmem:[#allocation2 + $0x130] sm:$0xff]  ;;  %v4410_v17 = vld [vmem:[#allocation2 + $0x158] sm:$0xff]  ;;  %v2339_v39 = vadd.f32 %v2338_v18, %v4401_v7  ;;  %v2367_v40 = vadd.f32 %v2366_v22, %v4403_v8  ;;  %v2429_v41 = vadd.f32 %v2428_v15, %v2427_v23 }
 0x236   : > { %5709 = vst [vmem:[#allocation42_spill] sm:$0xff] %v4403_v8  ;;  %5710 = vst [vmem:[#allocation43_spill] sm:$0xff] %v4408_v16  ;;  %v4414_v29 = vld [vmem:[#allocation2 + $0x140] sm:$0xff]  ;;  %v4416_v30 = vld [vmem:[#allocation2 + $0x148] sm:$0xff]  ;;  %v2394_v48 = vadd.f32 %v2393_v31, %v4408_v16  ;;  %v2432_v49 = vsel %vm2160_vm2, %v4410_v17, 0.0 }
 0x237   : > { %5711 = vst [vmem:[#allocation44_spill] sm:$0xff] %v4410_v17  ;;  %5712 = vst [vmem:[#allocation45_spill] sm:$0xff] %v4414_v29  ;;  %v4421_v36 = vld [vmem:[#allocation2 + $0x150] sm:$0xff]  ;;  %v4425_v44 = vld [vmem:[#allocation2 + $0x160] sm:$0xff]  ;;  %v2340_v59 = vadd.f32 %v2339_v39, %v4414_v29  ;;  %v2368_v1 = vadd.f32 %v2367_v40, %v4416_v30  ;;  %v2431_v5 = vadd.f32 %v2430_v35, %v2429_v41 }
 0x238   : > { %5713 = vst [vmem:[#allocation46_spill] sm:$0xff] %v4421_v36  ;;  %v4427_v45 = vld [vmem:[#allocation2 + $0x168] sm:$0xff]  ;;  %v4432_v50 = vld [vmem:[#allocation2 + $0x170] sm:$0xff]  ;;  %v4434_v58 = vld [vmem:[#allocation2 + $0x178] sm:$0xff]  ;;  %v2395_v6 = vadd.f32 %v2394_v48, %v4421_v36 }
 0x239   : > { %5714 = vst [vmem:[#allocation47_spill] sm:$0xff] %v4432_v50  ;;  %5715 = vst [vmem:[#allocation48_spill] sm:$0xff] %v4434_v58  ;;  %v4439_v12 = vld [vmem:[#allocation2 + $0x180] sm:$0xff]  ;;  %v4441_v15 = vld [vmem:[#allocation2 + $0x188] sm:$0xff]  ;;  %v2341_v18 = vadd.f32 %v2340_v59, %v4425_v44  ;;  %v2369_v22 = vadd.f32 %v2368_v1, %v4427_v45  ;;  %v2433_v23 = vadd.f32 %v2432_v49, %v2431_v5  ;;  %v2434_v39 = vsel %vm2160_vm2, %v4434_v58, 0.0 }
 0x23a   : > { %5716 = vst [vmem:[#allocation49_spill] sm:$0xff] %v4439_v12  ;;  %5717 = vst [vmem:[#allocation50_spill] sm:$0xff] %v4441_v15  ;;  %v4445_v31 = vld [vmem:[#allocation2 + $0x190] sm:$0xff]  ;;  %v2396_v17 = vadd.f32 %v2395_v6, %v4432_v50  ;;  %v4450_v40 = vld [vmem:[#allocation2 + $0x198] sm:$0xff] }
 0x23b   : > { %5718 = vst [vmem:[#allocation51_spill] sm:$0xff] %v4450_v40  ;;  %v2342_v35 = vadd.f32 %v2341_v18, %v4439_v12  ;;  %v2370_v41 = vadd.f32 %v2369_v22, %v4441_v15  ;;  %v4454_v48 = vld [vmem:[#allocation2 + $0x1a0] sm:$0xff]  ;;  %v4456_v36 = vld [vmem:[#allocation2 + $0x1a8] sm:$0xff]  ;;  %v2435_v49 = vadd.f32 %v2434_v39, %v2433_v23  ;;  %v4459_v1 = vld [vmem:[#allocation2 + $0x1b0] sm:$0xff]  ;;  %v2436_v5 = vsel %vm2160_vm2, %v4450_v40, 0.0 }
 0x23c   : > { %v2397_v59 = vadd.f32 %v2396_v17, %v4445_v31  ;;  %5719 = vst [vmem:[#allocation52_spill] sm:$0xff] %v4459_v1  ;;  %v4463_v6 = vld [vmem:[#allocation2 + $0x1b8] sm:$0xff]  ;;  %v4467_v12 = vld [vmem:[#allocation2 + $0x1c0] sm:$0xff]  ;;  %v4469_v22 = vld [vmem:[#allocation2 + $0x1c8] sm:$0xff]  ;;  %v4480_v40 = vmul.f32 %v4288_v25, %v4288_v25 }
 0x23d   : > { %5720 = vst [vmem:[#allocation53_spill] sm:$0xff] %v4463_v6  ;;  %v2343_v58 = vadd.f32 %v2342_v35, %v4454_v48  ;;  %v2371_v18 = vadd.f32 %v2370_v41, %v4456_v36  ;;  %5721 = vst [vmem:[#allocation54_spill] sm:$0xff] %v4467_v12  ;;  %v2437_v50 = vadd.f32 %v2436_v5, %v2435_v49  ;;  %v4472_v17 = vld [vmem:[#allocation2 + $0x1d0] sm:$0xff]  ;;  %v2438_v23 = vsel %vm2160_vm2, %v4463_v6, 0.0  ;;  %v4476_v39 = vld [vmem:[#allocation2 + $0x1d8] sm:$0xff] }
 0x23e   : > { %5722 = vst [vmem:[#allocation55_spill] sm:$0xff] %v4469_v22  ;;  %v2398_v15 = vadd.f32 %v2397_v59, %v4459_v1  ;;  %5723 = vst [vmem:[#allocation56_spill] sm:$0xff] %v4472_v17  ;;  %v4484_v35 = vmul.f32 %v4290_v26, %v4290_v26  ;;  %v4490_v49 = vmul.f32 %v4292_v27, %v4292_v27  ;;  %v4496_v6 = vld [vmem:[#allocation2 + $0x1e0] sm:$0xff]  ;;  %v4498_v25 = vld [vmem:[#allocation2 + $0x1e8] sm:$0xff] }
 0x23f   : > { %5724 = vst [vmem:[#allocation57_spill] sm:$0xff] %v4476_v39  ;;  %v2344_v41 = vadd.f32 %v2343_v58, %v4467_v12  ;;  %v2372_v59 = vadd.f32 %v2371_v18, %v4469_v22  ;;  %v4494_v5 = vmul.f32 %v4294_v28, %v4294_v28  ;;  %5725 = vst [vmem:[#allocation58_spill] sm:$0xff] %v4496_v6  ;;  %v4509_v27 = vld [vmem:[#allocation2 + $0x1f0] sm:$0xff]  ;;  %v2440_v28 = vsel %vm2160_vm2, %v4476_v39, 0.0 }
 0x240   : > { %5726 = vst [vmem:[#allocation59_spill] sm:$0xff] %v4498_v25  ;;  %v2399_v1 = vadd.f32 %v2398_v15, %v4472_v17  ;;  %v2439_v26 = vadd.f32 %v2438_v23, %v2437_v50  ;;  %v4503_v58 = vmul.f32 %v4296_v53, %v4296_v53  ;;  %v4507_v18 = vmul.f32 %v4298_v54, %v4298_v54  ;;  %v4525_v23 = vld [vmem:[#allocation2 + $0x1f8] sm:$0xff]  ;;  %v4553_v17 = vld [vmem:[#allocation2 + $0x200] sm:$0xff] }
 0x241   : > { %5727 = vst [vmem:[#allocation60_spill] sm:$0xff] %v4509_v27  ;;  %v4515_v22 = vmul.f32 %v4300_v55, %v4300_v55  ;;  %v4519_v50 = vmul.f32 %v4302_v56, %v4302_v56  ;;  %v4523_v15 = vmul.f32 %v4304_v57, %v4304_v57  ;;  %5728 = vst [vmem:[#allocation61_spill] sm:$0xff] %v4525_v23 }
 0x242   : > { %v4529_v54 = vmul.f32 %v4312_v61, %v4312_v61  ;;  %v4533_v53 = vmul.f32 %v4314_v62, %v4314_v62  ;;  %v4537_v55 = vmul.f32 %v4316_v63, %v4316_v63  ;;  %v4541_v56 = vmul.f32 %v4322_v2, %v4322_v2  ;;  %5729 = vst [vmem:[#allocation62_spill] sm:$0xff] %v4553_v17  ;;  %v4555_v63 = vld [vmem:[#allocation2 + $0x208] sm:$0xff] }
 0x243   : > { %v2345_v57 = vadd.f32 %v2344_v41, %v4496_v6  ;;  %v2373_v39 = vadd.f32 %v2372_v59, %v4498_v25  ;;  %v4547_v61 = vmul.f32 %v4324_v3, %v4324_v3  ;;  %v4551_v62 = vmul.f32 %v4326_v4, %v4326_v4  ;;  %5730 = vst [vmem:[#allocation63_spill] sm:$0xff] %v4555_v63  ;;  %v4566_v3 = vld [vmem:[#allocation2 + $0x210] sm:$0xff]  ;;  %v4612_v6 = vld [vmem:[#allocation2 + $0x220] sm:$0xff] }
 0x244   : > { %v2400_v12 = vadd.f32 %v2399_v1, %v4509_v27  ;;  %v2441_v2 = vadd.f32 %v2440_v28, %v2439_v26  ;;  %v4560_v41 = vmul.f32 %v4332_v9, %v4332_v9  ;;  %v4564_v59 = vmul.f32 %v4334_v10, %v4334_v10  ;;  %5731 = vst [vmem:[#allocation64_spill] sm:$0xff] %v4566_v3  ;;  %v4582_v1 = vld [vmem:[#allocation2 + $0x218] sm:$0xff] }
 0x245   : > { %v2442_v4 = vsel %vm2160_vm2, %v4525_v23, 0.0  ;;  %v4572_v25 = vmul.f32 %v4336_v11, %v4336_v11  ;;  %v4576_v26 = vmul.f32 %v4339_v13, %v4339_v13  ;;  %v4580_v28 = vmul.f32 %v4341_v14, %v4341_v14  ;;  %5732 = vst [vmem:[#allocation65_spill] sm:$0xff] %v4582_v1  ;;  %v4584_v10 = vld [vmem:[#allocation2 + $0x238] sm:$0xff]  ;;  %5736 = vst [vmem:[#allocation69_spill] sm:$0xff] %v4612_v6 }
 0x246   : > { %5733 = vst [vmem:[#allocation66_spill] sm:$0xff] %v4584_v10  ;;  %v4588_v9 = vmul.f32 %v4347_v19, %v4347_v19  ;;  %v4592_v11 = vmul.f32 %v4349_v20, %v4349_v20  ;;  %v4596_v13 = vmul.f32 %v4356_v24, %v4356_v24  ;;  %v4600_v14 = vmul.f32 %v4351_v21, %v4351_v21  ;;  %v4614_v24 = vld [vmem:[#allocation2 + $0x228] sm:$0xff] }
 0x247   : > { %v2346_v23 = vadd.f32 %v2345_v57, %v4553_v17  ;;  %v2374_v27 = vadd.f32 %v2373_v39, %v4555_v63  ;;  %v4606_v19 = vmul.f32 %v4360_v32, %v4360_v32  ;;  %v4610_v20 = vmul.f32 %v4362_v33, %v4362_v33  ;;  %5737 = vst [vmem:[#allocation70_spill] sm:$0xff] %v4614_v24  ;;  %v4627_v32 = vld [vmem:[#allocation2 + $0x230] sm:$0xff]  ;;  %v4629_v33 = vld [vmem:[#allocation2 + $0x278] sm:$0xff] }
 0x248   : > { %5734 = vst [vmem:[#allocation67_spill] sm:$0xff] %v4596_v13  ;;  %5735 = vst [vmem:[#allocation68_spill] sm:$0xff] %v4600_v14  ;;  %v4616_v13 = vld [vmem:[#allocation2 + $0x258] sm:$0xff]  ;;  %v2401_v21 = vadd.f32 %v2400_v12, %v4566_v3  ;;  %v2443_v14 = vadd.f32 %v2442_v4, %v2441_v2  ;;  %v4621_v57 = vmul.f32 %v4369_v37, %v4369_v37  ;;  %v2444_v63 = vsel %vm2160_vm2, %v4582_v1, 0.0  ;;  %v4643_v12 = vld [vmem:[#allocation2 + $0x280] sm:$0x3] }
 0x249   : > { %5738 = vst [vmem:[#allocation71_spill] sm:$0xff] %v4616_v13  ;;  %v4625_v39 = vmul.f32 %v4364_v34, %v4364_v34  ;;  %5739 = vst [vmem:[#allocation72_spill] sm:$0xff] %v4627_v32  ;;  %v2446_v17 = vsel %vm2160_vm2, %v4584_v10, 0.0  ;;  %v4637_v2 = vmul.f32 %v4375_v42, %v4375_v42  ;;  %v4641_v4 = vmul.f32 %v4377_v43, %v4377_v43  ;;  %v4645_v34 = vld [vmem:[#allocation2 + $0x288] sm:$0x3] }
 0x24a   : > { %5740 = vst [vmem:[#allocation73_spill] sm:$0xff] %v4629_v33  ;;  %5743 = vst [vmem:[#allocation76_spill] sm:$0xff] %v4643_v12  ;;  %v4647_v37 = vld [vmem:[#allocation2 + $0x290] sm:$0x3]  ;;  %v4651_v1 = vmul.f32 %v4382_v46, %v4382_v46  ;;  %v4655_v10 = vmul.f32 %v4371_v38, %v4371_v38  ;;  %v4659_v42 = vmul.f32 %v4388_v51, %v4388_v51  ;;  %v4665_v3 = vld [vmem:[#allocation2 + $0x298] sm:$0x3] }
 0x24b   : > { %5741 = vst [vmem:[#allocation74_spill] sm:$0xff] %v4637_v2  ;;  %5742 = vst [vmem:[#allocation75_spill] sm:$0xff] %v4641_v4  ;;  %v4663_v43 = vmul.f32 %v4390_v52, %v4390_v52  ;;  %v2347_v4 = vadd.f32 %v2346_v23, %v4612_v6  ;;  %v2375_v2 = vadd.f32 %v2374_v27, %v4614_v24  ;;  %v2448_v46 = vsel %vm2160_vm2, %v4616_v13, 0.0  ;;  %v4677_v51 = vld [vmem:[#allocation2 + $0x248] sm:$0xff]  ;;  %v4688_v23 = vld [vmem:[#allocation2 + $0x250] sm:$0xff] }
 0x24c   : > { %5744 = vst [vmem:[#allocation77_spill] sm:$0xff] %v4645_v34  ;;  %5745 = vst [vmem:[#allocation78_spill] sm:$0xff] %v4647_v37  ;;  %v4673_v38 = vmul.f32 %v4395_v60, %v4395_v60  ;;  %v2402_v52 = vadd.f32 %v2401_v21, %v4627_v32  ;;  %v4686_v27 = vmul.f32 %v4401_v7, %v4401_v7  ;;  %v2351_v60 = vsel %vm2350_vm4, %v4643_v12, 0.0  ;;  %v5754_v24 = vld [vmem:[#allocation46_spill] sm:$0xff] }
 0x24d   : > { %5746 = vst [vmem:[#allocation79_spill] sm:$0xff] %v4651_v1  ;;  %5747 = vst [vmem:[#allocation80_spill] sm:$0xff] %v4659_v42  ;;  %v4675_v1 = vld [vmem:[#allocation2 + $0x240] sm:$0xff]  ;;  %v4682_v42 = vmul.f32 %v4384_v47, %v4384_v47  ;;  %v2378_v13 = vsel %vm2350_vm4, %v4645_v34, 0.0  ;;  %v2405_v21 = vsel %vm2350_vm4, %v4647_v37, 0.0  ;;  %v4704_v7 = vmul.f32 %v4403_v8, %v4403_v8  ;;  %v5762_v6 = vld [vmem:[#allocation50_spill] sm:$0xff] }
 0x24e   : > { %5748 = vst [vmem:[#allocation81_spill] sm:$0xff] %v4663_v43  ;;  %5749 = vst [vmem:[#allocation82_spill] sm:$0xff] %v4665_v3  ;;  %v2445_v43 = vadd.f32 %v2444_v63, %v2443_v14  ;;  %v2450_v63 = vsel %vm2160_vm2, %v4629_v33, 0.0  ;;  %v4700_v14 = vsel %vm2241_vm3, %v4665_v3, 0.0  ;;  %v4708_v47 = vmul.f32 %v4408_v16, %v4408_v16  ;;  %v4724_v33 = vld [vmem:[#allocation2 + $0x260] sm:$0xff]  ;;  %v4726_v16 = vld [vmem:[#allocation2 + $0x268] sm:$0xff] }
 0x24f   : > { %5750 = vst [vmem:[#allocation83_spill] sm:$0xff] %v4675_v1  ;;  %5751 = vst [vmem:[#allocation84_spill] sm:$0xff] %v4677_v51  ;;  %v4712_v34 = vmul.f32 %v4397_v0, %v4397_v0  ;;  %v2348_v37 = vadd.f32 %v2347_v4, %v4675_v1  ;;  %v2376_v12 = vadd.f32 %v2375_v2, %v4677_v51  ;;  %v5755_v2 = vld [vmem:[#allocation44_spill] sm:$0xff] }
 0x250   : > { %5752 = vst [vmem:[#allocation85_spill] sm:$0xff] %v4688_v23  ;;  %v4718_v3 = vmul.f32 %v4414_v29, %v4414_v29  ;;  %v4722_v8 = vmul.f32 %v4416_v30, %v4416_v30  ;;  %5753 = vst [vmem:[#allocation86_spill] sm:$0xff] %v4726_v16  ;;  %v2403_v32 = vadd.f32 %v2402_v52, %v4688_v23  ;;  %v4737_v29 = vld [vmem:[#allocation2 + $0x270] sm:$0xff]  ;;  %v5758_v52 = vld [vmem:[#allocation47_spill] sm:$0xff] }
 0x251   : > { %v2447_v0 = vadd.f32 %v2446_v17, %v2445_v43  ;;  %v4731_v4 = vmul.f32 %v5754_v24, %v5754_v24  ;;  %v4735_v51 = vmul.f32 %v5755_v2, %v5755_v2  ;;  %5756 = vst [vmem:[#allocation46_spill] sm:$0xff] %v4737_v29  ;;  %v4741_v30 = vmul.f32 %v4425_v44, %v4425_v44  ;;  %v5760_v24 = vld [vmem:[#allocation48_spill] sm:$0xff]  ;;  %v5761_v2 = vld [vmem:[#allocation49_spill] sm:$0xff] }
 0x252   : > { %v4745_v1 = vmul.f32 %v4427_v45, %v4427_v45  ;;  %v4749_v43 = vmul.f32 %v5758_v52, %v5758_v52  ;;  %v4753_v17 = vmul.f32 %v5760_v24, %v5760_v24  ;;  %v4757_v23 = vmul.f32 %v5761_v2, %v5761_v2 }
 0x253   : > { %v4761_v44 = vmul.f32 %v5762_v6, %v5762_v6  ;;  %v4765_v45 = vmul.f32 %v4445_v31, %v4445_v31  ;;  %v2377_v24 = vadd.f32 %v2376_v12, %v4726_v16  ;;  %v4775_v2 = vmul.f32 %v4454_v48, %v4454_v48  ;;  %v5767_v16 = vld [vmem:[#allocation53_spill] sm:$0xff] }
 0x254   : > { %5757 = vst [vmem:[#allocation44_spill] sm:$0xff] %v4745_v1  ;;  %5759 = vst [vmem:[#allocation47_spill] sm:$0xff] %v4749_v43  ;;  %v5765_v1 = vld [vmem:[#allocation51_spill] sm:$0xff]  ;;  %v2349_v43 = vadd.f32 %v2348_v37, %v4724_v33  ;;  %v4779_v6 = vmul.f32 %v4456_v36, %v4456_v36  ;;  %v2449_v31 = vadd.f32 %v2448_v46, %v2447_v0  ;;  %v5766_v37 = vld [vmem:[#allocation52_spill] sm:$0xff] }
 0x255   : > { %5763 = vst [vmem:[#allocation48_spill] sm:$0xff] %v4761_v44  ;;  %5764 = vst [vmem:[#allocation49_spill] sm:$0xff] %v4765_v45  ;;  %v4769_v52 = vmul.f32 %v5765_v1, %v5765_v1  ;;  %v2404_v44 = vadd.f32 %v2403_v32, %v4737_v29  ;;  %v2544_v45 = vadd.f32 %v4503_v58, %v4480_v40  ;;  %v2625_v32 = vsel %vm2160_vm2, %v4494_v5, 0.0  ;;  %v5768_v29 = vld [vmem:[#allocation54_spill] sm:$0xff] }
 0x256   : > { %v2571_v1 = vadd.f32 %v4507_v18, %v4484_v35  ;;  %v4788_v12 = vmul.f32 %v5766_v37, %v5766_v37  ;;  %v4792_v48 = vmul.f32 %v5767_v16, %v5767_v16  ;;  %v2598_v36 = vadd.f32 %v4515_v22, %v4490_v49 }
 0x257   : > { %v2545_v46 = vadd.f32 %v2544_v45, %v4523_v15  ;;  %v2626_v40 = vsel %vm2160_vm2, %v4519_v50, 0.0  ;;  %v2628_v35 = vsel %vm2160_vm2, %v4537_v55, 0.0  ;;  %v2352_v58 = vadd.f32 %v2351_v60, %v2349_v43  ;;  %v5769_v15 = vld [vmem:[#allocation55_spill] sm:$0xff] }
 0x258   : > { %v2572_v0 = vadd.f32 %v2571_v1, %v4529_v54  ;;  %v2379_v18 = vadd.f32 %v2378_v13, %v2377_v24  ;;  %v2599_v16 = vadd.f32 %v2598_v36, %v4533_v53  ;;  %v2627_v37 = vadd.f32 %v2626_v40, %v2625_v32  ;;  %v5773_v1 = vld [vmem:[#allocation58_spill] sm:$0xff]  ;;  %v5774_v32 = vld [vmem:[#allocation67_spill] sm:$0xff] }
 0x259   : > { %v4807_v22 = vmul.f32 %v5768_v29, %v5768_v29  ;;  %v2546_v49 = vadd.f32 %v2545_v46, %v4541_v56  ;;  %v2630_v54 = vsel %vm2160_vm2, %v4560_v41, 0.0  ;;  %v2406_v50 = vadd.f32 %v2405_v21, %v2404_v44  ;;  %v5771_v41 = vld [vmem:[#allocation57_spill] sm:$0xff]  ;;  %v5775_v40 = vld [vmem:[#allocation59_spill] sm:$0xff] }
 0x25a   : > { %v2573_v5 = vadd.f32 %v2572_v0, %v4547_v61  ;;  %v4815_v55 = vmul.f32 %v5769_v15, %v5769_v15  ;;  %v2600_v13 = vadd.f32 %v2599_v16, %v4551_v62  ;;  %v2629_v53 = vadd.f32 %v2628_v35, %v2627_v37  ;;  %v5770_v61 = vld [vmem:[#allocation56_spill] sm:$0xff] }
 0x25b   : > { %v2451_v60 = vadd.f32 %v2450_v63, %v2449_v31  ;;  %v2547_v43 = vadd.f32 %v2546_v49, %v4564_v59  ;;  %v2632_v56 = vsel %vm2160_vm2, %v4580_v28, 0.0  ;;  %v4824_v45 = vmul.f32 %v5770_v61, %v5770_v61  ;;  %v5780_v61 = vld [vmem:[#allocation79_spill] sm:$0xff] }
 0x25c   : > { %v2574_v29 = vadd.f32 %v2573_v5, %v4572_v25  ;;  %v4828_v21 = vmul.f32 %v5771_v41, %v5771_v41  ;;  %v2601_v44 = vadd.f32 %v2600_v13, %v4576_v26  ;;  %v2631_v62 = vadd.f32 %v2630_v54, %v2629_v53  ;;  %v5772_v25 = vld [vmem:[#allocation68_spill] sm:$0xff]  ;;  %v5777_v13 = vld [vmem:[#allocation74_spill] sm:$0xff] }
 0x25d   : > { %v2353_v24 = vrot.slane %v2352_v58, 4  ;;  %v2548_v63 = vadd.f32 %v2547_v43, %v4588_v9  ;;  %v2634_v31 = vsel %vm2160_vm2, %v5772_v25, 0.0  ;;  %v2380_v28 = vrot.slane %v2379_v18, 4  ;;  %v5776_v54 = vld [vmem:[#allocation60_spill] sm:$0xff]  ;;  %v5778_v43 = vld [vmem:[#allocation75_spill] sm:$0xff]  ;;  %v5783_v25 = vld [vmem:[#allocation62_spill] sm:$0xff] }
 0x25e   : > { %v2575_v59 = vadd.f32 %v2574_v29, %v4592_v11  ;;  %v4837_v36 = vmul.f32 %v5773_v1, %v5773_v1  ;;  %v2602_v46 = vadd.f32 %v2601_v44, %v5774_v32  ;;  %v2633_v0 = vadd.f32 %v2632_v56, %v2631_v62  ;;  %v5779_v56 = vld [vmem:[#allocation61_spill] sm:$0xff]  ;;  %v5781_v41 = vld [vmem:[#allocation80_spill] sm:$0xff]  ;;  %v5784_v1 = vld [vmem:[#allocation63_spill] sm:$0xff] }
 0x25f   : > { %v4842_v26 = vmul.f32 %v5775_v40, %v5775_v40  ;;  %v2549_v35 = vadd.f32 %v2548_v63, %v4606_v19  ;;  %v2636_v11 = vsel %vm2160_vm2, %v4625_v39, 0.0  ;;  %v2407_v16 = vrot.slane %v2406_v50, 4  ;;  %v5782_v62 = vld [vmem:[#allocation81_spill] sm:$0xff]  ;;  %v5785_v40 = vld [vmem:[#allocation64_spill] sm:$0xff] }
 0x260   : > { %v2576_v9 = vadd.f32 %v2575_v59, %v4610_v20  ;;  %v2453_v37 = vadd.f32 %v4700_v14, %v2451_v60  ;;  %v2603_v49 = vadd.f32 %v2602_v46, %v4621_v57  ;;  %v2635_v5 = vadd.f32 %v2634_v31, %v2633_v0 }
 0x261   : > { %v4852_v15 = vmul.f32 %v5776_v54, %v5776_v54  ;;  %v2550_v53 = vadd.f32 %v2549_v35, %v5777_v13  ;;  %v2638_v19 = vsel %vm2160_vm2, %v4655_v10, 0.0  ;;  %v2354_v20 = vadd.f32 %v2353_v24, %v2352_v58  ;;  %v5787_v54 = vld [vmem:[#allocation69_spill] sm:$0xff] }
 0x262   : > { %v2577_v29 = vadd.f32 %v2576_v9, %v5778_v43  ;;  %v2523_v39 = vmul.f32 %v5779_v56, %v5779_v56  ;;  %v2604_v14 = vadd.f32 %v2603_v49, %v5780_v61  ;;  %v2637_v60 = vadd.f32 %v2636_v11, %v2635_v5  ;;  %v5786_v11 = vld [vmem:[#allocation65_spill] sm:$0xff] }
 0x263   : > { %v2381_v57 = vadd.f32 %v2380_v28, %v2379_v18  ;;  %v2551_v44 = vadd.f32 %v2550_v53, %v5781_v41  ;;  %v2640_v59 = vsel %vm2160_vm2, %v4682_v42, 0.0  ;;  %v2524_v31 = vmul.f32 %v5783_v25, %v5783_v25  ;;  %v5788_v53 = vld [vmem:[#allocation44_spill] sm:$0xff] }
 0x264   : > { %v2578_v63 = vadd.f32 %v2577_v29, %v5782_v62  ;;  %v2525_v10 = vmul.f32 %v5784_v1, %v5784_v1  ;;  %v2605_v58 = vadd.f32 %v2604_v14, %v4673_v38  ;;  %v2639_v24 = vadd.f32 %v2638_v19, %v2637_v60  ;;  %v5791_v60 = vld [vmem:[#allocation48_spill] sm:$0xff] }
 0x265   : > { %v2408_v32 = vadd.f32 %v2407_v16, %v2406_v50  ;;  %v2552_v46 = vadd.f32 %v2551_v44, %v4686_v27  ;;  %v2642_v28 = vsel %vm2160_vm2, %v4712_v34, 0.0  ;;  %v2454_v0 = vrot.slane %v2453_v37, 4  ;;  %v5792_v44 = vld [vmem:[#allocation72_spill] sm:$0xff] }
 0x266   : > { %v2579_v18 = vadd.f32 %v2578_v63, %v4704_v7  ;;  %v2526_v42 = vmul.f32 %v5785_v40, %v5785_v40  ;;  %v2606_v35 = vadd.f32 %v2605_v58, %v4708_v47  ;;  %v2641_v9 = vadd.f32 %v2640_v59, %v2639_v24  ;;  %v5793_v63 = vld [vmem:[#allocation66_spill] sm:$0xff]  ;;  %v5794_v59 = vld [vmem:[#allocation49_spill] sm:$0xff]  ;;  %v5796_v40 = vld [vmem:[#allocation84_spill] sm:$0xff] }
 0x267   : > { %v2527_v49 = vmul.f32 %v5786_v11, %v5786_v11  ;;  %v2553_v38 = vadd.f32 %v2552_v46, %v4718_v3  ;;  %v2644_v7 = vsel %vm2160_vm2, %v4735_v51, 0.0  ;;  %v2355_v27 = vrot.slane %v2354_v20, 2  ;;  %v5790_v51 = vld [vmem:[#allocation47_spill] sm:$0xff] }
 0x268   : > { %v2580_v50 = vadd.f32 %v2579_v18, %v4722_v8  ;;  %v2382_v16 = vrot.slane %v2381_v57, 2  ;;  %v2607_v34 = vadd.f32 %v2606_v35, %v4731_v4  ;;  %v2643_v5 = vadd.f32 %v2642_v28, %v2641_v9  ;;  %v5789_v8 = vld [vmem:[#allocation70_spill] sm:$0xff] }
 0x269   : > { %v2528_v13 = vmul.f32 %v5787_v54, %v5787_v54  ;;  %v2554_v47 = vadd.f32 %v2553_v38, %v4741_v30  ;;  %v2646_v3 = vsel %vm2160_vm2, %v4753_v17, 0.0  ;;  %v2409_v29 = vrot.slane %v2408_v32, 2 }
 0x26a   : > { %v2581_v43 = vadd.f32 %v2580_v50, %v5788_v53  ;;  %v2529_v19 = vmul.f32 %v5789_v8, %v5789_v8  ;;  %v2608_v56 = vadd.f32 %v2607_v34, %v5790_v51  ;;  %v2645_v61 = vadd.f32 %v2644_v7, %v2643_v5  ;;  %v5798_v50 = vld [vmem:[#allocation71_spill] sm:$0xff]  ;;  %v5801_v53 = vld [vmem:[#allocation76_spill] sm:$0xff] }
 0x26b   : > { %v2455_v14 = vadd.f32 %v2454_v0, %v2453_v37  ;;  %v2555_v4 = vadd.f32 %v2554_v47, %v4757_v23  ;;  %v2648_v30 = vsel %vm2160_vm2, %v4769_v52, 0.0  ;;  %v2530_v62 = vmul.f32 %v5792_v44, %v5792_v44  ;;  %v5795_v52 = vld [vmem:[#allocation83_spill] sm:$0xff] }
 0x26c   : > { %v2582_v41 = vadd.f32 %v2581_v43, %v5791_v60  ;;  %v2531_v17 = vmul.f32 %v5793_v63, %v5793_v63  ;;  %v2609_v25 = vadd.f32 %v2608_v56, %v5794_v59  ;;  %v2647_v1 = vadd.f32 %v2646_v3, %v2645_v61  ;;  %v5805_v60 = vld [vmem:[#allocation82_spill] sm:$0xff] }
 0x26d   : > { %v4902_v58 = vadd.f32 %v2355_v27, %v2354_v20  ;;  %v2556_v37 = vadd.f32 %v2555_v4, %v4775_v2  ;;  %v2650_v24 = vsel %vm2160_vm2, %v4792_v48, 0.0  ;;  %v4908_v46 = vadd.f32 %v2382_v16, %v2381_v57  ;;  %v5797_v48 = vld [vmem:[#allocation85_spill] sm:$0xff] }
 0x26e   : > { %v2583_v23 = vadd.f32 %v2582_v41, %v4779_v6  ;;  %v2532_v18 = vmul.f32 %v5795_v52, %v5795_v52  ;;  %v2610_v28 = vadd.f32 %v2609_v25, %v4788_v12  ;;  %v2649_v0 = vadd.f32 %v2648_v30, %v2647_v1 }
 0x26f   : > { %v2533_v35 = vmul.f32 %v5796_v40, %v5796_v40  ;;  %v2557_v20 = vadd.f32 %v2556_v37, %v4807_v22  ;;  %v2652_v6 = vsel %vm2160_vm2, %v4828_v21, 0.0  ;;  %v2410_v9 = vadd.f32 %v2409_v29, %v2408_v32  ;;  %v5799_v21 = vld [vmem:[#allocation86_spill] sm:$0xff] }
 0x270   : > { %v2584_v2 = vadd.f32 %v2583_v23, %v4815_v55  ;;  %v2534_v57 = vmul.f32 %v5797_v48, %v5797_v48  ;;  %v2611_v11 = vadd.f32 %v2610_v28, %v4824_v45  ;;  %v2651_v38 = vadd.f32 %v2650_v24, %v2649_v0  ;;  %v5800_v45 = vld [vmem:[#allocation73_spill] sm:$0xff]  ;;  %v5803_v29 = vld [vmem:[#allocation78_spill] sm:$0xff] }
 0x271   : > { %v2535_v12 = vmul.f32 %v5798_v50, %v5798_v50  ;;  %v2558_v7 = vadd.f32 %v2557_v20, %v4837_v36  ;;  %v2654_v22 = vsel %vm2160_vm2, %v2523_v39, 0.0  ;;  %v2536_v55 = vmul.f32 %v4724_v33, %v4724_v33  ;;  %v5802_v39 = vld [vmem:[#allocation77_spill] sm:$0xff] }
 0x272   : > { %v2585_v27 = vadd.f32 %v2584_v2, %v4842_v26  ;;  %v2537_v32 = vmul.f32 %v5799_v21, %v5799_v21  ;;  %v2612_v16 = vadd.f32 %v2611_v11, %v4852_v15  ;;  %v2653_v34 = vadd.f32 %v2652_v6, %v2651_v38 }
 0x273   : > { %v2539_v5 = vmul.f32 %v5800_v45, %v5800_v45  ;;  %v2559_v54 = vadd.f32 %v2558_v7, %v2524_v31  ;;  %v2656_v36 = vsel %vm2160_vm2, %v2527_v49, 0.0  ;;  %v2540_v26 = vmul.f32 %v5801_v53, %v5801_v53  ;;  %v5804_v31 = vld [vmem:[#allocation46_spill] sm:$0xff] }
 0x274   : > { %v2586_v47 = vadd.f32 %v2585_v27, %v2525_v10  ;;  %v2541_v43 = vmul.f32 %v5802_v39, %v5802_v39  ;;  %v2613_v33 = vadd.f32 %v2612_v16, %v2526_v42  ;;  %v2655_v3 = vadd.f32 %v2654_v22, %v2653_v34 }
 0x275   : > { %v2542_v8 = vmul.f32 %v5803_v29, %v5803_v29  ;;  %v2560_v15 = vadd.f32 %v2559_v54, %v2528_v13  ;;  %v2658_v56 = vsel %vm2160_vm2, %v2531_v17, 0.0  ;;  %v2456_v61 = vrot.slane %v2455_v14, 2 }
 0x276   : > { %v2587_v51 = vadd.f32 %v2586_v47, %v2529_v19  ;;  %v2538_v10 = vmul.f32 %v5804_v31, %v5804_v31  ;;  %v2614_v49 = vadd.f32 %v2613_v33, %v2530_v62  ;;  %v2657_v4 = vadd.f32 %v2656_v36, %v2655_v3 }
 0x277   : > { %v2543_v41 = vmul.f32 %v5805_v60, %v5805_v60  ;;  %v2561_v30 = vadd.f32 %v2560_v15, %v2532_v18  ;;  %v2660_v42 = vsel %vm2160_vm2, %v2535_v12, 0.0  ;;  %v2563_v63 = vsel %vm2350_vm4, %v2540_v26, 0.0 }
 0x278   : > { %v2588_v44 = vadd.f32 %v2587_v51, %v2533_v35  ;;  %v2590_v13 = vsel %vm2350_vm4, %v2541_v43, 0.0  ;;  %v2615_v19 = vadd.f32 %v2614_v49, %v2534_v57  ;;  %v2659_v59 = vadd.f32 %v2658_v56, %v2657_v4 }
 0x279   : > { %v2562_v17 = vadd.f32 %v2561_v30, %v2536_v55  ;;  %v2617_v1 = vsel %vm2350_vm4, %v2542_v8, 0.0  ;;  %v2662_v62 = vsel %vm2160_vm2, %v2539_v5, 0.0  ;;  %v2357_v37 = vrot.slane %v4902_v58, 1 }
 0x27a   : > { %v2589_v25 = vadd.f32 %v2588_v44, %v2537_v32  ;;  %v2457_v23 = vadd.f32 %v2456_v61, %v2455_v14  ;;  %v2616_v24 = vadd.f32 %v2615_v19, %v2538_v10  ;;  %v2661_v52 = vadd.f32 %v2660_v42, %v2659_v59 }
 0x27b   : > { %v2384_v18 = vrot.slane %v4908_v46, 1  ;;  %v2564_v28 = vadd.f32 %v2563_v63, %v2562_v17  ;;  %v2664_v40 = vsel %vm2241_vm3, %v2543_v41, 0.0  ;;  %v2411_v35 = vrot.slane %v2410_v9, 1 }
 0x27c   : > { %v2591_v0 = vadd.f32 %v2590_v13, %v2589_v25  ;;  %v2618_v20 = vadd.f32 %v2617_v1, %v2616_v24  ;;  %v2663_v2 = vadd.f32 %v2662_v62, %v2661_v52  ;;  %v2458_v57 = vrot.slane %v2457_v23, 1 }
 0x27d   : > { %v2565_v6 = vrot.slane %v2564_v28, 4  ;;  %v2358_v50 = vadd.f32 %v2357_v37, %v4902_v58  ;;  %v2385_v14 = vadd.f32 %v2384_v18, %v4908_v46  ;;  %v2412_v27 = vadd.f32 %v2411_v35, %v2410_v9 }
 0x27e   : > { %v2592_v48 = vrot.slane %v2591_v0, 4  ;;  %v2619_v11 = vrot.slane %v2618_v20, 4  ;;  %v2665_v38 = vadd.f32 %v2664_v40, %v2663_v2  ;;  %v2459_v16 = vadd.f32 %v2458_v57, %v2457_v23 }
 0x27f   : > { %v2566_v12 = vadd.f32 %v2565_v6, %v2564_v28  ;;  %v4956_v47 = vmul.f32 0.0061728396, %v2358_v50  ;;  %v4958_v36 = vmul.f32 0.0061728396, %v2385_v14  ;;  %v4960_v26 = vmul.f32 0.0061728396, %v2412_v27 }
 0x280   : > { %v2593_v7 = vadd.f32 %v2592_v48, %v2591_v0  ;;  %v2620_v22 = vadd.f32 %v2619_v11, %v2618_v20  ;;  %v2666_v55 = vrot.slane %v2665_v38, 4  ;;  %v2675_v33 = vmul.f32 0.0061728396, %v2459_v16  ;;  %v2692_v50 = vld [vmem:[%s5591_s2] sm:$0xf] }
 0x281   : > { %v2567_v21 = vrot.slane %v2566_v12, 2  ;;  %v2680_v8 = vmul.f32 %v4956_v47, %v4956_v47  ;;  %v2681_v15 = vmul.f32 %v4958_v36, %v4958_v36  ;;  %v2682_v61 = vmul.f32 %v4960_v26, %v4960_v26 }
 0x282   : > { %v2594_v32 = vrot.slane %v2593_v7, 2  ;;  %v2621_v34 = vrot.slane %v2620_v22, 2  ;;  %v2667_v45 = vadd.f32 %v2666_v55, %v2665_v38  ;;  %v2683_v60 = vmul.f32 %v2675_v33, %v2675_v33 }
 0x283   : > { %v2568_v5 = vadd.f32 %v2567_v21, %v2566_v12  ;;  %v3817_v23 = vmov 1966171168   ;;  %v2710_v52 = vlaneseq }
 0x284   : > { %v2595_v54 = vadd.f32 %v2594_v32, %v2593_v7  ;;  %v2622_v53 = vadd.f32 %v2621_v34, %v2620_v22  ;;  %v2668_v58 = vrot.slane %v2667_v45, 2  ;;  %v2708_v24 = vunpack.c.l.s4 %v3817_v23  ;;  %v5821_v23 = vld [vmem:[#allocation19_spill] sm:$0xff] }
 0x285   : > { %v2569_v46 = vrot.slane %v2568_v5, 1  ;;  %v4968_v28 = vshrl.u32 %v2710_v52, 7 }
 0x286   : > { %v2596_v39 = vrot.slane %v2595_v54, 1  ;;  %v2623_v9 = vrot.slane %v2622_v53, 1  ;;  %v2669_v43 = vadd.f32 %v2668_v58, %v2667_v45  ;;  %v2709_v18 = vunpack.c.0.s8 %v2708_v24  ;;  %v5806_v58 = vld [vmem:[#allocation4_spill] sm:$0xff] }
 0x287   : > { %v2570_v3 = vadd.f32 %v2569_v46, %v2568_v5  ;;  %v2735_v14 = vsub.s32 0, %v4968_v28  ;;  %v2739_v7 = vsub.s32 1, %v4968_v28  ;;  %v2743_v27 = vsub.s32 2, %v4968_v28 }
 0x288   : > { %v2597_v29 = vadd.f32 %v2596_v39, %v2595_v54  ;;  %v2624_v51 = vadd.f32 %v2623_v9, %v2622_v53  ;;  %v2670_v56 = vrot.slane %v2669_v43, 1  ;;  %v2712_v40 = vsub.s32 %v2709_v18, %v4968_v28  ;;  %v5807_v39 = vld [vmem:[#allocation5_spill] sm:$0xff]  ;;  %v5822_v18 = vld [vmem:[#allocation20_spill] sm:$0xff] }
 0x289   : > { %v2676_v31 = vmul.f32 0.0061728396, %v2570_v3  ;;  %v2747_v22 = vsub.s32 3, %v4968_v28 }
 0x28a   : > { %v2677_v10 = vmul.f32 0.0061728396, %v2597_v29  ;;  %v2671_v49 = vadd.f32 %v2670_v56, %v2669_v43  ;;  %v2678_v4 = vmul.f32 0.0061728396, %v2624_v51  ;;  %v5808_v43 = vld [vmem:[#allocation6_spill] sm:$0xff]  ;;  %v5809_v29 = vld [vmem:[#allocation7_spill] sm:$0xff] }
 0x28b   : > { %v2684_v41 = vsub.f32 %v2676_v31, %v2680_v8  ;;  %v5812_v56 = vld [vmem:[#allocation10_spill] sm:$0xff]  ;;  %v5813_v31 = vld [vmem:[#allocation11_spill] sm:$0xff] }
 0x28c   : > { %v2685_v30 = vsub.f32 %v2677_v10, %v2681_v15  ;;  %v2679_v44 = vmul.f32 0.0061728396, %v2671_v49  ;;  %v2686_v42 = vsub.f32 %v2678_v4, %v2682_v61  ;;  %v5814_v49 = vld [vmem:[#allocation12_spill] sm:$0xff] }
 0x28d   : > { %v2688_v63 = vmax.f32 %v2684_v41, 0.0 }
 0x28e   : > { %v2689_v13 = vmax.f32 %v2685_v30, 0.0  ;;  %v2687_v19 = vsub.f32 %v2679_v44, %v2683_v60  ;;  %v2690_v59 = vmax.f32 %v2686_v42, 0.0  ;;  %v5815_v60 = vld [vmem:[#allocation13_spill] sm:$0xff]  ;;  %v5816_v42 = vld [vmem:[#allocation14_spill] sm:$0xff] }
 0x28f   : > { %v2693_v17 = vadd.f32 0.001, %v2688_v63 }
 0x290   : > { %v2694_v25 = vadd.f32 0.001, %v2689_v13  ;;  %v2691_v1 = vmax.f32 %v2687_v19, 0.0  ;;  %v2695_v62 = vadd.f32 0.001, %v2690_v59  ;;  %v5817_v13 = vld [vmem:[#allocation15_spill] sm:$0xff] }
 0x291   : > { %3741 = vrsqrt.f32 %v2693_v17  ;;  %v5818_v59 = vld [vmem:[#allocation16_spill] sm:$0xff] }
 0x292   : > { %v2696_v37 = vadd.f32 0.001, %v2691_v1  ;;  %3743 = vrsqrt.f32 %v2694_v25  ;;  %v5819_v25 = vld [vmem:[#allocation17_spill] sm:$0xff] }
 0x293   : > { %3745 = vrsqrt.f32 %v2695_v62  ;;  %v5820_v62 = vld [vmem:[#allocation18_spill] sm:$0xff] }
 0x294   : > { %3747 = vrsqrt.f32 %v2696_v37 }
 0x29b   : > { %v3742_v0 = vpop.eup %3741 }
 0x29c   : > { %v3744_v35 = vpop.eup %3743 }
 0x29d   : > { %v3746_v20 = vpop.eup %3745  ;;  %v2705_v2 = vcombine.low %v3742_v0, %v3744_v35  ;;  %v5823_v0 = vld [vmem:[#allocation21_spill] sm:$0xff] }
 0x29e   : > { %v3748_v6 = vpop.eup %3747 }
 0x29f   : > { %v2706_v48 = vcombine.low %v3746_v20, %v3748_v6  ;;  %v2713_v57 = vrot.slane %v2705_v2, %v2712_v40  ;;  %v5824_v20 = vld [vmem:[#allocation22_spill] sm:$0xff]  ;;  %v2731_v6 = vld [vmem:[%s5592_s3] sm:$0xf] }
 0x2a1   : > { %v2720_v11 = vrot.slane %v2706_v48, %v2712_v40  ;;  %v5825_v48 = vld [vmem:[#allocation23_spill] sm:$0xff] }
 0x2a3   : > { %v2721_v38 = vcombine.low %v2713_v57, %v2720_v11  ;;  %v5826_v11 = vld [vmem:[#allocation24_spill] sm:$0xff] }
 0x2a5   : > { %v2728_v12 = vrot.slane %v2721_v38, %v2712_v40 }
 0x2a7   : > { %v2730_v55 = vmul.f32 %v2728_v12, %v2692_v50  ;;  %v5827_v50 = vld [vmem:[#allocation25_spill] sm:$0xff] }
 0x2a9   : > { %v4978_v21 = vrot.slane %v2730_v55, %v2735_v14  ;;  %v4980_v32 = vrot.slane %v2730_v55, %v2739_v7  ;;  %v4982_v16 = vrot.slane %v2730_v55, %v2743_v27  ;;  %v4984_v34 = vrot.slane %v2730_v55, %v2747_v22  ;;  %v5828_v55 = vld [vmem:[#allocation27_spill] sm:$0xff] }
 0x2ab   : > { %v2753_v45 = vmul.f32 %v4978_v21, %v4956_v47  ;;  %v2754_v5 = vmul.f32 %v4980_v32, %v4958_v36  ;;  %v2755_v54 = vmul.f32 %v4982_v16, %v4960_v26  ;;  %v2756_v53 = vmul.f32 %v4984_v34, %v2675_v33  ;;  %v5810_v36 = vld [vmem:[#allocation8_spill] sm:$0xff]  ;;  %v5811_v26 = vld [vmem:[#allocation9_spill] sm:$0xff] }
 0x2ac   : > { %v2787_v46 = vmul.f32 %v4978_v21, %v5806_v58  ;;  %v2788_v9 = vmul.f32 %v4980_v32, %v5807_v39  ;;  %v2789_v3 = vmul.f32 %v4982_v16, %v5808_v43  ;;  %v2790_v47 = vmul.f32 %v4984_v34, %v5809_v29  ;;  %v5830_v58 = vld [vmem:[#allocation28_spill] sm:$0xff]  ;;  %v5831_v43 = vld [vmem:[#allocation29_spill] sm:$0xff] }
 0x2ad   : > { %v2761_v8 = vcombine.low %v2753_v45, %v2754_v5  ;;  %v2762_v15 = vcombine.low %v2755_v54, %v2756_v53  ;;  %v2791_v51 = vmul.f32 %v4978_v21, %v5810_v36  ;;  %v2792_v33 = vmul.f32 %v4980_v32, %v5811_v26  ;;  %v5829_v54 = vld [vmem:[#allocation26_spill] sm:$0xff] }
 0x2ae   : > { %v2793_v61 = vmul.f32 %v4982_v16, %v5812_v56  ;;  %v2794_v10 = vmul.f32 %v4984_v34, %v5813_v31  ;;  %v5011_v4 = vmul.f32 %v4978_v21, %v5814_v49  ;;  %v5015_v41 = vmul.f32 %v4980_v32, %v5815_v60  ;;  %v5833_v36 = vld [vmem:[#allocation30_spill] sm:$0xff] }
 0x2af   : > { %v2769_v30 = vrot.slane %v2761_v8, %v2712_v40  ;;  %v2776_v44 = vrot.slane %v2762_v15, %v2712_v40  ;;  %v2797_v63 = vmul.f32 %v4982_v16, %v5816_v42  ;;  %v2798_v19 = vmul.f32 %v4984_v34, %v5817_v13  ;;  %v5832_v8 = vld [vmem:[#allocation31_spill] sm:$0xff]  ;;  %v5835_v31 = vld [vmem:[#allocation34_spill] sm:$0xff]  ;;  %v5837_v42 = vld [vmem:[#allocation32_spill] sm:$0xff] }
 0x2b0   : > { %v5023_v17 = vmul.f32 %v4978_v21, %v5818_v59  ;;  %v5027_v1 = vmul.f32 %v4980_v32, %v5819_v25  ;;  %v5031_v37 = vmul.f32 %v4982_v16, %v5820_v62  ;;  %v5035_v24 = vmul.f32 %v4984_v34, %v5821_v23  ;;  %v5838_v59 = vld [vmem:[#allocation37_spill] sm:$0xff]  ;;  %v5839_v62 = vld [vmem:[#allocation38_spill] sm:$0xff] }
 0x2b1   : > { %v2777_v52 = vcombine.low %v2769_v30, %v2776_v44  ;;  %v5039_v28 = vmul.f32 %v4978_v21, %v5822_v18  ;;  %v5043_v35 = vmul.f32 %v4980_v32, %v5823_v0  ;;  %v5047_v2 = vmul.f32 %v4982_v16, %v5824_v20  ;;  %v5836_v30 = vld [vmem:[#allocation35_spill] sm:$0xff]  ;;  %v5841_v0 = vld [vmem:[#allocation36_spill] sm:$0xff] }
 0x2b2   : > { %v5054_v57 = vmul.f32 %v4984_v34, %v5825_v48  ;;  %v5058_v38 = vmul.f32 %v4978_v21, %v5826_v11  ;;  %v5062_v12 = vmul.f32 %v4980_v32, %v5827_v50  ;;  %v5066_v45 = vmul.f32 %v4982_v16, %v5828_v55 }
 0x2b3   : > { %v2784_v5 = vrot.slane %v2777_v52, %v2712_v40  ;;  %v5070_v53 = vmul.f32 %v4984_v34, %v5829_v54  ;;  %v5074_v39 = vmul.f32 %v4978_v21, %v5830_v58  ;;  %v5078_v29 = vmul.f32 %v4980_v32, %v5831_v43  ;;  %v5834_v40 = vld [vmem:[#allocation33_spill] sm:$0xff]  ;;  %v5840_v52 = vld [vmem:[#allocation39_spill] sm:$0xff]  ;;  %v5843_v54 = vld [vmem:[#allocation42_spill] sm:$0xff] }
 0x2b4   : > { %v5082_v15 = vmul.f32 %v4982_v16, %v5832_v8  ;;  %v5086_v26 = vmul.f32 %v4984_v34, %v5833_v36  ;;  %v5090_v56 = vmul.f32 %v4978_v21, %v5834_v40  ;;  %v5094_v49 = vmul.f32 %v4980_v32, %v5835_v31  ;;  %v5844_v43 = vld [vmem:[#allocation43_spill] sm:$0xff]  ;;  %v5845_v36 = vld [vmem:[#allocation40_spill] sm:$0xff] }
 0x2b5   : > { %v2786_v60 = vsub.f32 %v2731_v6, %v2784_v5  ;;  %v5098_v44 = vmul.f32 %v4982_v16, %v5836_v30  ;;  %v5102_v13 = vmul.f32 %v4984_v34, %v5837_v42  ;;  %v5106_v25 = vmul.f32 %v4978_v21, %v5838_v59  ;;  %v5842_v6 = vld [vmem:[#allocation41_spill] sm:$0xff] }
 0x2b6   : > { %v5110_v23 = vmul.f32 %v4980_v32, %v5839_v62  ;;  %v5114_v18 = vmul.f32 %v4982_v16, %v5840_v52  ;;  %v5118_v20 = vmul.f32 %v4984_v34, %v5841_v0  ;;  %v5122_v48 = vmul.f32 %v4978_v21, %v5842_v6 }
 0x2b7   : > { %v5124_v11 = vrot.slane %v2786_v60, %v2735_v14  ;;  %v5126_v50 = vrot.slane %v2786_v60, %v2739_v7  ;;  %v5128_v55 = vrot.slane %v2786_v60, %v2743_v27  ;;  %v5130_v5 = vrot.slane %v2786_v60, %v2747_v22  ;;  %v5846_v14 = vld [vmem:[#allocation45_spill] sm:$0xff] }
 0x2b8   : > { %v5134_v58 = vmul.f32 %v4980_v32, %v5843_v54  ;;  %v5138_v8 = vmul.f32 %v4982_v16, %v5844_v43  ;;  %v5142_v40 = vmul.f32 %v4984_v34, %v5845_v36  ;;  %v5146_v7 = vmul.f32 %v4978_v21, %v5846_v14 }
 0x2b9   : > { %v2892_v27 = vadd.f32 %v5124_v11, %v2787_v46  ;;  %v2893_v22 = vadd.f32 %v5126_v50, %v2788_v9  ;;  %v2894_v31 = vadd.f32 %v5128_v55, %v2789_v3  ;;  %v2895_v60 = vadd.f32 %v5130_v5, %v2790_v47 }
 0x2ba   : > { %v2896_v30 = vadd.f32 %v5124_v11, %v2791_v51  ;;  %v2897_v42 = vadd.f32 %v5126_v50, %v2792_v33  ;;  %v2898_v59 = vadd.f32 %v5128_v55, %v2793_v61  ;;  %v2899_v62 = vadd.f32 %v5130_v5, %v2794_v10 }
 0x2bb   : > { %v2976_v52 = vmax.f32 %v2892_v27, 0.0  ;;  %v2977_v0 = vmax.f32 %v2893_v22, 0.0  ;;  %v2978_v6 = vmax.f32 %v2894_v31, 0.0  ;;  %v2979_v54 = vmax.f32 %v2895_v60, 0.0 }
 0x2bc   : > { %v2980_v43 = vmax.f32 %v2896_v30, 0.0  ;;  %v2981_v46 = vmax.f32 %v2897_v42, 0.0  ;;  %v2982_v36 = vmax.f32 %v2898_v59, 0.0  ;;  %v2983_v9 = vmax.f32 %v2899_v62, 0.0 }
 0x2bd   : > { %3060 = vst [vmem:[%s5593_s4] sm:$0xff] %v2976_v52  ;;  %3061 = vst [vmem:[%s5593_s4 + $0x8] sm:$0xff] %v2977_v0  ;;  %v2900_v3 = vadd.f32 %v5124_v11, %v5011_v4  ;;  %v2901_v47 = vadd.f32 %v5126_v50, %v5015_v41  ;;  %v2902_v51 = vadd.f32 %v5128_v55, %v2797_v63 }
 0x2be   : > { %3062 = vst [vmem:[%s5593_s4 + $0x10] sm:$0xff] %v2978_v6  ;;  %3063 = vst.msk [vmem:[%s5593_s4 + $0x18] sm:$0xff] %vm2160_vm2, %v2979_v54  ;;  %v2903_v33 = vadd.f32 %v5130_v5, %v2798_v19  ;;  %v2904_v61 = vadd.f32 %v5124_v11, %v5023_v17  ;;  %v2905_v10 = vadd.f32 %v5126_v50, %v5027_v1 }
 0x2bf   : > { %3064 = vst [vmem:[%s5593_s4 + $0x20] sm:$0xff] %v2980_v43  ;;  %3065 = vst [vmem:[%s5593_s4 + $0x28] sm:$0xff] %v2981_v46  ;;  %v2906_v4 = vadd.f32 %v5128_v55, %v5031_v37  ;;  %v2907_v41 = vadd.f32 %v5130_v5, %v5035_v24  ;;  %v2984_v63 = vmax.f32 %v2900_v3, 0.0  ;;  %v2985_v19 = vmax.f32 %v2901_v47, 0.0 }
 0x2c0   : > { %3066 = vst [vmem:[%s5593_s4 + $0x30] sm:$0xff] %v2982_v36  ;;  %3067 = vst.msk [vmem:[%s5593_s4 + $0x38] sm:$0xff] %vm2160_vm2, %v2983_v9  ;;  %v2986_v14 = vmax.f32 %v2902_v51, 0.0  ;;  %v2987_v27 = vmax.f32 %v2903_v33, 0.0  ;;  %v2988_v22 = vmax.f32 %v2904_v61, 0.0  ;;  %v2989_v31 = vmax.f32 %v2905_v10, 0.0 }
 0x2c1   : > { %v2990_v60 = vmax.f32 %v2906_v4, 0.0  ;;  %v2991_v30 = vmax.f32 %v2907_v41, 0.0  ;;  %3068 = vst [vmem:[%s5593_s4 + $0x40] sm:$0xff] %v2984_v63  ;;  %3069 = vst [vmem:[%s5593_s4 + $0x48] sm:$0xff] %v2985_v19  ;;  %v2908_v17 = vadd.f32 %v5124_v11, %v5039_v28  ;;  %v2909_v1 = vadd.f32 %v5126_v50, %v5043_v35 }
 0x2c2   : > { %3070 = vst [vmem:[%s5593_s4 + $0x50] sm:$0xff] %v2986_v14  ;;  %3071 = vst.msk [vmem:[%s5593_s4 + $0x58] sm:$0xff] %vm2160_vm2, %v2987_v27  ;;  %v2910_v37 = vadd.f32 %v5128_v55, %v5047_v2  ;;  %v2911_v24 = vadd.f32 %v5130_v5, %v5054_v57  ;;  %v2912_v28 = vadd.f32 %v5124_v11, %v5058_v38 }
 0x2c3   : > { %3072 = vst [vmem:[%s5593_s4 + $0x60] sm:$0xff] %v2988_v22  ;;  %3073 = vst [vmem:[%s5593_s4 + $0x68] sm:$0xff] %v2989_v31  ;;  %v2913_v35 = vadd.f32 %v5126_v50, %v5062_v12  ;;  %v2914_v2 = vadd.f32 %v5128_v55, %v5066_v45  ;;  %v2915_v57 = vadd.f32 %v5130_v5, %v5070_v53  ;;  %v2992_v42 = vmax.f32 %v2908_v17, 0.0 }
 0x2c4   : > { %3074 = vst [vmem:[%s5593_s4 + $0x70] sm:$0xff] %v2990_v60  ;;  %3075 = vst.msk [vmem:[%s5593_s4 + $0x78] sm:$0xff] %vm2160_vm2, %v2991_v30  ;;  %v2993_v59 = vmax.f32 %v2909_v1, 0.0  ;;  %v2994_v62 = vmax.f32 %v2910_v37, 0.0  ;;  %v2995_v52 = vmax.f32 %v2911_v24, 0.0  ;;  %v2996_v0 = vmax.f32 %v2912_v28, 0.0 }
 0x2c5   : > { %v2997_v6 = vmax.f32 %v2913_v35, 0.0  ;;  %v2998_v54 = vmax.f32 %v2914_v2, 0.0  ;;  %v2999_v43 = vmax.f32 %v2915_v57, 0.0  ;;  %3076 = vst [vmem:[%s5593_s4 + $0x80] sm:$0xff] %v2992_v42  ;;  %v2916_v38 = vadd.f32 %v5124_v11, %v5074_v39  ;;  %v3751_v60 = vld [vmem:[#allocation2 + $0x158] sm:$0xff]  ;;  %v3753_v1 = vld [vmem:[#allocation2 + $0x168] sm:$0xff] }
 0x2c6   : > { %3077 = vst [vmem:[%s5593_s4 + $0x88] sm:$0xff] %v2993_v59  ;;  %3078 = vst [vmem:[%s5593_s4 + $0x90] sm:$0xff] %v2994_v62  ;;  %v2917_v12 = vadd.f32 %v5126_v50, %v5078_v29  ;;  %v2918_v45 = vadd.f32 %v5128_v55, %v5082_v15  ;;  %v2919_v53 = vadd.f32 %v5130_v5, %v5086_v26  ;;  %v3754_v24 = vld [vmem:[#allocation2 + $0x170] sm:$0xff]  ;;  %v3755_v35 = vld [vmem:[#allocation2 + $0x178] sm:$0xff] }
 0x2c7   : > { %3079 = vst.msk [vmem:[%s5593_s4 + $0x98] sm:$0xff] %vm2160_vm2, %v2995_v52  ;;  %3080 = vst [vmem:[%s5593_s4 + $0xa0] sm:$0xff] %v2996_v0  ;;  %v2920_v39 = vadd.f32 %v5124_v11, %v5090_v56  ;;  %v2921_v29 = vadd.f32 %v5126_v50, %v5094_v49  ;;  %v2922_v15 = vadd.f32 %v5128_v55, %v5098_v44  ;;  %v3000_v46 = vmax.f32 %v2916_v38, 0.0 }
 0x2c8   : > { %3081 = vst [vmem:[%s5593_s4 + $0xa8] sm:$0xff] %v2997_v6  ;;  %3082 = vst [vmem:[%s5593_s4 + $0xb0] sm:$0xff] %v2998_v54  ;;  %v2923_v26 = vadd.f32 %v5130_v5, %v5102_v13  ;;  %v3001_v36 = vmax.f32 %v2917_v12, 0.0  ;;  %v3002_v9 = vmax.f32 %v2918_v45, 0.0  ;;  %v3003_v3 = vmax.f32 %v2919_v53, 0.0  ;;  %v3756_v45 = vld [vmem:[#allocation2 + $0x180] sm:$0xff] }
 0x2c9   : > { %3083 = vst.msk [vmem:[%s5593_s4 + $0xb8] sm:$0xff] %vm2160_vm2, %v2999_v43  ;;  %v3004_v47 = vmax.f32 %v2920_v39, 0.0  ;;  %v3005_v51 = vmax.f32 %v2921_v29, 0.0  ;;  %v3006_v33 = vmax.f32 %v2922_v15, 0.0  ;;  %3084 = vst [vmem:[%s5593_s4 + $0xc0] sm:$0xff] %v3000_v46  ;;  %v2924_v56 = vadd.f32 %v5124_v11, %v5106_v25 }
 0x2ca   : > { %v3007_v61 = vmax.f32 %v2923_v26, 0.0  ;;  %3085 = vst [vmem:[%s5593_s4 + $0xc8] sm:$0xff] %v3001_v36  ;;  %3086 = vst [vmem:[%s5593_s4 + $0xd0] sm:$0xff] %v3002_v9  ;;  %v2925_v49 = vadd.f32 %v5126_v50, %v5110_v23  ;;  %v2926_v44 = vadd.f32 %v5128_v55, %v5114_v18  ;;  %v2927_v13 = vadd.f32 %v5130_v5, %v5118_v20  ;;  %v3757_v36 = vld [vmem:[#allocation2 + $0x188] sm:$0xff] }
 0x2cb   : > { %3087 = vst.msk [vmem:[%s5593_s4 + $0xd8] sm:$0xff] %vm2160_vm2, %v3003_v3  ;;  %3088 = vst [vmem:[%s5593_s4 + $0xe0] sm:$0xff] %v3004_v47  ;;  %v2928_v25 = vadd.f32 %v5124_v11, %v5122_v48  ;;  %v2929_v23 = vadd.f32 %v5126_v50, %v5134_v58  ;;  %v2930_v18 = vadd.f32 %v5128_v55, %v5138_v8  ;;  %v3008_v10 = vmax.f32 %v2924_v56, 0.0  ;;  %v3749_v58 = vld [vmem:[#allocation2 + $0x148] sm:$0xff]  ;;  %v3758_v3 = vld [vmem:[#allocation2 + $0x190] sm:$0xff] }
 0x2cc   : > { %3089 = vst [vmem:[%s5593_s4 + $0xe8] sm:$0xff] %v3005_v51  ;;  %3090 = vst [vmem:[%s5593_s4 + $0xf0] sm:$0xff] %v3006_v33  ;;  %v2931_v20 = vadd.f32 %v5130_v5, %v5142_v40  ;;  %v3009_v4 = vmax.f32 %v2925_v49, 0.0  ;;  %v3010_v41 = vmax.f32 %v2926_v44, 0.0  ;;  %v3011_v63 = vmax.f32 %v2927_v13, 0.0  ;;  %v3750_v40 = vld [vmem:[#allocation2 + $0x150] sm:$0xff] }
 0x2cd   : > { %3091 = vst.msk [vmem:[%s5593_s4 + $0xf8] sm:$0xff] %vm2160_vm2, %v3007_v61  ;;  %v3012_v19 = vmax.f32 %v2928_v25, 0.0  ;;  %v3013_v14 = vmax.f32 %v2929_v23, 0.0  ;;  %v3014_v27 = vmax.f32 %v2930_v18, 0.0  ;;  %3092 = vst [vmem:[%s5593_s4 + $0x100] sm:$0xff] %v3008_v10  ;;  %v2932_v48 = vadd.f32 %v5124_v11, %v5146_v7  ;;  %v3752_v7 = vld [vmem:[#allocation2 + $0x160] sm:$0xff] }
 0x2ce   : > { %v3015_v22 = vmax.f32 %v2931_v20, 0.0  ;;  %3093 = vst [vmem:[%s5593_s4 + $0x108] sm:$0xff] %v3009_v4  ;;  %3094 = vst [vmem:[%s5593_s4 + $0x110] sm:$0xff] %v3010_v41  ;;  %v2828_v8 = vmul.f32 %v3749_v58, %v4980_v32  ;;  %v2829_v31 = vmul.f32 %v3750_v40, %v4982_v16  ;;  %v2830_v30 = vmul.f32 %v3751_v60, %v4984_v34  ;;  %v3759_v51 = vld [vmem:[#allocation2 + $0x198] sm:$0xff]  ;;  %v3760_v61 = vld [vmem:[#allocation2 + $0x1a0] sm:$0xff] }
 0x2cf   : > { %3095 = vst.msk [vmem:[%s5593_s4 + $0x118] sm:$0xff] %vm2160_vm2, %v3011_v63  ;;  %3096 = vst [vmem:[%s5593_s4 + $0x120] sm:$0xff] %v3012_v19  ;;  %v2831_v17 = vmul.f32 %v3752_v7, %v4978_v21  ;;  %v2832_v37 = vmul.f32 %v3753_v1, %v4980_v32  ;;  %v2833_v28 = vmul.f32 %v3754_v24, %v4982_v16  ;;  %v3016_v57 = vmax.f32 %v2932_v48, 0.0  ;;  %v3761_v49 = vld [vmem:[#allocation2 + $0x1a8] sm:$0xff]  ;;  %v3762_v13 = vld [vmem:[#allocation2 + $0x1b0] sm:$0xff] }
 0x2d0   : > { %3097 = vst [vmem:[%s5593_s4 + $0x128] sm:$0xff] %v3013_v14  ;;  %3098 = vst [vmem:[%s5593_s4 + $0x130] sm:$0xff] %v3014_v27  ;;  %v2834_v2 = vmul.f32 %v3755_v35, %v4984_v34  ;;  %v2933_v42 = vadd.f32 %v5126_v50, %v2828_v8  ;;  %v2934_v59 = vadd.f32 %v5128_v55, %v2829_v31  ;;  %v3763_v23 = vld [vmem:[#allocation2 + $0x1b8] sm:$0xff]  ;;  %v3764_v8 = vld [vmem:[#allocation2 + $0x1c0] sm:$0xff] }
 0x2d1   : > { %3099 = vst.msk [vmem:[%s5593_s4 + $0x138] sm:$0xff] %vm2160_vm2, %v3015_v22  ;;  %v2935_v62 = vadd.f32 %v5130_v5, %v2830_v30  ;;  %v2936_v52 = vadd.f32 %v5124_v11, %v2831_v17  ;;  %v2937_v0 = vadd.f32 %v5126_v50, %v2832_v37  ;;  %v2938_v6 = vadd.f32 %v5128_v55, %v2833_v28  ;;  %v3765_v1 = vld [vmem:[#allocation2 + $0x1c8] sm:$0xff]  ;;  %v3766_v24 = vld [vmem:[#allocation2 + $0x1d0] sm:$0xff]  ;;  %v3767_v35 = vld [vmem:[#allocation2 + $0x1d8] sm:$0xff] }
 0x2d2   : > { %v2939_v54 = vadd.f32 %v5130_v5, %v2834_v2  ;;  %3100 = vst [vmem:[%s5593_s4 + $0x140] sm:$0xff] %v3016_v57  ;;  %v3017_v43 = vmax.f32 %v2933_v42, 0.0  ;;  %v3018_v38 = vmax.f32 %v2934_v59, 0.0  ;;  %v2835_v53 = vmul.f32 %v3756_v45, %v4978_v21  ;;  %v3768_v57 = vld [vmem:[#allocation2 + $0x1e0] sm:$0xff]  ;;  %v3769_v59 = vld [vmem:[#allocation2 + $0x1e8] sm:$0xff] }
 0x2d3   : > { %v3019_v12 = vmax.f32 %v2935_v62, 0.0  ;;  %v3020_v39 = vmax.f32 %v2936_v52, 0.0  ;;  %v3021_v29 = vmax.f32 %v2937_v0, 0.0  ;;  %v3022_v15 = vmax.f32 %v2938_v6, 0.0  ;;  %v3770_v52 = vld [vmem:[#allocation2 + $0x1f0] sm:$0xff]  ;;  %v3771_v6 = vld [vmem:[#allocation2 + $0x1f8] sm:$0xff] }
 0x2d4   : > { %v3023_v26 = vmax.f32 %v2939_v54, 0.0  ;;  %3101 = vst [vmem:[%s5593_s4 + $0x148] sm:$0xff] %v3017_v43  ;;  %3102 = vst [vmem:[%s5593_s4 + $0x150] sm:$0xff] %v3018_v38  ;;  %v2940_v46 = vadd.f32 %v5124_v11, %v2835_v53  ;;  %v2836_v9 = vmul.f32 %v3757_v36, %v4980_v32  ;;  %v2837_v47 = vmul.f32 %v3758_v3, %v4982_v16 }
 0x2d5   : > { %3103 = vst.msk [vmem:[%s5593_s4 + $0x158] sm:$0xff] %vm2160_vm2, %v3019_v12  ;;  %v2838_v33 = vmul.f32 %v3759_v51, %v4984_v34  ;;  %3104 = vst [vmem:[%s5593_s4 + $0x160] sm:$0xff] %v3020_v39  ;;  %v2839_v56 = vmul.f32 %v3760_v61, %v4978_v21  ;;  %v2840_v44 = vmul.f32 %v3761_v49, %v4980_v32  ;;  %v3773_v49 = vld [vmem:[#allocation2 + $0x208] sm:$0xff] }
 0x2d6   : > { %3105 = vst [vmem:[%s5593_s4 + $0x168] sm:$0xff] %v3021_v29  ;;  %3106 = vst [vmem:[%s5593_s4 + $0x170] sm:$0xff] %v3022_v15  ;;  %v2841_v25 = vmul.f32 %v3762_v13, %v4982_v16  ;;  %v2842_v18 = vmul.f32 %v3763_v23, %v4984_v34  ;;  %v3024_v20 = vmax.f32 %v2940_v46, 0.0  ;;  %v2941_v10 = vadd.f32 %v5126_v50, %v2836_v9  ;;  %v3772_v9 = vld [vmem:[#allocation2 + $0x200] sm:$0xff]  ;;  %v3774_v13 = vld [vmem:[#allocation2 + $0x210] sm:$0xff] }
 0x2d7   : > { %3107 = vst.msk [vmem:[%s5593_s4 + $0x178] sm:$0xff] %vm2160_vm2, %v3023_v26  ;;  %v2942_v4 = vadd.f32 %v5128_v55, %v2837_v47  ;;  %v2943_v41 = vadd.f32 %v5130_v5, %v2838_v33  ;;  %v2944_v63 = vadd.f32 %v5124_v11, %v2839_v56  ;;  %v2945_v19 = vadd.f32 %v5126_v50, %v2840_v44  ;;  %v3775_v23 = vld [vmem:[#allocation2 + $0x218] sm:$0xff] }
 0x2d8   : > { %v2946_v14 = vadd.f32 %v5128_v55, %v2841_v25  ;;  %v2947_v27 = vadd.f32 %v5130_v5, %v2842_v18  ;;  %3108 = vst [vmem:[%s5593_s4 + $0x180] sm:$0xff] %v3024_v20  ;;  %v3025_v22 = vmax.f32 %v2941_v10, 0.0  ;;  %v2843_v40 = vmul.f32 %v3764_v8, %v4978_v21  ;;  %v3776_v20 = vld [vmem:[#allocation2 + $0x220] sm:$0xff] }
 0x2d9   : > { %v3026_v48 = vmax.f32 %v2942_v4, 0.0  ;;  %v3027_v58 = vmax.f32 %v2943_v41, 0.0  ;;  %v3028_v31 = vmax.f32 %v2944_v63, 0.0  ;;  %v3029_v60 = vmax.f32 %v2945_v19, 0.0  ;;  %v3777_v4 = vld [vmem:[#allocation2 + $0x228] sm:$0xff]  ;;  %v3778_v63 = vld [vmem:[#allocation2 + $0x230] sm:$0xff] }
 0x2da   : > { %v3030_v30 = vmax.f32 %v2946_v14, 0.0  ;;  %v3031_v7 = vmax.f32 %v2947_v27, 0.0  ;;  %3109 = vst [vmem:[%s5593_s4 + $0x188] sm:$0xff] %v3025_v22  ;;  %v2948_v17 = vadd.f32 %v5124_v11, %v2843_v40  ;;  %v2844_v37 = vmul.f32 %v3765_v1, %v4980_v32  ;;  %v3779_v14 = vld [vmem:[#allocation2 + $0x238] sm:$0xff] }
 0x2db   : > { %3110 = vst [vmem:[%s5593_s4 + $0x190] sm:$0xff] %v3026_v48  ;;  %3111 = vst.msk [vmem:[%s5593_s4 + $0x198] sm:$0xff] %vm2160_vm2, %v3027_v58  ;;  %v2845_v28 = vmul.f32 %v3766_v24, %v4982_v16  ;;  %v2846_v2 = vmul.f32 %v3767_v35, %v4984_v34  ;;  %v2847_v42 = vmul.f32 %v3768_v57, %v4978_v21 }
 0x2dc   : > { %3112 = vst [vmem:[%s5593_s4 + $0x1a0] sm:$0xff] %v3028_v31  ;;  %3113 = vst [vmem:[%s5593_s4 + $0x1a8] sm:$0xff] %v3029_v60  ;;  %v2848_v62 = vmul.f32 %v3769_v59, %v4980_v32  ;;  %v2849_v0 = vmul.f32 %v3770_v52, %v4982_v16  ;;  %v2850_v54 = vmul.f32 %v3771_v6, %v4984_v34  ;;  %v3032_v43 = vmax.f32 %v2948_v17, 0.0  ;;  %v3781_v59 = vld [vmem:[#allocation2 + $0x248] sm:$0xff]  ;;  %v3782_v52 = vld [vmem:[#allocation2 + $0x250] sm:$0xff] }
 0x2dd   : > { %3114 = vst [vmem:[%s5593_s4 + $0x1b0] sm:$0xff] %v3030_v30  ;;  %3115 = vst.msk [vmem:[%s5593_s4 + $0x1b8] sm:$0xff] %vm2160_vm2, %v3031_v7  ;;  %v2949_v38 = vadd.f32 %v5126_v50, %v2844_v37  ;;  %v2950_v12 = vadd.f32 %v5128_v55, %v2845_v28  ;;  %v2951_v45 = vadd.f32 %v5130_v5, %v2846_v2  ;;  %v3780_v37 = vld [vmem:[#allocation2 + $0x240] sm:$0xff]  ;;  %v3783_v6 = vld [vmem:[#allocation2 + $0x258] sm:$0xff] }
 0x2de   : > { %v2952_v53 = vadd.f32 %v5124_v11, %v2847_v42  ;;  %v2953_v39 = vadd.f32 %v5126_v50, %v2848_v62  ;;  %v2954_v29 = vadd.f32 %v5128_v55, %v2849_v0  ;;  %v2955_v15 = vadd.f32 %v5130_v5, %v2850_v54  ;;  %3116 = vst [vmem:[%s5593_s4 + $0x1c0] sm:$0xff] %v3032_v43  ;;  %v3784_v43 = vld [vmem:[#allocation2 + $0x260] sm:$0xff] }
 0x2df   : > { %v3033_v26 = vmax.f32 %v2949_v38, 0.0  ;;  %v3034_v46 = vmax.f32 %v2950_v12, 0.0  ;;  %v3035_v36 = vmax.f32 %v2951_v45, 0.0  ;;  %v2851_v3 = vmul.f32 %v3772_v9, %v4978_v21  ;;  %v3785_v12 = vld [vmem:[#allocation2 + $0x268] sm:$0xff] }
 0x2e0   : > { %v3036_v47 = vmax.f32 %v2952_v53, 0.0  ;;  %v3037_v51 = vmax.f32 %v2953_v39, 0.0  ;;  %v3038_v33 = vmax.f32 %v2954_v29, 0.0  ;;  %v3039_v61 = vmax.f32 %v2955_v15, 0.0  ;;  %v3786_v53 = vld [vmem:[#allocation2 + $0x270] sm:$0xff]  ;;  %v3787_v29 = vld [vmem:[#allocation2 + $0x278] sm:$0xff] }
 0x2e1   : > { %3117 = vst [vmem:[%s5593_s4 + $0x1c8] sm:$0xff] %v3033_v26  ;;  %3118 = vst [vmem:[%s5593_s4 + $0x1d0] sm:$0xff] %v3034_v46  ;;  %v2956_v56 = vadd.f32 %v5124_v11, %v2851_v3  ;;  %v2852_v44 = vmul.f32 %v3773_v49, %v4980_v32  ;;  %v2853_v25 = vmul.f32 %v3774_v13, %v4982_v16 }
 0x2e2   : > { %3119 = vst.msk [vmem:[%s5593_s4 + $0x1d8] sm:$0xff] %vm2160_vm2, %v3035_v36  ;;  %v2854_v18 = vmul.f32 %v3775_v23, %v4984_v34  ;;  %3120 = vst [vmem:[%s5593_s4 + $0x1e0] sm:$0xff] %v3036_v47  ;;  %v2855_v10 = vmul.f32 %v3776_v20, %v4978_v21  ;;  %v2856_v41 = vmul.f32 %v3777_v4, %v4980_v32 }
 0x2e3   : > { %3121 = vst [vmem:[%s5593_s4 + $0x1e8] sm:$0xff] %v3037_v51  ;;  %3122 = vst [vmem:[%s5593_s4 + $0x1f0] sm:$0xff] %v3038_v33  ;;  %v2857_v19 = vmul.f32 %v3778_v63, %v4982_v16  ;;  %v2858_v27 = vmul.f32 %v3779_v14, %v4984_v34  ;;  %v3040_v22 = vmax.f32 %v2956_v56, 0.0  ;;  %v2957_v48 = vadd.f32 %v5126_v50, %v2852_v44  ;;  %v3788_v44 = vld [vmem:[#allocation2 + $0x280] sm:$0x3] }
 0x2e4   : > { %3123 = vst.msk [vmem:[%s5593_s4 + $0x1f8] sm:$0xff] %vm2160_vm2, %v3039_v61  ;;  %v2958_v58 = vadd.f32 %v5128_v55, %v2853_v25  ;;  %v2959_v8 = vadd.f32 %v5130_v5, %v2854_v18  ;;  %v2960_v40 = vadd.f32 %v5124_v11, %v2855_v10  ;;  %v2961_v31 = vadd.f32 %v5126_v50, %v2856_v41  ;;  %v3790_v41 = vld [vmem:[#allocation2 + $0x290] sm:$0x3] }
 0x2e5   : > { %v2962_v60 = vadd.f32 %v5128_v55, %v2857_v19  ;;  %v2963_v30 = vadd.f32 %v5130_v5, %v2858_v27  ;;  %3124 = vst [vmem:[%s5593_s4 + $0x200] sm:$0xff] %v3040_v22  ;;  %v3041_v7 = vmax.f32 %v2957_v48, 0.0  ;;  %v2859_v24 = vmul.f32 %v3780_v37, %v4978_v21  ;;  %v3791_v19 = vld [vmem:[#allocation2 + $0x298] sm:$0x3] }
 0x2e6   : > { %v3042_v17 = vmax.f32 %v2958_v58, 0.0  ;;  %v3043_v1 = vmax.f32 %v2959_v8, 0.0  ;;  %v3044_v28 = vmax.f32 %v2960_v40, 0.0  ;;  %v3045_v35 = vmax.f32 %v2961_v31, 0.0 }
 0x2e7   : > { %v3046_v2 = vmax.f32 %v2962_v60, 0.0  ;;  %v3047_v57 = vmax.f32 %v2963_v30, 0.0  ;;  %3125 = vst [vmem:[%s5593_s4 + $0x208] sm:$0xff] %v3041_v7  ;;  %v2964_v42 = vadd.f32 %v5124_v11, %v2859_v24  ;;  %v2860_v62 = vmul.f32 %v3781_v59, %v4980_v32 }
 0x2e8   : > { %3126 = vst [vmem:[%s5593_s4 + $0x210] sm:$0xff] %v3042_v17  ;;  %3127 = vst.msk [vmem:[%s5593_s4 + $0x218] sm:$0xff] %vm2160_vm2, %v3043_v1  ;;  %v2861_v0 = vmul.f32 %v3782_v52, %v4982_v16  ;;  %v2862_v54 = vmul.f32 %v3783_v6, %v4984_v34  ;;  %v2863_v38 = vmul.f32 %v3784_v43, %v4978_v21 }
 0x2e9   : > { %3128 = vst [vmem:[%s5593_s4 + $0x220] sm:$0xff] %v3044_v28  ;;  %3129 = vst [vmem:[%s5593_s4 + $0x228] sm:$0xff] %v3045_v35  ;;  %v2864_v45 = vmul.f32 %v3785_v12, %v4980_v32  ;;  %v2865_v39 = vmul.f32 %v3786_v53, %v4982_v16  ;;  %v2866_v15 = vmul.f32 %v3787_v29, %v4984_v34  ;;  %v3048_v26 = vmax.f32 %v2964_v42, 0.0 }
 0x2ea   : > { %3130 = vst [vmem:[%s5593_s4 + $0x230] sm:$0xff] %v3046_v2  ;;  %3131 = vst.msk [vmem:[%s5593_s4 + $0x238] sm:$0xff] %vm2160_vm2, %v3047_v57  ;;  %v2965_v46 = vadd.f32 %v5126_v50, %v2860_v62  ;;  %v2966_v36 = vadd.f32 %v5128_v55, %v2861_v0  ;;  %v2967_v9 = vadd.f32 %v5130_v5, %v2862_v54 }
 0x2eb   : > { %v2968_v3 = vadd.f32 %v5124_v11, %v2863_v38  ;;  %v2969_v47 = vadd.f32 %v5126_v50, %v2864_v45  ;;  %v2970_v51 = vadd.f32 %v5128_v55, %v2865_v39  ;;  %v2971_v33 = vadd.f32 %v5130_v5, %v2866_v15  ;;  %3132 = vst [vmem:[%s5593_s4 + $0x240] sm:$0xff] %v3048_v26 }
 0x2ec   : > { %v3049_v61 = vmax.f32 %v2965_v46, 0.0  ;;  %v3050_v56 = vmax.f32 %v2966_v36, 0.0  ;;  %v3051_v49 = vmax.f32 %v2967_v9, 0.0  ;;  %v2867_v13 = vmul.f32 %v3788_v44, %v4978_v21  ;;  %v3789_v21 = vld [vmem:[#allocation2 + $0x288] sm:$0x3] }
 0x2ed   : > { %v3052_v25 = vmax.f32 %v2968_v3, 0.0  ;;  %v3053_v23 = vmax.f32 %v2969_v47, 0.0  ;;  %v3054_v18 = vmax.f32 %v2970_v51, 0.0  ;;  %v3055_v20 = vmax.f32 %v2971_v33, 0.0 }
 0x2ee   : > { %3133 = vst [vmem:[%s5593_s4 + $0x248] sm:$0xff] %v3049_v61  ;;  %3134 = vst [vmem:[%s5593_s4 + $0x250] sm:$0xff] %v3050_v56  ;;  %v2972_v10 = vadd.f32 %v5124_v11, %v2867_v13  ;;  %v2868_v4 = vmul.f32 %v3789_v21, %v4980_v32  ;;  %v2869_v63 = vmul.f32 %v3790_v41, %v4982_v16 }
 0x2ef   : > { %3135 = vst.msk [vmem:[%s5593_s4 + $0x258] sm:$0xff] %vm2160_vm2, %v3051_v49  ;;  %v2870_v14 = vmul.f32 %v3791_v19, %v4984_v34  ;;  %3136 = vst [vmem:[%s5593_s4 + $0x260] sm:$0xff] %v3052_v25 }
 0x2f0   : > { %3137 = vst [vmem:[%s5593_s4 + $0x268] sm:$0xff] %v3053_v23  ;;  %3138 = vst [vmem:[%s5593_s4 + $0x270] sm:$0xff] %v3054_v18  ;;  %v3056_v32 = vmax.f32 %v2972_v10, 0.0  ;;  %v2973_v16 = vadd.f32 %v5126_v50, %v2868_v4  ;;  %v2974_v34 = vadd.f32 %v5128_v55, %v2869_v63 }
 0x2f1   : > { %3139 = vst.msk [vmem:[%s5593_s4 + $0x278] sm:$0xff] %vm2160_vm2, %v3055_v20  ;;  %v2975_v11 = vadd.f32 %v5130_v5, %v2870_v14 }
 0x2f2   : > { %3140 = vst [vmem:[%s5593_s4 + $0x280] sm:$0x3] %v3056_v32  ;;  %v3057_v27 = vmax.f32 %v2973_v16, 0.0  ;;  %v3058_v22 = vmax.f32 %v2974_v34, 0.0 }
 0x2f3   : > { %v3059_v48 = vmax.f32 %v2975_v11, 0.0 }
 0x2f4   : > { %3141 = vst [vmem:[%s5593_s4 + $0x288] sm:$0x3] %v3057_v27  ;;  %3142 = vst [vmem:[%s5593_s4 + $0x290] sm:$0x3] %v3058_v22 }
 0x2f5   : > { %3143 = vst.msk [vmem:[%s5593_s4 + $0x298] sm:$0x3] %vm2241_vm3, %v3059_v48 }
 0x2f6 PF: > { %p11_p11 = scmp.ge.s32.totalorder %s3862_s19, 4   ;;  %s5847_s15 = smov %s3810_s16 }
 0x2f7   : > { %s5848_s16 = smov %s3871_s22  ;;  %s5849_s17 = smov %s3862_s19 }
 0x2f8   :  { %13 = sbr.rel (!%p11_p11) target bundleno = 2 (0x2), region = 101 }

// kernel: reduction_b_forward.7
= control target key start
LH: loop header
LB: loop body
LE: loop exit
PB: predicated region body
PF: predicated region fallthrough
CT: control target
= control target key end

     0   :  { %s1325_s15 = smov 0   ;;  %s1327_s16 = smov 0   ;;  %s1550_s0 = inlined_call_operand.vmem [shape: bf16[32,2048], index: 0, kind: input, shape index: {}]   ;;  %s1551_s1 = inlined_call_operand.vmem [shape: bf16[2048,192], index: 1, kind: input, shape index: {}]   ;;  %s1552_s2 = inlined_call_operand.vmem [shape: f32[1,192], index: 2, kind: input, shape index: {}]   ;;  %s1553_s3 = inlined_call_operand.vmem [shape: f32[1,192], index: 3, kind: input, shape index: {}]   ;;  %s1554_s4 = inlined_call_operand.vmem [shape: f32[32,192], index: 4, kind: output, shape index: {}]  }
   0x1   :  { %s1329_s17 = smov 0  }
   0x2 LB: > { %s1341_s18 = sadd.s32 4294967295, %s1296_s17   ;;  %s1344_s19 = sadd.s32 1, %s1296_s17   ;;  %s1296_s17 = sphi %s1329_s17, %s1557_s17   ;;  %s1292_s16 = sphi %s1327_s16, %s1556_s16   ;;  %s1288_s15 = sphi %s1325_s15, %s1555_s15  }
   0x3   : > { %s18_s20 = ssub.s32 %s1296_s17, %s1344_s19  ;;  %s21_s21 = sadd.s32 1, %s1292_s16 }
   0x4   : > { %p19_p0 = scmp.eq.s32.totalorder %s18_s20, 0  ;;  %p28_p1 = scmp.ne.s32.totalorder %s1292_s16, %s1288_s15 }
   0x5   : > { %p29_p2 = scmp.eq.s32.totalorder %s1296_s17, 0  ;;  %p1041_p4 = scmp.ge.s32.totalorder %s1296_s17, 4 }
   0x6   : > { %s1353_s22 = scalar_select %p19_p0, %s1292_s16, %s21_s21  }
   0x7   : > { %p30_p3 = por %p29_p2, %p28_p1  ;;  %149 = sbr.rel (%p1041_p4) target bundleno = 22 (0x16), region = 24 }
   0xe   : > { %152 = sbr.rel (!%p30_p3) target bundleno = 22 (0x16), region = 28  ;;  %s154_s23 = sand.u32 (%p30_p3), 1, %s1292_s16  }
   0xf   : > { %s1126_s24 = sshll.u32 (%p30_p3), %s1296_s17, 4  ;;  %s1042_s25 = sshll.u32 (%p30_p3), %s154_s23, 6 }
  0x10   : > { %s159_s28 = scalar_lea.vmem (%p30_p3), %s1550_s0, %s1126_s24  ;;  %s156_s29 = scalar_lea.vmem (%p30_p3), [#allocation3], %s1042_s25 }
  0x11   : > { %v172_v0 = vld [vmem:[%s159_s28] sm:$0xff] (%p30_p3)  ;;  %v174_v1 = vld [vmem:[%s159_s28 + $0x8] sm:$0xff] (%p30_p3) }
  0x12   : > { %v176_v2 = vld [vmem:[%s159_s28 + $0x40] sm:$0xff] (%p30_p3)  ;;  %173 = vst [vmem:[%s156_s29] sm:$0xff] (%p30_p3), %v172_v0  ;;  %175 = vst [vmem:[%s156_s29 + $0x8] sm:$0xff] (%p30_p3), %v174_v1  ;;  %v178_v3 = vld [vmem:[%s159_s28 + $0x48] sm:$0xff] (%p30_p3) }
  0x13   : > { %177 = vst [vmem:[%s156_s29 + $0x10] sm:$0xff] (%p30_p3), %v176_v2  ;;  %v180_v4 = vld [vmem:[%s159_s28 + $0x80] sm:$0xff] (%p30_p3)  ;;  %v182_v5 = vld [vmem:[%s159_s28 + $0x88] sm:$0xff] (%p30_p3)  ;;  %179 = vst [vmem:[%s156_s29 + $0x18] sm:$0xff] (%p30_p3), %v178_v3 }
  0x14   : > { %181 = vst [vmem:[%s156_s29 + $0x20] sm:$0xff] (%p30_p3), %v180_v4  ;;  %183 = vst [vmem:[%s156_s29 + $0x28] sm:$0xff] (%p30_p3), %v182_v5  ;;  %v184_v6 = vld [vmem:[%s159_s28 + $0xc0] sm:$0xff] (%p30_p3)  ;;  %v186_v7 = vld [vmem:[%s159_s28 + $0xc8] sm:$0xff] (%p30_p3) }
  0x15   : > { %185 = vst [vmem:[%s156_s29 + $0x30] sm:$0xff] %v184_v6  ;;  %187 = vst [vmem:[%s156_s29 + $0x38] sm:$0xff] %v186_v7 }
  0x16 PF: > { %p1045_p5 = scmp.ge.s32.totalorder %s1296_s17, 1  ;;  %p202_p6 = scmp.lt.s32.totalorder %s1296_s17, 5 }
  0x18   : > { %p203_p7 = pnand %p1045_p5, %p202_p6 }
  0x19   : > { %s209_s30 = sand.u32 (!%p203_p7), 1, %s1288_s15   ;;  %s1047_s5 = sshll.u32 (!%p203_p7), %s1341_s18, 6 }
  0x1a   : > { %206 = sbr.rel (%p203_p7) target bundleno = 407 (0x197), region = 55  ;;  %s1046_s6 = sshll.u32 (!%p203_p7), %s209_s30, 6 }
  0x1b   : > { %p237_p8 = scmp.lt.s32.totalorder (!%p203_p7), %s1047_s5, 255  ;;  %s1370_s11 = scalar_lea.vmem (!%p203_p7), [#allocation3], %s1046_s6 }
  0x1c   : > { %p1050_p9 = scmp.ne.s32.totalorder (!%p203_p7), %s1341_s18, 0 }
  0x21   : > { %s1559_s5 = smov (!%p237_p8, %s1047_s5), 255  ;;  %246 = sbr.rel (%p1050_p9) target bundleno = 40 (0x28), region = 63 }
  0x22   : > { %s1127_s7 = sshll.u32 %s1559_s5, 3  ;;  %vm248_vm0 = vcmask (!%p1050_p9), 523264   ;;  %v1298_v8 = vmov (!%p1050_p9), 0.0  }
  0x23   : > { %s1368_s10 = scalar_lea.vmem %s1551_s1, %s1127_s7  ;;  %247 = vst [vmem:[#allocation2] sm:$0xff] (!%p1050_p9), %v1298_v8  ;;  %250 = vst [vmem:[#allocation2 + $0x10] sm:$0xff] (!%p1050_p9), %v1298_v8 }
  0x24   : > { %252 = vst [vmem:[#allocation2 + $0x20] sm:$0xff] (!%p1050_p9), %v1298_v8  ;;  %254 = vst [vmem:[#allocation2 + $0x30] sm:$0xff] (!%p1050_p9), %v1298_v8 }
  0x25   : > { %249 = vst.msk [vmem:[#allocation2 + $0x8] sm:$0xff] (!%p1050_p9), %vm248_vm0, %v1298_v8  ;;  %251 = vst.msk [vmem:[#allocation2 + $0x18] sm:$0xff] (!%p1050_p9), %vm248_vm0, %v1298_v8 }
  0x26   : > { %253 = vst.msk [vmem:[#allocation2 + $0x28] sm:$0xff] (!%p1050_p9), %vm248_vm0, %v1298_v8  ;;  %255 = vst.msk [vmem:[#allocation2 + $0x38] sm:$0xff] (!%p1050_p9), %vm248_vm0, %v1298_v8 }
  0x28 PF: > { %v1162_v9 = vld [vmem:[%s1368_s10 + $0x4] ss:$8 sps:$4 sm:$0xff]   ;;  %v1166_v11 = vld [vmem:[%s1368_s10] ss:$8 sps:$4 sm:$0xff]   ;;  %v1168_v13 = vld [vmem:[%s1368_s10 + $0x14] ss:$8 sps:$4 sm:$0xff]  }
  0x29   : > { %v1164_v10 = vld [vmem:[%s1368_s10 + $0x104] ss:$8 sps:$4 sm:$0xff]   ;;  %696 = vmatprep.subr.bf16.mxu1 %v1162_v9  ;;  %v1167_v12 = vld [vmem:[%s1368_s10 + $0x100] ss:$8 sps:$4 sm:$0xff]   ;;  %v1170_v14 = vld [vmem:[%s1368_s10 + $0x114] ss:$8 sps:$4 sm:$0xff]  }
  0x2a   : > { %749 = vmatprep.subr.bf16.mxu0 %v1164_v10  ;;  %697 = vmatpush1.bf16.msra.mxu1 %v1166_v11  ;;  %v1172_v15 = vld [vmem:[%s1368_s10 + $0x10] ss:$8 sps:$4 sm:$0xff]   ;;  %v1174_v17 = vld [vmem:[%s1368_s10 + $0x24] ss:$8 sps:$4 sm:$0xff]   ;;  %v1178_v19 = vld [vmem:[%s1368_s10 + $0x20] ss:$8 sps:$4 sm:$0xff]  }
  0x2b   : > { %750 = vmatpush1.bf16.msra.mxu0 %v1167_v12  ;;  %698 = vmatprep.subr.bf16.mxu1 %v1168_v13  ;;  %v1173_v16 = vld [vmem:[%s1368_s10 + $0x110] ss:$8 sps:$4 sm:$0xff]   ;;  %v1176_v18 = vld [vmem:[%s1368_s10 + $0x124] ss:$8 sps:$4 sm:$0xff]   ;;  %v1179_v20 = vld [vmem:[%s1368_s10 + $0x120] ss:$8 sps:$4 sm:$0xff]  }
  0x2c   : > { %751 = vmatprep.subr.bf16.mxu0 %v1170_v14  ;;  %v1180_v21 = vld [vmem:[%s1368_s10 + $0x34] ss:$8 sps:$4 sm:$0xff]   ;;  %v1184_v23 = vld [vmem:[%s1368_s10 + $0x30] ss:$8 sps:$4 sm:$0xff]   ;;  %v1186_v25 = vld [vmem:[%s1368_s10 + $0x44] ss:$8 sps:$4 sm:$0xff]  }
  0x2d   : > { %v1182_v22 = vld [vmem:[%s1368_s10 + $0x134] ss:$8 sps:$4 sm:$0xff]   ;;  %v1185_v24 = vld [vmem:[%s1368_s10 + $0x130] ss:$8 sps:$4 sm:$0xff]   ;;  %v1188_v26 = vld [vmem:[%s1368_s10 + $0x144] ss:$8 sps:$4 sm:$0xff]  }
  0x2e   : > { %699 = vmatpush1.bf16.msra.mxu1 %v1172_v15  ;;  %v1190_v27 = vld [vmem:[%s1368_s10 + $0x40] ss:$8 sps:$4 sm:$0xff]   ;;  %v1192_v29 = vld [vmem:[%s1368_s10 + $0x54] ss:$8 sps:$4 sm:$0xff]   ;;  %v1196_v31 = vld [vmem:[%s1368_s10 + $0x50] ss:$8 sps:$4 sm:$0xff]  }
  0x2f   : > { %752 = vmatpush1.bf16.msra.mxu0 %v1173_v16  ;;  %700 = vmatprep.subr.bf16.mxu1 %v1174_v17  ;;  %v1191_v28 = vld [vmem:[%s1368_s10 + $0x140] ss:$8 sps:$4 sm:$0xff]   ;;  %v1194_v30 = vld [vmem:[%s1368_s10 + $0x154] ss:$8 sps:$4 sm:$0xff]   ;;  %v1197_v32 = vld [vmem:[%s1368_s10 + $0x150] ss:$8 sps:$4 sm:$0xff]  }
  0x30   : > { %753 = vmatprep.subr.bf16.mxu0 %v1176_v18  ;;  %v1198_v33 = vld [vmem:[%s1368_s10 + $0x64] ss:$8 sps:$4 sm:$0xff]   ;;  %v1202_v35 = vld [vmem:[%s1368_s10 + $0x60] ss:$8 sps:$4 sm:$0xff]   ;;  %v1204_v37 = vld [vmem:[%s1368_s10 + $0x74] ss:$8 sps:$4 sm:$0xff]  }
  0x31   : > { %v1200_v34 = vld [vmem:[%s1368_s10 + $0x164] ss:$8 sps:$4 sm:$0xff]   ;;  %v1203_v36 = vld [vmem:[%s1368_s10 + $0x160] ss:$8 sps:$4 sm:$0xff]   ;;  %v1206_v38 = vld [vmem:[%s1368_s10 + $0x174] ss:$8 sps:$4 sm:$0xff]  }
  0x32   : > { %701 = vmatpush1.bf16.msra.mxu1 %v1178_v19  ;;  %v1208_v39 = vld [vmem:[%s1368_s10 + $0x70] ss:$8 sps:$4 sm:$0xff]   ;;  %v1210_v41 = vld [vmem:[%s1368_s10 + $0x84] ss:$8 sps:$4 sm:$0xff]   ;;  %v1214_v43 = vld [vmem:[%s1368_s10 + $0x80] ss:$8 sps:$4 sm:$0xff]  }
  0x33   : > { %754 = vmatpush1.bf16.msra.mxu0 %v1179_v20  ;;  %702 = vmatprep.subr.bf16.mxu1 %v1180_v21  ;;  %v1209_v40 = vld [vmem:[%s1368_s10 + $0x170] ss:$8 sps:$4 sm:$0xff]   ;;  %v1212_v42 = vld [vmem:[%s1368_s10 + $0x184] ss:$8 sps:$4 sm:$0xff]   ;;  %v1215_v44 = vld [vmem:[%s1368_s10 + $0x180] ss:$8 sps:$4 sm:$0xff]  }
  0x34   : > { %755 = vmatprep.subr.bf16.mxu0 %v1182_v22  ;;  %v1216_v45 = vld [vmem:[%s1368_s10 + $0x94] ss:$8 sps:$4 sm:$0xff]   ;;  %v1220_v47 = vld [vmem:[%s1368_s10 + $0x90] ss:$8 sps:$4 sm:$0xff]   ;;  %v1222_v49 = vld [vmem:[%s1368_s10 + $0xa4] ss:$8 sps:$4 sm:$0xff]  }
  0x35   : > { %v1218_v46 = vld [vmem:[%s1368_s10 + $0x194] ss:$8 sps:$4 sm:$0xff]   ;;  %v1221_v48 = vld [vmem:[%s1368_s10 + $0x190] ss:$8 sps:$4 sm:$0xff]   ;;  %v1224_v50 = vld [vmem:[%s1368_s10 + $0x1a4] ss:$8 sps:$4 sm:$0xff]  }
  0x36   : > { %703 = vmatpush1.bf16.msra.mxu1 %v1184_v23  ;;  %v1226_v51 = vld [vmem:[%s1368_s10 + $0xa0] ss:$8 sps:$4 sm:$0xff]   ;;  %v1228_v53 = vld [vmem:[%s1368_s10 + $0xb4] ss:$8 sps:$4 sm:$0xff]   ;;  %v1232_v55 = vld [vmem:[%s1368_s10 + $0xb0] ss:$8 sps:$4 sm:$0xff]  }
  0x37   : > { %756 = vmatpush1.bf16.msra.mxu0 %v1185_v24  ;;  %704 = vmatprep.subr.bf16.mxu1 %v1186_v25  ;;  %v1227_v52 = vld [vmem:[%s1368_s10 + $0x1a0] ss:$8 sps:$4 sm:$0xff]   ;;  %v1230_v54 = vld [vmem:[%s1368_s10 + $0x1b4] ss:$8 sps:$4 sm:$0xff]   ;;  %v1233_v56 = vld [vmem:[%s1368_s10 + $0x1b0] ss:$8 sps:$4 sm:$0xff]  }
  0x38   : > { %757 = vmatprep.subr.bf16.mxu0 %v1188_v26  ;;  %v1234_v57 = vld [vmem:[%s1368_s10 + $0xc4] ss:$8 sps:$4 sm:$0xff]   ;;  %v1238_v61 = vld [vmem:[%s1368_s10 + $0xc0] ss:$8 sps:$4 sm:$0xff]   ;;  %v1240_v63 = vld [vmem:[%s1368_s10 + $0xd4] ss:$8 sps:$4 sm:$0xff]  }
  0x39   : > { %v1260_v58 = vld [vmem:[%s1370_s11 + $0x4] ss:$16 sps:$4 sm:$0xff]   ;;  %v1263_v60 = vld [vmem:[%s1370_s11 + $0xc] ss:$16 sps:$4 sm:$0xff]   ;;  %v1239_v62 = vld [vmem:[%s1368_s10 + $0x1c0] ss:$8 sps:$4 sm:$0xff]  }
  0x3a   : > { %705 = vmatpush1.bf16.msra.mxu1 %v1190_v27  ;;  %v1236_v59 = vld [vmem:[%s1368_s10 + $0x1c4] ss:$8 sps:$4 sm:$0xff]   ;;  %728 = vmatprep.mubr.bf16.mxu1 %v1260_v58  ;;  %v1242_v0 = vld [vmem:[%s1368_s10 + $0x1d4] ss:$8 sps:$4 sm:$0xff]   ;;  %v1244_v1 = vld [vmem:[%s1368_s10 + $0xd0] ss:$8 sps:$4 sm:$0xff]  }
  0x3b   : > { %758 = vmatpush1.bf16.msra.mxu0 %v1191_v28  ;;  %706 = vmatprep.subr.bf16.mxu1 %v1192_v29  ;;  %v1245_v2 = vld [vmem:[%s1368_s10 + $0x1d0] ss:$8 sps:$4 sm:$0xff]   ;;  %v1246_v3 = vld [vmem:[%s1368_s10 + $0xe4] ss:$8 sps:$4 sm:$0xff]   ;;  %v1250_v5 = vld [vmem:[%s1368_s10 + $0xe0] ss:$8 sps:$4 sm:$0xff]  }
  0x3c   : > { %759 = vmatprep.subr.bf16.mxu0 %v1194_v30  ;;  %781 = vmatprep.mubr.bf16.mxu0 %v1263_v60  ;;  %v1248_v4 = vld [vmem:[%s1368_s10 + $0x1e4] ss:$8 sps:$4 sm:$0xff]   ;;  %v1251_v6 = vld [vmem:[%s1368_s10 + $0x1e0] ss:$8 sps:$4 sm:$0xff]   ;;  %v1252_v7 = vld [vmem:[%s1368_s10 + $0xf4] ss:$8 sps:$4 sm:$0xff]  }
  0x3d   : > { %v1254_v8 = vld [vmem:[%s1368_s10 + $0x1f4] ss:$8 sps:$4 sm:$0xff]   ;;  %v1256_v9 = vld [vmem:[%s1368_s10 + $0xf0] ss:$8 sps:$4 sm:$0xff]   ;;  %v256_v18 = vld [vmem:[#allocation2] sm:$0xff]  ;;  %vm811_vm1 = vcmask 523264  }
  0x3e   : > { %707 = vmatpush1.bf16.msra.mxu1 %v1196_v31  ;;  %v1257_v10 = vld [vmem:[%s1368_s10 + $0x1f0] ss:$8 sps:$4 sm:$0xff]   ;;  %v1264_v13 = vld [vmem:[%s1370_s11 + $0x24] ss:$16 sps:$4 sm:$0xff]   ;;  %v1266_v14 = vld [vmem:[%s1370_s11 + $0x2c] ss:$16 sps:$4 sm:$0xff]  }
  0x3f   : > { %760 = vmatpush1.bf16.msra.mxu0 %v1197_v32  ;;  %708 = vmatprep.subr.bf16.mxu1 %v1198_v33  ;;  %v1258_v11 = vld [vmem:[%s1370_s11] ss:$16 sps:$4 sm:$0xff]   ;;  %v1261_v12 = vld [vmem:[%s1370_s11 + $0x8] ss:$16 sps:$4 sm:$0xff]   ;;  %p1123_p10 = scmp.ne.s32.totalorder %s1341_s18, 3 }
  0x40   : > { %761 = vmatprep.subr.bf16.mxu0 %v1200_v34  ;;  %v1268_v15 = vld [vmem:[%s1370_s11 + $0x20] ss:$16 sps:$4 sm:$0xff]   ;;  %v1269_v16 = vld [vmem:[%s1370_s11 + $0x28] ss:$16 sps:$4 sm:$0xff]  }
  0x41   : > { %v257_v22 = vld [vmem:[#allocation2 + $0x8] sm:$0xff]  ;;  %v258_v26 = vld [vmem:[#allocation2 + $0x10] sm:$0xff]  ;;  %v259_v31 = vld [vmem:[#allocation2 + $0x18] sm:$0xff] }
  0x42   : > { %709 = vmatpush1.bf16.msra.mxu1 %v1202_v35 }
  0x43   : > { %762 = vmatpush1.bf16.msra.mxu0 %v1203_v36  ;;  %710 = vmatprep.subr.bf16.mxu1 %v1204_v37 }
  0x44   : > { %763 = vmatprep.subr.bf16.mxu0 %v1206_v38  ;;  %v260_v38 = vld [vmem:[#allocation2 + $0x20] sm:$0xff] }
  0x46   : > { %711 = vmatpush1.bf16.msra.mxu1 %v1208_v39 }
  0x47   : > { %764 = vmatpush1.bf16.msra.mxu0 %v1209_v40  ;;  %712 = vmatprep.subr.bf16.mxu1 %v1210_v41 }
  0x48   : > { %765 = vmatprep.subr.bf16.mxu0 %v1212_v42  ;;  %v261_v42 = vld [vmem:[#allocation2 + $0x28] sm:$0xff] }
  0x4a   : > { %713 = vmatpush1.bf16.msra.mxu1 %v1214_v43 }
  0x4b   : > { %766 = vmatpush1.bf16.msra.mxu0 %v1215_v44  ;;  %714 = vmatprep.subr.bf16.mxu1 %v1216_v45 }
  0x4c   : > { %767 = vmatprep.subr.bf16.mxu0 %v1218_v46  ;;  %v262_v46 = vld [vmem:[#allocation2 + $0x30] sm:$0xff] }
  0x4e   : > { %715 = vmatpush1.bf16.msra.mxu1 %v1220_v47 }
  0x4f   : > { %768 = vmatpush1.bf16.msra.mxu0 %v1221_v48  ;;  %716 = vmatprep.subr.bf16.mxu1 %v1222_v49 }
  0x50   : > { %769 = vmatprep.subr.bf16.mxu0 %v1224_v50 }
  0x52   : > { %717 = vmatpush1.bf16.msra.mxu1 %v1226_v51  ;;  %v263_v51 = vld [vmem:[#allocation2 + $0x38] sm:$0xff] }
  0x53   : > { %770 = vmatpush1.bf16.msra.mxu0 %v1227_v52  ;;  %718 = vmatprep.subr.bf16.mxu1 %v1228_v53 }
  0x54   : > { %771 = vmatprep.subr.bf16.mxu0 %v1230_v54 }
  0x56   : > { %719 = vmatpush1.bf16.msra.mxu1 %v1232_v55 }
  0x57   : > { %772 = vmatpush1.bf16.msra.mxu0 %v1233_v56  ;;  %720 = vmatprep.subr.bf16.mxu1 %v1234_v57 }
  0x58   : > { %773 = vmatprep.subr.bf16.mxu0 %v1236_v59 }
  0x5a   : > { %721 = vmatpush1.bf16.msra.mxu1 %v1238_v61 }
  0x5b   : > { %774 = vmatpush1.bf16.msra.mxu0 %v1239_v62  ;;  %722 = vmatprep.subr.bf16.mxu1 %v1240_v63 }
  0x5c   : > { %775 = vmatprep.subr.bf16.mxu0 %v1242_v0 }
  0x5e   : > { %723 = vmatpush1.bf16.msra.mxu1 %v1244_v1 }
  0x5f   : > { %776 = vmatpush1.bf16.msra.mxu0 %v1245_v2  ;;  %724 = vmatprep.subr.bf16.mxu1 %v1246_v3 }
  0x60   : > { %777 = vmatprep.subr.bf16.mxu0 %v1248_v4 }
  0x62   : > { %725 = vmatpush1.bf16.msra.mxu1 %v1250_v5 }
  0x63   : > { %778 = vmatpush1.bf16.msra.mxu0 %v1251_v6  ;;  %726 = vmatprep.subr.bf16.mxu1 %v1252_v7 }
  0x64   : > { %779 = vmatprep.subr.bf16.mxu0 %v1254_v8 }
  0x66   : > { %727 = vmatpush1.bf16.msra.mxu1 %v1256_v9 }
  0x67   : > { %780 = vmatpush1.bf16.msra.mxu0 %v1257_v10 }
  0x69   : > { %729 = vmatmul.mubr.bf16.vlgmr.msra.gmra.mrb[0].mxu1 %v1258_v11 }
  0x6a   : > { %782 = vmatmul.mubr.bf16.vlgmr.msra.gmra.mrb[0].mxu0 %v1261_v12  ;;  %738 = vmatprep.mubr.bf16.mxu1 %v1264_v13 }
  0x6b   : > { %791 = vmatprep.mubr.bf16.mxu0 %v1266_v14 }
  0x71   : > { %739 = vmatmul.mubr.bf16.gmra.mrb[4].mxu1 %v1268_v15 }
  0x72   : > { %792 = vmatmul.mubr.bf16.gmra.mrb[4].mxu0 %v1269_v16 }
 0x13c   : > { %v730_v17 = vpop.f32.mrb[0].mxu1 }
 0x13d   : > { %v783_v19 = vpop.f32.mrb[0].mxu0  ;;  %v732_v21 = vpop.f32.mrb[1].mxu1 }
 0x13e   : > { %v784_v20 = vadd.f32 %v783_v19, %v730_v17  ;;  %v785_v23 = vpop.f32.mrb[1].mxu0  ;;  %v734_v25 = vpop.f32.mrb[2].mxu1 }
 0x13f   : > { %v786_v24 = vadd.f32 %v785_v23, %v732_v21  ;;  %v787_v27 = vpop.f32.mrb[2].mxu0  ;;  %v736_v30 = vpop.f32.mrb[3].mxu1 }
 0x140   : > { %v802_v28 = vadd.f32 %v784_v20, %v256_v18  ;;  %v788_v29 = vadd.f32 %v787_v27, %v734_v25  ;;  %v789_v32 = vpop.f32.mrb[3].mxu0 }
 0x141   : > { %v803_v33 = vadd.f32 %v786_v24, %v257_v22  ;;  %v790_v34 = vadd.f32 %v789_v32, %v736_v30 }
 0x142   : > { %810 = vst [vmem:[#allocation2] sm:$0xff] %v802_v28  ;;  %v804_v35 = vadd.f32 %v788_v29, %v258_v26 }
 0x143   : > { %812 = vst.msk [vmem:[#allocation2 + $0x8] sm:$0xff] %vm811_vm1, %v803_v33  ;;  %v805_v36 = vadd.f32 %v790_v34, %v259_v31 }
 0x144   : > { %813 = vst [vmem:[#allocation2 + $0x10] sm:$0xff] %v804_v35  ;;  %v740_v37 = vpop.f32.mrb[4].mxu1 }
 0x145   : > { %814 = vst.msk [vmem:[#allocation2 + $0x18] sm:$0xff] %vm811_vm1, %v805_v36  ;;  %v793_v39 = vpop.f32.mrb[4].mxu0  ;;  %v742_v41 = vpop.f32.mrb[5].mxu1 }
 0x146   : > { %v794_v40 = vadd.f32 %v793_v39, %v740_v37  ;;  %v795_v43 = vpop.f32.mrb[5].mxu0  ;;  %v744_v45 = vpop.f32.mrb[6].mxu1 }
 0x147   : > { %v796_v44 = vadd.f32 %v795_v43, %v742_v41  ;;  %v797_v47 = vpop.f32.mrb[6].mxu0  ;;  %v746_v50 = vpop.f32.mrb[7].mxu1  ;;  %822 = sbr.rel (%p1123_p10) target bundleno = 407 (0x197), region = 67 }
 0x148   : > { %v806_v48 = vadd.f32 %v794_v40, %v260_v38  ;;  %v798_v49 = vadd.f32 %v797_v47, %v744_v45  ;;  %v799_v52 = vpop.f32.mrb[7].mxu0 }
 0x149   : > { %v807_v53 = vadd.f32 %v796_v44, %v261_v42  ;;  %v800_v54 = vadd.f32 %v799_v52, %v746_v50  ;;  %v1450_v57 = vld [vmem:[#allocation2] sm:$0xff] (!%p1123_p10) }
 0x14a   : > { %815 = vst [vmem:[#allocation2 + $0x20] sm:$0xff] %v806_v48  ;;  %v808_v55 = vadd.f32 %v798_v49, %v262_v46  ;;  %v1452_v58 = vld [vmem:[#allocation2 + $0x8] sm:$0xff] (!%p1123_p10)  ;;  %v853_v1 = vmul.f32 (!%p1123_p10), %v1450_v57, %v1450_v57 }
 0x14b   : > { %816 = vst.msk [vmem:[#allocation2 + $0x28] sm:$0xff] %vm811_vm1, %v807_v53  ;;  %v809_v56 = vadd.f32 %v800_v54, %v263_v51  ;;  %v1454_v59 = vld [vmem:[#allocation2 + $0x10] sm:$0xff] (!%p1123_p10)  ;;  %v840_v0 = vsel (!%p1123_p10), %vm811_vm1, %v1452_v58, 0.0  ;;  %v854_v2 = vmul.f32 (!%p1123_p10), %v1452_v58, %v1452_v58 }
 0x14c   : > { %817 = vst [vmem:[#allocation2 + $0x30] sm:$0xff] %v808_v55  ;;  %v1456_v60 = vld [vmem:[#allocation2 + $0x18] sm:$0xff] (!%p1123_p10)  ;;  %v831_v63 = vadd.f32 (!%p1123_p10), %v1454_v59, %v1450_v57  ;;  %v855_v7 = vmul.f32 (!%p1123_p10), %v1454_v59, %v1454_v59 }
 0x14d   : > { %818 = vst.msk [vmem:[#allocation2 + $0x38] sm:$0xff] %vm811_vm1, %v809_v56  ;;  %v841_v5 = vsel (!%p1123_p10), %vm811_vm1, %v1456_v60, 0.0  ;;  %v856_v8 = vmul.f32 (!%p1123_p10), %v1456_v60, %v1456_v60  ;;  %v870_v19 = vsel (!%p1123_p10), %vm811_vm1, %v854_v2, 0.0 }
 0x14e   : > { %v842_v10 = vadd.f32 %v841_v5, %v840_v0  ;;  %v861_v16 = vadd.f32 %v855_v7, %v853_v1 }
 0x14f   : > { %v871_v20 = vsel %vm811_vm1, %v856_v8, 0.0 }
 0x150   : > { %v872_v22 = vadd.f32 %v871_v20, %v870_v19  ;;  %v893_v19 = vld [vmem:[%s1552_s2] sm:$0x3] }
 0x151   : > { %v1458_v61 = vld [vmem:[#allocation2 + $0x20] sm:$0xff] }
 0x152   : > { %v1460_v62 = vld [vmem:[#allocation2 + $0x28] sm:$0xff]  ;;  %v832_v9 = vadd.f32 %v831_v63, %v1458_v61  ;;  %v857_v12 = vmul.f32 %v1458_v61, %v1458_v61 }
 0x153   : > { %v1470_v3 = vld [vmem:[#allocation2 + $0x30] sm:$0xff]  ;;  %v843_v6 = vsel %vm811_vm1, %v1460_v62, 0.0  ;;  %v858_v13 = vmul.f32 %v1460_v62, %v1460_v62 }
 0x154   : > { %v1472_v4 = vld [vmem:[#allocation2 + $0x38] sm:$0xff]  ;;  %v859_v14 = vmul.f32 %v1470_v3, %v1470_v3  ;;  %v833_v17 = vadd.f32 %v832_v9, %v1470_v3  ;;  %v844_v18 = vadd.f32 %v843_v6, %v842_v10  ;;  %v862_v21 = vadd.f32 %v861_v16, %v857_v12 }
 0x155   : > { %v845_v11 = vsel %vm811_vm1, %v1472_v4, 0.0  ;;  %v860_v15 = vmul.f32 %v1472_v4, %v1472_v4  ;;  %v873_v23 = vsel %vm811_vm1, %v858_v13, 0.0  ;;  %v1299_v9 = vmov 1966171168  }
 0x156   : > { %v834_v24 = vrot.slane %v833_v17, 4  ;;  %v846_v25 = vadd.f32 %v845_v11, %v844_v18  ;;  %v863_v27 = vadd.f32 %v862_v21, %v859_v14  ;;  %v874_v28 = vadd.f32 %v873_v23, %v872_v22 }
 0x157   : > { %v875_v26 = vsel %vm811_vm1, %v860_v15, 0.0  ;;  %v902_v10 = vunpack.c.l.s4 %v1299_v9  ;;  %v904_v11 = vlaneseq }
 0x158   : > { %v835_v29 = vadd.f32 %v834_v24, %v833_v17  ;;  %v847_v30 = vrot.slane %v846_v25, 4  ;;  %v864_v31 = vrot.slane %v863_v27, 4  ;;  %v876_v32 = vadd.f32 %v875_v26, %v874_v28 }
 0x159   : > { %v903_v12 = vunpack.c.0.s8 %v902_v10  ;;  %v905_v13 = vshrl.u32 %v904_v11, 7 }
 0x15a   : > { %v836_v33 = vrot.slane %v835_v29, 2  ;;  %v848_v34 = vadd.f32 %v847_v30, %v846_v25  ;;  %v865_v35 = vadd.f32 %v864_v31, %v863_v27  ;;  %v877_v36 = vrot.slane %v876_v32, 4  ;;  %v917_v30 = vld [vmem:[%s1553_s3] sm:$0x3] }
 0x15b   : > { %v906_v15 = vsub.s32 %v903_v12, %v905_v13  ;;  %v921_v21 = vsub.s32 0, %v905_v13  ;;  %v925_v22 = vsub.s32 1, %v905_v13 }
 0x15c   : > { %v837_v37 = vadd.f32 %v836_v33, %v835_v29  ;;  %v849_v38 = vrot.slane %v848_v34, 2  ;;  %v866_v39 = vrot.slane %v865_v35, 2  ;;  %v878_v40 = vadd.f32 %v877_v36, %v876_v32 }
 0x15e   : > { %v838_v41 = vrot.slane %v837_v37, 1  ;;  %v850_v42 = vadd.f32 %v849_v38, %v848_v34  ;;  %v867_v43 = vadd.f32 %v866_v39, %v865_v35  ;;  %v879_v44 = vrot.slane %v878_v40, 2 }
 0x160   : > { %v839_v45 = vadd.f32 %v838_v41, %v837_v37  ;;  %v851_v46 = vrot.slane %v850_v42, 1  ;;  %v868_v47 = vrot.slane %v867_v43, 1  ;;  %v880_v48 = vadd.f32 %v879_v44, %v878_v40 }
 0x162   : > { %v852_v49 = vadd.f32 %v851_v46, %v850_v42  ;;  %v883_v50 = vmul.f32 0.03125, %v839_v45  ;;  %v869_v51 = vadd.f32 %v868_v47, %v867_v43  ;;  %v881_v52 = vrot.slane %v880_v48, 1 }
 0x164   : > { %v884_v53 = vmul.f32 0.03125, %v852_v49  ;;  %v887_v54 = vmul.f32 %v883_v50, %v883_v50  ;;  %v882_v55 = vadd.f32 %v881_v52, %v880_v48  ;;  %v885_v56 = vmul.f32 0.03125, %v869_v51 }
 0x166   : > { %v888_v63 = vmul.f32 %v884_v53, %v884_v53  ;;  %v886_v0 = vmul.f32 0.03125, %v882_v55  ;;  %v889_v1 = vsub.f32 %v885_v56, %v887_v54 }
 0x168   : > { %v890_v2 = vsub.f32 %v886_v0, %v888_v63  ;;  %v891_v5 = vmax.f32 %v889_v1, 0.0 }
 0x16a   : > { %v892_v6 = vmax.f32 %v890_v2, 0.0  ;;  %v894_v7 = vadd.f32 0.001, %v891_v5 }
 0x16c   : > { %v895_v8 = vadd.f32 0.001, %v892_v6  ;;  %1270 = vrsqrt.f32 %v894_v7 }
 0x16e   : > { %1272 = vrsqrt.f32 %v895_v8 }
 0x176   : > { %v1271_v14 = vpop.eup %1270 }
 0x178   : > { %v1273_v16 = vpop.eup %1272 }
 0x179   : > { %v900_v17 = vcombine.low %v1271_v14, %v1273_v16 }
 0x17b   : > { %v907_v18 = vrot.slane %v900_v17, %v906_v15 }
 0x17d   : > { %v914_v20 = vrot.slane %v907_v18, %v906_v15 }
 0x17f   : > { %v916_v23 = vmul.f32 %v914_v20, %v893_v19 }
 0x181   : > { %v922_v24 = vrot.slane %v916_v23, %v921_v21  ;;  %v926_v25 = vrot.slane %v916_v23, %v925_v22 }
 0x183   : > { %v929_v26 = vmul.f32 %v922_v24, %v883_v50  ;;  %v930_v27 = vmul.f32 %v926_v25, %v884_v53  ;;  %v950_v32 = vmul.f32 %v922_v24, %v1450_v57  ;;  %v951_v34 = vmul.f32 %v926_v25, %v1452_v58 }
 0x184   : > { %v952_v35 = vmul.f32 %v922_v24, %v1454_v59  ;;  %v953_v36 = vmul.f32 %v926_v25, %v1456_v60  ;;  %v954_v37 = vmul.f32 %v922_v24, %v1458_v61  ;;  %v955_v38 = vmul.f32 %v926_v25, %v1460_v62 }
 0x185   : > { %v933_v28 = vcombine.low %v929_v26, %v930_v27  ;;  %v956_v39 = vmul.f32 %v922_v24, %v1470_v3  ;;  %v957_v40 = vmul.f32 %v926_v25, %v1472_v4 }
 0x187   : > { %v940_v29 = vrot.slane %v933_v28, %v906_v15 }
 0x189   : > { %v947_v31 = vrot.slane %v940_v29, %v906_v15 }
 0x18b   : > { %v949_v33 = vsub.f32 %v917_v30, %v947_v31 }
 0x18d   : > { %v962_v41 = vrot.slane %v949_v33, %v921_v21  ;;  %v966_v42 = vrot.slane %v949_v33, %v925_v22 }
 0x18f   : > { %v969_v43 = vadd.f32 %v962_v41, %v950_v32  ;;  %v970_v44 = vadd.f32 %v966_v42, %v951_v34  ;;  %v971_v57 = vadd.f32 %v962_v41, %v952_v35  ;;  %v972_v45 = vadd.f32 %v966_v42, %v953_v36 }
 0x190   : > { %v973_v46 = vadd.f32 %v962_v41, %v954_v37  ;;  %v974_v58 = vadd.f32 %v966_v42, %v955_v38  ;;  %v975_v47 = vadd.f32 %v962_v41, %v956_v39  ;;  %v976_v59 = vadd.f32 %v966_v42, %v957_v40 }
 0x191   : > { %v977_v48 = vmax.f32 %v969_v43, 0.0  ;;  %v978_v60 = vmax.f32 %v970_v44, 0.0  ;;  %v979_v49 = vmax.f32 %v971_v57, 0.0  ;;  %v980_v61 = vmax.f32 %v972_v45, 0.0 }
 0x192   : > { %v981_v50 = vmax.f32 %v973_v46, 0.0  ;;  %v982_v62 = vmax.f32 %v974_v58, 0.0  ;;  %v983_v51 = vmax.f32 %v975_v47, 0.0  ;;  %v984_v3 = vmax.f32 %v976_v59, 0.0 }
 0x193   : > { %985 = vst [vmem:[%s1554_s4] sm:$0xff] %v977_v48  ;;  %986 = vst.msk [vmem:[%s1554_s4 + $0x8] sm:$0xff] %vm811_vm1, %v978_v60 }
 0x194   : > { %987 = vst [vmem:[%s1554_s4 + $0x10] sm:$0xff] %v979_v49  ;;  %988 = vst.msk [vmem:[%s1554_s4 + $0x18] sm:$0xff] %vm811_vm1, %v980_v61 }
 0x195   : > { %989 = vst [vmem:[%s1554_s4 + $0x20] sm:$0xff] %v981_v50  ;;  %990 = vst.msk [vmem:[%s1554_s4 + $0x28] sm:$0xff] %vm811_vm1, %v982_v62 }
 0x196   : > { %991 = vst [vmem:[%s1554_s4 + $0x30] sm:$0xff] %v983_v51  ;;  %992 = vst.msk [vmem:[%s1554_s4 + $0x38] sm:$0xff] %vm811_vm1, %v984_v3 }
 0x197 PF: > { %p11_p11 = scmp.ge.s32.totalorder %s1344_s19, 6   ;;  %s1555_s15 = smov %s1292_s16 }
 0x198   : > { %s1556_s16 = smov %s1353_s22  ;;  %s1557_s17 = smov %s1344_s19 }
 0x199   :  { %13 = sbr.rel (!%p11_p11) target bundleno = 2 (0x2), region = 101 }

// kernel: reduction_b_forward.8
= control target key start
LH: loop header
LB: loop body
LE: loop exit
PB: predicated region body
PF: predicated region fallthrough
CT: control target
= control target key end

     0   :  { %s2300_s15 = smov 0   ;;  %s2302_s16 = smov 0   ;;  %s3107_s0 = inlined_call_operand.vmem [shape: bf16[162,2048], index: 0, kind: input, shape index: {}]   ;;  %s3108_s1 = inlined_call_operand.vmem [shape: bf16[2048,256], index: 1, kind: input, shape index: {}]   ;;  %s3109_s2 = inlined_call_operand.vmem [shape: f32[1,256], index: 2, kind: input, shape index: {}]   ;;  %s3110_s3 = inlined_call_operand.vmem [shape: f32[1,256], index: 3, kind: input, shape index: {}]   ;;  %s3111_s4 = inlined_call_operand.vmem [shape: f32[162,256], index: 4, kind: output, shape index: {}]  }
   0x1   :  { %s2304_s17 = smov 0  }
   0x2 LB: > { %s2316_s18 = sadd.s32 4294967295, %s2271_s17   ;;  %s2319_s19 = sadd.s32 1, %s2271_s17   ;;  %s2271_s17 = sphi %s2304_s17, %s3141_s17   ;;  %s2267_s16 = sphi %s2302_s16, %s3140_s16   ;;  %s2263_s15 = sphi %s2300_s15, %s3139_s15  }
   0x3   : > { %s18_s20 = ssub.s32 %s2271_s17, %s2319_s19  ;;  %s21_s21 = sadd.s32 1, %s2267_s16 }
   0x4   : > { %p19_p0 = scmp.eq.s32.totalorder %s18_s20, 0  ;;  %p28_p1 = scmp.ne.s32.totalorder %s2267_s16, %s2263_s15 }
   0x5   : > { %p29_p2 = scmp.eq.s32.totalorder %s2271_s17, 0  ;;  %p1896_p4 = scmp.ge.s32.totalorder %s2271_s17, 4 }
   0x6   : > { %s2328_s22 = scalar_select %p19_p0, %s2267_s16, %s21_s21  }
   0x7   : > { %p30_p3 = por %p29_p2, %p28_p1  ;;  %149 = sbr.rel (%p1896_p4) target bundleno = 39 (0x27), region = 24 }
   0xe   : > { %152 = sbr.rel (!%p30_p3) target bundleno = 39 (0x27), region = 28  ;;  %s154_s23 = sand.u32 (%p30_p3), 1, %s2267_s16  }
   0xf   : > { %s2015_s24 = sshll.u32 (%p30_p3), %s2271_s17, 4  ;;  %s2057_s25 = smul.u32 (%p30_p3), 336, %s154_s23 }
  0x10   : > { %s2336_s28 = scalar_lea.vmem (%p30_p3), %s3107_s0, %s2015_s24 }
  0x11   : > { %v172_v0 = vld [vmem:[%s2336_s28] sm:$0xff] (%p30_p3)  ;;  %v174_v1 = vld [vmem:[%s2336_s28 + $0x8] sm:$0xff] (%p30_p3)  ;;  %s2344_s29 = scalar_lea.vmem (%p30_p3), [#allocation3], %s2057_s25 }
  0x12   : > { %v176_v2 = vld [vmem:[%s2336_s28 + $0x40] sm:$0xff] (%p30_p3)  ;;  %v178_v3 = vld [vmem:[%s2336_s28 + $0x48] sm:$0xff] (%p30_p3)  ;;  %173 = vst [vmem:[%s2344_s29] sm:$0xff] (%p30_p3), %v172_v0  ;;  %175 = vst [vmem:[%s2344_s29 + $0x8] sm:$0xff] (%p30_p3), %v174_v1 }
  0x13   : > { %v180_v4 = vld [vmem:[%s2336_s28 + $0x80] sm:$0xff] (%p30_p3)  ;;  %v182_v5 = vld [vmem:[%s2336_s28 + $0x88] sm:$0xff] (%p30_p3)  ;;  %177 = vst [vmem:[%s2344_s29 + $0x10] sm:$0xff] (%p30_p3), %v176_v2  ;;  %179 = vst [vmem:[%s2344_s29 + $0x18] sm:$0xff] (%p30_p3), %v178_v3 }
  0x14   : > { %181 = vst [vmem:[%s2344_s29 + $0x20] sm:$0xff] (%p30_p3), %v180_v4  ;;  %183 = vst [vmem:[%s2344_s29 + $0x28] sm:$0xff] (%p30_p3), %v182_v5  ;;  %v184_v6 = vld [vmem:[%s2336_s28 + $0xc0] sm:$0xff] (%p30_p3)  ;;  %v186_v7 = vld [vmem:[%s2336_s28 + $0xc8] sm:$0xff] (%p30_p3) }
  0x15   : > { %v188_v8 = vld [vmem:[%s2336_s28 + $0x100] sm:$0xff]  ;;  %185 = vst [vmem:[%s2344_s29 + $0x30] sm:$0xff] %v184_v6  ;;  %187 = vst [vmem:[%s2344_s29 + $0x38] sm:$0xff] %v186_v7  ;;  %v190_v9 = vld [vmem:[%s2336_s28 + $0x108] sm:$0xff] }
  0x16   : > { %189 = vst [vmem:[%s2344_s29 + $0x40] sm:$0xff] %v188_v8  ;;  %v192_v10 = vld [vmem:[%s2336_s28 + $0x140] sm:$0xff]  ;;  %v194_v11 = vld [vmem:[%s2336_s28 + $0x148] sm:$0xff]  ;;  %191 = vst [vmem:[%s2344_s29 + $0x48] sm:$0xff] %v190_v9 }
  0x17   : > { %193 = vst [vmem:[%s2344_s29 + $0x50] sm:$0xff] %v192_v10  ;;  %195 = vst [vmem:[%s2344_s29 + $0x58] sm:$0xff] %v194_v11  ;;  %v196_v12 = vld [vmem:[%s2336_s28 + $0x180] sm:$0xff]  ;;  %v198_v13 = vld [vmem:[%s2336_s28 + $0x188] sm:$0xff] }
  0x18   : > { %v200_v14 = vld [vmem:[%s2336_s28 + $0x1c0] sm:$0xff]  ;;  %197 = vst [vmem:[%s2344_s29 + $0x60] sm:$0xff] %v196_v12  ;;  %199 = vst [vmem:[%s2344_s29 + $0x68] sm:$0xff] %v198_v13  ;;  %v202_v15 = vld [vmem:[%s2336_s28 + $0x1c8] sm:$0xff] }
  0x19   : > { %201 = vst [vmem:[%s2344_s29 + $0x70] sm:$0xff] %v200_v14  ;;  %v204_v16 = vld [vmem:[%s2336_s28 + $0x200] sm:$0xff]  ;;  %v206_v17 = vld [vmem:[%s2336_s28 + $0x208] sm:$0xff]  ;;  %203 = vst [vmem:[%s2344_s29 + $0x78] sm:$0xff] %v202_v15 }
  0x1a   : > { %205 = vst [vmem:[%s2344_s29 + $0x80] sm:$0xff] %v204_v16  ;;  %207 = vst [vmem:[%s2344_s29 + $0x88] sm:$0xff] %v206_v17  ;;  %v208_v18 = vld [vmem:[%s2336_s28 + $0x240] sm:$0xff]  ;;  %v210_v19 = vld [vmem:[%s2336_s28 + $0x248] sm:$0xff] }
  0x1b   : > { %v212_v20 = vld [vmem:[%s2336_s28 + $0x280] sm:$0xff]  ;;  %209 = vst [vmem:[%s2344_s29 + $0x90] sm:$0xff] %v208_v18  ;;  %211 = vst [vmem:[%s2344_s29 + $0x98] sm:$0xff] %v210_v19  ;;  %v214_v21 = vld [vmem:[%s2336_s28 + $0x288] sm:$0xff] }
  0x1c   : > { %213 = vst [vmem:[%s2344_s29 + $0xa0] sm:$0xff] %v212_v20  ;;  %v216_v22 = vld [vmem:[%s2336_s28 + $0x2c0] sm:$0xff]  ;;  %v218_v23 = vld [vmem:[%s2336_s28 + $0x2c8] sm:$0xff]  ;;  %215 = vst [vmem:[%s2344_s29 + $0xa8] sm:$0xff] %v214_v21 }
  0x1d   : > { %217 = vst [vmem:[%s2344_s29 + $0xb0] sm:$0xff] %v216_v22  ;;  %219 = vst [vmem:[%s2344_s29 + $0xb8] sm:$0xff] %v218_v23  ;;  %v220_v24 = vld [vmem:[%s2336_s28 + $0x300] sm:$0xff]  ;;  %v222_v25 = vld [vmem:[%s2336_s28 + $0x308] sm:$0xff] }
  0x1e   : > { %v224_v26 = vld [vmem:[%s2336_s28 + $0x340] sm:$0xff]  ;;  %221 = vst [vmem:[%s2344_s29 + $0xc0] sm:$0xff] %v220_v24  ;;  %223 = vst [vmem:[%s2344_s29 + $0xc8] sm:$0xff] %v222_v25  ;;  %v226_v27 = vld [vmem:[%s2336_s28 + $0x348] sm:$0xff] }
  0x1f   : > { %225 = vst [vmem:[%s2344_s29 + $0xd0] sm:$0xff] %v224_v26  ;;  %v228_v28 = vld [vmem:[%s2336_s28 + $0x380] sm:$0xff]  ;;  %v230_v29 = vld [vmem:[%s2336_s28 + $0x388] sm:$0xff]  ;;  %227 = vst [vmem:[%s2344_s29 + $0xd8] sm:$0xff] %v226_v27 }
  0x20   : > { %229 = vst [vmem:[%s2344_s29 + $0xe0] sm:$0xff] %v228_v28  ;;  %231 = vst [vmem:[%s2344_s29 + $0xe8] sm:$0xff] %v230_v29  ;;  %v232_v30 = vld [vmem:[%s2336_s28 + $0x3c0] sm:$0xff]  ;;  %v234_v31 = vld [vmem:[%s2336_s28 + $0x3c8] sm:$0xff] }
  0x21   : > { %v236_v32 = vld [vmem:[%s2336_s28 + $0x400] sm:$0xff]  ;;  %233 = vst [vmem:[%s2344_s29 + $0xf0] sm:$0xff] %v232_v30  ;;  %235 = vst [vmem:[%s2344_s29 + $0xf8] sm:$0xff] %v234_v31  ;;  %v238_v33 = vld [vmem:[%s2336_s28 + $0x408] sm:$0xff] }
  0x22   : > { %237 = vst [vmem:[%s2344_s29 + $0x100] sm:$0xff] %v236_v32  ;;  %v240_v34 = vld [vmem:[%s2336_s28 + $0x440] sm:$0xff]  ;;  %v242_v35 = vld [vmem:[%s2336_s28 + $0x448] sm:$0xff]  ;;  %239 = vst [vmem:[%s2344_s29 + $0x108] sm:$0xff] %v238_v33 }
  0x23   : > { %241 = vst [vmem:[%s2344_s29 + $0x110] sm:$0xff] %v240_v34  ;;  %243 = vst [vmem:[%s2344_s29 + $0x118] sm:$0xff] %v242_v35  ;;  %v244_v36 = vld [vmem:[%s2336_s28 + $0x480] sm:$0xff]  ;;  %v246_v37 = vld [vmem:[%s2336_s28 + $0x488] sm:$0xff] }
  0x24   : > { %v248_v38 = vld [vmem:[%s2336_s28 + $0x4c0] sm:$0xff]  ;;  %245 = vst [vmem:[%s2344_s29 + $0x120] sm:$0xff] %v244_v36  ;;  %247 = vst [vmem:[%s2344_s29 + $0x128] sm:$0xff] %v246_v37  ;;  %v250_v39 = vld [vmem:[%s2336_s28 + $0x4c8] sm:$0xff] }
  0x25   : > { %249 = vst [vmem:[%s2344_s29 + $0x130] sm:$0xff] %v248_v38  ;;  %v252_v40 = vld [vmem:[%s2336_s28 + $0x500] sm:$0xff]  ;;  %v254_v41 = vld [vmem:[%s2336_s28 + $0x508] sm:$0xff]  ;;  %251 = vst [vmem:[%s2344_s29 + $0x138] sm:$0xff] %v250_v39 }
  0x26   : > { %253 = vst [vmem:[%s2344_s29 + $0x140] sm:$0xff] %v252_v40  ;;  %255 = vst [vmem:[%s2344_s29 + $0x148] sm:$0xff] %v254_v41 }
  0x27 PF: > { %p1899_p5 = scmp.ge.s32.totalorder %s2271_s17, 1  ;;  %p270_p6 = scmp.lt.s32.totalorder %s2271_s17, 5 }
  0x29   : > { %p271_p7 = pnand %p1899_p5, %p270_p6 }
  0x2a   : > { %s277_s30 = sand.u32 (!%p271_p7), 1, %s2263_s15   ;;  %s1900_s5 = sshll.u32 (!%p271_p7), %s2316_s18, 6 }
  0x2b   : > { %274 = sbr.rel (%p271_p7) target bundleno = 571 (0x23b), region = 55  ;;  %p305_p8 = scmp.lt.s32.totalorder (!%p271_p7), %s1900_s5, 255 }
  0x2c   : > { %s2058_s6 = smul.u32 (!%p271_p7), 336, %s277_s30  ;;  %p1903_p9 = scmp.ne.s32.totalorder (!%p271_p7), %s2316_s18, 0 }
  0x2e   : > { %s2433_s11 = scalar_lea.vmem (!%p271_p7), [#allocation3], %s2058_s6 }
  0x32   : > { %s3143_s5 = smov (!%p305_p8, %s1900_s5), 255  ;;  %314 = sbr.rel (%p1903_p9) target bundleno = 73 (0x49), region = 63 }
  0x33   : > { %s2016_s7 = sshll.u32 %s3143_s5, 3  ;;  %v2273_v42 = vmov (!%p1903_p9), 0.0  }
  0x34   : > { %s2431_s10 = scalar_lea.vmem %s3108_s1, %s2016_s7  ;;  %315 = vst [vmem:[#allocation2] sm:$0xff] (!%p1903_p9), %v2273_v42  ;;  %316 = vst [vmem:[#allocation2 + $0x8] sm:$0xff] (!%p1903_p9), %v2273_v42 }
  0x35   : > { %317 = vst [vmem:[#allocation2 + $0x10] sm:$0xff] (!%p1903_p9), %v2273_v42  ;;  %318 = vst [vmem:[#allocation2 + $0x18] sm:$0xff] (!%p1903_p9), %v2273_v42 }
  0x36   : > { %319 = vst [vmem:[#allocation2 + $0x20] sm:$0xff] (!%p1903_p9), %v2273_v42  ;;  %320 = vst [vmem:[#allocation2 + $0x28] sm:$0xff] (!%p1903_p9), %v2273_v42 }
  0x37   : > { %321 = vst [vmem:[#allocation2 + $0x30] sm:$0xff] (!%p1903_p9), %v2273_v42  ;;  %322 = vst [vmem:[#allocation2 + $0x38] sm:$0xff] (!%p1903_p9), %v2273_v42 }
  0x38   : > { %323 = vst [vmem:[#allocation2 + $0x40] sm:$0xff] (!%p1903_p9), %v2273_v42  ;;  %324 = vst [vmem:[#allocation2 + $0x48] sm:$0xff] (!%p1903_p9), %v2273_v42 }
  0x39   : > { %325 = vst [vmem:[#allocation2 + $0x50] sm:$0xff] %v2273_v42  ;;  %326 = vst [vmem:[#allocation2 + $0x58] sm:$0xff] %v2273_v42 }
  0x3a   : > { %327 = vst [vmem:[#allocation2 + $0x60] sm:$0xff] %v2273_v42  ;;  %328 = vst [vmem:[#allocation2 + $0x68] sm:$0xff] %v2273_v42 }
  0x3b   : > { %329 = vst [vmem:[#allocation2 + $0x70] sm:$0xff] %v2273_v42  ;;  %330 = vst [vmem:[#allocation2 + $0x78] sm:$0xff] %v2273_v42 }
  0x3c   : > { %331 = vst [vmem:[#allocation2 + $0x80] sm:$0xff] %v2273_v42  ;;  %332 = vst [vmem:[#allocation2 + $0x88] sm:$0xff] %v2273_v42 }
  0x3d   : > { %333 = vst [vmem:[#allocation2 + $0x90] sm:$0xff] %v2273_v42  ;;  %334 = vst [vmem:[#allocation2 + $0x98] sm:$0xff] %v2273_v42 }
  0x3e   : > { %335 = vst [vmem:[#allocation2 + $0xa0] sm:$0xff] %v2273_v42  ;;  %336 = vst [vmem:[#allocation2 + $0xa8] sm:$0xff] %v2273_v42 }
  0x3f   : > { %337 = vst [vmem:[#allocation2 + $0xb0] sm:$0xff] %v2273_v42  ;;  %338 = vst [vmem:[#allocation2 + $0xb8] sm:$0xff] %v2273_v42 }
  0x40   : > { %339 = vst [vmem:[#allocation2 + $0xc0] sm:$0xff] %v2273_v42  ;;  %340 = vst [vmem:[#allocation2 + $0xc8] sm:$0xff] %v2273_v42 }
  0x41   : > { %341 = vst [vmem:[#allocation2 + $0xd0] sm:$0xff] %v2273_v42  ;;  %342 = vst [vmem:[#allocation2 + $0xd8] sm:$0xff] %v2273_v42 }
  0x42   : > { %343 = vst [vmem:[#allocation2 + $0xe0] sm:$0xff] %v2273_v42  ;;  %344 = vst [vmem:[#allocation2 + $0xe8] sm:$0xff] %v2273_v42 }
  0x43   : > { %345 = vst [vmem:[#allocation2 + $0xf0] sm:$0xff] %v2273_v42  ;;  %346 = vst [vmem:[#allocation2 + $0xf8] sm:$0xff] %v2273_v42 }
  0x44   : > { %347 = vst [vmem:[#allocation2 + $0x100] sm:$0xff] %v2273_v42  ;;  %348 = vst [vmem:[#allocation2 + $0x108] sm:$0xff] %v2273_v42 }
  0x45   : > { %349 = vst [vmem:[#allocation2 + $0x110] sm:$0xff] %v2273_v42  ;;  %350 = vst [vmem:[#allocation2 + $0x118] sm:$0xff] %v2273_v42 }
  0x46   : > { %351 = vst [vmem:[#allocation2 + $0x120] sm:$0xff] %v2273_v42  ;;  %352 = vst [vmem:[#allocation2 + $0x128] sm:$0xff] %v2273_v42 }
  0x47   : > { %353 = vst [vmem:[#allocation2 + $0x130] sm:$0xff] %v2273_v42  ;;  %354 = vst [vmem:[#allocation2 + $0x138] sm:$0xff] %v2273_v42 }
  0x48   : > { %355 = vst [vmem:[#allocation2 + $0x140] sm:$0x3] %v2273_v42  ;;  %356 = vst [vmem:[#allocation2 + $0x148] sm:$0x3] %v2273_v42 }
  0x49 PF: > { %v2085_v43 = vld [vmem:[%s2431_s10 + $0x4] ss:$8 sps:$4 sm:$0xff]   ;;  %v2089_v45 = vld [vmem:[%s2431_s10] ss:$8 sps:$4 sm:$0xff]   ;;  %v2091_v47 = vld [vmem:[%s2431_s10 + $0x14] ss:$8 sps:$4 sm:$0xff]  }
  0x4a   : > { %v2087_v44 = vld [vmem:[%s2431_s10 + $0x104] ss:$8 sps:$4 sm:$0xff]   ;;  %1039 = vmatprep.subr.bf16.mxu1 %v2085_v43  ;;  %v2090_v46 = vld [vmem:[%s2431_s10 + $0x100] ss:$8 sps:$4 sm:$0xff]   ;;  %v2093_v48 = vld [vmem:[%s2431_s10 + $0x114] ss:$8 sps:$4 sm:$0xff]  }
  0x4b   : > { %1180 = vmatprep.subr.bf16.mxu0 %v2087_v44  ;;  %1040 = vmatpush1.bf16.msra.mxu1 %v2089_v45  ;;  %v2095_v49 = vld [vmem:[%s2431_s10 + $0x10] ss:$8 sps:$4 sm:$0xff]   ;;  %v2097_v51 = vld [vmem:[%s2431_s10 + $0x24] ss:$8 sps:$4 sm:$0xff]   ;;  %v2101_v53 = vld [vmem:[%s2431_s10 + $0x20] ss:$8 sps:$4 sm:$0xff]  }
  0x4c   : > { %1181 = vmatpush1.bf16.msra.mxu0 %v2090_v46  ;;  %1041 = vmatprep.subr.bf16.mxu1 %v2091_v47  ;;  %v2096_v50 = vld [vmem:[%s2431_s10 + $0x110] ss:$8 sps:$4 sm:$0xff]   ;;  %v2099_v52 = vld [vmem:[%s2431_s10 + $0x124] ss:$8 sps:$4 sm:$0xff]   ;;  %v2102_v54 = vld [vmem:[%s2431_s10 + $0x120] ss:$8 sps:$4 sm:$0xff]  }
  0x4d   : > { %1182 = vmatprep.subr.bf16.mxu0 %v2093_v48  ;;  %v2103_v55 = vld [vmem:[%s2431_s10 + $0x34] ss:$8 sps:$4 sm:$0xff]   ;;  %v2107_v57 = vld [vmem:[%s2431_s10 + $0x30] ss:$8 sps:$4 sm:$0xff]   ;;  %v2109_v59 = vld [vmem:[%s2431_s10 + $0x44] ss:$8 sps:$4 sm:$0xff]  }
  0x4e   : > { %v2105_v56 = vld [vmem:[%s2431_s10 + $0x134] ss:$8 sps:$4 sm:$0xff]   ;;  %v2108_v58 = vld [vmem:[%s2431_s10 + $0x130] ss:$8 sps:$4 sm:$0xff]   ;;  %v2111_v60 = vld [vmem:[%s2431_s10 + $0x144] ss:$8 sps:$4 sm:$0xff]  }
  0x4f   : > { %1042 = vmatpush1.bf16.msra.mxu1 %v2095_v49  ;;  %v2113_v61 = vld [vmem:[%s2431_s10 + $0x40] ss:$8 sps:$4 sm:$0xff]   ;;  %v2115_v63 = vld [vmem:[%s2431_s10 + $0x54] ss:$8 sps:$4 sm:$0xff]   ;;  %v2119_v1 = vld [vmem:[%s2431_s10 + $0x50] ss:$8 sps:$4 sm:$0xff]  }
  0x50   : > { %1183 = vmatpush1.bf16.msra.mxu0 %v2096_v50  ;;  %1043 = vmatprep.subr.bf16.mxu1 %v2097_v51  ;;  %v2114_v62 = vld [vmem:[%s2431_s10 + $0x140] ss:$8 sps:$4 sm:$0xff]   ;;  %v2117_v0 = vld [vmem:[%s2431_s10 + $0x154] ss:$8 sps:$4 sm:$0xff]   ;;  %v2120_v2 = vld [vmem:[%s2431_s10 + $0x150] ss:$8 sps:$4 sm:$0xff]  }
  0x51   : > { %1184 = vmatprep.subr.bf16.mxu0 %v2099_v52  ;;  %v2121_v3 = vld [vmem:[%s2431_s10 + $0x64] ss:$8 sps:$4 sm:$0xff]   ;;  %v2125_v5 = vld [vmem:[%s2431_s10 + $0x60] ss:$8 sps:$4 sm:$0xff]   ;;  %v2127_v7 = vld [vmem:[%s2431_s10 + $0x74] ss:$8 sps:$4 sm:$0xff]  }
  0x52   : > { %v2123_v4 = vld [vmem:[%s2431_s10 + $0x164] ss:$8 sps:$4 sm:$0xff]   ;;  %v2126_v6 = vld [vmem:[%s2431_s10 + $0x160] ss:$8 sps:$4 sm:$0xff]   ;;  %v2129_v8 = vld [vmem:[%s2431_s10 + $0x174] ss:$8 sps:$4 sm:$0xff]  }
  0x53   : > { %1044 = vmatpush1.bf16.msra.mxu1 %v2101_v53  ;;  %v2131_v9 = vld [vmem:[%s2431_s10 + $0x70] ss:$8 sps:$4 sm:$0xff]   ;;  %v2133_v11 = vld [vmem:[%s2431_s10 + $0x84] ss:$8 sps:$4 sm:$0xff]   ;;  %v2137_v13 = vld [vmem:[%s2431_s10 + $0x80] ss:$8 sps:$4 sm:$0xff]  }
  0x54   : > { %1185 = vmatpush1.bf16.msra.mxu0 %v2102_v54  ;;  %1045 = vmatprep.subr.bf16.mxu1 %v2103_v55  ;;  %v2132_v10 = vld [vmem:[%s2431_s10 + $0x170] ss:$8 sps:$4 sm:$0xff]   ;;  %v2135_v12 = vld [vmem:[%s2431_s10 + $0x184] ss:$8 sps:$4 sm:$0xff]   ;;  %v2138_v14 = vld [vmem:[%s2431_s10 + $0x180] ss:$8 sps:$4 sm:$0xff]  }
  0x55   : > { %1186 = vmatprep.subr.bf16.mxu0 %v2105_v56  ;;  %v2139_v15 = vld [vmem:[%s2431_s10 + $0x94] ss:$8 sps:$4 sm:$0xff]   ;;  %v2143_v17 = vld [vmem:[%s2431_s10 + $0x90] ss:$8 sps:$4 sm:$0xff]   ;;  %v2145_v19 = vld [vmem:[%s2431_s10 + $0xa4] ss:$8 sps:$4 sm:$0xff]  }
  0x56   : > { %v2141_v16 = vld [vmem:[%s2431_s10 + $0x194] ss:$8 sps:$4 sm:$0xff]   ;;  %v2144_v18 = vld [vmem:[%s2431_s10 + $0x190] ss:$8 sps:$4 sm:$0xff]   ;;  %v2147_v20 = vld [vmem:[%s2431_s10 + $0x1a4] ss:$8 sps:$4 sm:$0xff]  }
  0x57   : > { %1046 = vmatpush1.bf16.msra.mxu1 %v2107_v57  ;;  %v2149_v21 = vld [vmem:[%s2431_s10 + $0xa0] ss:$8 sps:$4 sm:$0xff]   ;;  %v2151_v23 = vld [vmem:[%s2431_s10 + $0xb4] ss:$8 sps:$4 sm:$0xff]   ;;  %v2155_v25 = vld [vmem:[%s2431_s10 + $0xb0] ss:$8 sps:$4 sm:$0xff]  }
  0x58   : > { %1187 = vmatpush1.bf16.msra.mxu0 %v2108_v58  ;;  %1047 = vmatprep.subr.bf16.mxu1 %v2109_v59  ;;  %v2150_v22 = vld [vmem:[%s2431_s10 + $0x1a0] ss:$8 sps:$4 sm:$0xff]   ;;  %v2153_v24 = vld [vmem:[%s2431_s10 + $0x1b4] ss:$8 sps:$4 sm:$0xff]   ;;  %v2156_v26 = vld [vmem:[%s2431_s10 + $0x1b0] ss:$8 sps:$4 sm:$0xff]  }
  0x59   : > { %1188 = vmatprep.subr.bf16.mxu0 %v2111_v60  ;;  %v2157_v27 = vld [vmem:[%s2431_s10 + $0xc4] ss:$8 sps:$4 sm:$0xff]   ;;  %v2161_v31 = vld [vmem:[%s2431_s10 + $0xc0] ss:$8 sps:$4 sm:$0xff]   ;;  %v2163_v33 = vld [vmem:[%s2431_s10 + $0xd4] ss:$8 sps:$4 sm:$0xff]  }
  0x5a   : > { %v2183_v28 = vld [vmem:[%s2433_s11 + $0x4] ss:$16 sps:$4 sm:$0xff]   ;;  %v2186_v30 = vld [vmem:[%s2433_s11 + $0xc] ss:$16 sps:$4 sm:$0xff]   ;;  %v2162_v32 = vld [vmem:[%s2431_s10 + $0x1c0] ss:$8 sps:$4 sm:$0xff]  }
  0x5b   : > { %1048 = vmatpush1.bf16.msra.mxu1 %v2113_v61  ;;  %v2159_v29 = vld [vmem:[%s2431_s10 + $0x1c4] ss:$8 sps:$4 sm:$0xff]   ;;  %1071 = vmatprep.mubr.bf16.mxu1 %v2183_v28  ;;  %v2165_v34 = vld [vmem:[%s2431_s10 + $0x1d4] ss:$8 sps:$4 sm:$0xff]   ;;  %v2167_v35 = vld [vmem:[%s2431_s10 + $0xd0] ss:$8 sps:$4 sm:$0xff]  }
  0x5c   : > { %1189 = vmatpush1.bf16.msra.mxu0 %v2114_v62  ;;  %1049 = vmatprep.subr.bf16.mxu1 %v2115_v63  ;;  %v2168_v36 = vld [vmem:[%s2431_s10 + $0x1d0] ss:$8 sps:$4 sm:$0xff]   ;;  %v2169_v37 = vld [vmem:[%s2431_s10 + $0xe4] ss:$8 sps:$4 sm:$0xff]   ;;  %v2173_v39 = vld [vmem:[%s2431_s10 + $0xe0] ss:$8 sps:$4 sm:$0xff]  }
  0x5d   : > { %1190 = vmatprep.subr.bf16.mxu0 %v2117_v0  ;;  %1212 = vmatprep.mubr.bf16.mxu0 %v2186_v30  ;;  %v2171_v38 = vld [vmem:[%s2431_s10 + $0x1e4] ss:$8 sps:$4 sm:$0xff]   ;;  %v2174_v40 = vld [vmem:[%s2431_s10 + $0x1e0] ss:$8 sps:$4 sm:$0xff]   ;;  %v2175_v41 = vld [vmem:[%s2431_s10 + $0xf4] ss:$8 sps:$4 sm:$0xff]  }
  0x5e   : > { %v2177_v42 = vld [vmem:[%s2431_s10 + $0x1f4] ss:$8 sps:$4 sm:$0xff]   ;;  %v2179_v43 = vld [vmem:[%s2431_s10 + $0xf0] ss:$8 sps:$4 sm:$0xff]   ;;  %v358_v30 = vld [vmem:[#allocation2 + $0x8] sm:$0xff]  ;;  %p2012_p10 = scmp.ne.s32.totalorder %s2316_s18, 3 }
  0x5f   : > { %1050 = vmatpush1.bf16.msra.mxu1 %v2119_v1  ;;  %v2180_v44 = vld [vmem:[%s2431_s10 + $0x1f0] ss:$8 sps:$4 sm:$0xff]   ;;  %v2187_v47 = vld [vmem:[%s2433_s11 + $0x24] ss:$16 sps:$4 sm:$0xff]   ;;  %v2189_v48 = vld [vmem:[%s2433_s11 + $0x2c] ss:$16 sps:$4 sm:$0xff]  }
  0x60   : > { %1191 = vmatpush1.bf16.msra.mxu0 %v2120_v2  ;;  %1051 = vmatprep.subr.bf16.mxu1 %v2121_v3  ;;  %v2181_v45 = vld [vmem:[%s2433_s11] ss:$16 sps:$4 sm:$0xff]   ;;  %v2184_v46 = vld [vmem:[%s2433_s11 + $0x8] ss:$16 sps:$4 sm:$0xff]   ;;  %v2193_v51 = vld [vmem:[%s2433_s11 + $0x44] ss:$16 sps:$4 sm:$0xff]  }
  0x61   : > { %1192 = vmatprep.subr.bf16.mxu0 %v2123_v4  ;;  %v2191_v49 = vld [vmem:[%s2433_s11 + $0x20] ss:$16 sps:$4 sm:$0xff]   ;;  %v2192_v50 = vld [vmem:[%s2433_s11 + $0x28] ss:$16 sps:$4 sm:$0xff]   ;;  %v2195_v52 = vld [vmem:[%s2433_s11 + $0x4c] ss:$16 sps:$4 sm:$0xff]  }
  0x62   : > { %v2197_v53 = vld [vmem:[%s2433_s11 + $0x40] ss:$16 sps:$4 sm:$0xff]   ;;  %v2198_v54 = vld [vmem:[%s2433_s11 + $0x48] ss:$16 sps:$4 sm:$0xff]   ;;  %v2199_v55 = vld [vmem:[%s2433_s11 + $0x64] ss:$16 sps:$4 sm:$0xff]  }
  0x63   : > { %1052 = vmatpush1.bf16.msra.mxu1 %v2125_v5  ;;  %v2201_v56 = vld [vmem:[%s2433_s11 + $0x6c] ss:$16 sps:$4 sm:$0xff]   ;;  %v2203_v57 = vld [vmem:[%s2433_s11 + $0x60] ss:$16 sps:$4 sm:$0xff]   ;;  %v2204_v58 = vld [vmem:[%s2433_s11 + $0x68] ss:$16 sps:$4 sm:$0xff]  }
  0x64   : > { %1193 = vmatpush1.bf16.msra.mxu0 %v2126_v6  ;;  %1053 = vmatprep.subr.bf16.mxu1 %v2127_v7  ;;  %v2205_v59 = vld [vmem:[%s2433_s11 + $0x84] ss:$16 sps:$4 sm:$0xff]   ;;  %v2207_v60 = vld [vmem:[%s2433_s11 + $0x8c] ss:$16 sps:$4 sm:$0xff]   ;;  %v2209_v61 = vld [vmem:[%s2433_s11 + $0x80] ss:$16 sps:$4 sm:$0xff]  }
  0x65   : > { %1194 = vmatprep.subr.bf16.mxu0 %v2129_v8  ;;  %v2210_v62 = vld [vmem:[%s2433_s11 + $0x88] ss:$16 sps:$4 sm:$0xff]   ;;  %v2211_v63 = vld [vmem:[%s2433_s11 + $0xa4] ss:$16 sps:$4 sm:$0xff]   ;;  %v2213_v0 = vld [vmem:[%s2433_s11 + $0xac] ss:$16 sps:$4 sm:$0xff]  }
  0x66   : > { %v2215_v1 = vld [vmem:[%s2433_s11 + $0xa0] ss:$16 sps:$4 sm:$0xff]   ;;  %v2216_v2 = vld [vmem:[%s2433_s11 + $0xa8] ss:$16 sps:$4 sm:$0xff]   ;;  %v2217_v3 = vld [vmem:[%s2433_s11 + $0xc4] ss:$16 sps:$4 sm:$0xff]  }
  0x67   : > { %1054 = vmatpush1.bf16.msra.mxu1 %v2131_v9  ;;  %v2219_v4 = vld [vmem:[%s2433_s11 + $0xcc] ss:$16 sps:$4 sm:$0xff]   ;;  %v2221_v5 = vld [vmem:[%s2433_s11 + $0xc0] ss:$16 sps:$4 sm:$0xff]   ;;  %v2222_v6 = vld [vmem:[%s2433_s11 + $0xc8] ss:$16 sps:$4 sm:$0xff]  }
  0x68   : > { %1195 = vmatpush1.bf16.msra.mxu0 %v2132_v10  ;;  %1055 = vmatprep.subr.bf16.mxu1 %v2133_v11  ;;  %v2223_v7 = vld [vmem:[%s2433_s11 + $0xe4] ss:$16 sps:$4 sm:$0xff]   ;;  %v2225_v8 = vld [vmem:[%s2433_s11 + $0xec] ss:$16 sps:$4 sm:$0xff]   ;;  %v2227_v9 = vld [vmem:[%s2433_s11 + $0xe0] ss:$16 sps:$4 sm:$0xff]  }
  0x69   : > { %1196 = vmatprep.subr.bf16.mxu0 %v2135_v12  ;;  %v2228_v10 = vld [vmem:[%s2433_s11 + $0xe8] ss:$16 sps:$4 sm:$0xff]   ;;  %v2229_v11 = vld [vmem:[%s2433_s11 + $0x104] ss:$16 sps:$4 sm:$0xff]   ;;  %v2231_v12 = vld [vmem:[%s2433_s11 + $0x10c] ss:$16 sps:$4 sm:$0xff]  }
  0x6b   : > { %1056 = vmatpush1.bf16.msra.mxu1 %v2137_v13  ;;  %v2233_v13 = vld [vmem:[%s2433_s11 + $0x100] ss:$16 sps:$4 sm:$0xff]  }
  0x6c   : > { %1197 = vmatpush1.bf16.msra.mxu0 %v2138_v14  ;;  %1057 = vmatprep.subr.bf16.mxu1 %v2139_v15  ;;  %v2234_v14 = vld [vmem:[%s2433_s11 + $0x108] ss:$16 sps:$4 sm:$0xff]   ;;  %v2235_v15 = vld [vmem:[%s2433_s11 + $0x124] ss:$16 sps:$4 sm:$0xff]  }
  0x6d   : > { %1198 = vmatprep.subr.bf16.mxu0 %v2141_v16  ;;  %v2237_v16 = vld [vmem:[%s2433_s11 + $0x12c] ss:$16 sps:$4 sm:$0xff]  }
  0x6f   : > { %1058 = vmatpush1.bf16.msra.mxu1 %v2143_v17  ;;  %v439_v17 = vld [vmem:[%s2433_s11 + $0x140] sm:$0x11] }
  0x70   : > { %1199 = vmatpush1.bf16.msra.mxu0 %v2144_v18  ;;  %1059 = vmatprep.subr.bf16.mxu1 %v2145_v19  ;;  %v440_v18 = vld [vmem:[%s2433_s11 + $0x148] sm:$0x11]  ;;  %v2239_v19 = vld [vmem:[%s2433_s11 + $0x120] ss:$16 sps:$4 sm:$0xff]  }
  0x71   : > { %1200 = vmatprep.subr.bf16.mxu0 %v2147_v20  ;;  %v2240_v20 = vld [vmem:[%s2433_s11 + $0x128] ss:$16 sps:$4 sm:$0xff]  }
  0x73   : > { %1060 = vmatpush1.bf16.msra.mxu1 %v2149_v21  ;;  %v1945_v21 = vcombine.high %v439_v17, %v439_v17 }
  0x74   : > { %1201 = vmatpush1.bf16.msra.mxu0 %v2150_v22  ;;  %1061 = vmatprep.subr.bf16.mxu1 %v2151_v23  ;;  %v1947_v22 = vcombine.high %v440_v18, %v440_v18  ;;  %v1944_v23 = vcombine.low %v439_v17, %v439_v17 }
  0x75   : > { %1202 = vmatprep.subr.bf16.mxu0 %v2153_v24  ;;  %v1946_v24 = vcombine.low %v440_v18, %v440_v18 }
  0x77   : > { %1062 = vmatpush1.bf16.msra.mxu1 %v2155_v25 }
  0x78   : > { %1203 = vmatpush1.bf16.msra.mxu0 %v2156_v26  ;;  %1063 = vmatprep.subr.bf16.mxu1 %v2157_v27  ;;  %v357_v26 = vld [vmem:[#allocation2] sm:$0xff] }
  0x79   : > { %1204 = vmatprep.subr.bf16.mxu0 %v2159_v29 }
  0x7b   : > { %1064 = vmatpush1.bf16.msra.mxu1 %v2161_v31 }
  0x7c   : > { %1205 = vmatpush1.bf16.msra.mxu0 %v2162_v32  ;;  %1065 = vmatprep.subr.bf16.mxu1 %v2163_v33 }
  0x7d   : > { %1206 = vmatprep.subr.bf16.mxu0 %v2165_v34  ;;  %v359_v34 = vld [vmem:[#allocation2 + $0x10] sm:$0xff] }
  0x7f   : > { %1066 = vmatpush1.bf16.msra.mxu1 %v2167_v35 }
  0x80   : > { %1207 = vmatpush1.bf16.msra.mxu0 %v2168_v36  ;;  %1067 = vmatprep.subr.bf16.mxu1 %v2169_v37 }
  0x81   : > { %1208 = vmatprep.subr.bf16.mxu0 %v2171_v38 }
  0x83   : > { %1068 = vmatpush1.bf16.msra.mxu1 %v2173_v39  ;;  %v360_v39 = vld [vmem:[#allocation2 + $0x18] sm:$0xff] }
  0x84   : > { %1209 = vmatpush1.bf16.msra.mxu0 %v2174_v40  ;;  %1069 = vmatprep.subr.bf16.mxu1 %v2175_v41 }
  0x85   : > { %1210 = vmatprep.subr.bf16.mxu0 %v2177_v42 }
  0x87   : > { %1070 = vmatpush1.bf16.msra.mxu1 %v2179_v43 }
  0x88   : > { %1211 = vmatpush1.bf16.msra.mxu0 %v2180_v44 }
  0x8a   : > { %1072 = vmatmul.mubr.bf16.vlgmr.msra.gmra.mrb[0].mxu1 %v2181_v45 }
  0x8b   : > { %1213 = vmatmul.mubr.bf16.vlgmr.msra.gmra.mrb[0].mxu0 %v2184_v46  ;;  %1081 = vmatprep.mubr.bf16.mxu1 %v2187_v47  ;;  %v361_v46 = vld [vmem:[#allocation2 + $0x20] sm:$0xff] }
  0x8c   : > { %1222 = vmatprep.mubr.bf16.mxu0 %v2189_v48 }
  0x92   : > { %1082 = vmatmul.mubr.bf16.gmra.mrb[4].mxu1 %v2191_v49 }
  0x93   : > { %1223 = vmatmul.mubr.bf16.gmra.mrb[4].mxu0 %v2192_v50  ;;  %1091 = vmatprep.mubr.bf16.mxu1 %v2193_v51  ;;  %v362_v50 = vld [vmem:[#allocation2 + $0x28] sm:$0xff] }
  0x94   : > { %1232 = vmatprep.mubr.bf16.mxu0 %v2195_v52 }
  0x9a   : > { %1092 = vmatmul.mubr.bf16.gmra.mrb[8].mxu1 %v2197_v53 }
  0x9b   : > { %1233 = vmatmul.mubr.bf16.gmra.mrb[8].mxu0 %v2198_v54  ;;  %1101 = vmatprep.mubr.bf16.mxu1 %v2199_v55  ;;  %v363_v54 = vld [vmem:[#allocation2 + $0x30] sm:$0xff] }
  0x9c   : > { %1242 = vmatprep.mubr.bf16.mxu0 %v2201_v56 }
  0xa2   : > { %1102 = vmatmul.mubr.bf16.gmra.mrb[12].mxu1 %v2203_v57 }
  0xa3   : > { %1243 = vmatmul.mubr.bf16.gmra.mrb[12].mxu0 %v2204_v58  ;;  %1111 = vmatprep.mubr.bf16.mxu1 %v2205_v59  ;;  %v364_v59 = vld [vmem:[#allocation2 + $0x38] sm:$0xff] }
  0xa4   : > { %1252 = vmatprep.mubr.bf16.mxu0 %v2207_v60 }
  0xaa   : > { %1112 = vmatmul.mubr.bf16.gmra.mrb[16].mxu1 %v2209_v61 }
  0xab   : > { %1253 = vmatmul.mubr.bf16.gmra.mrb[16].mxu0 %v2210_v62  ;;  %1121 = vmatprep.mubr.bf16.mxu1 %v2211_v63 }
  0xac   : > { %1262 = vmatprep.mubr.bf16.mxu0 %v2213_v0 }
  0xb2   : > { %1122 = vmatmul.mubr.bf16.gmra.mrb[20].mxu1 %v2215_v1 }
  0xb3   : > { %1263 = vmatmul.mubr.bf16.gmra.mrb[20].mxu0 %v2216_v2  ;;  %1131 = vmatprep.mubr.bf16.mxu1 %v2217_v3  ;;  %v365_v2 = vld [vmem:[#allocation2 + $0x40] sm:$0xff] }
  0xb4   : > { %1272 = vmatprep.mubr.bf16.mxu0 %v2219_v4 }
  0xba   : > { %1132 = vmatmul.mubr.bf16.gmra.mrb[24].mxu1 %v2221_v5 }
  0xbb   : > { %1273 = vmatmul.mubr.bf16.gmra.mrb[24].mxu0 %v2222_v6  ;;  %1141 = vmatprep.mubr.bf16.mxu1 %v2223_v7  ;;  %v366_v6 = vld [vmem:[#allocation2 + $0x48] sm:$0xff] }
  0xbc   : > { %1282 = vmatprep.mubr.bf16.mxu0 %v2225_v8 }
  0xc2   : > { %1142 = vmatmul.mubr.bf16.gmra.mrb[28].mxu1 %v2227_v9 }
  0xc3   : > { %1283 = vmatmul.mubr.bf16.gmra.mrb[28].mxu0 %v2228_v10  ;;  %1151 = vmatprep.mubr.bf16.mxu1 %v2229_v11  ;;  %v367_v10 = vld [vmem:[#allocation2 + $0x50] sm:$0xff] }
  0xc4   : > { %1292 = vmatprep.mubr.bf16.mxu0 %v2231_v12 }
  0xca   : > { %1152 = vmatmul.mubr.bf16.gmra.mrb[32].mxu1 %v2233_v13 }
  0xcb   : > { %1293 = vmatmul.mubr.bf16.gmra.mrb[32].mxu0 %v2234_v14  ;;  %1161 = vmatprep.mubr.bf16.mxu1 %v2235_v15  ;;  %v368_v15 = vld [vmem:[#allocation2 + $0x58] sm:$0xff] }
  0xcc   : > { %1302 = vmatprep.mubr.bf16.mxu0 %v2237_v16 }
  0xd2   : > { %1162 = vmatmul.mubr.bf16.gmra.mrb[36].mxu1 %v2239_v19 }
  0xd3   : > { %1303 = vmatmul.mubr.bf16.gmra.mrb[36].mxu0 %v2240_v20  ;;  %1171 = vmatprep.mubr.bf16.mxu1 %v1945_v21 }
  0xd4   : > { %1312 = vmatprep.mubr.bf16.mxu0 %v1947_v22  ;;  %v369_v22 = vld [vmem:[#allocation2 + $0x60] sm:$0xff] }
  0xda   : > { %1172 = vmatmul.mubr.bf16.gmra.mrb[40].mxu1 %v1944_v23 }
  0xdb   : > { %1313 = vmatmul.mubr.bf16.gmra.mrb[40].mxu0 %v1946_v24 }
 0x15d   : > { %v1073_v25 = vpop.f32.mrb[0].mxu1 }
 0x15e   : > { %v1214_v27 = vpop.f32.mrb[0].mxu0  ;;  %v1075_v29 = vpop.f32.mrb[1].mxu1 }
 0x15f   : > { %v1215_v28 = vadd.f32 %v1214_v27, %v1073_v25  ;;  %v1216_v31 = vpop.f32.mrb[1].mxu0  ;;  %v1077_v33 = vpop.f32.mrb[2].mxu1 }
 0x160   : > { %v1217_v32 = vadd.f32 %v1216_v31, %v1075_v29  ;;  %v1218_v35 = vpop.f32.mrb[2].mxu0  ;;  %v1079_v38 = vpop.f32.mrb[3].mxu1 }
 0x161   : > { %v1321_v36 = vadd.f32 %v1215_v28, %v357_v26  ;;  %v1219_v37 = vadd.f32 %v1218_v35, %v1077_v33  ;;  %v1220_v40 = vpop.f32.mrb[3].mxu0  ;;  %v370_v26 = vld [vmem:[#allocation2 + $0x68] sm:$0xff]  ;;  %v372_v35 = vld [vmem:[#allocation2 + $0x78] sm:$0xff] }
 0x162   : > { %v1322_v41 = vadd.f32 %v1217_v32, %v358_v30  ;;  %v1221_v42 = vadd.f32 %v1220_v40, %v1079_v38  ;;  %v371_v30 = vld [vmem:[#allocation2 + $0x70] sm:$0xff] }
 0x163   : > { %1363 = vst [vmem:[#allocation2] sm:$0xff] %v1321_v36  ;;  %v1323_v43 = vadd.f32 %v1219_v37, %v359_v34 }
 0x164   : > { %1364 = vst [vmem:[#allocation2 + $0x8] sm:$0xff] %v1322_v41  ;;  %v1324_v44 = vadd.f32 %v1221_v42, %v360_v39  ;;  %v373_v42 = vld [vmem:[#allocation2 + $0x80] sm:$0xff] }
 0x165   : > { %1365 = vst [vmem:[#allocation2 + $0x10] sm:$0xff] %v1323_v43  ;;  %v1083_v45 = vpop.f32.mrb[4].mxu1 }
 0x166   : > { %1366 = vst [vmem:[#allocation2 + $0x18] sm:$0xff] %v1324_v44  ;;  %v1224_v47 = vpop.f32.mrb[4].mxu0  ;;  %v1085_v49 = vpop.f32.mrb[5].mxu1 }
 0x167   : > { %v1225_v48 = vadd.f32 %v1224_v47, %v1083_v45  ;;  %v1226_v51 = vpop.f32.mrb[5].mxu0  ;;  %v1087_v53 = vpop.f32.mrb[6].mxu1 }
 0x168   : > { %v1227_v52 = vadd.f32 %v1226_v51, %v1085_v49  ;;  %v1228_v55 = vpop.f32.mrb[6].mxu0  ;;  %v1089_v58 = vpop.f32.mrb[7].mxu1 }
 0x169   : > { %v1325_v56 = vadd.f32 %v1225_v48, %v361_v46  ;;  %v1229_v57 = vadd.f32 %v1228_v55, %v1087_v53  ;;  %v1230_v60 = vpop.f32.mrb[7].mxu0  ;;  %v374_v46 = vld [vmem:[#allocation2 + $0x88] sm:$0xff]  ;;  %v376_v55 = vld [vmem:[#allocation2 + $0x98] sm:$0xff] }
 0x16a   : > { %v1326_v61 = vadd.f32 %v1227_v52, %v362_v50  ;;  %v1231_v62 = vadd.f32 %v1230_v60, %v1089_v58  ;;  %v375_v50 = vld [vmem:[#allocation2 + $0x90] sm:$0xff] }
 0x16b   : > { %1367 = vst [vmem:[#allocation2 + $0x20] sm:$0xff] %v1325_v56  ;;  %v1327_v63 = vadd.f32 %v1229_v57, %v363_v54 }
 0x16c   : > { %1368 = vst [vmem:[#allocation2 + $0x28] sm:$0xff] %v1326_v61  ;;  %v1328_v0 = vadd.f32 %v1231_v62, %v364_v59  ;;  %v377_v62 = vld [vmem:[#allocation2 + $0xa0] sm:$0xff] }
 0x16d   : > { %1369 = vst [vmem:[#allocation2 + $0x30] sm:$0xff] %v1327_v63  ;;  %v1093_v1 = vpop.f32.mrb[8].mxu1 }
 0x16e   : > { %1370 = vst [vmem:[#allocation2 + $0x38] sm:$0xff] %v1328_v0  ;;  %v1234_v3 = vpop.f32.mrb[8].mxu0  ;;  %v1095_v5 = vpop.f32.mrb[9].mxu1 }
 0x16f   : > { %v1235_v4 = vadd.f32 %v1234_v3, %v1093_v1  ;;  %v1236_v7 = vpop.f32.mrb[9].mxu0  ;;  %v1097_v9 = vpop.f32.mrb[10].mxu1 }
 0x170   : > { %v1237_v8 = vadd.f32 %v1236_v7, %v1095_v5  ;;  %v1238_v11 = vpop.f32.mrb[10].mxu0  ;;  %v1099_v14 = vpop.f32.mrb[11].mxu1 }
 0x171   : > { %v1329_v12 = vadd.f32 %v1235_v4, %v365_v2  ;;  %v1239_v13 = vadd.f32 %v1238_v11, %v1097_v9  ;;  %v1240_v16 = vpop.f32.mrb[11].mxu0  ;;  %v378_v2 = vld [vmem:[#allocation2 + $0xa8] sm:$0xff]  ;;  %v380_v11 = vld [vmem:[#allocation2 + $0xb8] sm:$0xff] }
 0x172   : > { %v1330_v17 = vadd.f32 %v1237_v8, %v366_v6  ;;  %v1241_v18 = vadd.f32 %v1240_v16, %v1099_v14  ;;  %v379_v6 = vld [vmem:[#allocation2 + $0xb0] sm:$0xff] }
 0x173   : > { %1371 = vst [vmem:[#allocation2 + $0x40] sm:$0xff] %v1329_v12  ;;  %v1331_v19 = vadd.f32 %v1239_v13, %v367_v10 }
 0x174   : > { %1372 = vst [vmem:[#allocation2 + $0x48] sm:$0xff] %v1330_v17  ;;  %v1332_v20 = vadd.f32 %v1241_v18, %v368_v15  ;;  %v381_v18 = vld [vmem:[#allocation2 + $0xc0] sm:$0xff] }
 0x175   : > { %1373 = vst [vmem:[#allocation2 + $0x50] sm:$0xff] %v1331_v19  ;;  %v1103_v21 = vpop.f32.mrb[12].mxu1 }
 0x176   : > { %1374 = vst [vmem:[#allocation2 + $0x58] sm:$0xff] %v1332_v20  ;;  %v1244_v23 = vpop.f32.mrb[12].mxu0  ;;  %v1105_v25 = vpop.f32.mrb[13].mxu1 }
 0x177   : > { %v1245_v24 = vadd.f32 %v1244_v23, %v1103_v21  ;;  %v1246_v27 = vpop.f32.mrb[13].mxu0  ;;  %v1107_v29 = vpop.f32.mrb[14].mxu1 }
 0x178   : > { %v1247_v28 = vadd.f32 %v1246_v27, %v1105_v25  ;;  %v1248_v31 = vpop.f32.mrb[14].mxu0  ;;  %v1109_v34 = vpop.f32.mrb[15].mxu1 }
 0x179   : > { %v1333_v32 = vadd.f32 %v1245_v24, %v369_v22  ;;  %v1249_v33 = vadd.f32 %v1248_v31, %v1107_v29  ;;  %v1250_v36 = vpop.f32.mrb[15].mxu0  ;;  %v382_v22 = vld [vmem:[#allocation2 + $0xc8] sm:$0xff]  ;;  %v384_v31 = vld [vmem:[#allocation2 + $0xd8] sm:$0xff] }
 0x17a   : > { %v1334_v37 = vadd.f32 %v1247_v28, %v370_v26  ;;  %v1251_v38 = vadd.f32 %v1250_v36, %v1109_v34  ;;  %v383_v26 = vld [vmem:[#allocation2 + $0xd0] sm:$0xff] }
 0x17b   : > { %1375 = vst [vmem:[#allocation2 + $0x60] sm:$0xff] %v1333_v32  ;;  %v1335_v39 = vadd.f32 %v1249_v33, %v371_v30 }
 0x17c   : > { %1376 = vst [vmem:[#allocation2 + $0x68] sm:$0xff] %v1334_v37  ;;  %v1336_v40 = vadd.f32 %v1251_v38, %v372_v35  ;;  %v385_v38 = vld [vmem:[#allocation2 + $0xe0] sm:$0xff] }
 0x17d   : > { %1377 = vst [vmem:[#allocation2 + $0x70] sm:$0xff] %v1335_v39  ;;  %v1113_v41 = vpop.f32.mrb[16].mxu1 }
 0x17e   : > { %1378 = vst [vmem:[#allocation2 + $0x78] sm:$0xff] %v1336_v40  ;;  %v1254_v43 = vpop.f32.mrb[16].mxu0  ;;  %v1115_v45 = vpop.f32.mrb[17].mxu1 }
 0x17f   : > { %v1255_v44 = vadd.f32 %v1254_v43, %v1113_v41  ;;  %v1256_v47 = vpop.f32.mrb[17].mxu0  ;;  %v1117_v49 = vpop.f32.mrb[18].mxu1 }
 0x180   : > { %v1257_v48 = vadd.f32 %v1256_v47, %v1115_v45  ;;  %v1258_v51 = vpop.f32.mrb[18].mxu0  ;;  %v1119_v54 = vpop.f32.mrb[19].mxu1 }
 0x181   : > { %v1337_v52 = vadd.f32 %v1255_v44, %v373_v42  ;;  %v1259_v53 = vadd.f32 %v1258_v51, %v1117_v49  ;;  %v1260_v56 = vpop.f32.mrb[19].mxu0  ;;  %v386_v42 = vld [vmem:[#allocation2 + $0xe8] sm:$0xff]  ;;  %v388_v51 = vld [vmem:[#allocation2 + $0xf8] sm:$0xff] }
 0x182   : > { %v1338_v57 = vadd.f32 %v1257_v48, %v374_v46  ;;  %v1261_v58 = vadd.f32 %v1260_v56, %v1119_v54  ;;  %v387_v46 = vld [vmem:[#allocation2 + $0xf0] sm:$0xff] }
 0x183   : > { %1379 = vst [vmem:[#allocation2 + $0x80] sm:$0xff] %v1337_v52  ;;  %v1339_v59 = vadd.f32 %v1259_v53, %v375_v50 }
 0x184   : > { %1380 = vst [vmem:[#allocation2 + $0x88] sm:$0xff] %v1338_v57  ;;  %v1340_v60 = vadd.f32 %v1261_v58, %v376_v55  ;;  %v389_v58 = vld [vmem:[#allocation2 + $0x100] sm:$0xff] }
 0x185   : > { %1381 = vst [vmem:[#allocation2 + $0x90] sm:$0xff] %v1339_v59  ;;  %v1123_v61 = vpop.f32.mrb[20].mxu1 }
 0x186   : > { %1382 = vst [vmem:[#allocation2 + $0x98] sm:$0xff] %v1340_v60  ;;  %v1264_v63 = vpop.f32.mrb[20].mxu0  ;;  %v1125_v1 = vpop.f32.mrb[21].mxu1 }
 0x187   : > { %v1265_v0 = vadd.f32 %v1264_v63, %v1123_v61  ;;  %v1266_v3 = vpop.f32.mrb[21].mxu0  ;;  %v1127_v5 = vpop.f32.mrb[22].mxu1 }
 0x188   : > { %v1267_v4 = vadd.f32 %v1266_v3, %v1125_v1  ;;  %v1268_v7 = vpop.f32.mrb[22].mxu0  ;;  %v1129_v10 = vpop.f32.mrb[23].mxu1 }
 0x189   : > { %v1341_v8 = vadd.f32 %v1265_v0, %v377_v62  ;;  %v1269_v9 = vadd.f32 %v1268_v7, %v1127_v5  ;;  %v1270_v12 = vpop.f32.mrb[23].mxu0  ;;  %v390_v62 = vld [vmem:[#allocation2 + $0x108] sm:$0xff]  ;;  %v392_v7 = vld [vmem:[#allocation2 + $0x118] sm:$0xff] }
 0x18a   : > { %v1342_v13 = vadd.f32 %v1267_v4, %v378_v2  ;;  %v1271_v14 = vadd.f32 %v1270_v12, %v1129_v10  ;;  %v391_v2 = vld [vmem:[#allocation2 + $0x110] sm:$0xff] }
 0x18b   : > { %1383 = vst [vmem:[#allocation2 + $0xa0] sm:$0xff] %v1341_v8  ;;  %v1343_v15 = vadd.f32 %v1269_v9, %v379_v6 }
 0x18c   : > { %1384 = vst [vmem:[#allocation2 + $0xa8] sm:$0xff] %v1342_v13  ;;  %v1344_v16 = vadd.f32 %v1271_v14, %v380_v11  ;;  %v393_v14 = vld [vmem:[#allocation2 + $0x120] sm:$0xff] }
 0x18d   : > { %1385 = vst [vmem:[#allocation2 + $0xb0] sm:$0xff] %v1343_v15  ;;  %v1133_v17 = vpop.f32.mrb[24].mxu1 }
 0x18e   : > { %1386 = vst [vmem:[#allocation2 + $0xb8] sm:$0xff] %v1344_v16  ;;  %v1274_v19 = vpop.f32.mrb[24].mxu0  ;;  %v1135_v21 = vpop.f32.mrb[25].mxu1 }
 0x18f   : > { %v1275_v20 = vadd.f32 %v1274_v19, %v1133_v17  ;;  %v1276_v23 = vpop.f32.mrb[25].mxu0  ;;  %v1137_v25 = vpop.f32.mrb[26].mxu1 }
 0x190   : > { %v1277_v24 = vadd.f32 %v1276_v23, %v1135_v21  ;;  %v1278_v27 = vpop.f32.mrb[26].mxu0  ;;  %v1139_v30 = vpop.f32.mrb[27].mxu1 }
 0x191   : > { %v1345_v28 = vadd.f32 %v1275_v20, %v381_v18  ;;  %v1279_v29 = vadd.f32 %v1278_v27, %v1137_v25  ;;  %v1280_v32 = vpop.f32.mrb[27].mxu0  ;;  %v394_v18 = vld [vmem:[#allocation2 + $0x128] sm:$0xff]  ;;  %v396_v27 = vld [vmem:[#allocation2 + $0x138] sm:$0xff] }
 0x192   : > { %v1346_v33 = vadd.f32 %v1277_v24, %v382_v22  ;;  %v1281_v34 = vadd.f32 %v1280_v32, %v1139_v30  ;;  %v395_v22 = vld [vmem:[#allocation2 + $0x130] sm:$0xff] }
 0x193   : > { %1387 = vst [vmem:[#allocation2 + $0xc0] sm:$0xff] %v1345_v28  ;;  %v1347_v35 = vadd.f32 %v1279_v29, %v383_v26 }
 0x194   : > { %1388 = vst [vmem:[#allocation2 + $0xc8] sm:$0xff] %v1346_v33  ;;  %v1348_v36 = vadd.f32 %v1281_v34, %v384_v31  ;;  %v397_v34 = vld [vmem:[#allocation2 + $0x140] sm:$0x3] }
 0x195   : > { %1389 = vst [vmem:[#allocation2 + $0xd0] sm:$0xff] %v1347_v35  ;;  %v1143_v37 = vpop.f32.mrb[28].mxu1 }
 0x196   : > { %1390 = vst [vmem:[#allocation2 + $0xd8] sm:$0xff] %v1348_v36  ;;  %v1284_v39 = vpop.f32.mrb[28].mxu0  ;;  %v1145_v41 = vpop.f32.mrb[29].mxu1 }
 0x197   : > { %v1285_v40 = vadd.f32 %v1284_v39, %v1143_v37  ;;  %v1286_v43 = vpop.f32.mrb[29].mxu0  ;;  %v1147_v45 = vpop.f32.mrb[30].mxu1 }
 0x198   : > { %v1287_v44 = vadd.f32 %v1286_v43, %v1145_v41  ;;  %v1288_v47 = vpop.f32.mrb[30].mxu0  ;;  %v1149_v50 = vpop.f32.mrb[31].mxu1 }
 0x199   : > { %v1349_v48 = vadd.f32 %v1285_v40, %v385_v38  ;;  %v1289_v49 = vadd.f32 %v1288_v47, %v1147_v45  ;;  %v1290_v52 = vpop.f32.mrb[31].mxu0  ;;  %v398_v38 = vld [vmem:[#allocation2 + $0x148] sm:$0x3] }
 0x19a   : > { %v1350_v53 = vadd.f32 %v1287_v44, %v386_v42  ;;  %v1291_v54 = vadd.f32 %v1290_v52, %v1149_v50 }
 0x19b   : > { %1391 = vst [vmem:[#allocation2 + $0xe0] sm:$0xff] %v1349_v48  ;;  %v1351_v55 = vadd.f32 %v1289_v49, %v387_v46 }
 0x19c   : > { %1392 = vst [vmem:[#allocation2 + $0xe8] sm:$0xff] %v1350_v53  ;;  %v1352_v56 = vadd.f32 %v1291_v54, %v388_v51 }
 0x19d   : > { %1393 = vst [vmem:[#allocation2 + $0xf0] sm:$0xff] %v1351_v55  ;;  %v1153_v57 = vpop.f32.mrb[32].mxu1 }
 0x19e   : > { %1394 = vst [vmem:[#allocation2 + $0xf8] sm:$0xff] %v1352_v56  ;;  %v1294_v59 = vpop.f32.mrb[32].mxu0  ;;  %v1155_v61 = vpop.f32.mrb[33].mxu1 }
 0x19f   : > { %v1295_v60 = vadd.f32 %v1294_v59, %v1153_v57  ;;  %v1296_v63 = vpop.f32.mrb[33].mxu0  ;;  %v1157_v1 = vpop.f32.mrb[34].mxu1 }
 0x1a0   : > { %v1297_v0 = vadd.f32 %v1296_v63, %v1155_v61  ;;  %v1298_v3 = vpop.f32.mrb[34].mxu0  ;;  %v1159_v6 = vpop.f32.mrb[35].mxu1 }
 0x1a1   : > { %v1353_v4 = vadd.f32 %v1295_v60, %v389_v58  ;;  %v1299_v5 = vadd.f32 %v1298_v3, %v1157_v1  ;;  %v1300_v8 = vpop.f32.mrb[35].mxu0 }
 0x1a2   : > { %v1354_v9 = vadd.f32 %v1297_v0, %v390_v62  ;;  %v1301_v10 = vadd.f32 %v1300_v8, %v1159_v6 }
 0x1a3   : > { %1395 = vst [vmem:[#allocation2 + $0x100] sm:$0xff] %v1353_v4  ;;  %v1355_v11 = vadd.f32 %v1299_v5, %v391_v2 }
 0x1a4   : > { %1396 = vst [vmem:[#allocation2 + $0x108] sm:$0xff] %v1354_v9  ;;  %v1356_v12 = vadd.f32 %v1301_v10, %v392_v7 }
 0x1a5   : > { %1397 = vst [vmem:[#allocation2 + $0x110] sm:$0xff] %v1355_v11  ;;  %v1163_v13 = vpop.f32.mrb[36].mxu1 }
 0x1a6   : > { %1398 = vst [vmem:[#allocation2 + $0x118] sm:$0xff] %v1356_v12  ;;  %v1304_v15 = vpop.f32.mrb[36].mxu0  ;;  %v1165_v17 = vpop.f32.mrb[37].mxu1 }
 0x1a7   : > { %v1305_v16 = vadd.f32 %v1304_v15, %v1163_v13  ;;  %v1306_v19 = vpop.f32.mrb[37].mxu0  ;;  %v1167_v21 = vpop.f32.mrb[38].mxu1 }
 0x1a8   : > { %v1307_v20 = vadd.f32 %v1306_v19, %v1165_v17  ;;  %v1308_v23 = vpop.f32.mrb[38].mxu0  ;;  %v1169_v26 = vpop.f32.mrb[39].mxu1 }
 0x1a9   : > { %v1357_v24 = vadd.f32 %v1305_v16, %v393_v14  ;;  %v1309_v25 = vadd.f32 %v1308_v23, %v1167_v21  ;;  %v1310_v28 = vpop.f32.mrb[39].mxu0 }
 0x1aa   : > { %v1358_v29 = vadd.f32 %v1307_v20, %v394_v18  ;;  %v1311_v30 = vadd.f32 %v1310_v28, %v1169_v26 }
 0x1ab   : > { %1399 = vst [vmem:[#allocation2 + $0x120] sm:$0xff] %v1357_v24  ;;  %v1359_v31 = vadd.f32 %v1309_v25, %v395_v22 }
 0x1ac   : > { %1400 = vst [vmem:[#allocation2 + $0x128] sm:$0xff] %v1358_v29  ;;  %v1360_v32 = vadd.f32 %v1311_v30, %v396_v27 }
 0x1ad   : > { %1401 = vst [vmem:[#allocation2 + $0x130] sm:$0xff] %v1359_v31  ;;  %v1173_v33 = vpop.f32.mrb[40].mxu1 }
 0x1ae   : > { %1402 = vst [vmem:[#allocation2 + $0x138] sm:$0xff] %v1360_v32  ;;  %v1314_v35 = vpop.f32.mrb[40].mxu0  ;;  %v1175_v37 = vpop.f32.mrb[41].mxu1  ;;  %1408 = sbr.rel (%p2012_p10) target bundleno = 571 (0x23b), region = 67 }
 0x1af   : > { %v1315_v36 = vadd.f32 %v1314_v35, %v1173_v33  ;;  %v1316_v39 = vpop.f32.mrb[41].mxu0  ;;  %v1177_v41 = vpop.f32.mrb[42].mxu1 }
 0x1b0   : > { %v1317_v40 = vadd.f32 %v1316_v39, %v1175_v37  ;;  %v1318_v42 = vpop.f32.mrb[42].mxu0  ;;  %v1178_v44 = vpop.f32.mrb[43].mxu1 }
 0x1b1   : > { %v1361_v43 = vadd.f32 %v1315_v36, %v397_v34  ;;  %v1319_v45 = vpop.f32.mrb[43].mxu0 }
 0x1b2   : > { %v1362_v46 = vadd.f32 %v1317_v40, %v398_v38 }
 0x1b3   : > { %1403 = vst [vmem:[#allocation2 + $0x140] sm:$0x3] %v1361_v43 }
 0x1b4   : > { %1404 = vst [vmem:[#allocation2 + $0x148] sm:$0x3] %v1362_v46 }
 0x1b5   : > { %v2543_v47 = vld [vmem:[#allocation2] sm:$0xff]  ;;  %v2545_v48 = vld [vmem:[#allocation2 + $0x8] sm:$0xff]  ;;  %v2547_v49 = vld [vmem:[#allocation2 + $0x10] sm:$0xff]  ;;  %vm1470_vm0 = vcmask 1041408  }
 0x1b6   : > { %v2549_v50 = vld [vmem:[#allocation2 + $0x18] sm:$0xff]  ;;  %v2551_v51 = vld [vmem:[#allocation2 + $0x20] sm:$0xff]  ;;  %v2553_v52 = vld [vmem:[#allocation2 + $0x28] sm:$0xff]  ;;  %v1451_v53 = vadd.f32 %v2547_v49, %v2543_v47  ;;  %v1506_v10 = vmul.f32 %v2543_v47, %v2543_v47  ;;  %v1508_v11 = vmul.f32 %v2547_v49, %v2547_v49  ;;  %v1507_v14 = vmul.f32 %v2545_v48, %v2545_v48 }
 0x1b7   : > { %v2557_v54 = vld [vmem:[#allocation2 + $0x30] sm:$0xff]  ;;  %v1479_v55 = vadd.f32 %v2549_v50, %v2545_v48  ;;  %v2561_v56 = vld [vmem:[#allocation2 + $0x38] sm:$0xff]  ;;  %v2564_v58 = vld [vmem:[#allocation2 + $0x40] sm:$0xff]  ;;  %v1509_v15 = vmul.f32 %v2549_v50, %v2549_v50  ;;  %v1510_v18 = vmul.f32 %v2551_v51, %v2551_v51  ;;  %v1511_v21 = vmul.f32 %v2553_v52, %v2553_v52 }
 0x1b8   : > { %v1452_v57 = vadd.f32 %v1451_v53, %v2551_v51  ;;  %v2567_v60 = vld [vmem:[#allocation2 + $0x48] sm:$0xff]  ;;  %v2570_v62 = vld [vmem:[#allocation2 + $0x50] sm:$0xff]  ;;  %v2573_v0 = vld [vmem:[#allocation2 + $0x58] sm:$0xff]  ;;  %v1512_v24 = vmul.f32 %v2557_v54, %v2557_v54  ;;  %v1548_v25 = vadd.f32 %v1508_v11, %v1506_v10  ;;  %v1513_v28 = vmul.f32 %v2561_v56, %v2561_v56 }
 0x1b9   : > { %v1480_v59 = vadd.f32 %v1479_v55, %v2553_v52  ;;  %v2576_v2 = vld [vmem:[#allocation2 + $0x60] sm:$0xff]  ;;  %v2579_v4 = vld [vmem:[#allocation2 + $0x68] sm:$0xff]  ;;  %v2582_v6 = vld [vmem:[#allocation2 + $0x70] sm:$0xff]  ;;  %v1575_v29 = vadd.f32 %v1509_v15, %v1507_v14  ;;  %v1514_v32 = vmul.f32 %v2564_v58, %v2564_v58  ;;  %v1515_v36 = vmul.f32 %v2567_v60, %v2567_v60 }
 0x1ba   : > { %v1453_v61 = vadd.f32 %v1452_v57, %v2557_v54  ;;  %v2585_v8 = vld [vmem:[#allocation2 + $0x78] sm:$0xff]  ;;  %v2592_v12 = vld [vmem:[#allocation2 + $0x80] sm:$0xff]  ;;  %v2599_v16 = vld [vmem:[#allocation2 + $0x88] sm:$0xff]  ;;  %v1549_v33 = vadd.f32 %v1548_v25, %v1510_v18  ;;  %v1516_v40 = vmul.f32 %v2570_v62, %v2570_v62  ;;  %v1517_v44 = vmul.f32 %v2573_v0, %v2573_v0 }
 0x1bb   : > { %v1481_v63 = vadd.f32 %v1480_v59, %v2561_v56  ;;  %v2604_v19 = vld [vmem:[#allocation2 + $0x90] sm:$0xff]  ;;  %v2609_v22 = vld [vmem:[#allocation2 + $0x98] sm:$0xff]  ;;  %v2614_v26 = vld [vmem:[#allocation2 + $0xa0] sm:$0xff]  ;;  %v1576_v37 = vadd.f32 %v1575_v29, %v1511_v21  ;;  %v1518_v55 = vmul.f32 %v2576_v2, %v2576_v2  ;;  %v1522_v18 = vmul.f32 %v2592_v12, %v2592_v12 }
 0x1bc   : > { %v1454_v1 = vadd.f32 %v1453_v61, %v2564_v58  ;;  %v2619_v30 = vld [vmem:[#allocation2 + $0xa8] sm:$0xff]  ;;  %v2624_v34 = vld [vmem:[#allocation2 + $0xb0] sm:$0xff]  ;;  %v2629_v38 = vld [vmem:[#allocation2 + $0xb8] sm:$0xff]  ;;  %v1550_v41 = vadd.f32 %v1549_v33, %v1512_v24  ;;  %v1523_v24 = vmul.f32 %v2599_v16, %v2599_v16  ;;  %v1524_v29 = vmul.f32 %v2604_v19, %v2604_v19 }
 0x1bd   : > { %v1482_v3 = vadd.f32 %v1481_v63, %v2567_v60  ;;  %v2634_v42 = vld [vmem:[#allocation2 + $0xc0] sm:$0xff]  ;;  %v1577_v45 = vadd.f32 %v1576_v37, %v1513_v28  ;;  %v2639_v46 = vld [vmem:[#allocation2 + $0xc8] sm:$0xff]  ;;  %v2644_v59 = vld [vmem:[#allocation2 + $0xd0] sm:$0xff]  ;;  %v1519_v63 = vmul.f32 %v2579_v4, %v2579_v4 }
 0x1be   : > { %v1455_v5 = vadd.f32 %v1454_v1, %v2570_v62  ;;  %v1551_v57 = vadd.f32 %v1550_v41, %v1514_v32  ;;  %v2654_v10 = vld [vmem:[#allocation2 + $0xe0] sm:$0xff]  ;;  %v2659_v15 = vld [vmem:[#allocation2 + $0xe8] sm:$0xff]  ;;  %v2664_v21 = vld [vmem:[#allocation2 + $0xf0] sm:$0xff] }
 0x1bf   : > { %v1483_v7 = vadd.f32 %v1482_v3, %v2573_v0  ;;  %v1578_v1 = vadd.f32 %v1577_v45, %v1515_v36  ;;  %v2649_v3 = vld [vmem:[#allocation2 + $0xd8] sm:$0xff]  ;;  %3121 = vst [vmem:[#allocation4_spill] sm:$0xff] %v2659_v15  ;;  %v2674_v32 = vld [vmem:[#allocation2 + $0x100] sm:$0xff]  ;;  %v2679_v37 = vld [vmem:[#allocation2 + $0x108] sm:$0xff]  ;;  %v1527_v45 = vmul.f32 %v2619_v30, %v2619_v30 }
 0x1c0   : > { %v1456_v9 = vadd.f32 %v1455_v5, %v2576_v2 }
 0x1c1   : > { %v1484_v13 = vadd.f32 %v1483_v7, %v2579_v4  ;;  %v1520_v7 = vmul.f32 %v2582_v6, %v2582_v6  ;;  %v1579_v14 = vadd.f32 %v1578_v1, %v1517_v44  ;;  %v2694_v1 = vld [vmem:[#allocation2 + $0x120] sm:$0xff] }
 0x1c2   : > { %v1457_v17 = vadd.f32 %v1456_v9, %v2582_v6  ;;  %v1552_v9 = vadd.f32 %v1551_v57, %v1516_v40  ;;  %v1526_v40 = vmul.f32 %v2614_v26, %v2614_v26  ;;  %3124 = vst [vmem:[#allocation7_spill] sm:$0xff] %v2694_v1 }
 0x1c3   : > { %v1485_v20 = vadd.f32 %v1484_v13, %v2585_v8  ;;  %v1521_v13 = vmul.f32 %v2585_v8, %v2585_v8  ;;  %v1580_v25 = vadd.f32 %v1579_v14, %v1519_v63 }
 0x1c4   : > { %v1458_v23 = vadd.f32 %v1457_v17, %v2592_v12 }
 0x1c5   : > { %v1486_v27 = vadd.f32 %v1485_v20, %v2599_v16  ;;  %v1553_v20 = vadd.f32 %v1552_v9, %v1518_v55  ;;  %v1581_v36 = vadd.f32 %v1580_v25, %v1521_v13  ;;  %v2689_v55 = vld [vmem:[#allocation2 + $0x118] sm:$0xff]  ;;  %v2701_v13 = vld [vmem:[#allocation2 + $0x140] sm:$0x3]  ;;  %v1531_v25 = vmul.f32 %v2639_v46, %v2639_v46 }
 0x1c6   : > { %v1459_v31 = vadd.f32 %v1458_v23, %v2604_v19  ;;  %3123 = vst [vmem:[#allocation6_spill] sm:$0xff] %v2689_v55  ;;  %3126 = vst [vmem:[#allocation9_spill] sm:$0xff] %v2701_v13 }
 0x1c7   : > { %v1487_v35 = vadd.f32 %v1486_v27, %v2609_v22  ;;  %v2669_v27 = vld [vmem:[#allocation2 + $0xf8] sm:$0xff] }
 0x1c8   : > { %v1460_v39 = vadd.f32 %v1459_v31, %v2614_v26  ;;  %v1554_v31 = vadd.f32 %v1553_v20, %v1520_v7  ;;  %v1529_v7 = vmul.f32 %v2629_v38, %v2629_v38  ;;  %v2706_v20 = vld [vmem:[#allocation2 + $0x130] sm:$0xff] }
 0x1c9   : > { %v1488_v43 = vadd.f32 %v1487_v35, %v2619_v30  ;;  %v1525_v35 = vmul.f32 %v2609_v22, %v2609_v22  ;;  %3127 = vst [vmem:[#allocation10_spill] sm:$0xff] %v2706_v20 }
 0x1ca   : > { %v1461_v53 = vadd.f32 %v1460_v39, %v2624_v34  ;;  %v1555_v41 = vadd.f32 %v1554_v31, %v1522_v18 }
 0x1cb   : > { %v1489_v61 = vadd.f32 %v1488_v43, %v2629_v38  ;;  %v2684_v43 = vld [vmem:[#allocation2 + $0x110] sm:$0xff] }
 0x1cc   : > { %v1462_v5 = vadd.f32 %v1461_v53, %v2634_v42  ;;  %3122 = vst [vmem:[#allocation5_spill] sm:$0xff] %v2684_v43  ;;  %v1582_v53 = vadd.f32 %v1581_v36, %v1523_v24  ;;  %v1556_v63 = vadd.f32 %v1555_v41, %v1524_v29  ;;  %v2713_v29 = vld [vmem:[#allocation2 + $0x138] sm:$0xff]  ;;  %v1471_v36 = vsel %vm1470_vm0, %v2701_v13, 0.0 }
 0x1cd   : > { %v1490_v11 = vadd.f32 %v1489_v61, %v2639_v46  ;;  %v1528_v61 = vmul.f32 %v2624_v34, %v2624_v34  ;;  %3129 = vst [vmem:[#allocation12_spill] sm:$0xff] %v2713_v29 }
 0x1ce   : > { %v1463_v17 = vadd.f32 %v1462_v5, %v2644_v59  ;;  %v1583_v9 = vadd.f32 %v1582_v53, %v1525_v35  ;;  %v1557_v18 = vadd.f32 %v1556_v63, %v1526_v40  ;;  %v1533_v40 = vmul.f32 %v2649_v3, %v2649_v3 }
 0x1cf   : > { %v1491_v23 = vadd.f32 %v1490_v11, %v2649_v3  ;;  %v2699_v11 = vld [vmem:[#allocation2 + $0x128] sm:$0xff]  ;;  %v1534_v53 = vmul.f32 %v2654_v10, %v2654_v10  ;;  %v1535_v63 = vmul.f32 %v2659_v15, %v2659_v15 }
 0x1d0   : > { %v1464_v28 = vadd.f32 %v1463_v17, %v2654_v10  ;;  %3125 = vst [vmem:[#allocation8_spill] sm:$0xff] %v2699_v11  ;;  %v1530_v17 = vmul.f32 %v2634_v42, %v2634_v42  ;;  %v1558_v35 = vadd.f32 %v1557_v18, %v1528_v61 }
 0x1d1   : > { %v1492_v33 = vadd.f32 %v1491_v23, %v2659_v15  ;;  %v2708_v23 = vld [vmem:[#allocation2 + $0x148] sm:$0x3]  ;;  %v1539_v15 = vmul.f32 %v2679_v37, %v2679_v37 }
 0x1d2   : > { %v1465_v39 = vadd.f32 %v1464_v28, %v2664_v21  ;;  %3128 = vst [vmem:[#allocation11_spill] sm:$0xff] %v2708_v23  ;;  %v1584_v28 = vadd.f32 %v1583_v9, %v1527_v45  ;;  %v1498_v45 = vsel %vm1470_vm0, %v2708_v23, 0.0 }
 0x1d3   : > { %v1493_v44 = vadd.f32 %v1492_v33, %v2669_v27  ;;  %v1532_v33 = vmul.f32 %v2644_v59, %v2644_v59 }
 0x1d4   : > { %v1466_v57 = vadd.f32 %v1465_v39, %v2674_v32  ;;  %v1585_v41 = vadd.f32 %v1584_v28, %v1529_v7 }
 0x1d5   : > { %v1494_v5 = vadd.f32 %v1493_v44, %v2679_v37 }
 0x1d6   : > { %v1467_v14 = vadd.f32 %v1466_v57, %v2684_v43  ;;  %v1559_v57 = vadd.f32 %v1558_v35, %v1530_v17  ;;  %v1538_v17 = vmul.f32 %v2674_v32, %v2674_v32 }
 0x1d7   : > { %v1495_v24 = vadd.f32 %v1494_v5, %v2689_v55  ;;  %v1586_v5 = vadd.f32 %v1585_v41, %v1531_v25  ;;  %v1540_v41 = vmul.f32 %v2684_v43, %v2684_v43 }
 0x1d8   : > { %v1468_v31 = vadd.f32 %v1467_v14, %v2694_v1  ;;  %v1536_v14 = vmul.f32 %v2664_v21, %v2664_v21  ;;  %v1560_v7 = vadd.f32 %v1559_v57, %v1532_v33 }
 0x1d9   : > { %v1496_v39 = vadd.f32 %v1495_v24, %v2699_v11  ;;  %v1537_v24 = vmul.f32 %v2669_v27, %v2669_v27  ;;  %v1587_v28 = vadd.f32 %v1586_v5, %v1533_v40 }
 0x1da   : > { %v1469_v44 = vadd.f32 %v1468_v31, %v2706_v20  ;;  %v1561_v35 = vadd.f32 %v1560_v7, %v1534_v53  ;;  %v1543_v7 = vmul.f32 %v2699_v11, %v2699_v11 }
 0x1db   : > { %v1497_v61 = vadd.f32 %v1496_v39, %v2713_v29  ;;  %v1588_v25 = vadd.f32 %v1587_v28, %v1535_v63  ;;  %v1546_v63 = vmul.f32 %v2701_v13, %v2701_v13  ;;  %v1545_v28 = vmul.f32 %v2713_v29, %v2713_v29 }
 0x1dc   : > { %v1472_v9 = vadd.f32 %v1471_v36, %v1469_v44  ;;  %v1562_v33 = vadd.f32 %v1561_v35, %v1536_v14  ;;  %v1544_v14 = vmul.f32 %v2706_v20, %v2706_v20 }
 0x1dd   : > { %v1499_v18 = vadd.f32 %v1498_v45, %v1497_v61  ;;  %v1541_v45 = vmul.f32 %v2689_v55, %v2689_v55  ;;  %v1589_v40 = vadd.f32 %v1588_v25, %v1537_v24  ;;  %v1542_v61 = vmul.f32 %v2694_v1, %v2694_v1 }
 0x1de   : > { %v1473_v31 = vrot.slane %v1472_v9, 4  ;;  %v1563_v53 = vadd.f32 %v1562_v33, %v1538_v17  ;;  %v1567_v25 = vsel %vm1470_vm0, %v1546_v63, 0.0 }
 0x1df   : > { %v1500_v39 = vrot.slane %v1499_v18, 4 }
 0x1e0   : > { %v1474_v36 = vadd.f32 %v1473_v31, %v1472_v9  ;;  %v1590_v9 = vadd.f32 %v1589_v40, %v1539_v15  ;;  %v1564_v24 = vadd.f32 %v1563_v53, %v1540_v41 }
 0x1e1   : > { %v1501_v44 = vadd.f32 %v1500_v39, %v1499_v18  ;;  %v1547_v18 = vmul.f32 %v2708_v23, %v2708_v23 }
 0x1e2   : > { %v1475_v57 = vrot.slane %v1474_v36, 2  ;;  %v1591_v31 = vadd.f32 %v1590_v9, %v1541_v45  ;;  %v1565_v35 = vadd.f32 %v1564_v24, %v1542_v61 }
 0x1e3   : > { %v1502_v5 = vrot.slane %v1501_v44, 2  ;;  %v1594_v15 = vsel %vm1470_vm0, %v1547_v18, 0.0 }
 0x1e4   : > { %v1476_v17 = vadd.f32 %v1475_v57, %v1474_v36  ;;  %v1592_v33 = vadd.f32 %v1591_v31, %v1543_v7  ;;  %v1566_v11 = vadd.f32 %v1565_v35, %v1544_v14 }
 0x1e5   : > { %v1503_v39 = vadd.f32 %v1502_v5, %v1501_v44 }
 0x1e6   : > { %v1593_v40 = vadd.f32 %v1592_v33, %v1545_v28  ;;  %v1477_v13 = vrot.slane %v1476_v17, 1  ;;  %v1568_v20 = vadd.f32 %v1567_v25, %v1566_v11 }
 0x1e7   : > { %v1504_v1 = vrot.slane %v1503_v39, 1 }
 0x1e8   : > { %v1595_v55 = vadd.f32 %v1594_v15, %v1593_v40  ;;  %v1569_v23 = vrot.slane %v1568_v20, 4  ;;  %v1478_v53 = vadd.f32 %v1477_v13, %v1476_v17  ;;  %v1623_v17 = vlaneseq }
 0x1e9   : > { %v1505_v29 = vadd.f32 %v1504_v1, %v1503_v39 }
 0x1ea   : > { %v1596_v41 = vrot.slane %v1595_v55, 4  ;;  %v1570_v43 = vadd.f32 %v1569_v23, %v1568_v20  ;;  %v1602_v61 = vmul.f32 0.0061728396, %v1478_v53  ;;  %v1624_v39 = vshrl.u32 %v1623_v17, 7  ;;  %v3132_v17 = vld [vmem:[#allocation6_spill] sm:$0xff] }
 0x1eb   : > { %v1603_v7 = vmul.f32 0.0061728396, %v1505_v29 }
 0x1ec   : > { %v1597_v45 = vadd.f32 %v1596_v41, %v1595_v55  ;;  %v1571_v36 = vrot.slane %v1570_v43, 2  ;;  %v1606_v18 = vmul.f32 %v1602_v61, %v1602_v61 }
 0x1ed   : > { %v1607_v11 = vmul.f32 %v1603_v7, %v1603_v7 }
 0x1ee   : > { %v1598_v57 = vrot.slane %v1597_v45, 2  ;;  %v1572_v44 = vadd.f32 %v1571_v36, %v1570_v43  ;;  %v2274_v43 = vmov 1966171168  }
 0x1ef   : > { %v1621_v23 = vunpack.c.l.s4 %v2274_v43 }
 0x1f0   : > { %v1599_v5 = vadd.f32 %v1598_v57, %v1597_v45  ;;  %v1573_v63 = vrot.slane %v1572_v44, 1  ;;  %v1612_v45 = vld [vmem:[%s3109_s2] sm:$0x3]  ;;  %v1640_v57 = vsub.s32 0, %v1624_v39 }
 0x1f1   : > { %v1622_v29 = vunpack.c.0.s8 %v1621_v23  ;;  %v3131_v23 = vld [vmem:[#allocation5_spill] sm:$0xff] }
 0x1f2   : > { %v1600_v9 = vrot.slane %v1599_v5, 1  ;;  %v1574_v14 = vadd.f32 %v1573_v63, %v1572_v44  ;;  %v1644_v44 = vsub.s32 1, %v1624_v39 }
 0x1f3   : > { %v1625_v15 = vsub.s32 %v1622_v29, %v1624_v39  ;;  %v3133_v29 = vld [vmem:[#allocation7_spill] sm:$0xff]  ;;  %v3134_v39 = vld [vmem:[#allocation8_spill] sm:$0xff] }
 0x1f4   : > { %v1601_v24 = vadd.f32 %v1600_v9, %v1599_v5  ;;  %v1604_v28 = vmul.f32 0.0061728396, %v1574_v14 }
 0x1f6   : > { %v1605_v31 = vmul.f32 0.0061728396, %v1601_v24  ;;  %v1608_v35 = vsub.f32 %v1604_v28, %v1606_v18 }
 0x1f8   : > { %v1609_v25 = vsub.f32 %v1605_v31, %v1607_v11  ;;  %v1610_v13 = vmax.f32 %v1608_v35, 0.0 }
 0x1fa   : > { %v1611_v20 = vmax.f32 %v1609_v25, 0.0  ;;  %v1613_v1 = vadd.f32 0.001, %v1610_v13 }
 0x1fc   : > { %v1614_v55 = vadd.f32 0.001, %v1611_v20  ;;  %2245 = vrsqrt.f32 %v1613_v1  ;;  %v3130_v1 = vld [vmem:[#allocation4_spill] sm:$0xff] }
 0x1fe   : > { %2247 = vrsqrt.f32 %v1614_v55 }
 0x206   : > { %v2246_v33 = vpop.eup %2245 }
 0x208   : > { %v2248_v40 = vpop.eup %2247 }
 0x209   : > { %v1619_v41 = vcombine.low %v2246_v33, %v2248_v40  ;;  %v3135_v33 = vld [vmem:[#allocation10_spill] sm:$0xff]  ;;  %v3136_v40 = vld [vmem:[#allocation12_spill] sm:$0xff] }
 0x20b   : > { %v1626_v53 = vrot.slane %v1619_v41, %v1625_v15 }
 0x20d   : > { %v1633_v36 = vrot.slane %v1626_v53, %v1625_v15 }
 0x20f   : > { %v1635_v5 = vmul.f32 %v1633_v36, %v1612_v45 }
 0x211   : > { %v2760_v63 = vrot.slane %v1635_v5, %v1640_v57  ;;  %v2762_v9 = vrot.slane %v1635_v5, %v1644_v44 }
 0x213   : > { %v1648_v14 = vmul.f32 %v2760_v63, %v1602_v61  ;;  %v1649_v18 = vmul.f32 %v2762_v9, %v1603_v7  ;;  %v1669_v24 = vmul.f32 %v2760_v63, %v2543_v47  ;;  %v1670_v11 = vmul.f32 %v2762_v9, %v2545_v48 }
 0x214   : > { %v1671_v28 = vmul.f32 %v2760_v63, %v2547_v49  ;;  %v1672_v31 = vmul.f32 %v2762_v9, %v2549_v50  ;;  %v1673_v35 = vmul.f32 %v2760_v63, %v2551_v51  ;;  %v1674_v61 = vmul.f32 %v2762_v9, %v2553_v52 }
 0x215   : > { %v1652_v25 = vcombine.low %v1648_v14, %v1649_v18  ;;  %v1675_v7 = vmul.f32 %v2760_v63, %v2557_v54  ;;  %v1676_v47 = vmul.f32 %v2762_v9, %v2561_v56  ;;  %v1677_v48 = vmul.f32 %v2760_v63, %v2564_v58 }
 0x216   : > { %v1678_v49 = vmul.f32 %v2762_v9, %v2567_v60  ;;  %v1679_v50 = vmul.f32 %v2760_v63, %v2570_v62  ;;  %v1680_v51 = vmul.f32 %v2762_v9, %v2573_v0  ;;  %v1681_v52 = vmul.f32 %v2760_v63, %v2576_v2  ;;  %v1636_v60 = vld [vmem:[%s3110_s3] sm:$0x3] }
 0x217   : > { %v1659_v13 = vrot.slane %v1652_v25, %v1625_v15  ;;  %v1682_v54 = vmul.f32 %v2762_v9, %v2579_v4  ;;  %v1683_v56 = vmul.f32 %v2760_v63, %v2582_v6  ;;  %v1684_v58 = vmul.f32 %v2762_v9, %v2585_v8 }
 0x218   : > { %v2803_v62 = vmul.f32 %v2760_v63, %v2592_v12  ;;  %v2807_v0 = vmul.f32 %v2762_v9, %v2599_v16  ;;  %v2811_v2 = vmul.f32 %v2760_v63, %v2604_v19  ;;  %v2815_v4 = vmul.f32 %v2762_v9, %v2609_v22 }
 0x219   : > { %v1666_v6 = vrot.slane %v1659_v13, %v1625_v15  ;;  %v2819_v8 = vmul.f32 %v2760_v63, %v2614_v26  ;;  %v2823_v12 = vmul.f32 %v2762_v9, %v2619_v30  ;;  %v2827_v16 = vmul.f32 %v2760_v63, %v2624_v34 }
 0x21a   : > { %v2831_v19 = vmul.f32 %v2762_v9, %v2629_v38  ;;  %v2835_v22 = vmul.f32 %v2760_v63, %v2634_v42  ;;  %v2839_v26 = vmul.f32 %v2762_v9, %v2639_v46  ;;  %v2843_v30 = vmul.f32 %v2760_v63, %v2644_v59 }
 0x21b   : > { %v1668_v20 = vsub.f32 %v1636_v60, %v1666_v6  ;;  %v2847_v34 = vmul.f32 %v2762_v9, %v2649_v3  ;;  %v2851_v38 = vmul.f32 %v2760_v63, %v2654_v10  ;;  %v2855_v42 = vmul.f32 %v2762_v9, %v3130_v1 }
 0x21c   : > { %v2859_v46 = vmul.f32 %v2760_v63, %v2664_v21  ;;  %v2863_v59 = vmul.f32 %v2762_v9, %v2669_v27  ;;  %v2867_v3 = vmul.f32 %v2760_v63, %v2674_v32  ;;  %v2871_v10 = vmul.f32 %v2762_v9, %v2679_v37 }
 0x21d   : > { %v2873_v55 = vrot.slane %v1668_v20, %v1640_v57  ;;  %v2875_v43 = vrot.slane %v1668_v20, %v1644_v44  ;;  %v2879_v21 = vmul.f32 %v2760_v63, %v3131_v23  ;;  %v2883_v27 = vmul.f32 %v2762_v9, %v3132_v17 }
 0x21e   : > { %v2887_v32 = vmul.f32 %v2760_v63, %v3133_v29  ;;  %v2891_v37 = vmul.f32 %v2762_v9, %v3134_v39  ;;  %v2895_v15 = vmul.f32 %v2760_v63, %v3135_v33  ;;  %v2899_v41 = vmul.f32 %v2762_v9, %v3136_v40 }
 0x21f   : > { %v1722_v53 = vadd.f32 %v2873_v55, %v1669_v24  ;;  %v1723_v45 = vadd.f32 %v2875_v43, %v1670_v11  ;;  %v1724_v36 = vadd.f32 %v2873_v55, %v1671_v28  ;;  %v1725_v57 = vadd.f32 %v2875_v43, %v1672_v31 }
 0x220   : > { %v1726_v44 = vadd.f32 %v2873_v55, %v1673_v35  ;;  %v1727_v5 = vadd.f32 %v2875_v43, %v1674_v61  ;;  %v1728_v14 = vadd.f32 %v2873_v55, %v1675_v7  ;;  %v1729_v18 = vadd.f32 %v2875_v43, %v1676_v47 }
 0x221   : > { %v1764_v25 = vmax.f32 %v1722_v53, 0.0  ;;  %v1765_v13 = vmax.f32 %v1723_v45, 0.0  ;;  %v1766_v60 = vmax.f32 %v1724_v36, 0.0  ;;  %v1767_v6 = vmax.f32 %v1725_v57, 0.0 }
 0x222   : > { %v1768_v20 = vmax.f32 %v1726_v44, 0.0  ;;  %v1769_v24 = vmax.f32 %v1727_v5, 0.0  ;;  %v1770_v1 = vmax.f32 %v1728_v14, 0.0  ;;  %v1771_v11 = vmax.f32 %v1729_v18, 0.0 }
 0x223   : > { %1806 = vst [vmem:[%s3111_s4] sm:$0xff] %v1764_v25  ;;  %1807 = vst [vmem:[%s3111_s4 + $0x8] sm:$0xff] %v1765_v13  ;;  %v1730_v28 = vadd.f32 %v2873_v55, %v1677_v48  ;;  %v1731_v31 = vadd.f32 %v2875_v43, %v1678_v49  ;;  %v1732_v35 = vadd.f32 %v2873_v55, %v1679_v50 }
 0x224   : > { %1808 = vst [vmem:[%s3111_s4 + $0x10] sm:$0xff] %v1766_v60  ;;  %1809 = vst [vmem:[%s3111_s4 + $0x18] sm:$0xff] %v1767_v6  ;;  %v1733_v61 = vadd.f32 %v2875_v43, %v1680_v51  ;;  %v1734_v7 = vadd.f32 %v2873_v55, %v1681_v52  ;;  %v1735_v47 = vadd.f32 %v2875_v43, %v1682_v54 }
 0x225   : > { %1810 = vst [vmem:[%s3111_s4 + $0x20] sm:$0xff] %v1768_v20  ;;  %1811 = vst [vmem:[%s3111_s4 + $0x28] sm:$0xff] %v1769_v24  ;;  %v1736_v48 = vadd.f32 %v2873_v55, %v1683_v56  ;;  %v1737_v49 = vadd.f32 %v2875_v43, %v1684_v58  ;;  %v1772_v50 = vmax.f32 %v1730_v28, 0.0  ;;  %v1773_v51 = vmax.f32 %v1731_v31, 0.0 }
 0x226   : > { %1812 = vst [vmem:[%s3111_s4 + $0x30] sm:$0xff] %v1770_v1  ;;  %1813 = vst [vmem:[%s3111_s4 + $0x38] sm:$0xff] %v1771_v11  ;;  %v1774_v23 = vmax.f32 %v1732_v35, 0.0  ;;  %v1775_v17 = vmax.f32 %v1733_v61, 0.0  ;;  %v1776_v29 = vmax.f32 %v1734_v7, 0.0  ;;  %v1777_v39 = vmax.f32 %v1735_v47, 0.0 }
 0x227   : > { %v1778_v33 = vmax.f32 %v1736_v48, 0.0  ;;  %v1779_v40 = vmax.f32 %v1737_v49, 0.0  ;;  %1814 = vst [vmem:[%s3111_s4 + $0x40] sm:$0xff] %v1772_v50  ;;  %1815 = vst [vmem:[%s3111_s4 + $0x48] sm:$0xff] %v1773_v51  ;;  %v1738_v52 = vadd.f32 %v2873_v55, %v2803_v62  ;;  %v1739_v54 = vadd.f32 %v2875_v43, %v2807_v0 }
 0x228   : > { %1816 = vst [vmem:[%s3111_s4 + $0x50] sm:$0xff] %v1774_v23  ;;  %1817 = vst [vmem:[%s3111_s4 + $0x58] sm:$0xff] %v1775_v17  ;;  %v1740_v56 = vadd.f32 %v2873_v55, %v2811_v2  ;;  %v1741_v58 = vadd.f32 %v2875_v43, %v2815_v4  ;;  %v1742_v62 = vadd.f32 %v2873_v55, %v2819_v8 }
 0x229   : > { %1818 = vst [vmem:[%s3111_s4 + $0x60] sm:$0xff] %v1776_v29  ;;  %1819 = vst [vmem:[%s3111_s4 + $0x68] sm:$0xff] %v1777_v39  ;;  %v1743_v0 = vadd.f32 %v2875_v43, %v2823_v12  ;;  %v1744_v2 = vadd.f32 %v2873_v55, %v2827_v16  ;;  %v1745_v4 = vadd.f32 %v2875_v43, %v2831_v19  ;;  %v1780_v53 = vmax.f32 %v1738_v52, 0.0 }
 0x22a   : > { %1820 = vst [vmem:[%s3111_s4 + $0x70] sm:$0xff] %v1778_v33  ;;  %1821 = vst [vmem:[%s3111_s4 + $0x78] sm:$0xff] %v1779_v40  ;;  %v1781_v45 = vmax.f32 %v1739_v54, 0.0  ;;  %v1782_v36 = vmax.f32 %v1740_v56, 0.0  ;;  %v1783_v57 = vmax.f32 %v1741_v58, 0.0  ;;  %v1784_v44 = vmax.f32 %v1742_v62, 0.0 }
 0x22b   : > { %v1785_v5 = vmax.f32 %v1743_v0, 0.0  ;;  %v1786_v14 = vmax.f32 %v1744_v2, 0.0  ;;  %v1787_v18 = vmax.f32 %v1745_v4, 0.0  ;;  %1822 = vst [vmem:[%s3111_s4 + $0x80] sm:$0xff] %v1780_v53  ;;  %v1746_v8 = vadd.f32 %v2873_v55, %v2835_v22 }
 0x22c   : > { %1823 = vst [vmem:[%s3111_s4 + $0x88] sm:$0xff] %v1781_v45  ;;  %1824 = vst [vmem:[%s3111_s4 + $0x90] sm:$0xff] %v1782_v36  ;;  %v1747_v12 = vadd.f32 %v2875_v43, %v2839_v26  ;;  %v1748_v16 = vadd.f32 %v2873_v55, %v2843_v30  ;;  %v1749_v19 = vadd.f32 %v2875_v43, %v2847_v34 }
 0x22d   : > { %1825 = vst [vmem:[%s3111_s4 + $0x98] sm:$0xff] %v1783_v57  ;;  %1826 = vst [vmem:[%s3111_s4 + $0xa0] sm:$0xff] %v1784_v44  ;;  %v1750_v22 = vadd.f32 %v2873_v55, %v2851_v38  ;;  %v1751_v26 = vadd.f32 %v2875_v43, %v2855_v42  ;;  %v1752_v30 = vadd.f32 %v2873_v55, %v2859_v46  ;;  %v1788_v25 = vmax.f32 %v1746_v8, 0.0 }
 0x22e   : > { %1827 = vst [vmem:[%s3111_s4 + $0xa8] sm:$0xff] %v1785_v5  ;;  %1828 = vst [vmem:[%s3111_s4 + $0xb0] sm:$0xff] %v1786_v14  ;;  %v1753_v34 = vadd.f32 %v2875_v43, %v2863_v59  ;;  %v1789_v13 = vmax.f32 %v1747_v12, 0.0  ;;  %v1790_v60 = vmax.f32 %v1748_v16, 0.0  ;;  %v1791_v6 = vmax.f32 %v1749_v19, 0.0 }
 0x22f   : > { %1829 = vst [vmem:[%s3111_s4 + $0xb8] sm:$0xff] %v1787_v18  ;;  %v1792_v20 = vmax.f32 %v1750_v22, 0.0  ;;  %v1793_v24 = vmax.f32 %v1751_v26, 0.0  ;;  %v1794_v1 = vmax.f32 %v1752_v30, 0.0  ;;  %1830 = vst [vmem:[%s3111_s4 + $0xc0] sm:$0xff] %v1788_v25  ;;  %v1754_v38 = vadd.f32 %v2873_v55, %v2867_v3 }
 0x230   : > { %v1795_v11 = vmax.f32 %v1753_v34, 0.0  ;;  %1831 = vst [vmem:[%s3111_s4 + $0xc8] sm:$0xff] %v1789_v13  ;;  %1832 = vst [vmem:[%s3111_s4 + $0xd0] sm:$0xff] %v1790_v60  ;;  %v1755_v42 = vadd.f32 %v2875_v43, %v2871_v10  ;;  %v1756_v46 = vadd.f32 %v2873_v55, %v2879_v21  ;;  %v1757_v59 = vadd.f32 %v2875_v43, %v2883_v27 }
 0x231   : > { %1833 = vst [vmem:[%s3111_s4 + $0xd8] sm:$0xff] %v1791_v6  ;;  %1834 = vst [vmem:[%s3111_s4 + $0xe0] sm:$0xff] %v1792_v20  ;;  %v1758_v3 = vadd.f32 %v2873_v55, %v2887_v32  ;;  %v1759_v10 = vadd.f32 %v2875_v43, %v2891_v37  ;;  %v1760_v21 = vadd.f32 %v2873_v55, %v2895_v15  ;;  %v1796_v28 = vmax.f32 %v1754_v38, 0.0  ;;  %v3137_v32 = vld [vmem:[#allocation9_spill] sm:$0xff]  ;;  %v3138_v15 = vld [vmem:[#allocation11_spill] sm:$0xff] }
 0x232   : > { %1835 = vst [vmem:[%s3111_s4 + $0xe8] sm:$0xff] %v1793_v24  ;;  %1836 = vst [vmem:[%s3111_s4 + $0xf0] sm:$0xff] %v1794_v1  ;;  %v1761_v27 = vadd.f32 %v2875_v43, %v2899_v41  ;;  %v1797_v31 = vmax.f32 %v1755_v42, 0.0  ;;  %v1798_v35 = vmax.f32 %v1756_v46, 0.0  ;;  %v1799_v61 = vmax.f32 %v1757_v59, 0.0 }
 0x233   : > { %1837 = vst [vmem:[%s3111_s4 + $0xf8] sm:$0xff] %v1795_v11  ;;  %v1800_v7 = vmax.f32 %v1758_v3, 0.0  ;;  %v1801_v47 = vmax.f32 %v1759_v10, 0.0  ;;  %v1802_v48 = vmax.f32 %v1760_v21, 0.0  ;;  %1838 = vst [vmem:[%s3111_s4 + $0x100] sm:$0xff] %v1796_v28  ;;  %v1709_v37 = vmul.f32 %v2760_v63, %v3137_v32 }
 0x234   : > { %v1803_v49 = vmax.f32 %v1761_v27, 0.0  ;;  %1839 = vst [vmem:[%s3111_s4 + $0x108] sm:$0xff] %v1797_v31  ;;  %1840 = vst [vmem:[%s3111_s4 + $0x110] sm:$0xff] %v1798_v35  ;;  %v1710_v41 = vmul.f32 %v2762_v9, %v3138_v15 }
 0x235   : > { %1841 = vst [vmem:[%s3111_s4 + $0x118] sm:$0xff] %v1799_v61  ;;  %1842 = vst [vmem:[%s3111_s4 + $0x120] sm:$0xff] %v1800_v7  ;;  %v1762_v63 = vadd.f32 %v2873_v55, %v1709_v37 }
 0x236   : > { %1843 = vst [vmem:[%s3111_s4 + $0x128] sm:$0xff] %v1801_v47  ;;  %1844 = vst [vmem:[%s3111_s4 + $0x130] sm:$0xff] %v1802_v48  ;;  %v1763_v9 = vadd.f32 %v2875_v43, %v1710_v41 }
 0x237   : > { %1845 = vst [vmem:[%s3111_s4 + $0x138] sm:$0xff] %v1803_v49  ;;  %v1804_v50 = vmax.f32 %v1762_v63, 0.0 }
 0x238   : > { %v1805_v51 = vmax.f32 %v1763_v9, 0.0 }
 0x239   : > { %1846 = vst [vmem:[%s3111_s4 + $0x140] sm:$0x3] %v1804_v50 }
 0x23a   : > { %1847 = vst [vmem:[%s3111_s4 + $0x148] sm:$0x3] %v1805_v51 }
 0x23b PF: > { %p11_p11 = scmp.ge.s32.totalorder %s2319_s19, 6   ;;  %s3139_s15 = smov %s2267_s16 }
 0x23c   : > { %s3140_s16 = smov %s2328_s22  ;;  %s3141_s17 = smov %s2319_s19 }
 0x23d   :  { %13 = sbr.rel (!%p11_p11) target bundleno = 2 (0x2), region = 101 }

// kernel: reduction_b_forward.9
= control target key start
LH: loop header
LB: loop body
LE: loop exit
PB: predicated region body
PF: predicated region fallthrough
CT: control target
= control target key end

     0   :  { %s3370_s15 = smov 0   ;;  %s3372_s16 = smov 0   ;;  %s4813_s0 = inlined_call_operand.vmem [shape: bf16[162,2048], index: 0, kind: input, shape index: {}]   ;;  %s4814_s1 = inlined_call_operand.vmem [shape: bf16[2048,320], index: 1, kind: input, shape index: {}]   ;;  %s4815_s2 = inlined_call_operand.vmem [shape: f32[1,320], index: 2, kind: input, shape index: {}]   ;;  %s4816_s3 = inlined_call_operand.vmem [shape: f32[1,320], index: 3, kind: input, shape index: {}]   ;;  %s4817_s4 = inlined_call_operand.vmem [shape: f32[162,320], index: 4, kind: output, shape index: {}]  }
   0x1   :  { %s3374_s17 = smov 0  }
   0x2 LB: > { %s3386_s18 = sadd.s32 4294967295, %s3341_s17   ;;  %s3389_s19 = sadd.s32 1, %s3341_s17   ;;  %s3341_s17 = sphi %s3374_s17, %s4994_s17   ;;  %s3337_s16 = sphi %s3372_s16, %s4993_s16   ;;  %s3333_s15 = sphi %s3370_s15, %s4992_s15  }
   0x3   : > { %s18_s20 = ssub.s32 %s3341_s17, %s3389_s19  ;;  %s21_s21 = sadd.s32 1, %s3337_s16 }
   0x4   : > { %p19_p0 = scmp.eq.s32.totalorder %s18_s20, 0  ;;  %p28_p1 = scmp.ne.s32.totalorder %s3337_s16, %s3333_s15 }
   0x5   : > { %p29_p2 = scmp.eq.s32.totalorder %s3341_s17, 0  ;;  %p2737_p4 = scmp.ge.s32.totalorder %s3341_s17, 4 }
   0x6   : > { %s3398_s22 = scalar_select %p19_p0, %s3337_s16, %s21_s21  }
   0x7   : > { %p30_p3 = por %p29_p2, %p28_p1  ;;  %149 = sbr.rel (%p2737_p4) target bundleno = 39 (0x27), region = 24 }
   0xe   : > { %152 = sbr.rel (!%p30_p3) target bundleno = 39 (0x27), region = 28  ;;  %s154_s23 = sand.u32 (%p30_p3), 1, %s3337_s16  }
   0xf   : > { %s2887_s24 = sshll.u32 (%p30_p3), %s3341_s17, 4  ;;  %s3092_s25 = smul.u32 (%p30_p3), 336, %s154_s23 }
  0x10   : > { %s3406_s28 = scalar_lea.vmem (%p30_p3), %s4813_s0, %s2887_s24 }
  0x11   : > { %v172_v0 = vld [vmem:[%s3406_s28] sm:$0xff] (%p30_p3)  ;;  %v174_v1 = vld [vmem:[%s3406_s28 + $0x8] sm:$0xff] (%p30_p3)  ;;  %s3414_s29 = scalar_lea.vmem (%p30_p3), [#allocation3], %s3092_s25 }
  0x12   : > { %v176_v2 = vld [vmem:[%s3406_s28 + $0x40] sm:$0xff] (%p30_p3)  ;;  %v178_v3 = vld [vmem:[%s3406_s28 + $0x48] sm:$0xff] (%p30_p3)  ;;  %173 = vst [vmem:[%s3414_s29] sm:$0xff] (%p30_p3), %v172_v0  ;;  %175 = vst [vmem:[%s3414_s29 + $0x8] sm:$0xff] (%p30_p3), %v174_v1 }
  0x13   : > { %v180_v4 = vld [vmem:[%s3406_s28 + $0x80] sm:$0xff] (%p30_p3)  ;;  %v182_v5 = vld [vmem:[%s3406_s28 + $0x88] sm:$0xff] (%p30_p3)  ;;  %177 = vst [vmem:[%s3414_s29 + $0x10] sm:$0xff] (%p30_p3), %v176_v2  ;;  %179 = vst [vmem:[%s3414_s29 + $0x18] sm:$0xff] (%p30_p3), %v178_v3 }
  0x14   : > { %181 = vst [vmem:[%s3414_s29 + $0x20] sm:$0xff] (%p30_p3), %v180_v4  ;;  %183 = vst [vmem:[%s3414_s29 + $0x28] sm:$0xff] (%p30_p3), %v182_v5  ;;  %v184_v6 = vld [vmem:[%s3406_s28 + $0xc0] sm:$0xff] (%p30_p3)  ;;  %v186_v7 = vld [vmem:[%s3406_s28 + $0xc8] sm:$0xff] (%p30_p3) }
  0x15   : > { %v188_v8 = vld [vmem:[%s3406_s28 + $0x100] sm:$0xff]  ;;  %185 = vst [vmem:[%s3414_s29 + $0x30] sm:$0xff] %v184_v6  ;;  %187 = vst [vmem:[%s3414_s29 + $0x38] sm:$0xff] %v186_v7  ;;  %v190_v9 = vld [vmem:[%s3406_s28 + $0x108] sm:$0xff] }
  0x16   : > { %189 = vst [vmem:[%s3414_s29 + $0x40] sm:$0xff] %v188_v8  ;;  %v192_v10 = vld [vmem:[%s3406_s28 + $0x140] sm:$0xff]  ;;  %v194_v11 = vld [vmem:[%s3406_s28 + $0x148] sm:$0xff]  ;;  %191 = vst [vmem:[%s3414_s29 + $0x48] sm:$0xff] %v190_v9 }
  0x17   : > { %193 = vst [vmem:[%s3414_s29 + $0x50] sm:$0xff] %v192_v10  ;;  %195 = vst [vmem:[%s3414_s29 + $0x58] sm:$0xff] %v194_v11  ;;  %v196_v12 = vld [vmem:[%s3406_s28 + $0x180] sm:$0xff]  ;;  %v198_v13 = vld [vmem:[%s3406_s28 + $0x188] sm:$0xff] }
  0x18   : > { %v200_v14 = vld [vmem:[%s3406_s28 + $0x1c0] sm:$0xff]  ;;  %197 = vst [vmem:[%s3414_s29 + $0x60] sm:$0xff] %v196_v12  ;;  %199 = vst [vmem:[%s3414_s29 + $0x68] sm:$0xff] %v198_v13  ;;  %v202_v15 = vld [vmem:[%s3406_s28 + $0x1c8] sm:$0xff] }
  0x19   : > { %201 = vst [vmem:[%s3414_s29 + $0x70] sm:$0xff] %v200_v14  ;;  %v204_v16 = vld [vmem:[%s3406_s28 + $0x200] sm:$0xff]  ;;  %v206_v17 = vld [vmem:[%s3406_s28 + $0x208] sm:$0xff]  ;;  %203 = vst [vmem:[%s3414_s29 + $0x78] sm:$0xff] %v202_v15 }
  0x1a   : > { %205 = vst [vmem:[%s3414_s29 + $0x80] sm:$0xff] %v204_v16  ;;  %207 = vst [vmem:[%s3414_s29 + $0x88] sm:$0xff] %v206_v17  ;;  %v208_v18 = vld [vmem:[%s3406_s28 + $0x240] sm:$0xff]  ;;  %v210_v19 = vld [vmem:[%s3406_s28 + $0x248] sm:$0xff] }
  0x1b   : > { %v212_v20 = vld [vmem:[%s3406_s28 + $0x280] sm:$0xff]  ;;  %209 = vst [vmem:[%s3414_s29 + $0x90] sm:$0xff] %v208_v18  ;;  %211 = vst [vmem:[%s3414_s29 + $0x98] sm:$0xff] %v210_v19  ;;  %v214_v21 = vld [vmem:[%s3406_s28 + $0x288] sm:$0xff] }
  0x1c   : > { %213 = vst [vmem:[%s3414_s29 + $0xa0] sm:$0xff] %v212_v20  ;;  %v216_v22 = vld [vmem:[%s3406_s28 + $0x2c0] sm:$0xff]  ;;  %v218_v23 = vld [vmem:[%s3406_s28 + $0x2c8] sm:$0xff]  ;;  %215 = vst [vmem:[%s3414_s29 + $0xa8] sm:$0xff] %v214_v21 }
  0x1d   : > { %217 = vst [vmem:[%s3414_s29 + $0xb0] sm:$0xff] %v216_v22  ;;  %219 = vst [vmem:[%s3414_s29 + $0xb8] sm:$0xff] %v218_v23  ;;  %v220_v24 = vld [vmem:[%s3406_s28 + $0x300] sm:$0xff]  ;;  %v222_v25 = vld [vmem:[%s3406_s28 + $0x308] sm:$0xff] }
  0x1e   : > { %v224_v26 = vld [vmem:[%s3406_s28 + $0x340] sm:$0xff]  ;;  %221 = vst [vmem:[%s3414_s29 + $0xc0] sm:$0xff] %v220_v24  ;;  %223 = vst [vmem:[%s3414_s29 + $0xc8] sm:$0xff] %v222_v25  ;;  %v226_v27 = vld [vmem:[%s3406_s28 + $0x348] sm:$0xff] }
  0x1f   : > { %225 = vst [vmem:[%s3414_s29 + $0xd0] sm:$0xff] %v224_v26  ;;  %v228_v28 = vld [vmem:[%s3406_s28 + $0x380] sm:$0xff]  ;;  %v230_v29 = vld [vmem:[%s3406_s28 + $0x388] sm:$0xff]  ;;  %227 = vst [vmem:[%s3414_s29 + $0xd8] sm:$0xff] %v226_v27 }
  0x20   : > { %229 = vst [vmem:[%s3414_s29 + $0xe0] sm:$0xff] %v228_v28  ;;  %231 = vst [vmem:[%s3414_s29 + $0xe8] sm:$0xff] %v230_v29  ;;  %v232_v30 = vld [vmem:[%s3406_s28 + $0x3c0] sm:$0xff]  ;;  %v234_v31 = vld [vmem:[%s3406_s28 + $0x3c8] sm:$0xff] }
  0x21   : > { %v236_v32 = vld [vmem:[%s3406_s28 + $0x400] sm:$0xff]  ;;  %233 = vst [vmem:[%s3414_s29 + $0xf0] sm:$0xff] %v232_v30  ;;  %235 = vst [vmem:[%s3414_s29 + $0xf8] sm:$0xff] %v234_v31  ;;  %v238_v33 = vld [vmem:[%s3406_s28 + $0x408] sm:$0xff] }
  0x22   : > { %237 = vst [vmem:[%s3414_s29 + $0x100] sm:$0xff] %v236_v32  ;;  %v240_v34 = vld [vmem:[%s3406_s28 + $0x440] sm:$0xff]  ;;  %v242_v35 = vld [vmem:[%s3406_s28 + $0x448] sm:$0xff]  ;;  %239 = vst [vmem:[%s3414_s29 + $0x108] sm:$0xff] %v238_v33 }
  0x23   : > { %241 = vst [vmem:[%s3414_s29 + $0x110] sm:$0xff] %v240_v34  ;;  %243 = vst [vmem:[%s3414_s29 + $0x118] sm:$0xff] %v242_v35  ;;  %v244_v36 = vld [vmem:[%s3406_s28 + $0x480] sm:$0xff]  ;;  %v246_v37 = vld [vmem:[%s3406_s28 + $0x488] sm:$0xff] }
  0x24   : > { %v248_v38 = vld [vmem:[%s3406_s28 + $0x4c0] sm:$0xff]  ;;  %245 = vst [vmem:[%s3414_s29 + $0x120] sm:$0xff] %v244_v36  ;;  %247 = vst [vmem:[%s3414_s29 + $0x128] sm:$0xff] %v246_v37  ;;  %v250_v39 = vld [vmem:[%s3406_s28 + $0x4c8] sm:$0xff] }
  0x25   : > { %249 = vst [vmem:[%s3414_s29 + $0x130] sm:$0xff] %v248_v38  ;;  %v252_v40 = vld [vmem:[%s3406_s28 + $0x500] sm:$0xff]  ;;  %v254_v41 = vld [vmem:[%s3406_s28 + $0x508] sm:$0xff]  ;;  %251 = vst [vmem:[%s3414_s29 + $0x138] sm:$0xff] %v250_v39 }
  0x26   : > { %253 = vst [vmem:[%s3414_s29 + $0x140] sm:$0xff] %v252_v40  ;;  %255 = vst [vmem:[%s3414_s29 + $0x148] sm:$0xff] %v254_v41 }
  0x27 PF: > { %p2740_p5 = scmp.ge.s32.totalorder %s3341_s17, 1  ;;  %p270_p6 = scmp.lt.s32.totalorder %s3341_s17, 5 }
  0x29   : > { %p271_p7 = pnand %p2740_p5, %p270_p6 }
  0x2a   : > { %s277_s30 = sand.u32 (!%p271_p7), 1, %s3333_s15   ;;  %s2741_s5 = sshll.u32 (!%p271_p7), %s3386_s18, 6 }
  0x2b   : > { %274 = sbr.rel (%p271_p7) target bundleno = 708 (0x2c4), region = 55  ;;  %p305_p8 = scmp.lt.s32.totalorder (!%p271_p7), %s2741_s5, 255 }
  0x2c   : > { %s3093_s6 = smul.u32 (!%p271_p7), 336, %s277_s30  ;;  %p2743_p9 = scmp.ne.s32.totalorder (!%p271_p7), %s3386_s18, 0 }
  0x2e   : > { %s3503_s11 = scalar_lea.vmem (!%p271_p7), [#allocation3], %s3093_s6 }
  0x32   : > { %s4996_s5 = smov (!%p305_p8, %s2741_s5), 255  ;;  %315 = sbr.rel (%p2743_p9) target bundleno = 84 (0x54), region = 63 }
  0x33   : > { %s3094_s7 = smul.u32 12, %s4996_s5  ;;  %vm318_vm0 = vcmask (!%p2743_p9), 523264   ;;  %vm379_vm1 = vcmask (!%p2743_p9), 517120   ;;  %v3343_v42 = vmov (!%p2743_p9), 0.0  }
  0x34   : > { %316 = vst [vmem:[#allocation2] sm:$0xff] (!%p2743_p9), %v3343_v42  ;;  %317 = vst [vmem:[#allocation2 + $0x8] sm:$0xff] (!%p2743_p9), %v3343_v42 }
  0x35   : > { %s3501_s10 = scalar_lea.vmem %s4814_s1, %s3094_s7  ;;  %320 = vst [vmem:[#allocation2 + $0x18] sm:$0xff] (!%p2743_p9), %v3343_v42  ;;  %321 = vst [vmem:[#allocation2 + $0x20] sm:$0xff] (!%p2743_p9), %v3343_v42 }
  0x36   : > { %323 = vst [vmem:[#allocation2 + $0x30] sm:$0xff] (!%p2743_p9), %v3343_v42  ;;  %324 = vst [vmem:[#allocation2 + $0x38] sm:$0xff] (!%p2743_p9), %v3343_v42 }
  0x37   : > { %326 = vst [vmem:[#allocation2 + $0x48] sm:$0xff] (!%p2743_p9), %v3343_v42  ;;  %327 = vst [vmem:[#allocation2 + $0x50] sm:$0xff] (!%p2743_p9), %v3343_v42 }
  0x38   : > { %329 = vst [vmem:[#allocation2 + $0x60] sm:$0xff] (!%p2743_p9), %v3343_v42  ;;  %330 = vst [vmem:[#allocation2 + $0x68] sm:$0xff] (!%p2743_p9), %v3343_v42 }
  0x39   : > { %332 = vst [vmem:[#allocation2 + $0x78] sm:$0xff] %v3343_v42  ;;  %333 = vst [vmem:[#allocation2 + $0x80] sm:$0xff] %v3343_v42 }
  0x3a   : > { %335 = vst [vmem:[#allocation2 + $0x90] sm:$0xff] %v3343_v42  ;;  %336 = vst [vmem:[#allocation2 + $0x98] sm:$0xff] %v3343_v42 }
  0x3b   : > { %338 = vst [vmem:[#allocation2 + $0xa8] sm:$0xff] %v3343_v42  ;;  %339 = vst [vmem:[#allocation2 + $0xb0] sm:$0xff] %v3343_v42 }
  0x3c   : > { %341 = vst [vmem:[#allocation2 + $0xc0] sm:$0xff] %v3343_v42  ;;  %342 = vst [vmem:[#allocation2 + $0xc8] sm:$0xff] %v3343_v42 }
  0x3d   : > { %344 = vst [vmem:[#allocation2 + $0xd8] sm:$0xff] %v3343_v42  ;;  %345 = vst [vmem:[#allocation2 + $0xe0] sm:$0xff] %v3343_v42 }
  0x3e   : > { %347 = vst [vmem:[#allocation2 + $0xf0] sm:$0xff] %v3343_v42  ;;  %348 = vst [vmem:[#allocation2 + $0xf8] sm:$0xff] %v3343_v42 }
  0x3f   : > { %350 = vst [vmem:[#allocation2 + $0x108] sm:$0xff] %v3343_v42  ;;  %351 = vst [vmem:[#allocation2 + $0x110] sm:$0xff] %v3343_v42 }
  0x40   : > { %353 = vst [vmem:[#allocation2 + $0x120] sm:$0xff] %v3343_v42  ;;  %354 = vst [vmem:[#allocation2 + $0x128] sm:$0xff] %v3343_v42 }
  0x41   : > { %356 = vst [vmem:[#allocation2 + $0x138] sm:$0xff] %v3343_v42  ;;  %357 = vst [vmem:[#allocation2 + $0x140] sm:$0xff] %v3343_v42 }
  0x42   : > { %359 = vst [vmem:[#allocation2 + $0x150] sm:$0xff] %v3343_v42  ;;  %360 = vst [vmem:[#allocation2 + $0x158] sm:$0xff] %v3343_v42 }
  0x43   : > { %362 = vst [vmem:[#allocation2 + $0x168] sm:$0xff] %v3343_v42  ;;  %363 = vst [vmem:[#allocation2 + $0x170] sm:$0xff] %v3343_v42 }
  0x44   : > { %365 = vst [vmem:[#allocation2 + $0x180] sm:$0xff] %v3343_v42  ;;  %366 = vst [vmem:[#allocation2 + $0x188] sm:$0xff] %v3343_v42 }
  0x45   : > { %368 = vst [vmem:[#allocation2 + $0x198] sm:$0xff] %v3343_v42  ;;  %369 = vst [vmem:[#allocation2 + $0x1a0] sm:$0xff] %v3343_v42 }
  0x46   : > { %371 = vst [vmem:[#allocation2 + $0x1b0] sm:$0xff] %v3343_v42  ;;  %372 = vst [vmem:[#allocation2 + $0x1b8] sm:$0xff] %v3343_v42 }
  0x47   : > { %374 = vst [vmem:[#allocation2 + $0x1c8] sm:$0xff] %v3343_v42  ;;  %375 = vst [vmem:[#allocation2 + $0x1d0] sm:$0xff] %v3343_v42 }
  0x48   : > { %377 = vst [vmem:[#allocation2 + $0x1e0] sm:$0x3] %v3343_v42  ;;  %378 = vst [vmem:[#allocation2 + $0x1e8] sm:$0x3] %v3343_v42 }
  0x49   : > { %319 = vst.msk [vmem:[#allocation2 + $0x10] sm:$0xff] %vm318_vm0, %v3343_v42  ;;  %322 = vst.msk [vmem:[#allocation2 + $0x28] sm:$0xff] %vm318_vm0, %v3343_v42 }
  0x4a   : > { %325 = vst.msk [vmem:[#allocation2 + $0x40] sm:$0xff] %vm318_vm0, %v3343_v42  ;;  %328 = vst.msk [vmem:[#allocation2 + $0x58] sm:$0xff] %vm318_vm0, %v3343_v42 }
  0x4b   : > { %331 = vst.msk [vmem:[#allocation2 + $0x70] sm:$0xff] %vm318_vm0, %v3343_v42  ;;  %334 = vst.msk [vmem:[#allocation2 + $0x88] sm:$0xff] %vm318_vm0, %v3343_v42 }
  0x4c   : > { %337 = vst.msk [vmem:[#allocation2 + $0xa0] sm:$0xff] %vm318_vm0, %v3343_v42  ;;  %340 = vst.msk [vmem:[#allocation2 + $0xb8] sm:$0xff] %vm318_vm0, %v3343_v42 }
  0x4d   : > { %343 = vst.msk [vmem:[#allocation2 + $0xd0] sm:$0xff] %vm318_vm0, %v3343_v42  ;;  %346 = vst.msk [vmem:[#allocation2 + $0xe8] sm:$0xff] %vm318_vm0, %v3343_v42 }
  0x4e   : > { %349 = vst.msk [vmem:[#allocation2 + $0x100] sm:$0xff] %vm318_vm0, %v3343_v42  ;;  %352 = vst.msk [vmem:[#allocation2 + $0x118] sm:$0xff] %vm318_vm0, %v3343_v42 }
  0x4f   : > { %355 = vst.msk [vmem:[#allocation2 + $0x130] sm:$0xff] %vm318_vm0, %v3343_v42  ;;  %358 = vst.msk [vmem:[#allocation2 + $0x148] sm:$0xff] %vm318_vm0, %v3343_v42 }
  0x50   : > { %361 = vst.msk [vmem:[#allocation2 + $0x160] sm:$0xff] %vm318_vm0, %v3343_v42  ;;  %364 = vst.msk [vmem:[#allocation2 + $0x178] sm:$0xff] %vm318_vm0, %v3343_v42 }
  0x51   : > { %367 = vst.msk [vmem:[#allocation2 + $0x190] sm:$0xff] %vm318_vm0, %v3343_v42  ;;  %370 = vst.msk [vmem:[#allocation2 + $0x1a8] sm:$0xff] %vm318_vm0, %v3343_v42 }
  0x52   : > { %373 = vst.msk [vmem:[#allocation2 + $0x1c0] sm:$0xff] %vm318_vm0, %v3343_v42  ;;  %376 = vst.msk [vmem:[#allocation2 + $0x1d8] sm:$0xff] %vm318_vm0, %v3343_v42 }
  0x53   : > { %380 = vst.msk [vmem:[#allocation2 + $0x1f0] sm:$0x3] %vm379_vm1, %v3343_v42 }
  0x54 PF: > { %v3121_v43 = vld [vmem:[%s3501_s10 + $0x4] ss:$12 sps:$4 sm:$0xff]   ;;  %v3123_v44 = vld [vmem:[%s3501_s10 + $0xc8] ss:$12 sps:$4 sm:$0xff]   ;;  %v3124_v45 = vld [vmem:[%s3501_s10] ss:$12 sps:$4 sm:$0xff]  }
  0x55   : > { %1340 = vmatprep.subr.bf16.mxu0 %v3121_v43  ;;  %2888 = vmatprep.subr.bf16.mxu1 %v3123_v44  ;;  %v3125_v46 = vld [vmem:[%s3501_s10 + $0x8] ss:$12 sps:$4 sm:$0xff]   ;;  %v3128_v48 = vld [vmem:[%s3501_s10 + $0xe0] ss:$12 sps:$4 sm:$0xff]   ;;  %v3129_v49 = vld [vmem:[%s3501_s10 + $0x18] ss:$12 sps:$4 sm:$0xff]  }
  0x56   : > { %1341 = vmatpush1.bf16.msra.mxu0 %v3124_v45  ;;  %v3126_v47 = vld [vmem:[%s3501_s10 + $0x1c] ss:$12 sps:$4 sm:$0xff]   ;;  %2889 = vmatpush3.bf16.msra.mxu1 %v3125_v46  ;;  %v3130_v50 = vld [vmem:[%s3501_s10 + $0x20] ss:$12 sps:$4 sm:$0xff]   ;;  %v3133_v52 = vld [vmem:[%s3501_s10 + $0xf8] ss:$12 sps:$4 sm:$0xff]  }
  0x57   : > { %1342 = vmatprep.subr.bf16.mxu0 %v3126_v47  ;;  %2890 = vmatprep.subr.bf16.mxu1 %v3128_v48  ;;  %v3131_v51 = vld [vmem:[%s3501_s10 + $0x34] ss:$12 sps:$4 sm:$0xff]   ;;  %v3134_v53 = vld [vmem:[%s3501_s10 + $0x30] ss:$12 sps:$4 sm:$0xff]   ;;  %v3135_v54 = vld [vmem:[%s3501_s10 + $0x38] ss:$12 sps:$4 sm:$0xff]  }
  0x58   : > { %v3136_v55 = vld [vmem:[%s3501_s10 + $0x4c] ss:$12 sps:$4 sm:$0xff]   ;;  %v3138_v56 = vld [vmem:[%s3501_s10 + $0x110] ss:$12 sps:$4 sm:$0xff]   ;;  %v3139_v57 = vld [vmem:[%s3501_s10 + $0x48] ss:$12 sps:$4 sm:$0xff]  }
  0x59   : > { %v3140_v58 = vld [vmem:[%s3501_s10 + $0x50] ss:$12 sps:$4 sm:$0xff]   ;;  %v3143_v60 = vld [vmem:[%s3501_s10 + $0x128] ss:$12 sps:$4 sm:$0xff]   ;;  %v3144_v61 = vld [vmem:[%s3501_s10 + $0x60] ss:$12 sps:$4 sm:$0xff]  }
  0x5a   : > { %1343 = vmatpush1.bf16.msra.mxu0 %v3129_v49  ;;  %2891 = vmatpush3.bf16.msra.mxu1 %v3130_v50  ;;  %v3141_v59 = vld [vmem:[%s3501_s10 + $0x64] ss:$12 sps:$4 sm:$0xff]   ;;  %v3145_v62 = vld [vmem:[%s3501_s10 + $0x68] ss:$12 sps:$4 sm:$0xff]   ;;  %v3148_v0 = vld [vmem:[%s3501_s10 + $0x140] ss:$12 sps:$4 sm:$0xff]  }
  0x5b   : > { %1344 = vmatprep.subr.bf16.mxu0 %v3131_v51  ;;  %2892 = vmatprep.subr.bf16.mxu1 %v3133_v52  ;;  %v3146_v63 = vld [vmem:[%s3501_s10 + $0x7c] ss:$12 sps:$4 sm:$0xff]   ;;  %v3149_v1 = vld [vmem:[%s3501_s10 + $0x78] ss:$12 sps:$4 sm:$0xff]   ;;  %v3150_v2 = vld [vmem:[%s3501_s10 + $0x80] ss:$12 sps:$4 sm:$0xff]  }
  0x5c   : > { %v3151_v3 = vld [vmem:[%s3501_s10 + $0x94] ss:$12 sps:$4 sm:$0xff]   ;;  %v3153_v4 = vld [vmem:[%s3501_s10 + $0x158] ss:$12 sps:$4 sm:$0xff]   ;;  %v3154_v5 = vld [vmem:[%s3501_s10 + $0x90] ss:$12 sps:$4 sm:$0xff]  }
  0x5d   : > { %v3155_v6 = vld [vmem:[%s3501_s10 + $0x98] ss:$12 sps:$4 sm:$0xff]   ;;  %v3158_v8 = vld [vmem:[%s3501_s10 + $0x170] ss:$12 sps:$4 sm:$0xff]   ;;  %v3159_v9 = vld [vmem:[%s3501_s10 + $0xa8] ss:$12 sps:$4 sm:$0xff]  }
  0x5e   : > { %1345 = vmatpush1.bf16.msra.mxu0 %v3134_v53  ;;  %2893 = vmatpush3.bf16.msra.mxu1 %v3135_v54  ;;  %v3156_v7 = vld [vmem:[%s3501_s10 + $0xac] ss:$12 sps:$4 sm:$0xff]   ;;  %v3160_v11 = vld [vmem:[%s3501_s10 + $0xb0] ss:$12 sps:$4 sm:$0xff]   ;;  %v3172_v18 = vld [vmem:[%s3501_s10 + $0xf4] ss:$12 sps:$4 sm:$0xff]  }
  0x5f   : > { %1346 = vmatprep.subr.bf16.mxu0 %v3136_v55  ;;  %2894 = vmatprep.subr.bf16.mxu1 %v3138_v56  ;;  %v3163_v10 = vld [vmem:[%s3503_s11 + $0x4] ss:$16 sps:$4 sm:$0xff]   ;;  %v3164_v12 = vld [vmem:[%s3501_s10 + $0xc4] ss:$12 sps:$4 sm:$0xff]   ;;  %v3625_v13 = vld [vmem:[%s3503_s11] ss:$16 sps:$4 sm:$0xff]  }
  0x60   : > { %1654 = vmatprep.mubr.bf16.mxu1 %v3163_v10  ;;  %1372 = vmatprep.mubr.bf16.mxu0 %v3163_v10  ;;  %v3166_v14 = vld [vmem:[%s3501_s10 + $0xc0] ss:$12 sps:$4 sm:$0xff]   ;;  %v3167_v15 = vld [vmem:[%s3501_s10 + $0xdc] ss:$12 sps:$4 sm:$0xff]   ;;  %v3169_v17 = vld [vmem:[%s3501_s10 + $0xd8] ss:$12 sps:$4 sm:$0xff]  }
  0x61   : > { %v3630_v16 = vld [vmem:[%s3503_s11 + $0x24] ss:$16 sps:$4 sm:$0xff]   ;;  %v3637_v19 = vld [vmem:[%s3503_s11 + $0x20] ss:$16 sps:$4 sm:$0xff]   ;;  %v3181_v25 = vld [vmem:[%s3501_s10 + $0x124] ss:$12 sps:$4 sm:$0xff]  }
  0x62   : > { %1347 = vmatpush1.bf16.msra.mxu0 %v3139_v57  ;;  %2895 = vmatpush3.bf16.msra.mxu1 %v3140_v58  ;;  %v3175_v20 = vld [vmem:[%s3501_s10 + $0xf0] ss:$12 sps:$4 sm:$0xff]   ;;  %v3176_v21 = vld [vmem:[%s3501_s10 + $0x10c] ss:$12 sps:$4 sm:$0xff]   ;;  %v3178_v23 = vld [vmem:[%s3501_s10 + $0x108] ss:$12 sps:$4 sm:$0xff]  }
  0x63   : > { %1348 = vmatprep.subr.bf16.mxu0 %v3141_v59  ;;  %2896 = vmatprep.subr.bf16.mxu1 %v3143_v60  ;;  %v3642_v22 = vld [vmem:[%s3503_s11 + $0x44] ss:$16 sps:$4 sm:$0xff]   ;;  %v3197_v24 = vld [vmem:[%s3501_s10 + $0x248] ss:$12 sps:$4 sm:$0xff]   ;;  %v3187_v33 = vld [vmem:[%s3501_s10 + $0x138] ss:$12 sps:$4 sm:$0xff]  }
  0x64   : > { %v3200_v26 = vld [vmem:[%s3501_s10 + $0x188] ss:$12 sps:$4 sm:$0xff]   ;;  %v3184_v28 = vld [vmem:[%s3501_s10 + $0x120] ss:$12 sps:$4 sm:$0xff]   ;;  %v3193_v36 = vld [vmem:[%s3501_s10 + $0x150] ss:$12 sps:$4 sm:$0xff]  }
  0x65   : > { %v3651_v27 = vld [vmem:[%s3503_s11 + $0x40] ss:$16 sps:$4 sm:$0xff]   ;;  %v3656_v30 = vld [vmem:[%s3503_s11 + $0x64] ss:$16 sps:$4 sm:$0xff]   ;;  %v3190_v34 = vld [vmem:[%s3501_s10 + $0x154] ss:$12 sps:$4 sm:$0xff]  }
  0x66   : > { %1349 = vmatpush1.bf16.msra.mxu0 %v3144_v61  ;;  %2897 = vmatpush3.bf16.msra.mxu1 %v3145_v62  ;;  %v3185_v29 = vld [vmem:[%s3501_s10 + $0x13c] ss:$12 sps:$4 sm:$0xff]   ;;  %v3211_v31 = vld [vmem:[%s3501_s10 + $0x260] ss:$12 sps:$4 sm:$0xff]   ;;  %v3222_v39 = vld [vmem:[%s3501_s10 + $0x278] ss:$12 sps:$4 sm:$0xff]  }
  0x67   : > { %1350 = vmatprep.subr.bf16.mxu0 %v3146_v63  ;;  %2898 = vmatprep.subr.bf16.mxu1 %v3148_v0  ;;  %v3212_v32 = vld [vmem:[%s3501_s10 + $0x1a0] ss:$12 sps:$4 sm:$0xff]   ;;  %v3665_v35 = vld [vmem:[%s3503_s11 + $0x60] ss:$16 sps:$4 sm:$0xff]   ;;  %v3203_v42 = vld [vmem:[%s3501_s10 + $0x184] ss:$12 sps:$4 sm:$0xff]  }
  0x68   : > { %v3194_v37 = vld [vmem:[%s3501_s10 + $0x16c] ss:$12 sps:$4 sm:$0xff]   ;;  %v3196_v41 = vld [vmem:[%s3501_s10 + $0x168] ss:$12 sps:$4 sm:$0xff]   ;;  %v3235_v45 = vld [vmem:[%s3501_s10 + $0x290] ss:$12 sps:$4 sm:$0xff]  }
  0x69   : > { %v3670_v38 = vld [vmem:[%s3503_s11 + $0x84] ss:$16 sps:$4 sm:$0xff]   ;;  %v3223_v40 = vld [vmem:[%s3501_s10 + $0x1b8] ss:$12 sps:$4 sm:$0xff]   ;;  %v3215_v50 = vld [vmem:[%s3501_s10 + $0x1b4] ss:$12 sps:$4 sm:$0xff]  }
  0x6a   : > { %1351 = vmatpush1.bf16.msra.mxu0 %v3149_v1  ;;  %2899 = vmatpush3.bf16.msra.mxu1 %v3150_v2  ;;  %v3201_v43 = vld [vmem:[%s3501_s10 + $0x180] ss:$12 sps:$4 sm:$0xff]   ;;  %v3680_v44 = vld [vmem:[%s3503_s11 + $0x80] ss:$16 sps:$4 sm:$0xff]   ;;  %v3237_v47 = vld [vmem:[%s3501_s10 + $0x1d0] ss:$12 sps:$4 sm:$0xff]  }
  0x6b   : > { %1352 = vmatprep.subr.bf16.mxu0 %v3151_v3  ;;  %2900 = vmatprep.subr.bf16.mxu1 %v3153_v4  ;;  %v3207_v46 = vld [vmem:[%s3501_s10 + $0x19c] ss:$12 sps:$4 sm:$0xff]   ;;  %v3205_v49 = vld [vmem:[%s3501_s10 + $0x198] ss:$12 sps:$4 sm:$0xff]   ;;  %v3252_v56 = vld [vmem:[%s3501_s10 + $0x2c0] ss:$12 sps:$4 sm:$0xff]  }
  0x6c   : > { %v3686_v48 = vld [vmem:[%s3503_s11 + $0xa4] ss:$16 sps:$4 sm:$0xff]   ;;  %v3695_v51 = vld [vmem:[%s3503_s11 + $0xa0] ss:$16 sps:$4 sm:$0xff]   ;;  %v3226_v61 = vld [vmem:[%s3501_s10 + $0x1e4] ss:$12 sps:$4 sm:$0xff]  }
  0x6d   : > { %v3247_v52 = vld [vmem:[%s3501_s10 + $0x2a8] ss:$12 sps:$4 sm:$0xff]   ;;  %v3213_v54 = vld [vmem:[%s3501_s10 + $0x1b0] ss:$12 sps:$4 sm:$0xff]   ;;  %v3221_v57 = vld [vmem:[%s3501_s10 + $0x1cc] ss:$12 sps:$4 sm:$0xff]  }
  0x6e   : > { %1353 = vmatpush1.bf16.msra.mxu0 %v3154_v5  ;;  %2901 = vmatpush3.bf16.msra.mxu1 %v3155_v6  ;;  %v3248_v53 = vld [vmem:[%s3501_s10 + $0x1e8] ss:$12 sps:$4 sm:$0xff]   ;;  %v3701_v55 = vld [vmem:[%s3503_s11 + $0xc4] ss:$16 sps:$4 sm:$0xff]   ;;  %v3256_v59 = vld [vmem:[%s3501_s10 + $0x2d8] ss:$12 sps:$4 sm:$0xff]  }
  0x6f   : > { %1354 = vmatprep.subr.bf16.mxu0 %v3156_v7  ;;  %2902 = vmatprep.subr.bf16.mxu1 %v3158_v8  ;;  %v3253_v58 = vld [vmem:[%s3501_s10 + $0x200] ss:$12 sps:$4 sm:$0xff]   ;;  %v3219_v60 = vld [vmem:[%s3501_s10 + $0x1c8] ss:$12 sps:$4 sm:$0xff]   ;;  %v3257_v62 = vld [vmem:[%s3501_s10 + $0x218] ss:$12 sps:$4 sm:$0xff]  }
  0x70   : > { %v3261_v63 = vld [vmem:[%s3501_s10 + $0x2f0] ss:$12 sps:$4 sm:$0xff]   ;;  %v3716_v0 = vld [vmem:[%s3503_s11 + $0xc0] ss:$16 sps:$4 sm:$0xff]   ;;  %v3224_v1 = vld [vmem:[%s3501_s10 + $0x1e0] ss:$12 sps:$4 sm:$0xff]  }
  0x71   : > { %v3720_v2 = vld [vmem:[%s3503_s11 + $0xe4] ss:$16 sps:$4 sm:$0xff]   ;;  %v3230_v5 = vld [vmem:[%s3501_s10 + $0x1f8] ss:$12 sps:$4 sm:$0xff]   ;;  %v3240_v6 = vld [vmem:[%s3501_s10 + $0x214] ss:$12 sps:$4 sm:$0xff]  }
  0x72   : > { %1355 = vmatpush1.bf16.msra.mxu0 %v3159_v9  ;;  %2903 = vmatpush3.bf16.msra.mxu1 %v3160_v11  ;;  %v3232_v3 = vld [vmem:[%s3501_s10 + $0x1fc] ss:$12 sps:$4 sm:$0xff]   ;;  %v3243_v10 = vld [vmem:[%s3501_s10 + $0x22c] ss:$12 sps:$4 sm:$0xff]   ;;  %vm1927_vm2 = vcmask 523264   ;;  %vm1988_vm3 = vcmask 517120  }
  0x73   : > { %1356 = vmatprep.subr.bf16.mxu0 %v3164_v12  ;;  %2970 = vmatprep.subr.bf16.mxu1 %v3197_v24  ;;  %v3262_v4 = vld [vmem:[%s3501_s10 + $0x230] ss:$12 sps:$4 sm:$0xff]   ;;  %v3229_v7 = vld [vmem:[%s3503_s11 + $0xe0] ss:$16 sps:$4 sm:$0xff]   ;;  %p2884_p10 = scmp.ne.s32.totalorder %s3386_s18, 3 }
  0x74   : > { %v3233_v8 = vld [vmem:[%s3503_s11 + $0x104] ss:$16 sps:$4 sm:$0xff]   ;;  %v3241_v11 = vld [vmem:[%s3501_s10 + $0x228] ss:$12 sps:$4 sm:$0xff]   ;;  %v3251_v12 = vld [vmem:[%s3501_s10 + $0x244] ss:$12 sps:$4 sm:$0xff]  }
  0x75   : > { %1655 = vmatmul.mubr.bf16.vlgmr.msra.gmra.mrb[0].mxu1 %v3625_v13  ;;  %v3238_v9 = vld [vmem:[%s3501_s10 + $0x210] ss:$12 sps:$4 sm:$0xff]   ;;  %v3269_v24 = vld [vmem:[%s3501_s10 + $0x288] ss:$12 sps:$4 sm:$0xff]  }
  0x76   : > { %1357 = vmatpush1.bf16.msra.mxu0 %v3166_v14  ;;  %1662 = vmatprep.mubr.bf16.mxu1 %v3630_v16  ;;  %v3244_v14 = vld [vmem:[%s3503_s11 + $0x124] ss:$16 sps:$4 sm:$0xff]  }
  0x77   : > { %1358 = vmatprep.subr.bf16.mxu0 %v3167_v15  ;;  %2971 = vmatpush3.bf16.msra.mxu1 %v3200_v26  ;;  %v3249_v15 = vld [vmem:[%s3501_s10 + $0x240] ss:$12 sps:$4 sm:$0xff]  }
  0x78   : > { %2972 = vmatprep.subr.bf16.mxu1 %v3211_v31  ;;  %v3286_v31 = vld [vmem:[%s3501_s10 + $0x2d4] ss:$12 sps:$4 sm:$0xff]  }
  0x7a   : > { %1359 = vmatpush1.bf16.msra.mxu0 %v3169_v17  ;;  %v3258_v17 = vld [vmem:[%s3501_s10 + $0x258] ss:$12 sps:$4 sm:$0xff]  }
  0x7b   : > { %1360 = vmatprep.subr.bf16.mxu0 %v3172_v18  ;;  %2973 = vmatpush3.bf16.msra.mxu1 %v3212_v32  ;;  %v484_v18 = vld [vmem:[%s3503_s11 + $0x140] sm:$0x11]  ;;  %v3266_v32 = vld [vmem:[%s3503_s11 + $0x8] ss:$16 sps:$4 sm:$0xff]  }
  0x7c   : > { %2974 = vmatprep.subr.bf16.mxu1 %v3222_v39  ;;  %v2784_v26 = vcombine.low %v484_v18, %v484_v18  ;;  %v3283_v39 = vld [vmem:[%s3503_s11 + $0x48] ss:$16 sps:$4 sm:$0xff]  }
  0x7d   : > { %1663 = vmatmul.mubr.bf16.gmra.mrb[4].mxu1 %v3637_v19 }
  0x7e   : > { %1361 = vmatpush1.bf16.msra.mxu0 %v3175_v20  ;;  %1670 = vmatprep.mubr.bf16.mxu1 %v3642_v22  ;;  %v3246_v20 = vld [vmem:[%s3503_s11 + $0x120] ss:$16 sps:$4 sm:$0xff]  }
  0x7f   : > { %1362 = vmatprep.subr.bf16.mxu0 %v3176_v21  ;;  %2975 = vmatpush3.bf16.msra.mxu1 %v3223_v40  ;;  %v2785_v21 = vcombine.high %v484_v18, %v484_v18  ;;  %v3287_v40 = vld [vmem:[%s3503_s11 + $0x6c] ss:$16 sps:$4 sm:$0xff]  }
  0x80   : > { %2976 = vmatprep.subr.bf16.mxu1 %v3235_v45  ;;  %v3298_v45 = vld [vmem:[%s3503_s11 + $0xa8] ss:$16 sps:$4 sm:$0xff]  }
  0x82   : > { %1363 = vmatpush1.bf16.msra.mxu0 %v3178_v23  ;;  %v3271_v23 = vld [vmem:[%s3501_s10 + $0x28c] ss:$12 sps:$4 sm:$0xff]  }
  0x83   : > { %1364 = vmatprep.subr.bf16.mxu0 %v3181_v25  ;;  %2977 = vmatpush3.bf16.msra.mxu1 %v3237_v47  ;;  %v3277_v25 = vld [vmem:[%s3501_s10 + $0x2a4] ss:$12 sps:$4 sm:$0xff]  }
  0x84   : > { %2978 = vmatprep.subr.bf16.mxu1 %v3247_v52  ;;  %v3301_v47 = vld [vmem:[%s3503_s11 + $0xc8] ss:$16 sps:$4 sm:$0xff]   ;;  %v3308_v52 = vld [vmem:[%s3503_s11 + $0x12c] ss:$16 sps:$4 sm:$0xff]  }
  0x85   : > { %1671 = vmatmul.mubr.bf16.gmra.mrb[8].mxu1 %v3651_v27 }
  0x86   : > { %1365 = vmatpush1.bf16.msra.mxu0 %v3184_v28  ;;  %1678 = vmatprep.mubr.bf16.mxu1 %v3656_v30  ;;  %v3275_v28 = vld [vmem:[%s3501_s10 + $0x2a0] ss:$12 sps:$4 sm:$0xff]  }
  0x87   : > { %1366 = vmatprep.subr.bf16.mxu0 %v3185_v29  ;;  %2979 = vmatpush3.bf16.msra.mxu1 %v3248_v53  ;;  %v3282_v29 = vld [vmem:[%s3501_s10 + $0x2bc] ss:$12 sps:$4 sm:$0xff]   ;;  %v485_v53 = vld [vmem:[%s3503_s11 + $0x148] sm:$0x11] }
  0x88   : > { %2980 = vmatprep.subr.bf16.mxu1 %v3252_v56  ;;  %v2786_v56 = vcombine.low %v485_v53, %v485_v53 }
  0x8a   : > { %1367 = vmatpush1.bf16.msra.mxu0 %v3187_v33  ;;  %v3272_v33 = vld [vmem:[%s3503_s11 + $0x2c] ss:$16 sps:$4 sm:$0xff]  }
  0x8b   : > { %1368 = vmatprep.subr.bf16.mxu0 %v3190_v34  ;;  %2981 = vmatpush3.bf16.msra.mxu1 %v3253_v58  ;;  %v3284_v34 = vld [vmem:[%s3501_s10 + $0x2d0] ss:$12 sps:$4 sm:$0xff]  }
  0x8c   : > { %2982 = vmatprep.subr.bf16.mxu1 %v3256_v59 }
  0x8d   : > { %1679 = vmatmul.mubr.bf16.gmra.mrb[12].mxu1 %v3665_v35 }
  0x8e   : > { %1369 = vmatpush1.bf16.msra.mxu0 %v3193_v36  ;;  %1686 = vmatprep.mubr.bf16.mxu1 %v3670_v38  ;;  %v3290_v36 = vld [vmem:[%s3501_s10 + $0x2e8] ss:$12 sps:$4 sm:$0xff]  }
  0x8f   : > { %1370 = vmatprep.subr.bf16.mxu0 %v3194_v37  ;;  %2983 = vmatpush3.bf16.msra.mxu1 %v3257_v62  ;;  %v3274_v37 = vld [vmem:[%s3503_s11 + $0x28] ss:$16 sps:$4 sm:$0xff]  }
  0x90   : > { %2984 = vmatprep.subr.bf16.mxu1 %v3261_v63 }
  0x92   : > { %1371 = vmatpush1.bf16.msra.mxu0 %v3196_v41  ;;  %v3289_v41 = vld [vmem:[%s3503_s11 + $0x68] ss:$16 sps:$4 sm:$0xff]  }
  0x93   : > { %1481 = vmatprep.subr.bf16.mxu0 %v3203_v42  ;;  %2985 = vmatpush3.bf16.msra.mxu1 %v3262_v4  ;;  %v3293_v42 = vld [vmem:[%s3503_s11 + $0x8c] ss:$16 sps:$4 sm:$0xff]  }
  0x95   : > { %1373 = vmatmul.mubr.bf16.vlgmr.msra.gmra.mrb[0].mxu0 %v3625_v13  ;;  %1687 = vmatmul.mubr.bf16.gmra.mrb[16].mxu1 %v3680_v44  ;;  %v3236_v13 = vld [vmem:[%s3503_s11 + $0x100] ss:$16 sps:$4 sm:$0xff]  }
  0x96   : > { %1482 = vmatpush1.bf16.msra.mxu0 %v3201_v43  ;;  %1382 = vmatprep.mubr.bf16.mxu0 %v3630_v16  ;;  %v3260_v16 = vld [vmem:[%s3501_s10 + $0x25c] ss:$12 sps:$4 sm:$0xff]   ;;  %v3295_v43 = vld [vmem:[%s3503_s11 + $0x88] ss:$16 sps:$4 sm:$0xff]  }
  0x97   : > { %1483 = vmatprep.subr.bf16.mxu0 %v3207_v46  ;;  %1694 = vmatprep.mubr.bf16.mxu1 %v3686_v48  ;;  %v3299_v46 = vld [vmem:[%s3503_s11 + $0xcc] ss:$16 sps:$4 sm:$0xff]  }
  0x9a   : > { %1484 = vmatpush1.bf16.msra.mxu0 %v3205_v49  ;;  %v3304_v49 = vld [vmem:[%s3503_s11 + $0xe8] ss:$16 sps:$4 sm:$0xff]  }
  0x9b   : > { %1485 = vmatprep.subr.bf16.mxu0 %v3215_v50  ;;  %v3305_v50 = vld [vmem:[%s3503_s11 + $0x10c] ss:$16 sps:$4 sm:$0xff]  }
  0x9d   : > { %1383 = vmatmul.mubr.bf16.gmra.mrb[4].mxu0 %v3637_v19  ;;  %1695 = vmatmul.mubr.bf16.gmra.mrb[20].mxu1 %v3695_v51  ;;  %v3265_v19 = vld [vmem:[%s3501_s10 + $0x274] ss:$12 sps:$4 sm:$0xff]  }
  0x9e   : > { %1486 = vmatpush1.bf16.msra.mxu0 %v3213_v54  ;;  %1392 = vmatprep.mubr.bf16.mxu0 %v3642_v22  ;;  %v3263_v22 = vld [vmem:[%s3501_s10 + $0x270] ss:$12 sps:$4 sm:$0xff]  }
  0x9f   : > { %1702 = vmatprep.mubr.bf16.mxu1 %v3701_v55  ;;  %1487 = vmatprep.subr.bf16.mxu0 %v3221_v57  ;;  %v3310_v54 = vld [vmem:[%s3503_s11 + $0x128] ss:$16 sps:$4 sm:$0xff]  }
  0xa2   : > { %1488 = vmatpush1.bf16.msra.mxu0 %v3219_v60 }
  0xa3   : > { %1489 = vmatprep.subr.bf16.mxu0 %v3226_v61 }
  0xa5   : > { %1393 = vmatmul.mubr.bf16.gmra.mrb[8].mxu0 %v3651_v27  ;;  %1703 = vmatmul.mubr.bf16.gmra.mrb[24].mxu1 %v3716_v0  ;;  %v3268_v27 = vld [vmem:[%s3503_s11 + $0xc] ss:$16 sps:$4 sm:$0xff]  }
  0xa6   : > { %1402 = vmatprep.mubr.bf16.mxu0 %v3656_v30  ;;  %1490 = vmatpush1.bf16.msra.mxu0 %v3224_v1  ;;  %v3280_v30 = vld [vmem:[%s3501_s10 + $0x2b8] ss:$12 sps:$4 sm:$0xff]  }
  0xa7   : > { %1710 = vmatprep.mubr.bf16.mxu1 %v3720_v2  ;;  %1491 = vmatprep.subr.bf16.mxu0 %v3232_v3 }
  0xaa   : > { %1492 = vmatpush1.bf16.msra.mxu0 %v3230_v5 }
  0xab   : > { %1493 = vmatprep.subr.bf16.mxu0 %v3240_v6 }
  0xad   : > { %1403 = vmatmul.mubr.bf16.gmra.mrb[12].mxu0 %v3665_v35  ;;  %1711 = vmatmul.mubr.bf16.gmra.mrb[28].mxu1 %v3229_v7  ;;  %v3292_v35 = vld [vmem:[%s3501_s10 + $0x2ec] ss:$12 sps:$4 sm:$0xff]  }
  0xae   : > { %1412 = vmatprep.mubr.bf16.mxu0 %v3670_v38  ;;  %1718 = vmatprep.mubr.bf16.mxu1 %v3233_v8  ;;  %v3278_v38 = vld [vmem:[%s3503_s11 + $0x4c] ss:$16 sps:$4 sm:$0xff]  }
  0xaf   : > { %1494 = vmatpush1.bf16.msra.mxu0 %v3238_v9 }
  0xb0   : > { %1495 = vmatprep.subr.bf16.mxu0 %v3243_v10 }
  0xb3   : > { %1496 = vmatpush1.bf16.msra.mxu0 %v3241_v11 }
  0xb4   : > { %1497 = vmatprep.subr.bf16.mxu0 %v3251_v12 }
  0xb5   : > { %1413 = vmatmul.mubr.bf16.gmra.mrb[16].mxu0 %v3680_v44  ;;  %1719 = vmatmul.mubr.bf16.gmra.mrb[32].mxu1 %v3236_v13  ;;  %v3296_v44 = vld [vmem:[%s3503_s11 + $0xac] ss:$16 sps:$4 sm:$0xff]  }
  0xb6   : > { %1422 = vmatprep.mubr.bf16.mxu0 %v3686_v48  ;;  %1726 = vmatprep.mubr.bf16.mxu1 %v3244_v14  ;;  %v3302_v48 = vld [vmem:[%s3503_s11 + $0xec] ss:$16 sps:$4 sm:$0xff]  }
  0xb7   : > { %1498 = vmatpush1.bf16.msra.mxu0 %v3249_v15 }
  0xb8   : > { %1499 = vmatprep.subr.bf16.mxu0 %v3260_v16 }
  0xbb   : > { %1500 = vmatpush1.bf16.msra.mxu0 %v3258_v17 }
  0xbc   : > { %1501 = vmatprep.subr.bf16.mxu0 %v3265_v19 }
  0xbd   : > { %1423 = vmatmul.mubr.bf16.gmra.mrb[20].mxu0 %v3695_v51  ;;  %1727 = vmatmul.mubr.bf16.gmra.mrb[36].mxu1 %v3246_v20  ;;  %v3307_v51 = vld [vmem:[%s3503_s11 + $0x108] ss:$16 sps:$4 sm:$0xff]  }
  0xbe   : > { %1432 = vmatprep.mubr.bf16.mxu0 %v3701_v55  ;;  %1734 = vmatprep.mubr.bf16.mxu1 %v2785_v21  ;;  %v2787_v55 = vcombine.high %v485_v53, %v485_v53 }
  0xbf   : > { %1502 = vmatpush1.bf16.msra.mxu0 %v3263_v22 }
  0xc0   : > { %1503 = vmatprep.subr.bf16.mxu0 %v3271_v23 }
  0xc3   : > { %1504 = vmatpush1.bf16.msra.mxu0 %v3269_v24 }
  0xc4   : > { %1505 = vmatprep.subr.bf16.mxu0 %v3277_v25 }
  0xc5   : > { %1433 = vmatmul.mubr.bf16.gmra.mrb[24].mxu0 %v3716_v0  ;;  %1735 = vmatmul.mubr.bf16.gmra.mrb[40].mxu1 %v2784_v26 }
  0xc6   : > { %1442 = vmatprep.mubr.bf16.mxu0 %v3720_v2  ;;  %1774 = vmatprep.mubr.bf16.mxu1 %v3268_v27 }
  0xc7   : > { %1506 = vmatpush1.bf16.msra.mxu0 %v3275_v28 }
  0xc8   : > { %1507 = vmatprep.subr.bf16.mxu0 %v3282_v29 }
  0xcb   : > { %1508 = vmatpush1.bf16.msra.mxu0 %v3280_v30 }
  0xcc   : > { %1509 = vmatprep.subr.bf16.mxu0 %v3286_v31 }
  0xcd   : > { %1443 = vmatmul.mubr.bf16.gmra.mrb[28].mxu0 %v3229_v7  ;;  %1775 = vmatmul.mubr.bf16.vlgmr.msra.gmra.mrb[44].mxu1 %v3266_v32 }
  0xce   : > { %1452 = vmatprep.mubr.bf16.mxu0 %v3233_v8  ;;  %1782 = vmatprep.mubr.bf16.mxu1 %v3272_v33 }
  0xcf   : > { %1510 = vmatpush1.bf16.msra.mxu0 %v3284_v34 }
  0xd0   : > { %1511 = vmatprep.subr.bf16.mxu0 %v3292_v35 }
  0xd3   : > { %1512 = vmatpush1.bf16.msra.mxu0 %v3290_v36 }
  0xd5   : > { %1453 = vmatmul.mubr.bf16.gmra.mrb[32].mxu0 %v3236_v13  ;;  %1783 = vmatmul.mubr.bf16.gmra.mrb[48].mxu1 %v3274_v37 }
  0xd6   : > { %1462 = vmatprep.mubr.bf16.mxu0 %v3244_v14  ;;  %1790 = vmatprep.mubr.bf16.mxu1 %v3278_v38 }
  0xdd   : > { %1463 = vmatmul.mubr.bf16.gmra.mrb[36].mxu0 %v3246_v20  ;;  %1791 = vmatmul.mubr.bf16.gmra.mrb[52].mxu1 %v3283_v39 }
  0xde   : > { %1472 = vmatprep.mubr.bf16.mxu0 %v2785_v21  ;;  %1798 = vmatprep.mubr.bf16.mxu1 %v3287_v40 }
  0xe5   : > { %1473 = vmatmul.mubr.bf16.gmra.mrb[40].mxu0 %v2784_v26  ;;  %1799 = vmatmul.mubr.bf16.gmra.mrb[56].mxu1 %v3289_v41 }
  0xe6   : > { %1513 = vmatprep.mubr.bf16.mxu0 %v3268_v27  ;;  %1806 = vmatprep.mubr.bf16.mxu1 %v3293_v42 }
  0xed   : > { %1514 = vmatmul.mubr.bf16.vlgmr.msra.gmra.mrb[0].mxu0 %v3266_v32  ;;  %1807 = vmatmul.mubr.bf16.gmra.mrb[60].mxu1 %v3295_v43 }
  0xee   : > { %1523 = vmatprep.mubr.bf16.mxu0 %v3272_v33  ;;  %1814 = vmatprep.mubr.bf16.mxu1 %v3296_v44 }
  0xf5   : > { %1524 = vmatmul.mubr.bf16.gmra.mrb[4].mxu0 %v3274_v37  ;;  %1815 = vmatmul.mubr.bf16.gmra.mrb[64].mxu1 %v3298_v45 }
  0xf6   : > { %1533 = vmatprep.mubr.bf16.mxu0 %v3278_v38  ;;  %1822 = vmatprep.mubr.bf16.mxu1 %v3299_v46 }
  0xfd   : > { %1534 = vmatmul.mubr.bf16.gmra.mrb[8].mxu0 %v3283_v39  ;;  %1823 = vmatmul.mubr.bf16.gmra.mrb[68].mxu1 %v3301_v47 }
  0xfe   : > { %1543 = vmatprep.mubr.bf16.mxu0 %v3287_v40  ;;  %1830 = vmatprep.mubr.bf16.mxu1 %v3302_v48 }
 0x105   : > { %1544 = vmatmul.mubr.bf16.gmra.mrb[12].mxu0 %v3289_v41  ;;  %1831 = vmatmul.mubr.bf16.gmra.mrb[72].mxu1 %v3304_v49 }
 0x106   : > { %1553 = vmatprep.mubr.bf16.mxu0 %v3293_v42  ;;  %1838 = vmatprep.mubr.bf16.mxu1 %v3305_v50 }
 0x10d   : > { %1554 = vmatmul.mubr.bf16.gmra.mrb[16].mxu0 %v3295_v43  ;;  %1839 = vmatmul.mubr.bf16.gmra.mrb[76].mxu1 %v3307_v51 }
 0x10e   : > { %1563 = vmatprep.mubr.bf16.mxu0 %v3296_v44  ;;  %1846 = vmatprep.mubr.bf16.mxu1 %v3308_v52 }
 0x115   : > { %1564 = vmatmul.mubr.bf16.gmra.mrb[20].mxu0 %v3298_v45  ;;  %1847 = vmatmul.mubr.bf16.gmra.mrb[80].mxu1 %v3310_v54 }
 0x116   : > { %1573 = vmatprep.mubr.bf16.mxu0 %v3299_v46  ;;  %1854 = vmatprep.mubr.bf16.mxu1 %v2787_v55 }
 0x11d   : > { %1574 = vmatmul.mubr.bf16.gmra.mrb[24].mxu0 %v3301_v47  ;;  %1855 = vmatmul.mubr.bf16.gmra.mrb[84].mxu1 %v2786_v56 }
 0x11e   : > { %1583 = vmatprep.mubr.bf16.mxu0 %v3302_v48 }
 0x125   : > { %1584 = vmatmul.mubr.bf16.gmra.mrb[28].mxu0 %v3304_v49 }
 0x126   : > { %1593 = vmatprep.mubr.bf16.mxu0 %v3305_v50 }
 0x12d   : > { %1594 = vmatmul.mubr.bf16.gmra.mrb[32].mxu0 %v3307_v51 }
 0x12e   : > { %1603 = vmatprep.mubr.bf16.mxu0 %v3308_v52 }
 0x135   : > { %1604 = vmatmul.mubr.bf16.gmra.mrb[36].mxu0 %v3310_v54 }
 0x136   : > { %1613 = vmatprep.mubr.bf16.mxu0 %v2787_v55 }
 0x13d   : > { %1614 = vmatmul.mubr.bf16.gmra.mrb[44].mxu0 %v2786_v56 }
 0x148   : > { %v2904_v57 = vpop.f32.mrb[0].mxu1 }
 0x149   : > { %v2905_v58 = vpop.f32.mrb[1].mxu1 }
 0x14a   : > { %v3784_v59 = vadd.f32 %v2905_v58, %v2904_v57  ;;  %v2907_v60 = vpop.f32.mrb[2].mxu1 }
 0x14b   : > { %v2908_v61 = vpop.f32.mrb[3].mxu1 }
 0x14c   : > { %v3786_v62 = vadd.f32 %v2908_v61, %v2907_v60 }
 0x150   : > { %v2910_v63 = vpop.f32.mrb[4].mxu1 }
 0x151   : > { %v2911_v0 = vpop.f32.mrb[5].mxu1 }
 0x152   : > { %v3788_v1 = vadd.f32 %v2911_v0, %v2910_v63  ;;  %v2913_v2 = vpop.f32.mrb[6].mxu1  ;;  %v383_v0 = vld [vmem:[#allocation2 + $0x10] sm:$0xff] }
 0x153   : > { %v2914_v3 = vpop.f32.mrb[7].mxu1 }
 0x154   : > { %v3790_v4 = vadd.f32 %v2914_v3, %v2913_v2 }
 0x158   : > { %v2916_v5 = vpop.f32.mrb[8].mxu1 }
 0x159   : > { %v2917_v6 = vpop.f32.mrb[9].mxu1 }
 0x15a   : > { %v3792_v7 = vadd.f32 %v2917_v6, %v2916_v5  ;;  %v2919_v8 = vpop.f32.mrb[10].mxu1  ;;  %v386_v6 = vld [vmem:[#allocation2 + $0x28] sm:$0xff] }
 0x15b   : > { %v2920_v9 = vpop.f32.mrb[11].mxu1 }
 0x15c   : > { %v3794_v10 = vadd.f32 %v2920_v9, %v2919_v8 }
 0x160   : > { %v2922_v11 = vpop.f32.mrb[12].mxu1 }
 0x161   : > { %v2923_v12 = vpop.f32.mrb[13].mxu1 }
 0x162   : > { %v3796_v13 = vadd.f32 %v2923_v12, %v2922_v11  ;;  %v2925_v14 = vpop.f32.mrb[14].mxu1 }
 0x163   : > { %v2926_v15 = vpop.f32.mrb[15].mxu1 }
 0x164   : > { %v3798_v16 = vadd.f32 %v2926_v15, %v2925_v14 }
 0x168   : > { %v2928_v17 = vpop.f32.mrb[16].mxu1 }
 0x169   : > { %v2929_v18 = vpop.f32.mrb[17].mxu1 }
 0x16a   : > { %v3800_v19 = vadd.f32 %v2929_v18, %v2928_v17  ;;  %v2931_v20 = vpop.f32.mrb[18].mxu1  ;;  %v389_v18 = vld [vmem:[#allocation2 + $0x40] sm:$0xff] }
 0x16b   : > { %v2932_v21 = vpop.f32.mrb[19].mxu1 }
 0x16c   : > { %v3802_v22 = vadd.f32 %v2932_v21, %v2931_v20 }
 0x170   : > { %v2934_v23 = vpop.f32.mrb[20].mxu1 }
 0x171   : > { %v2935_v24 = vpop.f32.mrb[21].mxu1 }
 0x172   : > { %v3804_v25 = vadd.f32 %v2935_v24, %v2934_v23  ;;  %v2937_v26 = vpop.f32.mrb[22].mxu1  ;;  %v392_v23 = vld [vmem:[#allocation2 + $0x58] sm:$0xff] }
 0x173   : > { %v2938_v27 = vpop.f32.mrb[23].mxu1 }
 0x174   : > { %v3806_v28 = vadd.f32 %v2938_v27, %v2937_v26 }
 0x178   : > { %v2940_v29 = vpop.f32.mrb[24].mxu1 }
 0x179   : > { %v2941_v30 = vpop.f32.mrb[25].mxu1 }
 0x17a   : > { %v3808_v31 = vadd.f32 %v2941_v30, %v2940_v29  ;;  %v2943_v32 = vpop.f32.mrb[26].mxu1 }
 0x17b   : > { %v2944_v33 = vpop.f32.mrb[27].mxu1 }
 0x17c   : > { %v3810_v34 = vadd.f32 %v2944_v33, %v2943_v32  ;;  %v395_v33 = vld [vmem:[#allocation2 + $0x70] sm:$0xff] }
 0x180   : > { %v2946_v35 = vpop.f32.mrb[28].mxu1 }
 0x181   : > { %v2947_v36 = vpop.f32.mrb[29].mxu1 }
 0x182   : > { %v3812_v37 = vadd.f32 %v2947_v36, %v2946_v35  ;;  %v2949_v38 = vpop.f32.mrb[30].mxu1 }
 0x183   : > { %v2950_v39 = vpop.f32.mrb[31].mxu1 }
 0x184   : > { %v3814_v40 = vadd.f32 %v2950_v39, %v2949_v38 }
 0x188   : > { %v2952_v41 = vpop.f32.mrb[32].mxu1 }
 0x189   : > { %v2953_v42 = vpop.f32.mrb[33].mxu1 }
 0x18a   : > { %v3816_v43 = vadd.f32 %v2953_v42, %v2952_v41  ;;  %v2955_v44 = vpop.f32.mrb[34].mxu1 }
 0x18b   : > { %v2956_v45 = vpop.f32.mrb[35].mxu1 }
 0x18c   : > { %v3818_v46 = vadd.f32 %v2956_v45, %v2955_v44 }
 0x190   : > { %v2958_v47 = vpop.f32.mrb[36].mxu1 }
 0x191   : > { %v2959_v48 = vpop.f32.mrb[37].mxu1 }
 0x192   : > { %v3820_v49 = vadd.f32 %v2959_v48, %v2958_v47  ;;  %v2961_v50 = vpop.f32.mrb[38].mxu1 }
 0x193   : > { %v2962_v51 = vpop.f32.mrb[39].mxu1 }
 0x194   : > { %v3822_v52 = vadd.f32 %v2962_v51, %v2961_v50 }
 0x198   : > { %v2964_v53 = vpop.f32.mrb[40].mxu1 }
 0x199   : > { %v2965_v54 = vpop.f32.mrb[41].mxu1 }
 0x19a   : > { %v3824_v55 = vadd.f32 %v2965_v54, %v2964_v53  ;;  %v2967_v56 = vpop.f32.mrb[42].mxu1  ;;  %v401_v53 = vld [vmem:[#allocation2 + $0xa0] sm:$0xff] }
 0x19b   : > { %v2968_v57 = vpop.f32.mrb[43].mxu1 }
 0x19c   : > { %v404_v57 = vld [vmem:[#allocation2 + $0xb8] sm:$0xff] }
 0x1a0   : > { %v2986_v58 = vpop.f32.mrb[44].mxu1 }
 0x1a1   : > { %v2987_v60 = vpop.f32.mrb[45].mxu1 }
 0x1a2   : > { %v2988_v61 = vadd.f32 %v2987_v60, %v2986_v58  ;;  %v2989_v63 = vpop.f32.mrb[46].mxu1  ;;  %v381_v58 = vld [vmem:[#allocation2] sm:$0xff] }
 0x1a3   : > { %v2990_v2 = vpop.f32.mrb[47].mxu1 }
 0x1a4   : > { %v1777_v3 = vadd.f32 %v2988_v61, %v3784_v59  ;;  %v2991_v5 = vadd.f32 %v2990_v2, %v2989_v63  ;;  %v382_v63 = vld [vmem:[#allocation2 + $0x8] sm:$0xff]  ;;  %v384_v2 = vld [vmem:[#allocation2 + $0x18] sm:$0xff] }
 0x1a6   : > { %v1864_v8 = vadd.f32 %v1777_v3, %v383_v0  ;;  %v1780_v9 = vadd.f32 %v2991_v5, %v3786_v62 }
 0x1a8   : > { %1928 = vst.msk [vmem:[#allocation2 + $0x10] sm:$0xff] %vm1927_vm2, %v1864_v8  ;;  %v1867_v11 = vadd.f32 %v1780_v9, %v386_v6  ;;  %v2992_v12 = vpop.f32.mrb[48].mxu1  ;;  %v385_v9 = vld [vmem:[#allocation2 + $0x20] sm:$0xff] }
 0x1a9   : > { %v2993_v14 = vpop.f32.mrb[49].mxu1 }
 0x1aa   : > { %1931 = vst.msk [vmem:[#allocation2 + $0x28] sm:$0xff] %vm1927_vm2, %v1867_v11  ;;  %v2994_v15 = vadd.f32 %v2993_v14, %v2992_v12  ;;  %v2995_v17 = vpop.f32.mrb[50].mxu1 }
 0x1ab   : > { %v2996_v20 = vpop.f32.mrb[51].mxu1 }
 0x1ac   : > { %v1785_v21 = vadd.f32 %v2994_v15, %v3788_v1  ;;  %v2997_v59 = vadd.f32 %v2996_v20, %v2995_v17  ;;  %v398_v1 = vld [vmem:[#allocation2 + $0x88] sm:$0xff] }
 0x1ae   : > { %v1870_v24 = vadd.f32 %v1785_v21, %v389_v18  ;;  %v1788_v26 = vadd.f32 %v2997_v59, %v3790_v4  ;;  %v407_v18 = vld [vmem:[#allocation2 + $0xd0] sm:$0xff] }
 0x1b0   : > { %1934 = vst.msk [vmem:[#allocation2 + $0x40] sm:$0xff] %vm1927_vm2, %v1870_v24  ;;  %v1873_v62 = vadd.f32 %v1788_v26, %v392_v23  ;;  %v2998_v27 = vpop.f32.mrb[52].mxu1  ;;  %v410_v24 = vld [vmem:[#allocation2 + $0xe8] sm:$0xff]  ;;  %v387_v26 = vld [vmem:[#allocation2 + $0x30] sm:$0xff] }
 0x1b1   : > { %v2999_v29 = vpop.f32.mrb[53].mxu1 }
 0x1b2   : > { %1937 = vst.msk [vmem:[#allocation2 + $0x58] sm:$0xff] %vm1927_vm2, %v1873_v62  ;;  %v3000_v30 = vadd.f32 %v2999_v29, %v2998_v27  ;;  %v3001_v32 = vpop.f32.mrb[54].mxu1  ;;  %v388_v29 = vld [vmem:[#allocation2 + $0x38] sm:$0xff] }
 0x1b3   : > { %v3002_v35 = vpop.f32.mrb[55].mxu1 }
 0x1b4   : > { %v1793_v36 = vadd.f32 %v3000_v30, %v3792_v7  ;;  %v3003_v38 = vadd.f32 %v3002_v35, %v3001_v32  ;;  %v390_v32 = vld [vmem:[#allocation2 + $0x48] sm:$0xff] }
 0x1b6   : > { %v1876_v39 = vadd.f32 %v1793_v36, %v395_v33  ;;  %v1796_v41 = vadd.f32 %v3003_v38, %v3794_v10 }
 0x1b8   : > { %v3836_v42 = vpop.f32.mrb[40].mxu0  ;;  %1940 = vst.msk [vmem:[#allocation2 + $0x70] sm:$0xff] %vm1927_vm2, %v1876_v39  ;;  %v1879_v4 = vadd.f32 %v1796_v41, %v398_v1  ;;  %v3004_v44 = vpop.f32.mrb[56].mxu1  ;;  %v391_v1 = vld [vmem:[#allocation2 + $0x50] sm:$0xff] }
 0x1b9   : > { %v3839_v45 = vpop.f32.mrb[41].mxu0  ;;  %v3005_v47 = vpop.f32.mrb[57].mxu1 }
 0x1ba   : > { %v1478_v48 = vpop.f32.mrb[42].mxu0  ;;  %1943 = vst.msk [vmem:[#allocation2 + $0x88] sm:$0xff] %vm1927_vm2, %v1879_v4  ;;  %v3006_v50 = vadd.f32 %v3005_v47, %v3004_v44  ;;  %v3007_v51 = vpop.f32.mrb[58].mxu1 }
 0x1bb   : > { %v1479_v7 = vpop.f32.mrb[43].mxu0  ;;  %v3008_v54 = vpop.f32.mrb[59].mxu1  ;;  %v413_v48 = vld [vmem:[#allocation2 + $0x100] sm:$0xff] }
 0x1bc   : > { %v1801_v56 = vadd.f32 %v3006_v50, %v3796_v13  ;;  %v3009_v10 = vadd.f32 %v3008_v54, %v3007_v51  ;;  %v416_v54 = vld [vmem:[#allocation2 + $0x118] sm:$0xff] }
 0x1be   : > { %v1882_v60 = vadd.f32 %v1801_v56, %v401_v53  ;;  %v1804_v61 = vadd.f32 %v3009_v10, %v3798_v16  ;;  %v393_v56 = vld [vmem:[#allocation2 + $0x60] sm:$0xff] }
 0x1c0   : > { %v1515_v0 = vpop.f32.mrb[0].mxu0  ;;  %1946 = vst.msk [vmem:[#allocation2 + $0xa0] sm:$0xff] %vm1927_vm2, %v1882_v60  ;;  %v1885_v3 = vadd.f32 %v1804_v61, %v404_v57  ;;  %v3010_v6 = vpop.f32.mrb[60].mxu1  ;;  %v396_v61 = vld [vmem:[#allocation2 + $0x78] sm:$0xff] }
 0x1c1   : > { %v1862_v5 = vadd.f32 %v1515_v0, %v381_v58  ;;  %v1517_v8 = vpop.f32.mrb[1].mxu0  ;;  %v3011_v12 = vpop.f32.mrb[61].mxu1  ;;  %v394_v58 = vld [vmem:[#allocation2 + $0x68] sm:$0xff] }
 0x1c2   : > { %v1863_v11 = vadd.f32 %v1517_v8, %v382_v63  ;;  %v1519_v14 = vpop.f32.mrb[2].mxu0  ;;  %1949 = vst.msk [vmem:[#allocation2 + $0xb8] sm:$0xff] %vm1927_vm2, %v1885_v3  ;;  %v3012_v13 = vadd.f32 %v3011_v12, %v3010_v6  ;;  %v3013_v17 = vpop.f32.mrb[62].mxu1 }
 0x1c3   : > { %1925 = vst [vmem:[#allocation2] sm:$0xff] %v1862_v5  ;;  %v1865_v15 = vadd.f32 %v1519_v14, %v384_v2  ;;  %v1521_v16 = vpop.f32.mrb[3].mxu0  ;;  %v3014_v21 = vpop.f32.mrb[63].mxu1  ;;  %v397_v5 = vld [vmem:[#allocation2 + $0x80] sm:$0xff]  ;;  %v419_v14 = vld [vmem:[#allocation2 + $0x130] sm:$0xff] }
 0x1c4   : > { %1926 = vst [vmem:[#allocation2 + $0x8] sm:$0xff] %v1863_v11  ;;  %v1866_v20 = vadd.f32 %v1521_v16, %v385_v9  ;;  %v1809_v59 = vadd.f32 %v3012_v13, %v3800_v19  ;;  %v3015_v23 = vadd.f32 %v3014_v21, %v3013_v17 }
 0x1c5   : > { %1929 = vst [vmem:[#allocation2 + $0x18] sm:$0xff] %v1865_v15 }
 0x1c6   : > { %1930 = vst [vmem:[#allocation2 + $0x20] sm:$0xff] %v1866_v20  ;;  %v1888_v62 = vadd.f32 %v1809_v59, %v407_v18  ;;  %v1812_v27 = vadd.f32 %v3015_v23, %v3802_v22  ;;  %v422_v18 = vld [vmem:[#allocation2 + $0x148] sm:$0xff]  ;;  %v399_v20 = vld [vmem:[#allocation2 + $0x90] sm:$0xff]  ;;  %v400_v23 = vld [vmem:[#allocation2 + $0x98] sm:$0xff] }
 0x1c8   : > { %v1525_v30 = vpop.f32.mrb[4].mxu0  ;;  %1952 = vst.msk [vmem:[#allocation2 + $0xd0] sm:$0xff] %vm1927_vm2, %v1888_v62  ;;  %v1891_v33 = vadd.f32 %v1812_v27, %v410_v24  ;;  %v3016_v36 = vpop.f32.mrb[64].mxu1 }
 0x1c9   : > { %v1868_v35 = vadd.f32 %v1525_v30, %v387_v26  ;;  %v1527_v38 = vpop.f32.mrb[5].mxu0  ;;  %v3017_v19 = vpop.f32.mrb[65].mxu1  ;;  %v402_v26 = vld [vmem:[#allocation2 + $0xa8] sm:$0xff] }
 0x1ca   : > { %v1869_v39 = vadd.f32 %v1527_v38, %v388_v29  ;;  %v1529_v41 = vpop.f32.mrb[6].mxu0  ;;  %1955 = vst.msk [vmem:[#allocation2 + $0xe8] sm:$0xff] %vm1927_vm2, %v1891_v33  ;;  %v3018_v4 = vadd.f32 %v3017_v19, %v3016_v36  ;;  %v3019_v47 = vpop.f32.mrb[66].mxu1 }
 0x1cb   : > { %1932 = vst [vmem:[#allocation2 + $0x30] sm:$0xff] %v1868_v35  ;;  %v1871_v44 = vadd.f32 %v1529_v41, %v390_v32  ;;  %v1531_v22 = vpop.f32.mrb[7].mxu0  ;;  %v3020_v51 = vpop.f32.mrb[67].mxu1  ;;  %v403_v32 = vld [vmem:[#allocation2 + $0xb0] sm:$0xff] }
 0x1cc   : > { %1933 = vst [vmem:[#allocation2 + $0x38] sm:$0xff] %v1869_v39  ;;  %v1872_v50 = vadd.f32 %v1531_v22, %v391_v1  ;;  %v1817_v7 = vadd.f32 %v3018_v4, %v3804_v25  ;;  %v3021_v53 = vadd.f32 %v3020_v51, %v3019_v47  ;;  %v425_v39 = vld [vmem:[#allocation2 + $0x160] sm:$0xff]  ;;  %v428_v47 = vld [vmem:[#allocation2 + $0x178] sm:$0xff]  ;;  %v406_v51 = vld [vmem:[#allocation2 + $0xc8] sm:$0xff] }
 0x1cd   : > { %1935 = vst [vmem:[#allocation2 + $0x48] sm:$0xff] %v1871_v44  ;;  %v405_v22 = vld [vmem:[#allocation2 + $0xc0] sm:$0xff] }
 0x1ce   : > { %1936 = vst [vmem:[#allocation2 + $0x50] sm:$0xff] %v1872_v50  ;;  %v1894_v10 = vadd.f32 %v1817_v7, %v413_v48  ;;  %v1820_v57 = vadd.f32 %v3021_v53, %v3806_v28  ;;  %v408_v53 = vld [vmem:[#allocation2 + $0xd8] sm:$0xff] }
 0x1d0   : > { %v1535_v60 = vpop.f32.mrb[8].mxu0  ;;  %1958 = vst.msk [vmem:[#allocation2 + $0x100] sm:$0xff] %vm1927_vm2, %v1894_v10  ;;  %v1897_v63 = vadd.f32 %v1820_v57, %v416_v54  ;;  %v3022_v2 = vpop.f32.mrb[68].mxu1 }
 0x1d1   : > { %v1874_v0 = vadd.f32 %v1535_v60, %v393_v56  ;;  %v1537_v3 = vpop.f32.mrb[9].mxu0  ;;  %v3023_v25 = vpop.f32.mrb[69].mxu1 }
 0x1d2   : > { %v1875_v6 = vadd.f32 %v1537_v3, %v394_v58  ;;  %v1539_v8 = vpop.f32.mrb[10].mxu0  ;;  %1961 = vst.msk [vmem:[#allocation2 + $0x118] sm:$0xff] %vm1927_vm2, %v1897_v63  ;;  %v3024_v9 = vadd.f32 %v3023_v25, %v3022_v2  ;;  %v3025_v12 = vpop.f32.mrb[70].mxu1  ;;  %v409_v58 = vld [vmem:[#allocation2 + $0xe0] sm:$0xff]  ;;  %v431_v3 = vld [vmem:[#allocation2 + $0x190] sm:$0xff] }
 0x1d3   : > { %1938 = vst [vmem:[#allocation2 + $0x60] sm:$0xff] %v1874_v0  ;;  %v1877_v11 = vadd.f32 %v1539_v8, %v396_v61  ;;  %v1541_v28 = vpop.f32.mrb[11].mxu0  ;;  %v3026_v15 = vpop.f32.mrb[71].mxu1 }
 0x1d4   : > { %1939 = vst [vmem:[#allocation2 + $0x68] sm:$0xff] %v1875_v6  ;;  %v1878_v13 = vadd.f32 %v1541_v28, %v397_v5  ;;  %v1825_v17 = vadd.f32 %v3024_v9, %v3808_v31  ;;  %v3027_v16 = vadd.f32 %v3026_v15, %v3025_v12  ;;  %v434_v9 = vld [vmem:[#allocation2 + $0x1a8] sm:$0xff] }
 0x1d5   : > { %1941 = vst [vmem:[#allocation2 + $0x78] sm:$0xff] %v1877_v11  ;;  %v411_v11 = vld [vmem:[#allocation2 + $0xf0] sm:$0xff]  ;;  %v414_v15 = vld [vmem:[#allocation2 + $0x108] sm:$0xff] }
 0x1d6   : > { %1942 = vst [vmem:[#allocation2 + $0x80] sm:$0xff] %v1878_v13  ;;  %v1900_v21 = vadd.f32 %v1825_v17, %v419_v14  ;;  %v1828_v59 = vadd.f32 %v3027_v16, %v3810_v34  ;;  %v412_v14 = vld [vmem:[#allocation2 + $0xf8] sm:$0xff] }
 0x1d8   : > { %v1545_v24 = vpop.f32.mrb[12].mxu0  ;;  %1964 = vst.msk [vmem:[#allocation2 + $0x130] sm:$0xff] %vm1927_vm2, %v1900_v21  ;;  %v1903_v62 = vadd.f32 %v1828_v59, %v422_v18  ;;  %v3028_v29 = vpop.f32.mrb[72].mxu1  ;;  %v415_v21 = vld [vmem:[#allocation2 + $0x110] sm:$0xff] }
 0x1d9   : > { %v1880_v27 = vadd.f32 %v1545_v24, %v399_v20  ;;  %v1547_v30 = vpop.f32.mrb[13].mxu0  ;;  %v3029_v31 = vpop.f32.mrb[73].mxu1 }
 0x1da   : > { %v1881_v33 = vadd.f32 %v1547_v30, %v400_v23  ;;  %v1549_v35 = vpop.f32.mrb[14].mxu0  ;;  %1967 = vst.msk [vmem:[#allocation2 + $0x148] sm:$0xff] %vm1927_vm2, %v1903_v62  ;;  %v3030_v36 = vadd.f32 %v3029_v31, %v3028_v29  ;;  %v3031_v1 = vpop.f32.mrb[74].mxu1  ;;  %v440_v31 = vld [vmem:[#allocation2 + $0x1d8] sm:$0xff] }
 0x1db   : > { %1944 = vst [vmem:[#allocation2 + $0x90] sm:$0xff] %v1880_v27  ;;  %v1883_v38 = vadd.f32 %v1549_v35, %v402_v26  ;;  %v1551_v34 = vpop.f32.mrb[15].mxu0  ;;  %v3032_v41 = vpop.f32.mrb[75].mxu1  ;;  %v437_v27 = vld [vmem:[#allocation2 + $0x1c0] sm:$0xff] }
 0x1dc   : > { %1945 = vst [vmem:[#allocation2 + $0x98] sm:$0xff] %v1881_v33  ;;  %v1884_v19 = vadd.f32 %v1551_v34, %v403_v32  ;;  %v1833_v4 = vadd.f32 %v3030_v36, %v3812_v37  ;;  %v3033_v44 = vadd.f32 %v3032_v41, %v3031_v1  ;;  %v417_v35 = vld [vmem:[#allocation2 + $0x120] sm:$0xff]  ;;  %v418_v1 = vld [vmem:[#allocation2 + $0x128] sm:$0xff] }
 0x1dd   : > { %1947 = vst [vmem:[#allocation2 + $0xa8] sm:$0xff] %v1883_v38 }
 0x1de   : > { %1948 = vst [vmem:[#allocation2 + $0xb0] sm:$0xff] %v1884_v19  ;;  %v1906_v48 = vadd.f32 %v1833_v4, %v425_v39  ;;  %v1836_v50 = vadd.f32 %v3033_v44, %v3814_v40  ;;  %v420_v39 = vld [vmem:[#allocation2 + $0x138] sm:$0xff] }
 0x1e0   : > { %v1555_v7 = vpop.f32.mrb[16].mxu0  ;;  %1970 = vst.msk [vmem:[#allocation2 + $0x160] sm:$0xff] %vm1927_vm2, %v1906_v48  ;;  %v1909_v54 = vadd.f32 %v1836_v50, %v428_v47  ;;  %v3034_v10 = vpop.f32.mrb[76].mxu1  ;;  %v421_v47 = vld [vmem:[#allocation2 + $0x140] sm:$0xff] }
 0x1e1   : > { %v1886_v56 = vadd.f32 %v1555_v7, %v405_v22  ;;  %v1557_v57 = vpop.f32.mrb[17].mxu0  ;;  %v3035_v37 = vpop.f32.mrb[77].mxu1 }
 0x1e2   : > { %v1887_v60 = vadd.f32 %v1557_v57, %v406_v51  ;;  %v1559_v61 = vpop.f32.mrb[18].mxu0  ;;  %1973 = vst.msk [vmem:[#allocation2 + $0x178] sm:$0xff] %vm1927_vm2, %v1909_v54  ;;  %v3036_v63 = vadd.f32 %v3035_v37, %v3034_v10  ;;  %v3037_v2 = vpop.f32.mrb[78].mxu1  ;;  %v423_v57 = vld [vmem:[#allocation2 + $0x150] sm:$0xff] }
 0x1e3   : > { %1950 = vst [vmem:[#allocation2 + $0xc0] sm:$0xff] %v1886_v56  ;;  %v1889_v0 = vadd.f32 %v1559_v61, %v408_v53  ;;  %v1561_v40 = vpop.f32.mrb[19].mxu0  ;;  %v3038_v6 = vpop.f32.mrb[79].mxu1  ;;  %v443_v53 = vld [vmem:[#allocation2 + $0x1f0] sm:$0x3]  ;;  %v426_v61 = vld [vmem:[#allocation2 + $0x168] sm:$0xff] }
 0x1e4   : > { %1951 = vst [vmem:[#allocation2 + $0xc8] sm:$0xff] %v1887_v60  ;;  %v1890_v5 = vadd.f32 %v1561_v40, %v409_v58  ;;  %v1841_v25 = vadd.f32 %v3036_v63, %v3816_v43  ;;  %v3039_v8 = vadd.f32 %v3038_v6, %v3037_v2  ;;  %v424_v60 = vld [vmem:[#allocation2 + $0x158] sm:$0xff]  ;;  %v427_v2 = vld [vmem:[#allocation2 + $0x170] sm:$0xff] }
 0x1e5   : > { %1953 = vst [vmem:[#allocation2 + $0xd8] sm:$0xff] %v1889_v0 }
 0x1e6   : > { %1954 = vst [vmem:[#allocation2 + $0xe0] sm:$0xff] %v1890_v5  ;;  %v1912_v12 = vadd.f32 %v1841_v25, %v431_v3  ;;  %v1844_v28 = vadd.f32 %v3039_v8, %v3818_v46  ;;  %v429_v25 = vld [vmem:[#allocation2 + $0x180] sm:$0xff]  ;;  %v430_v8 = vld [vmem:[#allocation2 + $0x188] sm:$0xff] }
 0x1e8   : > { %v1565_v13 = vpop.f32.mrb[20].mxu0  ;;  %1976 = vst.msk [vmem:[#allocation2 + $0x190] sm:$0xff] %vm1927_vm2, %v1912_v12  ;;  %v1915_v17 = vadd.f32 %v1844_v28, %v434_v9  ;;  %v3040_v18 = vpop.f32.mrb[80].mxu1 }
 0x1e9   : > { %v1892_v16 = vadd.f32 %v1565_v13, %v411_v11  ;;  %v1567_v20 = vpop.f32.mrb[21].mxu0  ;;  %v3041_v43 = vpop.f32.mrb[81].mxu1  ;;  %v432_v11 = vld [vmem:[#allocation2 + $0x198] sm:$0xff] }
 0x1ea   : > { %v1893_v59 = vadd.f32 %v1567_v20, %v412_v14  ;;  %v1569_v23 = vpop.f32.mrb[22].mxu0  ;;  %1979 = vst.msk [vmem:[#allocation2 + $0x1a8] sm:$0xff] %vm1927_vm2, %v1915_v17  ;;  %v3042_v24 = vadd.f32 %v3041_v43, %v3040_v18  ;;  %v3043_v62 = vpop.f32.mrb[82].mxu1  ;;  %v433_v14 = vld [vmem:[#allocation2 + $0x1a0] sm:$0xff]  ;;  %v435_v20 = vld [vmem:[#allocation2 + $0x1b0] sm:$0xff]  ;;  %v438_v43 = vld [vmem:[#allocation2 + $0x1c8] sm:$0xff] }
 0x1eb   : > { %1956 = vst [vmem:[#allocation2 + $0xf0] sm:$0xff] %v1892_v16  ;;  %v1895_v26 = vadd.f32 %v1569_v23, %v414_v15  ;;  %v1571_v46 = vpop.f32.mrb[23].mxu0  ;;  %v3044_v30 = vpop.f32.mrb[83].mxu1 }
 0x1ec   : > { %1957 = vst [vmem:[#allocation2 + $0xf8] sm:$0xff] %v1893_v59  ;;  %v1896_v29 = vadd.f32 %v1571_v46, %v415_v21  ;;  %v1849_v32 = vadd.f32 %v3042_v24, %v3820_v49  ;;  %v3045_v33 = vadd.f32 %v3044_v30, %v3043_v62  ;;  %v436_v21 = vld [vmem:[#allocation2 + $0x1b8] sm:$0xff] }
 0x1ed   : > { %1959 = vst [vmem:[#allocation2 + $0x108] sm:$0xff] %v1895_v26  ;;  %v439_v26 = vld [vmem:[#allocation2 + $0x1d0] sm:$0xff] }
 0x1ee   : > { %1960 = vst [vmem:[#allocation2 + $0x110] sm:$0xff] %v1896_v29  ;;  %v1918_v36 = vadd.f32 %v1849_v32, %v437_v27  ;;  %v1852_v38 = vadd.f32 %v3045_v33, %v3822_v52  ;;  %v441_v32 = vld [vmem:[#allocation2 + $0x1e0] sm:$0x3] }
 0x1f0   : > { %v1575_v34 = vpop.f32.mrb[24].mxu0  ;;  %1982 = vst.msk [vmem:[#allocation2 + $0x1c0] sm:$0xff] %vm1927_vm2, %v1918_v36  ;;  %v1921_v19 = vadd.f32 %v1852_v38, %v440_v31  ;;  %v3046_v4 = vpop.f32.mrb[84].mxu1 }
 0x1f1   : > { %v1898_v41 = vadd.f32 %v1575_v34, %v417_v35  ;;  %v1577_v44 = vpop.f32.mrb[25].mxu0  ;;  %v3047_v49 = vpop.f32.mrb[85].mxu1  ;;  %v442_v35 = vld [vmem:[#allocation2 + $0x1e8] sm:$0x3] }
 0x1f2   : > { %v1899_v22 = vadd.f32 %v1577_v44, %v418_v1  ;;  %v1579_v48 = vpop.f32.mrb[26].mxu0  ;;  %1985 = vst.msk [vmem:[#allocation2 + $0x1d8] sm:$0xff] %vm1927_vm2, %v1921_v19  ;;  %v3048_v50 = vadd.f32 %v3047_v49, %v3046_v4  ;;  %v3049_v52 = vpop.f32.mrb[86].mxu1 }
 0x1f3   : > { %1962 = vst [vmem:[#allocation2 + $0x120] sm:$0xff] %v1898_v41  ;;  %v1901_v51 = vadd.f32 %v1579_v48, %v420_v39  ;;  %v1581_v7 = vpop.f32.mrb[27].mxu0  ;;  %v3050_v56 = vpop.f32.mrb[87].mxu1 }
 0x1f4   : > { %1963 = vst [vmem:[#allocation2 + $0x128] sm:$0xff] %v1899_v22  ;;  %v1902_v54 = vadd.f32 %v1581_v7, %v421_v47  ;;  %v1857_v10 = vadd.f32 %v3048_v50, %v3824_v55 }
 0x1f5   : > { %1965 = vst [vmem:[#allocation2 + $0x138] sm:$0xff] %v1901_v51 }
 0x1f6   : > { %1966 = vst [vmem:[#allocation2 + $0x140] sm:$0xff] %v1902_v54  ;;  %v1924_v58 = vadd.f32 %v1857_v10, %v443_v53 }
 0x1f8   : > { %v1585_v37 = vpop.f32.mrb[28].mxu0  ;;  %1989 = vst.msk [vmem:[#allocation2 + $0x1f0] sm:$0x3] %vm1988_vm3, %v1924_v58 }
 0x1f9   : > { %v1904_v63 = vadd.f32 %v1585_v37, %v423_v57  ;;  %v1587_v0 = vpop.f32.mrb[29].mxu0 }
 0x1fa   : > { %v1905_v40 = vadd.f32 %v1587_v0, %v424_v60  ;;  %v1589_v3 = vpop.f32.mrb[30].mxu0 }
 0x1fb   : > { %1968 = vst [vmem:[#allocation2 + $0x150] sm:$0xff] %v1904_v63  ;;  %v1907_v5 = vadd.f32 %v1589_v3, %v426_v61  ;;  %v1591_v6 = vpop.f32.mrb[31].mxu0 }
 0x1fc   : > { %1969 = vst [vmem:[#allocation2 + $0x158] sm:$0xff] %v1905_v40  ;;  %v1908_v55 = vadd.f32 %v1591_v6, %v427_v2 }
 0x1fd   : > { %1971 = vst [vmem:[#allocation2 + $0x168] sm:$0xff] %v1907_v5 }
 0x1fe   : > { %1972 = vst [vmem:[#allocation2 + $0x170] sm:$0xff] %v1908_v55 }
 0x200   : > { %v1595_v9 = vpop.f32.mrb[32].mxu0 }
 0x201   : > { %v1910_v12 = vadd.f32 %v1595_v9, %v429_v25  ;;  %v1597_v28 = vpop.f32.mrb[33].mxu0 }
 0x202   : > { %v1911_v13 = vadd.f32 %v1597_v28, %v430_v8  ;;  %v1599_v15 = vpop.f32.mrb[34].mxu0 }
 0x203   : > { %1974 = vst [vmem:[#allocation2 + $0x180] sm:$0xff] %v1910_v12  ;;  %v1913_v17 = vadd.f32 %v1599_v15, %v432_v11  ;;  %v1601_v16 = vpop.f32.mrb[35].mxu0 }
 0x204   : > { %1975 = vst [vmem:[#allocation2 + $0x188] sm:$0xff] %v1911_v13  ;;  %v1914_v18 = vadd.f32 %v1601_v16, %v433_v14 }
 0x205   : > { %1977 = vst [vmem:[#allocation2 + $0x198] sm:$0xff] %v1913_v17 }
 0x206   : > { %1978 = vst [vmem:[#allocation2 + $0x1a0] sm:$0xff] %v1914_v18 }
 0x208   : > { %v1605_v59 = vpop.f32.mrb[36].mxu0 }
 0x209   : > { %v1916_v23 = vadd.f32 %v1605_v59, %v435_v20  ;;  %v1607_v24 = vpop.f32.mrb[37].mxu0 }
 0x20a   : > { %v1917_v62 = vadd.f32 %v1607_v24, %v436_v21  ;;  %v1609_v46 = vpop.f32.mrb[38].mxu0 }
 0x20b   : > { %1980 = vst [vmem:[#allocation2 + $0x1b0] sm:$0xff] %v1916_v23  ;;  %v1919_v27 = vadd.f32 %v1609_v46, %v438_v43  ;;  %v1611_v29 = vpop.f32.mrb[39].mxu0 }
 0x20c   : > { %1981 = vst [vmem:[#allocation2 + $0x1b8] sm:$0xff] %v1917_v62  ;;  %v1920_v30 = vadd.f32 %v1611_v29, %v439_v26 }
 0x20d   : > { %1983 = vst [vmem:[#allocation2 + $0x1c8] sm:$0xff] %v1919_v27 }
 0x20e   : > { %1984 = vst [vmem:[#allocation2 + $0x1d0] sm:$0xff] %v1920_v30 }
 0x210   : > { %v1615_v33 = vpop.f32.mrb[44].mxu0  ;;  %1993 = sbr.rel (%p2884_p10) target bundleno = 708 (0x2c4), region = 67 }
 0x211   : > { %v1616_v31 = vadd.f32 %v1615_v33, %v3836_v42  ;;  %v1617_v36 = vpop.f32.mrb[45].mxu0 }
 0x212   : > { %v1618_v38 = vadd.f32 %v1617_v36, %v3839_v45  ;;  %v1619_v1 = vpop.f32.mrb[46].mxu0 }
 0x213   : > { %v1922_v34 = vadd.f32 %v1616_v31, %v441_v32  ;;  %v1620_v39 = vpop.f32.mrb[47].mxu0 }
 0x214   : > { %v1923_v19 = vadd.f32 %v1618_v38, %v442_v35 }
 0x215   : > { %1986 = vst [vmem:[#allocation2 + $0x1e0] sm:$0x3] %v1922_v34 }
 0x216   : > { %1987 = vst [vmem:[#allocation2 + $0x1e8] sm:$0x3] %v1923_v19 }
 0x217   : > { %v3875_v41 = vld [vmem:[#allocation2] sm:$0xff]  ;;  %v3877_v4 = vld [vmem:[#allocation2 + $0x8] sm:$0xff]  ;;  %v3879_v44 = vld [vmem:[#allocation2 + $0x10] sm:$0xff]  ;;  %vm2076_vm4 = vcmask 1041408  }
 0x218   : > { %4881 = vst [vmem:[#allocation4_spill] sm:$0xff] %v3875_v41  ;;  %4882 = vst [vmem:[#allocation5_spill] sm:$0xff] %v3877_v4  ;;  %v3881_v42 = vld [vmem:[#allocation2 + $0x18] sm:$0xff]  ;;  %v3883_v47 = vld [vmem:[#allocation2 + $0x20] sm:$0xff]  ;;  %v2112_v22 = vsel %vm1927_vm2, %v3879_v44, 0.0 }
 0x219   : > { %4883 = vst [vmem:[#allocation6_spill] sm:$0xff] %v3879_v44  ;;  %4884 = vst [vmem:[#allocation7_spill] sm:$0xff] %v3881_v42  ;;  %v3885_v45 = vld [vmem:[#allocation2 + $0x28] sm:$0xff]  ;;  %v3889_v49 = vld [vmem:[#allocation2 + $0x30] sm:$0xff]  ;;  %v2057_v51 = vadd.f32 %v3881_v42, %v3875_v41  ;;  %v2085_v7 = vadd.f32 %v3883_v47, %v3877_v4 }
 0x21a   : > { %4885 = vst [vmem:[#allocation8_spill] sm:$0xff] %v3883_v47  ;;  %4886 = vst [vmem:[#allocation9_spill] sm:$0xff] %v3885_v45  ;;  %v3891_v48 = vld [vmem:[#allocation2 + $0x38] sm:$0xff]  ;;  %v3893_v50 = vld [vmem:[#allocation2 + $0x40] sm:$0xff]  ;;  %v2113_v52 = vsel %vm1927_vm2, %v3885_v45, 0.0 }
 0x21b   : > { %4887 = vst [vmem:[#allocation10_spill] sm:$0xff] %v3889_v49  ;;  %4888 = vst [vmem:[#allocation11_spill] sm:$0xff] %v3891_v48  ;;  %v3901_v53 = vld [vmem:[#allocation2 + $0x48] sm:$0xff]  ;;  %v3903_v54 = vld [vmem:[#allocation2 + $0x50] sm:$0xff]  ;;  %v2114_v10 = vadd.f32 %v2113_v52, %v2112_v22  ;;  %v2115_v57 = vsel %vm1927_vm2, %v3893_v50, 0.0  ;;  %v2058_v60 = vadd.f32 %v2057_v51, %v3889_v49  ;;  %v2086_v37 = vadd.f32 %v2085_v7, %v3891_v48 }
 0x21c   : > { %4889 = vst [vmem:[#allocation12_spill] sm:$0xff] %v3893_v50  ;;  %4890 = vst [vmem:[#allocation13_spill] sm:$0xff] %v3901_v53  ;;  %v3905_v56 = vld [vmem:[#allocation2 + $0x58] sm:$0xff]  ;;  %v3909_v58 = vld [vmem:[#allocation2 + $0x70] sm:$0xff] }
 0x21d   : > { %4891 = vst [vmem:[#allocation14_spill] sm:$0xff] %v3903_v54  ;;  %4892 = vst [vmem:[#allocation15_spill] sm:$0xff] %v3905_v56  ;;  %v2117_v61 = vsel %vm1927_vm2, %v3905_v56, 0.0  ;;  %v3915_v63 = vld [vmem:[#allocation2 + $0x60] sm:$0xff]  ;;  %v3917_v0 = vld [vmem:[#allocation2 + $0x68] sm:$0xff]  ;;  %v2116_v40 = vadd.f32 %v2115_v57, %v2114_v10  ;;  %v2059_v3 = vadd.f32 %v2058_v60, %v3901_v53  ;;  %v2087_v5 = vadd.f32 %v2086_v37, %v3903_v54 }
 0x21e   : > { %4893 = vst [vmem:[#allocation16_spill] sm:$0xff] %v3909_v58  ;;  %4894 = vst [vmem:[#allocation17_spill] sm:$0xff] %v3915_v63  ;;  %v3919_v2 = vld [vmem:[#allocation2 + $0x88] sm:$0xff]  ;;  %v2119_v6 = vsel %vm1927_vm2, %v3909_v58, 0.0  ;;  %v3925_v55 = vld [vmem:[#allocation2 + $0x78] sm:$0xff] }
 0x21f   : > { %4895 = vst [vmem:[#allocation18_spill] sm:$0xff] %v3917_v0  ;;  %4896 = vst [vmem:[#allocation19_spill] sm:$0xff] %v3919_v2  ;;  %v3927_v25 = vld [vmem:[#allocation2 + $0x80] sm:$0xff]  ;;  %v2118_v9 = vadd.f32 %v2117_v61, %v2116_v40  ;;  %v2060_v11 = vadd.f32 %v2059_v3, %v3915_v63  ;;  %v2088_v12 = vadd.f32 %v2087_v5, %v3917_v0  ;;  %v2121_v28 = vsel %vm1927_vm2, %v3919_v2, 0.0  ;;  %v3935_v14 = vld [vmem:[#allocation2 + $0x90] sm:$0xff] }
 0x220   : > { %4897 = vst [vmem:[#allocation20_spill] sm:$0xff] %v3925_v55  ;;  %4898 = vst [vmem:[#allocation21_spill] sm:$0xff] %v3927_v25  ;;  %v3929_v8 = vld [vmem:[#allocation2 + $0xa0] sm:$0xff]  ;;  %v3937_v13 = vld [vmem:[#allocation2 + $0x98] sm:$0xff] }
 0x221   : > { %4899 = vst [vmem:[#allocation22_spill] sm:$0xff] %v3929_v8  ;;  %4900 = vst [vmem:[#allocation23_spill] sm:$0xff] %v3935_v14  ;;  %v3939_v15 = vld [vmem:[#allocation2 + $0xb8] sm:$0xff]  ;;  %v2120_v17 = vadd.f32 %v2119_v6, %v2118_v9  ;;  %v2061_v16 = vadd.f32 %v2060_v11, %v3925_v55  ;;  %v2089_v18 = vadd.f32 %v2088_v12, %v3927_v25  ;;  %v2123_v20 = vsel %vm1927_vm2, %v3929_v8, 0.0  ;;  %v3945_v21 = vld [vmem:[#allocation2 + $0xa8] sm:$0xff] }
 0x222   : > { %4901 = vst [vmem:[#allocation24_spill] sm:$0xff] %v3937_v13  ;;  %4902 = vst [vmem:[#allocation25_spill] sm:$0xff] %v3939_v15  ;;  %v3947_v59 = vld [vmem:[#allocation2 + $0xb0] sm:$0xff]  ;;  %v2125_v62 = vsel %vm1927_vm2, %v3939_v15, 0.0  ;;  %v3955_v46 = vld [vmem:[#allocation2 + $0xc0] sm:$0xff] }
 0x223   : > { %4903 = vst [vmem:[#allocation26_spill] sm:$0xff] %v3945_v21  ;;  %4904 = vst [vmem:[#allocation27_spill] sm:$0xff] %v3947_v59  ;;  %v3949_v43 = vld [vmem:[#allocation2 + $0xd0] sm:$0xff]  ;;  %v2122_v23 = vadd.f32 %v2121_v28, %v2120_v17  ;;  %v2062_v24 = vadd.f32 %v2061_v16, %v3935_v14  ;;  %v2090_v26 = vadd.f32 %v2089_v18, %v3937_v13  ;;  %v3957_v27 = vld [vmem:[#allocation2 + $0xc8] sm:$0xff] }
 0x224   : > { %4905 = vst [vmem:[#allocation28_spill] sm:$0xff] %v3949_v43  ;;  %4906 = vst [vmem:[#allocation29_spill] sm:$0xff] %v3955_v46  ;;  %v3959_v29 = vld [vmem:[#allocation2 + $0xe8] sm:$0xff]  ;;  %v2127_v31 = vsel %vm1927_vm2, %v3949_v43, 0.0  ;;  %v3965_v35 = vld [vmem:[#allocation2 + $0xd8] sm:$0xff] }
 0x225   : > { %4907 = vst [vmem:[#allocation30_spill] sm:$0xff] %v3957_v27  ;;  %4908 = vst [vmem:[#allocation31_spill] sm:$0xff] %v3959_v29  ;;  %v2124_v30 = vadd.f32 %v2123_v20, %v2122_v23  ;;  %v2063_v32 = vadd.f32 %v2062_v24, %v3945_v21  ;;  %v2091_v33 = vadd.f32 %v2090_v26, %v3947_v59  ;;  %v3967_v36 = vld [vmem:[#allocation2 + $0xe0] sm:$0xff]  ;;  %v2129_v19 = vsel %vm1927_vm2, %v3959_v29, 0.0  ;;  %v3975_v22 = vld [vmem:[#allocation2 + $0xf0] sm:$0xff] }
 0x226   : > { %4909 = vst [vmem:[#allocation32_spill] sm:$0xff] %v3965_v35  ;;  %4910 = vst [vmem:[#allocation33_spill] sm:$0xff] %v3967_v36  ;;  %v3969_v38 = vld [vmem:[#allocation2 + $0x100] sm:$0xff]  ;;  %v3977_v51 = vld [vmem:[#allocation2 + $0xf8] sm:$0xff] }
 0x227   : > { %v2126_v1 = vadd.f32 %v2125_v62, %v2124_v30  ;;  %v2064_v34 = vadd.f32 %v2063_v32, %v3955_v46  ;;  %v2092_v39 = vadd.f32 %v2091_v33, %v3957_v27  ;;  %v3979_v7 = vld [vmem:[#allocation2 + $0x118] sm:$0xff]  ;;  %v2131_v60 = vsel %vm1927_vm2, %v3969_v38, 0.0  ;;  %v3985_v37 = vld [vmem:[#allocation2 + $0x108] sm:$0xff]  ;;  %v3987_v61 = vld [vmem:[#allocation2 + $0x110] sm:$0xff] }
 0x228   : > { %v3989_v40 = vld [vmem:[#allocation2 + $0x130] sm:$0xff]  ;;  %v2133_v9 = vsel %vm1927_vm2, %v3979_v7, 0.0  ;;  %v3995_v11 = vld [vmem:[#allocation2 + $0x120] sm:$0xff]  ;;  %v3997_v12 = vld [vmem:[#allocation2 + $0x128] sm:$0xff] }
 0x229   : > { %v2128_v52 = vadd.f32 %v2127_v31, %v2126_v1  ;;  %v2065_v10 = vadd.f32 %v2064_v34, %v3965_v35  ;;  %v2093_v57 = vadd.f32 %v2092_v39, %v3967_v36  ;;  %v3999_v17 = vld [vmem:[#allocation2 + $0x148] sm:$0xff]  ;;  %v2135_v20 = vsel %vm1927_vm2, %v3989_v40, 0.0  ;;  %v4005_v23 = vld [vmem:[#allocation2 + $0x138] sm:$0xff]  ;;  %v4007_v24 = vld [vmem:[#allocation2 + $0x140] sm:$0xff] }
 0x22a   : > { %4911 = vst [vmem:[#allocation34_spill] sm:$0xff] %v3999_v17  ;;  %v4011_v32 = vld [vmem:[#allocation2 + $0x150] sm:$0xff]  ;;  %v2137_v31 = vsel %vm1927_vm2, %v3999_v17, 0.0  ;;  %v2159_v1 = vmul.f32 %v3875_v41, %v3875_v41  ;;  %v2160_v34 = vmul.f32 %v3877_v4, %v3877_v4  ;;  %v4019_v39 = vld [vmem:[#allocation2 + $0x158] sm:$0xff]  ;;  %v4125_v4 = vmul.f32 %v3965_v35, %v3965_v35  ;;  %v4135_v35 = vld [vmem:[#allocation2 + $0x1a0] sm:$0xff] }
 0x22b   : > { %v2130_v3 = vadd.f32 %v2129_v19, %v2128_v52  ;;  %v2066_v5 = vadd.f32 %v2065_v10, %v3975_v22  ;;  %v2094_v6 = vadd.f32 %v2093_v57, %v3977_v51  ;;  %4912 = vst [vmem:[#allocation35_spill] sm:$0xff] %v4019_v39  ;;  %v4021_v19 = vld [vmem:[#allocation2 + $0x160] sm:$0xff]  ;;  %v2161_v57 = vmul.f32 %v3879_v44, %v3879_v44 }
 0x22c   : > { %4913 = vst [vmem:[#allocation36_spill] sm:$0xff] %v4021_v19  ;;  %4923 = vst [vmem:[#allocation46_spill] sm:$0xff] %v4135_v35 }
 0x22d   : > { %v2132_v28 = vadd.f32 %v2131_v60, %v2130_v3  ;;  %v2067_v16 = vadd.f32 %v2066_v5, %v3985_v37  ;;  %v2095_v18 = vadd.f32 %v2094_v6, %v3987_v61  ;;  %v2162_v60 = vmul.f32 %v3881_v42, %v3881_v42 }
 0x22e   : > { %v2163_v3 = vmul.f32 %v3883_v47, %v3883_v47  ;;  %v2164_v5 = vmul.f32 %v3885_v45, %v3885_v45  ;;  %v2165_v6 = vmul.f32 %v3889_v49, %v3889_v49  ;;  %v2169_v49 = vmul.f32 %v3903_v54, %v3903_v54  ;;  %v4065_v54 = vld [vmem:[#allocation2 + $0x190] sm:$0xff] }
 0x22f   : > { %v2134_v26 = vadd.f32 %v2133_v9, %v2132_v28  ;;  %v2068_v62 = vadd.f32 %v2067_v16, %v3995_v11  ;;  %v2096_v30 = vadd.f32 %v2095_v18, %v3997_v12  ;;  %v2166_v9 = vmul.f32 %v3891_v48, %v3891_v48  ;;  %4917 = vst [vmem:[#allocation40_spill] sm:$0xff] %v4065_v54 }
 0x230   : > { %v2167_v18 = vmul.f32 %v3893_v50, %v3893_v50  ;;  %v2172_v50 = vmul.f32 %v3917_v0, %v3917_v0  ;;  %v4063_v48 = vmul.f32 %v3925_v55, %v3925_v55  ;;  %v2176_v45 = vmul.f32 %v3919_v2, %v3919_v2  ;;  %v4079_v0 = vld [vmem:[#allocation2 + $0x1a8] sm:$0xff] }
 0x231   : > { %v2136_v33 = vadd.f32 %v2135_v20, %v2134_v26  ;;  %v2069_v52 = vadd.f32 %v2068_v62, %v4005_v23  ;;  %v2097_v10 = vadd.f32 %v2096_v30, %v4007_v24  ;;  %v2168_v20 = vmul.f32 %v3901_v53, %v3901_v53  ;;  %v4042_v26 = vld [vmem:[#allocation2 + $0x168] sm:$0xff]  ;;  %4918 = vst [vmem:[#allocation41_spill] sm:$0xff] %v4079_v0 }
 0x232   : > { %4914 = vst [vmem:[#allocation37_spill] sm:$0xff] %v4042_v26  ;;  %v2139_v30 = vsel %vm1927_vm2, %v4021_v19, 0.0  ;;  %v2171_v53 = vmul.f32 %v3915_v63, %v3915_v63  ;;  %v4073_v63 = vmul.f32 %v3935_v14, %v3935_v14  ;;  %v4084_v42 = vmul.f32 %v3929_v8, %v3929_v8  ;;  %v4092_v14 = vld [vmem:[#allocation2 + $0x1c0] sm:$0xff] }
 0x233   : > { %v2070_v28 = vadd.f32 %v2069_v52, %v4011_v32  ;;  %v2138_v16 = vadd.f32 %v2137_v31, %v2136_v33  ;;  %v2098_v62 = vadd.f32 %v2097_v10, %v4019_v39  ;;  %v2170_v52 = vmul.f32 %v3905_v56, %v3905_v56  ;;  %v4051_v33 = vld [vmem:[#allocation2 + $0x170] sm:$0xff]  ;;  %v4053_v31 = vld [vmem:[#allocation2 + $0x178] sm:$0xff]  ;;  %4920 = vst [vmem:[#allocation43_spill] sm:$0xff] %v4092_v14 }
 0x234   : > { %4915 = vst [vmem:[#allocation38_spill] sm:$0xff] %v4051_v33  ;;  %4916 = vst [vmem:[#allocation39_spill] sm:$0xff] %v4053_v31  ;;  %v2173_v10 = vmul.f32 %v3909_v58, %v3909_v58  ;;  %v2175_v56 = vmul.f32 %v3927_v25, %v3927_v25  ;;  %v4077_v58 = vmul.f32 %v3937_v13, %v3937_v13  ;;  %v4090_v25 = vld [vmem:[#allocation2 + $0x180] sm:$0xff]  ;;  %v2141_v44 = vsel %vm1927_vm2, %v4053_v31, 0.0 }
 0x235   : > { %v2071_v55 = vadd.f32 %v2070_v28, %v4042_v26  ;;  %v2140_v47 = vadd.f32 %v2139_v30, %v2138_v16  ;;  %v4088_v2 = vmul.f32 %v3945_v21, %v3945_v21  ;;  %4919 = vst [vmem:[#allocation42_spill] sm:$0xff] %v4090_v25  ;;  %v2099_v13 = vadd.f32 %v2098_v62, %v4051_v33  ;;  %v4105_v30 = vld [vmem:[#allocation2 + $0x188] sm:$0xff]  ;;  %v4131_v26 = vld [vmem:[#allocation2 + $0x198] sm:$0xff] }
 0x236   : > { %v4099_v28 = vmul.f32 %v3947_v59, %v3947_v59  ;;  %v4103_v16 = vmul.f32 %v3939_v15, %v3939_v15  ;;  %4921 = vst [vmem:[#allocation44_spill] sm:$0xff] %v4105_v30  ;;  %v2143_v21 = vsel %vm1927_vm2, %v4065_v54, 0.0  ;;  %v4111_v8 = vmul.f32 %v3955_v46, %v3955_v46  ;;  %4922 = vst [vmem:[#allocation45_spill] sm:$0xff] %v4131_v26 }
 0x237   : > { %v4115_v62 = vmul.f32 %v3957_v27, %v3957_v27  ;;  %v4119_v59 = vmul.f32 %v3949_v43, %v3949_v43  ;;  %v2145_v15 = vsel %vm1927_vm2, %v4079_v0, 0.0  ;;  %v2222_v41 = vadd.f32 %v2162_v60, %v2159_v1 }
 0x238   : > { %v2249_v54 = vadd.f32 %v2163_v3, %v2160_v34  ;;  %v2072_v46 = vadd.f32 %v2071_v55, %v4090_v25  ;;  %v2142_v31 = vadd.f32 %v2141_v44, %v2140_v47  ;;  %v2147_v27 = vsel %vm1927_vm2, %v4092_v14, 0.0  ;;  %v4142_v34 = vld [vmem:[#allocation2 + $0x1d8] sm:$0xff] }
 0x239   : > { %v2276_v33 = vsel %vm1927_vm2, %v2161_v57, 0.0  ;;  %v2100_v43 = vadd.f32 %v2099_v13, %v4105_v30  ;;  %v2223_v19 = vadd.f32 %v2222_v41, %v2165_v6  ;;  %v2277_v39 = vsel %vm1927_vm2, %v2164_v5, 0.0  ;;  %4924 = vst [vmem:[#allocation47_spill] sm:$0xff] %v4142_v34  ;;  %v4144_v57 = vld [vmem:[#allocation2 + $0x1e0] sm:$0x3] }
 0x23a   : > { %v2250_v0 = vadd.f32 %v2249_v54, %v2166_v9  ;;  %v2187_v1 = vmul.f32 %v3967_v36, %v3967_v36  ;;  %v2188_v44 = vmul.f32 %v3959_v29, %v3959_v29  ;;  %v2278_v47 = vadd.f32 %v2277_v39, %v2276_v33  ;;  %4925 = vst [vmem:[#allocation48_spill] sm:$0xff] %v4144_v57  ;;  %v4146_v13 = vld [vmem:[#allocation2 + $0x1e8] sm:$0x3]  ;;  %v4151_v5 = vld [vmem:[#allocation2 + $0x1f0] sm:$0x3] }
 0x23b   : > { %v2279_v55 = vsel %vm1927_vm2, %v2167_v18, 0.0  ;;  %4926 = vst [vmem:[#allocation49_spill] sm:$0xff] %v4146_v13  ;;  %v2189_v41 = vmul.f32 %v3975_v22, %v3975_v22  ;;  %v2224_v54 = vadd.f32 %v2223_v19, %v2168_v20  ;;  %v2281_v3 = vsel %vm1927_vm2, %v2170_v52, 0.0  ;;  %4927 = vst [vmem:[#allocation50_spill] sm:$0xff] %v4151_v5  ;;  %v4156_v33 = vld [vmem:[#allocation2 + $0x1b0] sm:$0xff] }
 0x23c   : > { %v2251_v60 = vadd.f32 %v2250_v0, %v2169_v49  ;;  %v2073_v6 = vadd.f32 %v2072_v46, %v4131_v26  ;;  %v2144_v39 = vadd.f32 %v2143_v21, %v2142_v31  ;;  %v2190_v9 = vmul.f32 %v3977_v51, %v3977_v51  ;;  %4928 = vst [vmem:[#allocation51_spill] sm:$0xff] %v4156_v33  ;;  %v4160_v49 = vld [vmem:[#allocation2 + $0x1b8] sm:$0xff] }
 0x23d   : > { %v2280_v18 = vadd.f32 %v2279_v55, %v2278_v47  ;;  %v2101_v29 = vadd.f32 %v2100_v43, %v4135_v35  ;;  %v2225_v36 = vadd.f32 %v2224_v54, %v2171_v53  ;;  %v2283_v19 = vsel %vm1927_vm2, %v2173_v10, 0.0  ;;  %4929 = vst [vmem:[#allocation52_spill] sm:$0xff] %v4160_v49  ;;  %v4175_v54 = vld [vmem:[#allocation2 + $0x1c8] sm:$0xff] }
 0x23e   : > { %v2252_v14 = vadd.f32 %v2251_v60, %v2172_v50  ;;  %v2077_v0 = vsel %vm2076_vm4, %v4144_v57, 0.0  ;;  %v2104_v21 = vsel %vm2076_vm4, %v4146_v13, 0.0  ;;  %v2149_v46 = vsel %vm1927_vm2, %v4142_v34, 0.0  ;;  %4930 = vst [vmem:[#allocation53_spill] sm:$0xff] %v4175_v54 }
 0x23f   : > { %v2282_v20 = vadd.f32 %v2281_v3, %v2280_v18  ;;  %v2151_v52 = vsel %vm1988_vm3, %v4151_v5, 0.0  ;;  %v2226_v53 = vadd.f32 %v2225_v36, %v4063_v48  ;;  %v2285_v43 = vsel %vm1927_vm2, %v2176_v45, 0.0 }
 0x240   : > { %v2253_v50 = vadd.f32 %v2252_v14, %v2175_v56  ;;  %v2074_v31 = vadd.f32 %v2073_v6, %v4156_v33  ;;  %v2146_v10 = vadd.f32 %v2145_v15, %v2144_v39  ;;  %v2191_v47 = vmul.f32 %v3969_v38, %v3969_v38  ;;  %v4182_v56 = vld [vmem:[#allocation2 + $0x1d0] sm:$0xff] }
 0x241   : > { %v2284_v55 = vadd.f32 %v2283_v19, %v2282_v20  ;;  %v2102_v60 = vadd.f32 %v2101_v29, %v4160_v49  ;;  %v2227_v3 = vadd.f32 %v2226_v53, %v4073_v63  ;;  %v2287_v48 = vsel %vm1927_vm2, %v4084_v42, 0.0  ;;  %4931 = vst [vmem:[#allocation54_spill] sm:$0xff] %v4182_v56 }
 0x242   : > { %v2254_v18 = vadd.f32 %v2253_v50, %v4077_v58  ;;  %v2192_v45 = vmul.f32 %v3985_v37, %v3985_v37  ;;  %v2193_v14 = vmul.f32 %v3987_v61, %v3987_v61  ;;  %v2194_v15 = vmul.f32 %v3979_v7, %v3979_v7 }
 0x243   : > { %v2286_v36 = vadd.f32 %v2285_v43, %v2284_v55  ;;  %v2195_v63 = vmul.f32 %v3995_v11, %v3995_v11  ;;  %v2228_v58 = vadd.f32 %v2227_v3, %v4088_v2  ;;  %v2289_v42 = vsel %vm1927_vm2, %v4103_v16, 0.0 }
 0x244   : > { %v2255_v29 = vadd.f32 %v2254_v18, %v4099_v28  ;;  %v2075_v6 = vadd.f32 %v2074_v31, %v4175_v54  ;;  %v2148_v39 = vadd.f32 %v2147_v27, %v2146_v10  ;;  %v2196_v19 = vmul.f32 %v3997_v12, %v3997_v12 }
 0x245   : > { %v2288_v20 = vadd.f32 %v2287_v48, %v2286_v36  ;;  %v2103_v53 = vadd.f32 %v2102_v60, %v4182_v56  ;;  %v2229_v50 = vadd.f32 %v2228_v58, %v4111_v8  ;;  %v2291_v2 = vsel %vm1927_vm2, %v4119_v59, 0.0 }
 0x246   : > { %v2256_v43 = vadd.f32 %v2255_v29, %v4115_v62  ;;  %v2197_v28 = vmul.f32 %v3989_v40, %v3989_v40  ;;  %v2198_v16 = vmul.f32 %v4005_v23, %v4005_v23  ;;  %v2199_v27 = vmul.f32 %v4007_v24, %v4007_v24 }
 0x247   : > { %v2290_v31 = vadd.f32 %v2289_v42, %v2288_v20  ;;  %v2200_v10 = vmul.f32 %v3999_v17, %v3999_v17  ;;  %v2230_v8 = vadd.f32 %v2229_v50, %v4125_v4  ;;  %v2293_v62 = vsel %vm1927_vm2, %v2188_v44, 0.0  ;;  %v4932_v42 = vld [vmem:[#allocation35_spill] sm:$0xff]  ;;  %v4933_v17 = vld [vmem:[#allocation36_spill] sm:$0xff] }
 0x248   : > { %v2257_v55 = vadd.f32 %v2256_v43, %v2187_v1  ;;  %v2078_v60 = vadd.f32 %v2077_v0, %v2075_v6  ;;  %v2150_v59 = vadd.f32 %v2149_v46, %v2148_v39  ;;  %v2201_v3 = vmul.f32 %v4011_v32, %v4011_v32  ;;  %v4934_v1 = vld [vmem:[#allocation37_spill] sm:$0xff]  ;;  %v4935_v46 = vld [vmem:[#allocation38_spill] sm:$0xff] }
 0x249   : > { %v2292_v18 = vadd.f32 %v2291_v2, %v2290_v31  ;;  %v2105_v48 = vadd.f32 %v2104_v21, %v2103_v53  ;;  %v2231_v36 = vadd.f32 %v2230_v8, %v2189_v41  ;;  %v2295_v29 = vsel %vm1927_vm2, %v2191_v47, 0.0  ;;  %v4936_v47 = vld [vmem:[#allocation39_spill] sm:$0xff] }
 0x24a   : > { %v2258_v58 = vadd.f32 %v2257_v55, %v2190_v9  ;;  %v2202_v20 = vmul.f32 %v4932_v42, %v4932_v42  ;;  %v2203_v4 = vmul.f32 %v4933_v17, %v4933_v17  ;;  %v2204_v44 = vmul.f32 %v4934_v1, %v4934_v1 }
 0x24b   : > { %v2294_v0 = vadd.f32 %v2293_v62, %v2292_v18  ;;  %v2205_v6 = vmul.f32 %v4935_v46, %v4935_v46  ;;  %v2232_v39 = vadd.f32 %v2231_v36, %v2192_v45  ;;  %v2297_v41 = vsel %vm1927_vm2, %v2194_v15, 0.0 }
 0x24c   : > { %v2259_v50 = vadd.f32 %v2258_v58, %v2193_v14  ;;  %v2079_v9 = vrot.slane %v2078_v60, 4  ;;  %v2152_v21 = vadd.f32 %v2151_v52, %v2150_v59  ;;  %v2206_v53 = vmul.f32 %v4936_v47, %v4936_v47  ;;  %v4937_v14 = vld [vmem:[#allocation40_spill] sm:$0xff] }
 0x24d   : > { %v2296_v43 = vadd.f32 %v2295_v29, %v2294_v0  ;;  %v2106_v2 = vrot.slane %v2105_v48, 4  ;;  %v2233_v31 = vadd.f32 %v2232_v39, %v2195_v63  ;;  %v2299_v55 = vsel %vm1927_vm2, %v2197_v28, 0.0 }
 0x24e   : > { %v2260_v8 = vadd.f32 %v2259_v50, %v2196_v19  ;;  %v2207_v62 = vmul.f32 %v4090_v25, %v4090_v25  ;;  %v2208_v45 = vmul.f32 %v4105_v30, %v4105_v30  ;;  %v2209_v15 = vmul.f32 %v4937_v14, %v4937_v14  ;;  %v4938_v14 = vld [vmem:[#allocation41_spill] sm:$0xff] }
 0x24f   : > { %v2298_v18 = vadd.f32 %v2297_v41, %v2296_v43  ;;  %v2210_v52 = vmul.f32 %v4131_v26, %v4131_v26  ;;  %v2234_v59 = vadd.f32 %v2233_v31, %v2198_v16  ;;  %v2301_v63 = vsel %vm1927_vm2, %v2200_v10, 0.0 }
 0x250   : > { %v2261_v36 = vadd.f32 %v2260_v8, %v2199_v27  ;;  %v2080_v19 = vadd.f32 %v2079_v9, %v2078_v60  ;;  %v2153_v58 = vrot.slane %v2152_v21, 4  ;;  %v2211_v28 = vmul.f32 %v4135_v35, %v4135_v35  ;;  %v4939_v60 = vld [vmem:[#allocation43_spill] sm:$0xff] }
 0x251   : > { %v2300_v29 = vadd.f32 %v2299_v55, %v2298_v18  ;;  %v2107_v0 = vadd.f32 %v2106_v2, %v2105_v48  ;;  %v2235_v39 = vadd.f32 %v2234_v59, %v2201_v3  ;;  %v2303_v30 = vsel %vm1927_vm2, %v2203_v4, 0.0  ;;  %v4971_v35 = vld [vmem:[#allocation31_spill] sm:$0xff] }
 0x252   : > { %v2262_v50 = vadd.f32 %v2261_v36, %v2202_v20  ;;  %v2212_v41 = vmul.f32 %v4938_v14, %v4938_v14  ;;  %v2213_v16 = vmul.f32 %v4156_v33, %v4156_v33  ;;  %v2214_v27 = vmul.f32 %v4160_v49, %v4160_v49  ;;  %v4968_v49 = vld [vmem:[#allocation28_spill] sm:$0xff]  ;;  %v4970_v14 = vld [vmem:[#allocation33_spill] sm:$0xff] }
 0x253   : > { %v2302_v10 = vadd.f32 %v2301_v63, %v2300_v29  ;;  %v2215_v9 = vmul.f32 %v4939_v60, %v4939_v60  ;;  %v2236_v43 = vadd.f32 %v2235_v39, %v2204_v44  ;;  %v2305_v3 = vsel %vm1927_vm2, %v2206_v53, 0.0  ;;  %v4969_v33 = vld [vmem:[#allocation32_spill] sm:$0xff] }
 0x254   : > { %v2263_v31 = vadd.f32 %v2262_v50, %v2205_v6  ;;  %v2081_v48 = vrot.slane %v2080_v19, 2  ;;  %v2154_v20 = vadd.f32 %v2153_v58, %v2152_v21  ;;  %v2216_v4 = vmul.f32 %v4175_v54, %v4175_v54  ;;  %v4967_v54 = vld [vmem:[#allocation30_spill] sm:$0xff] }
 0x255   : > { %v2304_v2 = vadd.f32 %v2303_v30, %v2302_v10  ;;  %v2108_v8 = vrot.slane %v2107_v0, 2  ;;  %v2237_v55 = vadd.f32 %v2236_v43, %v2207_v62  ;;  %v2307_v59 = vsel %vm1927_vm2, %v2209_v15, 0.0 }
 0x256   : > { %v2264_v18 = vadd.f32 %v2263_v31, %v2208_v45  ;;  %v2217_v36 = vmul.f32 %v4182_v56, %v4182_v56  ;;  %v2219_v44 = vmul.f32 %v4144_v57, %v4144_v57  ;;  %v2220_v6 = vmul.f32 %v4146_v13, %v4146_v13  ;;  %v4962_v13 = vld [vmem:[#allocation22_spill] sm:$0xff] }
 0x257   : > { %v2306_v53 = vadd.f32 %v2305_v3, %v2304_v2  ;;  %v2218_v21 = vmul.f32 %v4142_v34, %v4142_v34  ;;  %v2238_v63 = vadd.f32 %v2237_v55, %v2210_v52  ;;  %v2309_v62 = vsel %vm1927_vm2, %v2212_v41, 0.0  ;;  %v4963_v57 = vld [vmem:[#allocation26_spill] sm:$0xff]  ;;  %v4966_v34 = vld [vmem:[#allocation29_spill] sm:$0xff] }
 0x258   : > { %v2265_v30 = vadd.f32 %v2264_v18, %v2211_v28  ;;  %v2082_v45 = vadd.f32 %v2081_v48, %v2080_v19  ;;  %v2155_v58 = vrot.slane %v2154_v20, 2  ;;  %v2221_v15 = vmul.f32 %v4151_v5, %v4151_v5 }
 0x259   : > { %v2308_v29 = vadd.f32 %v2307_v59, %v2306_v53  ;;  %v2109_v39 = vadd.f32 %v2108_v8, %v2107_v0  ;;  %v2239_v50 = vadd.f32 %v2238_v63, %v2213_v16  ;;  %v2311_v43 = vsel %vm1927_vm2, %v2215_v9, 0.0 }
 0x25a   : > { %v2266_v10 = vadd.f32 %v2265_v30, %v2214_v27  ;;  %v2241_v31 = vsel %vm2076_vm4, %v2219_v44, 0.0  ;;  %v2268_v3 = vsel %vm2076_vm4, %v2220_v6, 0.0  ;;  %v2313_v41 = vsel %vm1927_vm2, %v2218_v21, 0.0 }
 0x25b   : > { %v2310_v2 = vadd.f32 %v2309_v62, %v2308_v29  ;;  %v2240_v52 = vadd.f32 %v2239_v50, %v2216_v4  ;;  %v2083_v19 = vrot.slane %v2082_v45, 1  ;;  %v2156_v48 = vadd.f32 %v2155_v58, %v2154_v20 }
 0x25c   : > { %v2267_v28 = vadd.f32 %v2266_v10, %v2217_v36  ;;  %v2110_v18 = vrot.slane %v2109_v39, 1  ;;  %v2315_v0 = vsel %vm1988_vm3, %v2221_v15, 0.0 }
 0x25d   : > { %v2312_v55 = vadd.f32 %v2311_v43, %v2310_v2  ;;  %v2242_v5 = vadd.f32 %v2241_v31, %v2240_v52  ;;  %v2157_v8 = vrot.slane %v2156_v48, 1  ;;  %v2084_v53 = vadd.f32 %v2083_v19, %v2082_v45 }
 0x25e   : > { %v2269_v59 = vadd.f32 %v2268_v3, %v2267_v28  ;;  %v2111_v6 = vadd.f32 %v2110_v18, %v2109_v39 }
 0x25f   : > { %v2314_v16 = vadd.f32 %v2313_v41, %v2312_v55  ;;  %v2243_v27 = vrot.slane %v2242_v5, 4  ;;  %v2158_v62 = vadd.f32 %v2157_v8, %v2156_v48  ;;  %v2323_v50 = vmul.f32 0.0061728396, %v2084_v53 }
 0x260   : > { %v2270_v9 = vrot.slane %v2269_v59, 4  ;;  %v2324_v10 = vmul.f32 0.0061728396, %v2111_v6 }
 0x261   : > { %v2316_v44 = vadd.f32 %v2315_v0, %v2314_v16  ;;  %v2244_v63 = vadd.f32 %v2243_v27, %v2242_v5  ;;  %v2325_v2 = vmul.f32 0.0061728396, %v2158_v62  ;;  %v2329_v45 = vmul.f32 %v2323_v50, %v2323_v50 }
 0x262   : > { %v2271_v4 = vadd.f32 %v2270_v9, %v2269_v59  ;;  %v2330_v39 = vmul.f32 %v2324_v10, %v2324_v10 }
 0x263   : > { %v2317_v36 = vrot.slane %v2316_v44, 4  ;;  %v2245_v30 = vrot.slane %v2244_v63, 2  ;;  %v2331_v18 = vmul.f32 %v2325_v2, %v2325_v2 }
 0x264   : > { %v2272_v21 = vrot.slane %v2271_v4, 2 }
 0x265   : > { %v2318_v20 = vadd.f32 %v2317_v36, %v2316_v44  ;;  %v2246_v58 = vadd.f32 %v2245_v30, %v2244_v63  ;;  %v3344_v63 = vmov 1966171168   ;;  %v2352_v36 = vlaneseq }
 0x266   : > { %v2273_v29 = vadd.f32 %v2272_v21, %v2271_v4  ;;  %v2350_v4 = vunpack.c.l.s4 %v3344_v63 }
 0x267   : > { %v2319_v43 = vrot.slane %v2318_v20, 2  ;;  %v2247_v15 = vrot.slane %v2246_v58, 1  ;;  %v4269_v21 = vshrl.u32 %v2352_v36, 7 }
 0x268   : > { %v2274_v31 = vrot.slane %v2273_v29, 1  ;;  %v2351_v30 = vunpack.c.0.s8 %v2350_v4  ;;  %v4946_v4 = vld [vmem:[#allocation8_spill] sm:$0xff] }
 0x269   : > { %v2320_v3 = vadd.f32 %v2319_v43, %v2318_v20  ;;  %v2248_v52 = vadd.f32 %v2247_v15, %v2246_v58 }
 0x26a   : > { %v2275_v28 = vadd.f32 %v2274_v31, %v2273_v29  ;;  %v2354_v20 = vsub.s32 %v2351_v30, %v4269_v21 }
 0x26b   : > { %v2321_v5 = vrot.slane %v2320_v3, 1  ;;  %v2326_v41 = vmul.f32 0.0061728396, %v2248_v52  ;;  %v2338_v52 = vld [vmem:[%s4815_s2] sm:$0x7] }
 0x26c   : > { %v2327_v19 = vmul.f32 0.0061728396, %v2275_v28 }
 0x26d   : > { %v2322_v55 = vadd.f32 %v2321_v5, %v2320_v3  ;;  %v2332_v48 = vsub.f32 %v2326_v41, %v2329_v45  ;;  %v2377_v45 = vsub.s32 0, %v4269_v21  ;;  %v2385_v5 = vsub.s32 2, %v4269_v21 }
 0x26e   : > { %v2333_v59 = vsub.f32 %v2327_v19, %v2330_v39  ;;  %v2381_v39 = vsub.s32 1, %v4269_v21  ;;  %v4948_v21 = vld [vmem:[#allocation10_spill] sm:$0xff] }
 0x26f   : > { %v2328_v0 = vmul.f32 0.0061728396, %v2322_v55  ;;  %v2335_v16 = vmax.f32 %v2332_v48, 0.0 }
 0x270   : > { %v2336_v27 = vmax.f32 %v2333_v59, 0.0 }
 0x271   : > { %v2334_v9 = vsub.f32 %v2328_v0, %v2331_v18  ;;  %v2339_v8 = vadd.f32 0.001, %v2335_v16  ;;  %v4942_v16 = vld [vmem:[#allocation4_spill] sm:$0xff] }
 0x272   : > { %v2340_v44 = vadd.f32 0.001, %v2336_v27 }
 0x273   : > { %v2337_v53 = vmax.f32 %v2334_v9, 0.0  ;;  %3313 = vrsqrt.f32 %v2339_v8  ;;  %v4943_v9 = vld [vmem:[#allocation5_spill] sm:$0xff] }
 0x274   : > { %3315 = vrsqrt.f32 %v2340_v44  ;;  %v4944_v44 = vld [vmem:[#allocation6_spill] sm:$0xff] }
 0x275   : > { %v2341_v6 = vadd.f32 0.001, %v2337_v53 }
 0x277   : > { %3317 = vrsqrt.f32 %v2341_v6  ;;  %v4945_v6 = vld [vmem:[#allocation7_spill] sm:$0xff] }
 0x27d   : > { %v3314_v62 = vpop.eup %3313 }
 0x27e   : > { %v3316_v58 = vpop.eup %3315 }
 0x27f   : > { %v2348_v29 = vcombine.low %v3314_v62, %v3316_v58  ;;  %v4949_v58 = vld [vmem:[#allocation11_spill] sm:$0xff] }
 0x281   : > { %v3318_v43 = vpop.eup %3317  ;;  %v2355_v15 = vrot.slane %v2348_v29, %v2354_v20 }
 0x282   : > { %v2362_v31 = vrot.slane %v3318_v43, %v2354_v20  ;;  %v4950_v43 = vld [vmem:[#allocation12_spill] sm:$0xff] }
 0x284   : > { %v2363_v3 = vcombine.low %v2355_v15, %v2362_v31  ;;  %v4951_v31 = vld [vmem:[#allocation13_spill] sm:$0xff] }
 0x286   : > { %v2370_v28 = vrot.slane %v2363_v3, %v2354_v20 }
 0x288   : > { %v2372_v41 = vmul.f32 %v2370_v28, %v2338_v52  ;;  %v4952_v52 = vld [vmem:[#allocation14_spill] sm:$0xff] }
 0x28a   : > { %v4278_v19 = vrot.slane %v2372_v41, %v2377_v45  ;;  %v4280_v55 = vrot.slane %v2372_v41, %v2381_v39  ;;  %v4282_v18 = vrot.slane %v2372_v41, %v2385_v5 }
 0x28c   : > { %4940 = vst [vmem:[#allocation35_spill] sm:$0xff] %v4278_v19  ;;  %4941 = vst [vmem:[#allocation36_spill] sm:$0xff] %v4280_v55  ;;  %v2390_v48 = vmul.f32 %v4278_v19, %v2323_v50  ;;  %v2391_v59 = vmul.f32 %v4280_v55, %v2324_v10  ;;  %v2392_v0 = vmul.f32 %v4282_v18, %v2325_v2  ;;  %v4947_v10 = vld [vmem:[#allocation9_spill] sm:$0xff] }
 0x28d   : > { %v2421_v27 = vmul.f32 %v4278_v19, %v4942_v16  ;;  %v2422_v8 = vmul.f32 %v4280_v55, %v4943_v9  ;;  %v2423_v53 = vmul.f32 %v4282_v18, %v4944_v44  ;;  %v2424_v63 = vmul.f32 %v4278_v19, %v4945_v6  ;;  %v4955_v9 = vld [vmem:[#allocation18_spill] sm:$0xff]  ;;  %v4956_v6 = vld [vmem:[#allocation16_spill] sm:$0xff] }
 0x28e   : > { %v2425_v36 = vmul.f32 %v4280_v55, %v4946_v4  ;;  %v2396_v50 = vcombine.low %v2390_v48, %v2391_v59  ;;  %v2410_v30 = vrot.slane %v2392_v0, %v2354_v20  ;;  %v2426_v2 = vmul.f32 %v4282_v18, %v4947_v10  ;;  %v4953_v48 = vld [vmem:[#allocation15_spill] sm:$0xff]  ;;  %v4954_v0 = vld [vmem:[#allocation17_spill] sm:$0xff]  ;;  %v4957_v10 = vld [vmem:[#allocation20_spill] sm:$0xff] }
 0x28f   : > { %v2427_v62 = vmul.f32 %v4278_v19, %v4948_v21  ;;  %v2428_v29 = vmul.f32 %v4280_v55, %v4949_v58  ;;  %v4305_v15 = vmul.f32 %v4282_v18, %v4950_v43  ;;  %v4309_v3 = vmul.f32 %v4278_v19, %v4951_v31  ;;  %v4959_v43 = vld [vmem:[#allocation19_spill] sm:$0xff] }
 0x290   : > { %v4313_v28 = vmul.f32 %v4280_v55, %v4952_v52  ;;  %v2403_v41 = vrot.slane %v2396_v50, %v2354_v20  ;;  %v4317_v59 = vmul.f32 %v4282_v18, %v4953_v48  ;;  %v4321_v16 = vmul.f32 %v4278_v19, %v4954_v0  ;;  %v4958_v50 = vld [vmem:[#allocation21_spill] sm:$0xff]  ;;  %v4960_v48 = vld [vmem:[#allocation23_spill] sm:$0xff] }
 0x291   : > { %v4325_v44 = vmul.f32 %v4280_v55, %v4955_v9  ;;  %v4329_v4 = vmul.f32 %v4282_v18, %v4956_v6  ;;  %v4333_v21 = vmul.f32 %v4278_v19, %v4957_v10  ;;  %v4337_v58 = vmul.f32 %v4280_v55, %v4958_v50  ;;  %v4961_v9 = vld [vmem:[#allocation24_spill] sm:$0xff]  ;;  %v2373_v50 = vld [vmem:[%s4816_s3] sm:$0x7] }
 0x292   : > { %v4341_v31 = vmul.f32 %v4282_v18, %v4959_v43  ;;  %v2411_v52 = vcombine.low %v2403_v41, %v2410_v30  ;;  %v4345_v0 = vmul.f32 %v4278_v19, %v4960_v48  ;;  %v4349_v6 = vmul.f32 %v4280_v55, %v4961_v9  ;;  %v4964_v30 = vld [vmem:[#allocation27_spill] sm:$0xff]  ;;  %v4965_v48 = vld [vmem:[#allocation25_spill] sm:$0xff] }
 0x293   : > { %v4353_v10 = vmul.f32 %v4282_v18, %v4962_v13  ;;  %v4360_v43 = vmul.f32 %v4278_v19, %v4963_v57  ;;  %v4364_v41 = vmul.f32 %v4280_v55, %v4964_v30  ;;  %v4368_v9 = vmul.f32 %v4282_v18, %v4965_v48 }
 0x294   : > { %v4372_v13 = vmul.f32 %v4278_v19, %v4966_v34  ;;  %v2418_v56 = vrot.slane %v2411_v52, %v2354_v20  ;;  %v4376_v60 = vmul.f32 %v4280_v55, %v4967_v54  ;;  %v4380_v57 = vmul.f32 %v4282_v18, %v4968_v49 }
 0x295   : > { %v4384_v30 = vmul.f32 %v4278_v19, %v4969_v33  ;;  %v4388_v48 = vmul.f32 %v4280_v55, %v4970_v14  ;;  %v4392_v34 = vmul.f32 %v4282_v18, %v4971_v35  ;;  %v4396_v54 = vmul.f32 %v4278_v19, %v3975_v22 }
 0x296   : > { %v4400_v49 = vmul.f32 %v4280_v55, %v3977_v51  ;;  %v2420_v20 = vsub.f32 %v2373_v50, %v2418_v56  ;;  %v4404_v33 = vmul.f32 %v4282_v18, %v3969_v38  ;;  %v4408_v14 = vmul.f32 %v4278_v19, %v3985_v37 }
 0x297   : > { %v4412_v35 = vmul.f32 %v4280_v55, %v3987_v61  ;;  %v4416_v22 = vmul.f32 %v4282_v18, %v3979_v7  ;;  %v4420_v51 = vmul.f32 %v4278_v19, %v3995_v11  ;;  %v4424_v38 = vmul.f32 %v4280_v55, %v3997_v12  ;;  %v4972_v12 = vld [vmem:[#allocation34_spill] sm:$0xff] }
 0x298   : > { %v4428_v37 = vmul.f32 %v4282_v18, %v3989_v40  ;;  %v4430_v56 = vrot.slane %v2420_v20, %v2377_v45  ;;  %v4432_v61 = vrot.slane %v2420_v20, %v2381_v39  ;;  %v4434_v52 = vrot.slane %v2420_v20, %v2385_v5 }
 0x299   : > { %v4438_v7 = vmul.f32 %v4278_v19, %v4005_v23  ;;  %v4442_v11 = vmul.f32 %v4280_v55, %v4007_v24  ;;  %v4446_v50 = vmul.f32 %v4282_v18, %v4972_v12  ;;  %v4450_v40 = vmul.f32 %v4278_v19, %v4011_v32 }
 0x29a   : > { %v4454_v45 = vmul.f32 %v4280_v55, %v4932_v42  ;;  %v2500_v39 = vadd.f32 %v4430_v56, %v2421_v27  ;;  %v2501_v23 = vadd.f32 %v4432_v61, %v2422_v8  ;;  %v2502_v5 = vadd.f32 %v4434_v52, %v2423_v53 }
 0x29b   : > { %v2503_v24 = vadd.f32 %v4430_v56, %v2424_v63  ;;  %v2504_v20 = vadd.f32 %v4432_v61, %v2425_v36  ;;  %v2505_v12 = vadd.f32 %v4434_v52, %v2426_v2  ;;  %v2506_v26 = vadd.f32 %v4430_v56, %v2427_v62 }
 0x29c   : > { %v2507_v32 = vadd.f32 %v4432_v61, %v2428_v29  ;;  %v2563_v25 = vmax.f32 %v2500_v39, 0.0  ;;  %v2564_v47 = vmax.f32 %v2501_v23, 0.0  ;;  %v2565_v42 = vmax.f32 %v2502_v5, 0.0 }
 0x29d   : > { %v2566_v55 = vmax.f32 %v2503_v24, 0.0  ;;  %v2567_v46 = vmax.f32 %v2504_v20, 0.0  ;;  %v2568_v27 = vmax.f32 %v2505_v12, 0.0  ;;  %v2569_v19 = vmax.f32 %v2506_v26, 0.0 }
 0x29e   : > { %v2570_v8 = vmax.f32 %v2507_v32, 0.0  ;;  %2626 = vst [vmem:[%s4817_s4] sm:$0xff] %v2563_v25  ;;  %2627 = vst [vmem:[%s4817_s4 + $0x8] sm:$0xff] %v2564_v47  ;;  %v2508_v26 = vadd.f32 %v4434_v52, %v4305_v15  ;;  %v2509_v53 = vadd.f32 %v4430_v56, %v4309_v3  ;;  %v2510_v25 = vadd.f32 %v4432_v61, %v4313_v28 }
 0x29f   : > { %2628 = vst.msk [vmem:[%s4817_s4 + $0x10] sm:$0xff] %vm1927_vm2, %v2565_v42  ;;  %2629 = vst [vmem:[%s4817_s4 + $0x18] sm:$0xff] %v2566_v55  ;;  %v2511_v47 = vadd.f32 %v4434_v52, %v4317_v59  ;;  %v2512_v55 = vadd.f32 %v4430_v56, %v4321_v16  ;;  %v2513_v63 = vadd.f32 %v4432_v61, %v4325_v44 }
 0x2a0   : > { %2630 = vst [vmem:[%s4817_s4 + $0x20] sm:$0xff] %v2567_v46  ;;  %2631 = vst.msk [vmem:[%s4817_s4 + $0x28] sm:$0xff] %vm1927_vm2, %v2568_v27  ;;  %v2514_v46 = vadd.f32 %v4434_v52, %v4329_v4  ;;  %v2515_v36 = vadd.f32 %v4430_v56, %v4333_v21  ;;  %v2571_v2 = vmax.f32 %v2508_v26, 0.0  ;;  %v2572_v62 = vmax.f32 %v2509_v53, 0.0 }
 0x2a1   : > { %2632 = vst [vmem:[%s4817_s4 + $0x30] sm:$0xff] %v2569_v19  ;;  %2633 = vst [vmem:[%s4817_s4 + $0x38] sm:$0xff] %v2570_v8  ;;  %v2573_v29 = vmax.f32 %v2510_v25, 0.0  ;;  %v2574_v19 = vmax.f32 %v2511_v47, 0.0  ;;  %v2575_v15 = vmax.f32 %v2512_v55, 0.0  ;;  %v2576_v3 = vmax.f32 %v2513_v63, 0.0 }
 0x2a2   : > { %v2577_v28 = vmax.f32 %v2514_v46, 0.0  ;;  %v2578_v59 = vmax.f32 %v2515_v36, 0.0  ;;  %2634 = vst.msk [vmem:[%s4817_s4 + $0x40] sm:$0xff] %vm1927_vm2, %v2571_v2  ;;  %2635 = vst [vmem:[%s4817_s4 + $0x48] sm:$0xff] %v2572_v62  ;;  %v2516_v16 = vadd.f32 %v4432_v61, %v4337_v58  ;;  %v2517_v44 = vadd.f32 %v4434_v52, %v4341_v31 }
 0x2a3   : > { %2636 = vst [vmem:[%s4817_s4 + $0x50] sm:$0xff] %v2573_v29  ;;  %2637 = vst.msk [vmem:[%s4817_s4 + $0x58] sm:$0xff] %vm1927_vm2, %v2574_v19  ;;  %v2518_v4 = vadd.f32 %v4430_v56, %v4345_v0  ;;  %v2519_v21 = vadd.f32 %v4432_v61, %v4349_v6  ;;  %v2520_v58 = vadd.f32 %v4434_v52, %v4353_v10 }
 0x2a4   : > { %2638 = vst [vmem:[%s4817_s4 + $0x60] sm:$0xff] %v2575_v15  ;;  %2639 = vst [vmem:[%s4817_s4 + $0x68] sm:$0xff] %v2576_v3  ;;  %v2521_v31 = vadd.f32 %v4430_v56, %v4360_v43  ;;  %v2522_v0 = vadd.f32 %v4432_v61, %v4364_v41  ;;  %v2523_v6 = vadd.f32 %v4434_v52, %v4368_v9  ;;  %v2579_v39 = vmax.f32 %v2516_v16, 0.0  ;;  %v4976_v16 = vld [vmem:[#allocation39_spill] sm:$0xff] }
 0x2a5   : > { %2640 = vst.msk [vmem:[%s4817_s4 + $0x70] sm:$0xff] %vm1927_vm2, %v2577_v28  ;;  %2641 = vst [vmem:[%s4817_s4 + $0x78] sm:$0xff] %v2578_v59  ;;  %v2580_v23 = vmax.f32 %v2517_v44, 0.0  ;;  %v2581_v5 = vmax.f32 %v2518_v4, 0.0  ;;  %v2582_v24 = vmax.f32 %v2519_v21, 0.0  ;;  %v2583_v20 = vmax.f32 %v2520_v58, 0.0 }
 0x2a6   : > { %v2584_v12 = vmax.f32 %v2521_v31, 0.0  ;;  %v2585_v32 = vmax.f32 %v2522_v0, 0.0  ;;  %v2586_v42 = vmax.f32 %v2523_v6, 0.0  ;;  %2642 = vst [vmem:[%s4817_s4 + $0x80] sm:$0xff] %v2579_v39  ;;  %v2524_v10 = vadd.f32 %v4430_v56, %v4372_v13  ;;  %v4975_v28 = vld [vmem:[#allocation36_spill] sm:$0xff] }
 0x2a7   : > { %2643 = vst.msk [vmem:[%s4817_s4 + $0x88] sm:$0xff] %vm1927_vm2, %v2580_v23  ;;  %2644 = vst [vmem:[%s4817_s4 + $0x90] sm:$0xff] %v2581_v5  ;;  %v2525_v43 = vadd.f32 %v4432_v61, %v4376_v60  ;;  %v2526_v41 = vadd.f32 %v4434_v52, %v4380_v57  ;;  %v2527_v9 = vadd.f32 %v4430_v56, %v4384_v30  ;;  %v4978_v5 = vld [vmem:[#allocation44_spill] sm:$0xff] }
 0x2a8   : > { %2645 = vst [vmem:[%s4817_s4 + $0x98] sm:$0xff] %v2582_v24  ;;  %2646 = vst.msk [vmem:[%s4817_s4 + $0xa0] sm:$0xff] %vm1927_vm2, %v2583_v20  ;;  %v2528_v60 = vadd.f32 %v4432_v61, %v4388_v48  ;;  %v2529_v13 = vadd.f32 %v4434_v52, %v4392_v34  ;;  %v2530_v57 = vadd.f32 %v4430_v56, %v4396_v54  ;;  %v2587_v27 = vmax.f32 %v2524_v10, 0.0  ;;  %v4979_v20 = vld [vmem:[#allocation40_spill] sm:$0xff] }
 0x2a9   : > { %2647 = vst [vmem:[%s4817_s4 + $0xa8] sm:$0xff] %v2584_v12  ;;  %2648 = vst [vmem:[%s4817_s4 + $0xb0] sm:$0xff] %v2585_v32  ;;  %v2531_v30 = vadd.f32 %v4432_v61, %v4400_v49  ;;  %v2588_v8 = vmax.f32 %v2525_v43, 0.0  ;;  %v2589_v26 = vmax.f32 %v2526_v41, 0.0  ;;  %v2590_v53 = vmax.f32 %v2527_v9, 0.0  ;;  %v4980_v32 = vld [vmem:[#allocation45_spill] sm:$0xff] }
 0x2aa   : > { %2649 = vst.msk [vmem:[%s4817_s4 + $0xb8] sm:$0xff] %vm1927_vm2, %v2586_v42  ;;  %v2591_v25 = vmax.f32 %v2528_v60, 0.0  ;;  %v2592_v47 = vmax.f32 %v2529_v13, 0.0  ;;  %v2593_v55 = vmax.f32 %v2530_v57, 0.0  ;;  %2650 = vst [vmem:[%s4817_s4 + $0xc0] sm:$0xff] %v2587_v27  ;;  %v2532_v48 = vadd.f32 %v4434_v52, %v4404_v33  ;;  %v4981_v27 = vld [vmem:[#allocation46_spill] sm:$0xff] }
 0x2ab   : > { %v2594_v63 = vmax.f32 %v2531_v30, 0.0  ;;  %2651 = vst [vmem:[%s4817_s4 + $0xc8] sm:$0xff] %v2588_v8  ;;  %2652 = vst.msk [vmem:[%s4817_s4 + $0xd0] sm:$0xff] %vm1927_vm2, %v2589_v26  ;;  %v2533_v34 = vadd.f32 %v4430_v56, %v4408_v14  ;;  %v2534_v54 = vadd.f32 %v4432_v61, %v4412_v35  ;;  %v2535_v49 = vadd.f32 %v4434_v52, %v4416_v22  ;;  %v4982_v26 = vld [vmem:[#allocation41_spill] sm:$0xff] }
 0x2ac   : > { %2653 = vst [vmem:[%s4817_s4 + $0xd8] sm:$0xff] %v2590_v53  ;;  %2654 = vst [vmem:[%s4817_s4 + $0xe0] sm:$0xff] %v2591_v25  ;;  %v2536_v33 = vadd.f32 %v4430_v56, %v4420_v51  ;;  %v2537_v14 = vadd.f32 %v4432_v61, %v4424_v38  ;;  %v2538_v35 = vadd.f32 %v4434_v52, %v4428_v37  ;;  %v2595_v46 = vmax.f32 %v2532_v48, 0.0  ;;  %v4983_v25 = vld [vmem:[#allocation51_spill] sm:$0xff] }
 0x2ad   : > { %2655 = vst.msk [vmem:[%s4817_s4 + $0xe8] sm:$0xff] %vm1927_vm2, %v2592_v47  ;;  %2656 = vst [vmem:[%s4817_s4 + $0xf0] sm:$0xff] %v2593_v55  ;;  %v2539_v22 = vadd.f32 %v4430_v56, %v4438_v7  ;;  %v2596_v36 = vmax.f32 %v2533_v34, 0.0  ;;  %v2597_v2 = vmax.f32 %v2534_v54, 0.0  ;;  %v2598_v62 = vmax.f32 %v2535_v49, 0.0  ;;  %v4984_v55 = vld [vmem:[#allocation52_spill] sm:$0xff] }
 0x2ae   : > { %2657 = vst [vmem:[%s4817_s4 + $0xf8] sm:$0xff] %v2594_v63  ;;  %v2599_v29 = vmax.f32 %v2536_v33, 0.0  ;;  %v2600_v19 = vmax.f32 %v2537_v14, 0.0  ;;  %v2601_v15 = vmax.f32 %v2538_v35, 0.0  ;;  %2658 = vst.msk [vmem:[%s4817_s4 + $0x100] sm:$0xff] %vm1927_vm2, %v2595_v46  ;;  %v2540_v51 = vadd.f32 %v4432_v61, %v4442_v11  ;;  %v4985_v46 = vld [vmem:[#allocation43_spill] sm:$0xff] }
 0x2af   : > { %v2602_v3 = vmax.f32 %v2539_v22, 0.0  ;;  %2659 = vst [vmem:[%s4817_s4 + $0x108] sm:$0xff] %v2596_v36  ;;  %2660 = vst [vmem:[%s4817_s4 + $0x110] sm:$0xff] %v2597_v2  ;;  %v2541_v38 = vadd.f32 %v4434_v52, %v4446_v50  ;;  %v2542_v37 = vadd.f32 %v4430_v56, %v4450_v40  ;;  %v2543_v7 = vadd.f32 %v4432_v61, %v4454_v45  ;;  %v4973_v50 = vld [vmem:[#allocation35_spill] sm:$0xff]  ;;  %v4974_v45 = vld [vmem:[#allocation38_spill] sm:$0xff] }
 0x2b0   : > { %2661 = vst.msk [vmem:[%s4817_s4 + $0x118] sm:$0xff] %vm1927_vm2, %v2598_v62  ;;  %2662 = vst [vmem:[%s4817_s4 + $0x120] sm:$0xff] %v2599_v29  ;;  %v2465_v11 = vmul.f32 %v4282_v18, %v4933_v17  ;;  %v2466_v40 = vmul.f32 %v4973_v50, %v4934_v1  ;;  %v2467_v59 = vmul.f32 %v4975_v28, %v4974_v45  ;;  %v2603_v4 = vmax.f32 %v2540_v51, 0.0  ;;  %v4977_v1 = vld [vmem:[#allocation42_spill] sm:$0xff]  ;;  %v4986_v2 = vld [vmem:[#allocation53_spill] sm:$0xff] }
 0x2b1   : > { %2663 = vst [vmem:[%s4817_s4 + $0x128] sm:$0xff] %v2600_v19  ;;  %2664 = vst.msk [vmem:[%s4817_s4 + $0x130] sm:$0xff] %vm1927_vm2, %v2601_v15  ;;  %v2468_v44 = vmul.f32 %v4282_v18, %v4976_v16  ;;  %v2604_v21 = vmax.f32 %v2541_v38, 0.0  ;;  %v2605_v58 = vmax.f32 %v2542_v37, 0.0  ;;  %v2606_v31 = vmax.f32 %v2543_v7, 0.0  ;;  %v4987_v29 = vld [vmem:[#allocation54_spill] sm:$0xff] }
 0x2b2   : > { %2665 = vst [vmem:[%s4817_s4 + $0x138] sm:$0xff] %v2602_v3  ;;  %v2544_v0 = vadd.f32 %v4434_v52, %v2465_v11  ;;  %v2545_v6 = vadd.f32 %v4430_v56, %v2466_v40  ;;  %v2546_v39 = vadd.f32 %v4432_v61, %v2467_v59  ;;  %2666 = vst [vmem:[%s4817_s4 + $0x140] sm:$0xff] %v2603_v4  ;;  %v4988_v15 = vld [vmem:[#allocation47_spill] sm:$0xff]  ;;  %v4989_v16 = vld [vmem:[#allocation48_spill] sm:$0xff] }
 0x2b3   : > { %v2547_v17 = vadd.f32 %v4434_v52, %v2468_v44  ;;  %2667 = vst.msk [vmem:[%s4817_s4 + $0x148] sm:$0xff] %vm1927_vm2, %v2604_v21  ;;  %2668 = vst [vmem:[%s4817_s4 + $0x150] sm:$0xff] %v2605_v58  ;;  %v2469_v23 = vmul.f32 %v4973_v50, %v4977_v1  ;;  %v2470_v24 = vmul.f32 %v4975_v28, %v4978_v5  ;;  %v4990_v4 = vld [vmem:[#allocation49_spill] sm:$0xff]  ;;  %v4991_v58 = vld [vmem:[#allocation50_spill] sm:$0xff] }
 0x2b4   : > { %2669 = vst [vmem:[%s4817_s4 + $0x158] sm:$0xff] %v2606_v31  ;;  %v2471_v12 = vmul.f32 %v4282_v18, %v4979_v20  ;;  %v2472_v42 = vmul.f32 %v4973_v50, %v4980_v32  ;;  %v2607_v10 = vmax.f32 %v2544_v0, 0.0  ;;  %v2608_v43 = vmax.f32 %v2545_v6, 0.0 }
 0x2b5   : > { %v2609_v41 = vmax.f32 %v2546_v39, 0.0  ;;  %v2610_v9 = vmax.f32 %v2547_v17, 0.0  ;;  %v2548_v60 = vadd.f32 %v4430_v56, %v2469_v23  ;;  %v2549_v13 = vadd.f32 %v4432_v61, %v2470_v24 }
 0x2b6   : > { %v2550_v57 = vadd.f32 %v4434_v52, %v2471_v12  ;;  %v2551_v30 = vadd.f32 %v4430_v56, %v2472_v42  ;;  %2670 = vst.msk [vmem:[%s4817_s4 + $0x160] sm:$0xff] %vm1927_vm2, %v2607_v10  ;;  %2671 = vst [vmem:[%s4817_s4 + $0x168] sm:$0xff] %v2608_v43  ;;  %v2473_v8 = vmul.f32 %v4975_v28, %v4981_v27 }
 0x2b7   : > { %2672 = vst [vmem:[%s4817_s4 + $0x170] sm:$0xff] %v2609_v41  ;;  %2673 = vst.msk [vmem:[%s4817_s4 + $0x178] sm:$0xff] %vm1927_vm2, %v2610_v9  ;;  %v2474_v53 = vmul.f32 %v4282_v18, %v4982_v26  ;;  %v2475_v47 = vmul.f32 %v4973_v50, %v4983_v25  ;;  %v2476_v63 = vmul.f32 %v4975_v28, %v4984_v55  ;;  %v2611_v48 = vmax.f32 %v2548_v60, 0.0 }
 0x2b8   : > { %v2612_v34 = vmax.f32 %v2549_v13, 0.0  ;;  %v2613_v54 = vmax.f32 %v2550_v57, 0.0  ;;  %v2614_v49 = vmax.f32 %v2551_v30, 0.0  ;;  %v2552_v33 = vadd.f32 %v4432_v61, %v2473_v8 }
 0x2b9   : > { %v2553_v14 = vadd.f32 %v4434_v52, %v2474_v53  ;;  %v2554_v35 = vadd.f32 %v4430_v56, %v2475_v47  ;;  %v2555_v22 = vadd.f32 %v4432_v61, %v2476_v63  ;;  %2674 = vst [vmem:[%s4817_s4 + $0x180] sm:$0xff] %v2611_v48  ;;  %v2477_v36 = vmul.f32 %v4282_v18, %v4985_v46 }
 0x2ba   : > { %2675 = vst [vmem:[%s4817_s4 + $0x188] sm:$0xff] %v2612_v34  ;;  %2676 = vst.msk [vmem:[%s4817_s4 + $0x190] sm:$0xff] %vm1927_vm2, %v2613_v54  ;;  %v2478_v62 = vmul.f32 %v4973_v50, %v4986_v2  ;;  %v2479_v19 = vmul.f32 %v4975_v28, %v4987_v29  ;;  %v2480_v3 = vmul.f32 %v4282_v18, %v4988_v15  ;;  %v2615_v51 = vmax.f32 %v2552_v33, 0.0 }
 0x2bb   : > { %2677 = vst [vmem:[%s4817_s4 + $0x198] sm:$0xff] %v2614_v49  ;;  %v2616_v38 = vmax.f32 %v2553_v14, 0.0  ;;  %v2617_v37 = vmax.f32 %v2554_v35, 0.0  ;;  %v2618_v7 = vmax.f32 %v2555_v22, 0.0  ;;  %v2556_v11 = vadd.f32 %v4434_v52, %v2477_v36 }
 0x2bc   : > { %v2557_v40 = vadd.f32 %v4430_v56, %v2478_v62  ;;  %v2558_v45 = vadd.f32 %v4432_v61, %v2479_v19  ;;  %v2559_v59 = vadd.f32 %v4434_v52, %v2480_v3  ;;  %2678 = vst [vmem:[%s4817_s4 + $0x1a0] sm:$0xff] %v2615_v51  ;;  %v2481_v44 = vmul.f32 %v4973_v50, %v4989_v16 }
 0x2bd   : > { %2679 = vst.msk [vmem:[%s4817_s4 + $0x1a8] sm:$0xff] %vm1927_vm2, %v2616_v38  ;;  %2680 = vst [vmem:[%s4817_s4 + $0x1b0] sm:$0xff] %v2617_v37  ;;  %v2482_v21 = vmul.f32 %v4975_v28, %v4990_v4  ;;  %v2483_v31 = vmul.f32 %v4282_v18, %v4991_v58  ;;  %v2619_v0 = vmax.f32 %v2556_v11, 0.0 }
 0x2be   : > { %2681 = vst [vmem:[%s4817_s4 + $0x1b8] sm:$0xff] %v2618_v7  ;;  %v2620_v6 = vmax.f32 %v2557_v40, 0.0  ;;  %v2621_v39 = vmax.f32 %v2558_v45, 0.0  ;;  %v2622_v17 = vmax.f32 %v2559_v59, 0.0  ;;  %v2560_v1 = vadd.f32 %v4430_v56, %v2481_v44 }
 0x2bf   : > { %v2561_v23 = vadd.f32 %v4432_v61, %v2482_v21  ;;  %v2562_v5 = vadd.f32 %v4434_v52, %v2483_v31  ;;  %2682 = vst.msk [vmem:[%s4817_s4 + $0x1c0] sm:$0xff] %vm1927_vm2, %v2619_v0 }
 0x2c0   : > { %2683 = vst [vmem:[%s4817_s4 + $0x1c8] sm:$0xff] %v2620_v6  ;;  %2684 = vst [vmem:[%s4817_s4 + $0x1d0] sm:$0xff] %v2621_v39  ;;  %v2623_v18 = vmax.f32 %v2560_v1, 0.0 }
 0x2c1   : > { %2685 = vst.msk [vmem:[%s4817_s4 + $0x1d8] sm:$0xff] %vm1927_vm2, %v2622_v17  ;;  %v2624_v56 = vmax.f32 %v2561_v23, 0.0  ;;  %v2625_v61 = vmax.f32 %v2562_v5, 0.0 }
 0x2c2   : > { %2686 = vst [vmem:[%s4817_s4 + $0x1e0] sm:$0x3] %v2623_v18 }
 0x2c3   : > { %2687 = vst [vmem:[%s4817_s4 + $0x1e8] sm:$0x3] %v2624_v56  ;;  %2688 = vst.msk [vmem:[%s4817_s4 + $0x1f0] sm:$0x3] %vm1988_vm3, %v2625_v61 }
 0x2c4 PF: > { %p11_p11 = scmp.ge.s32.totalorder %s3389_s19, 6   ;;  %s4992_s15 = smov %s3337_s16 }
 0x2c5   : > { %s4993_s16 = smov %s3398_s22  ;;  %s4994_s17 = smov %s3389_s19 }
 0x2c6   :  { %13 = sbr.rel (!%p11_p11) target bundleno = 2 (0x2), region = 101 }

// kernel: reduction_b_forward.10
= control target key start
LH: loop header
LB: loop body
LE: loop exit
PB: predicated region body
PF: predicated region fallthrough
CT: control target
= control target key end

     0   :  { %s1895_s15 = smov 0   ;;  %s1897_s16 = smov 0   ;;  %s2188_s0 = inlined_call_operand.vmem [shape: bf16[32,3072], index: 0, kind: input, shape index: {}]   ;;  %s2189_s1 = inlined_call_operand.vmem [shape: bf16[3072,320], index: 1, kind: input, shape index: {}]   ;;  %s2190_s2 = inlined_call_operand.vmem [shape: f32[1,320], index: 2, kind: input, shape index: {}]   ;;  %s2191_s3 = inlined_call_operand.vmem [shape: f32[1,320], index: 3, kind: input, shape index: {}]   ;;  %s2192_s4 = inlined_call_operand.vmem [shape: f32[32,320], index: 4, kind: output, shape index: {}]  }
   0x1   :  { %s1899_s17 = smov 0  }
   0x2 LB: > { %s1911_s18 = sadd.s32 4294967295, %s1866_s17   ;;  %s1914_s19 = sadd.s32 1, %s1866_s17   ;;  %s1866_s17 = sphi %s1899_s17, %s2195_s17   ;;  %s1862_s16 = sphi %s1897_s16, %s2194_s16   ;;  %s1858_s15 = sphi %s1895_s15, %s2193_s15  }
   0x3   : > { %s18_s20 = ssub.s32 %s1866_s17, %s1914_s19  ;;  %s21_s21 = sadd.s32 1, %s1862_s16 }
   0x4   : > { %p19_p0 = scmp.eq.s32.totalorder %s18_s20, 0  ;;  %p28_p1 = scmp.ne.s32.totalorder %s1862_s16, %s1858_s15 }
   0x5   : > { %p29_p2 = scmp.eq.s32.totalorder %s1866_s17, 0  ;;  %p1490_p4 = scmp.ge.s32.totalorder %s1866_s17, 6 }
   0x6   : > { %s1923_s22 = scalar_select %p19_p0, %s1862_s16, %s21_s21  }
   0x7   : > { %p30_p3 = por %p29_p2, %p28_p1  ;;  %149 = sbr.rel (%p1490_p4) target bundleno = 22 (0x16), region = 24 }
   0xe   : > { %152 = sbr.rel (!%p30_p3) target bundleno = 22 (0x16), region = 28  ;;  %s154_s23 = sand.u32 (%p30_p3), 1, %s1862_s16  }
   0xf   : > { %s1606_s24 = sshll.u32 (%p30_p3), %s1866_s17, 4  ;;  %s1491_s25 = sshll.u32 (%p30_p3), %s154_s23, 6 }
  0x10   : > { %s159_s28 = scalar_lea.vmem (%p30_p3), %s2188_s0, %s1606_s24  ;;  %s156_s29 = scalar_lea.vmem (%p30_p3), [#allocation3], %s1491_s25 }
  0x11   : > { %v172_v0 = vld [vmem:[%s159_s28] sm:$0xff] (%p30_p3)  ;;  %v174_v1 = vld [vmem:[%s159_s28 + $0x8] sm:$0xff] (%p30_p3) }
  0x12   : > { %v176_v2 = vld [vmem:[%s159_s28 + $0x60] sm:$0xff] (%p30_p3)  ;;  %173 = vst [vmem:[%s156_s29] sm:$0xff] (%p30_p3), %v172_v0  ;;  %175 = vst [vmem:[%s156_s29 + $0x8] sm:$0xff] (%p30_p3), %v174_v1  ;;  %v178_v3 = vld [vmem:[%s159_s28 + $0x68] sm:$0xff] (%p30_p3) }
  0x13   : > { %177 = vst [vmem:[%s156_s29 + $0x10] sm:$0xff] (%p30_p3), %v176_v2  ;;  %v180_v4 = vld [vmem:[%s159_s28 + $0xc0] sm:$0xff] (%p30_p3)  ;;  %v182_v5 = vld [vmem:[%s159_s28 + $0xc8] sm:$0xff] (%p30_p3)  ;;  %179 = vst [vmem:[%s156_s29 + $0x18] sm:$0xff] (%p30_p3), %v178_v3 }
  0x14   : > { %181 = vst [vmem:[%s156_s29 + $0x20] sm:$0xff] (%p30_p3), %v180_v4  ;;  %183 = vst [vmem:[%s156_s29 + $0x28] sm:$0xff] (%p30_p3), %v182_v5  ;;  %v184_v6 = vld [vmem:[%s159_s28 + $0x120] sm:$0xff] (%p30_p3)  ;;  %v186_v7 = vld [vmem:[%s159_s28 + $0x128] sm:$0xff] (%p30_p3) }
  0x15   : > { %185 = vst [vmem:[%s156_s29 + $0x30] sm:$0xff] %v184_v6  ;;  %187 = vst [vmem:[%s156_s29 + $0x38] sm:$0xff] %v186_v7 }
  0x16 PF: > { %p1494_p5 = scmp.ge.s32.totalorder %s1866_s17, 1  ;;  %p202_p6 = scmp.lt.s32.totalorder %s1866_s17, 7 }
  0x18   : > { %p203_p7 = pnand %p1494_p5, %p202_p6 }
  0x19   : > { %s209_s30 = sand.u32 (!%p203_p7), 1, %s1858_s15   ;;  %s1496_s5 = sshll.u32 (!%p203_p7), %s1911_s18, 6 }
  0x1a   : > { %206 = sbr.rel (%p203_p7) target bundleno = 474 (0x1da), region = 55  ;;  %s1495_s6 = sshll.u32 (!%p203_p7), %s209_s30, 6 }
  0x1b   : > { %p237_p8 = scmp.lt.s32.totalorder (!%p203_p7), %s1496_s5, 383  ;;  %s1940_s11 = scalar_lea.vmem (!%p203_p7), [#allocation3], %s1495_s6 }
  0x1c   : > { %p1498_p9 = scmp.ne.s32.totalorder (!%p203_p7), %s1911_s18, 0 }
  0x21   : > { %s2197_s5 = smov (!%p237_p8, %s1496_s5), 383  ;;  %247 = sbr.rel (%p1498_p9) target bundleno = 41 (0x29), region = 63 }
  0x22   : > { %s1671_s7 = smul.u32 12, %s2197_s5  ;;  %vm250_vm0 = vcmask (!%p1498_p9), 523264   ;;  %v1868_v8 = vmov (!%p1498_p9), 0.0  }
  0x23   : > { %248 = vst [vmem:[#allocation2] sm:$0xff] (!%p1498_p9), %v1868_v8  ;;  %249 = vst [vmem:[#allocation2 + $0x8] sm:$0xff] (!%p1498_p9), %v1868_v8 }
  0x24   : > { %s1938_s10 = scalar_lea.vmem %s2189_s1, %s1671_s7  ;;  %252 = vst [vmem:[#allocation2 + $0x18] sm:$0xff] (!%p1498_p9), %v1868_v8  ;;  %253 = vst [vmem:[#allocation2 + $0x20] sm:$0xff] (!%p1498_p9), %v1868_v8 }
  0x25   : > { %255 = vst [vmem:[#allocation2 + $0x30] sm:$0xff] (!%p1498_p9), %v1868_v8  ;;  %256 = vst [vmem:[#allocation2 + $0x38] sm:$0xff] (!%p1498_p9), %v1868_v8 }
  0x26   : > { %258 = vst [vmem:[#allocation2 + $0x48] sm:$0xff] (!%p1498_p9), %v1868_v8  ;;  %259 = vst [vmem:[#allocation2 + $0x50] sm:$0xff] (!%p1498_p9), %v1868_v8 }
  0x27   : > { %251 = vst.msk [vmem:[#allocation2 + $0x10] sm:$0xff] (!%p1498_p9), %vm250_vm0, %v1868_v8  ;;  %254 = vst.msk [vmem:[#allocation2 + $0x28] sm:$0xff] (!%p1498_p9), %vm250_vm0, %v1868_v8 }
  0x28   : > { %257 = vst.msk [vmem:[#allocation2 + $0x40] sm:$0xff] %vm250_vm0, %v1868_v8  ;;  %260 = vst.msk [vmem:[#allocation2 + $0x58] sm:$0xff] %vm250_vm0, %v1868_v8 }
  0x29 PF: > { %v1698_v9 = vld [vmem:[%s1938_s10 + $0x4] ss:$12 sps:$4 sm:$0xff]   ;;  %v1700_v10 = vld [vmem:[%s1938_s10] ss:$12 sps:$4 sm:$0xff]   ;;  %v1701_v11 = vld [vmem:[%s1938_s10 + $0x1c] ss:$12 sps:$4 sm:$0xff]  }
  0x2a   : > { %961 = vmatprep.subr.bf16.mxu0 %v1698_v9  ;;  %v1703_v12 = vld [vmem:[%s1938_s10 + $0x18] ss:$12 sps:$4 sm:$0xff]   ;;  %v1704_v13 = vld [vmem:[%s1938_s10 + $0x34] ss:$12 sps:$4 sm:$0xff]   ;;  %v1706_v14 = vld [vmem:[%s1938_s10 + $0x30] ss:$12 sps:$4 sm:$0xff]  }
  0x2b   : > { %962 = vmatpush1.bf16.msra.mxu0 %v1700_v10  ;;  %v1707_v15 = vld [vmem:[%s1938_s10 + $0x4c] ss:$12 sps:$4 sm:$0xff]   ;;  %v1709_v16 = vld [vmem:[%s1938_s10 + $0x48] ss:$12 sps:$4 sm:$0xff]   ;;  %v1710_v19 = vld [vmem:[%s1938_s10 + $0x64] ss:$12 sps:$4 sm:$0xff]  }
  0x2c   : > { %963 = vmatprep.subr.bf16.mxu0 %v1701_v11  ;;  %v1719_v17 = vld [vmem:[%s1938_s10 + $0xc8] ss:$12 sps:$4 sm:$0xff]   ;;  %v1724_v20 = vld [vmem:[%s1938_s10 + $0xe0] ss:$12 sps:$4 sm:$0xff]   ;;  %v1729_v24 = vld [vmem:[%s1938_s10 + $0xf8] ss:$12 sps:$4 sm:$0xff]  }
  0x2d   : > { %v1720_v18 = vld [vmem:[%s1938_s10 + $0x8] ss:$12 sps:$4 sm:$0xff]   ;;  %1607 = vmatprep.subr.bf16.mxu1 %v1719_v17  ;;  %v1725_v21 = vld [vmem:[%s1938_s10 + $0x20] ss:$12 sps:$4 sm:$0xff]   ;;  %v1730_v25 = vld [vmem:[%s1938_s10 + $0x38] ss:$12 sps:$4 sm:$0xff]  }
  0x2e   : > { %1608 = vmatpush3.bf16.msra.mxu1 %v1720_v18  ;;  %v1712_v22 = vld [vmem:[%s1938_s10 + $0x60] ss:$12 sps:$4 sm:$0xff]   ;;  %v1713_v23 = vld [vmem:[%s1938_s10 + $0x7c] ss:$12 sps:$4 sm:$0xff]   ;;  %v1715_v26 = vld [vmem:[%s1938_s10 + $0x78] ss:$12 sps:$4 sm:$0xff]  }
  0x2f   : > { %964 = vmatpush1.bf16.msra.mxu0 %v1703_v12  ;;  %1609 = vmatprep.subr.bf16.mxu1 %v1724_v20  ;;  %v1716_v27 = vld [vmem:[%s1938_s10 + $0x94] ss:$12 sps:$4 sm:$0xff]   ;;  %v1734_v28 = vld [vmem:[%s1938_s10 + $0x110] ss:$12 sps:$4 sm:$0xff]   ;;  %v1721_v32 = vld [vmem:[%s1938_s10 + $0xac] ss:$12 sps:$4 sm:$0xff]  }
  0x30   : > { %965 = vmatprep.subr.bf16.mxu0 %v1704_v13  ;;  %v1735_v29 = vld [vmem:[%s1938_s10 + $0x50] ss:$12 sps:$4 sm:$0xff]   ;;  %v1739_v31 = vld [vmem:[%s1938_s10 + $0x128] ss:$12 sps:$4 sm:$0xff]   ;;  %v1744_v34 = vld [vmem:[%s1938_s10 + $0x140] ss:$12 sps:$4 sm:$0xff]  }
  0x31   : > { %v1718_v30 = vld [vmem:[%s1938_s10 + $0x90] ss:$12 sps:$4 sm:$0xff]   ;;  %v1740_v33 = vld [vmem:[%s1938_s10 + $0x68] ss:$12 sps:$4 sm:$0xff]   ;;  %v1745_v37 = vld [vmem:[%s1938_s10 + $0x80] ss:$12 sps:$4 sm:$0xff]  }
  0x32   : > { %1610 = vmatpush3.bf16.msra.mxu1 %v1725_v21  ;;  %v1723_v35 = vld [vmem:[%s1938_s10 + $0xa8] ss:$12 sps:$4 sm:$0xff]   ;;  %v1726_v36 = vld [vmem:[%s1938_s10 + $0xc4] ss:$12 sps:$4 sm:$0xff]   ;;  %v1728_v39 = vld [vmem:[%s1938_s10 + $0xc0] ss:$12 sps:$4 sm:$0xff]  }
  0x33   : > { %966 = vmatpush1.bf16.msra.mxu0 %v1706_v14  ;;  %1611 = vmatprep.subr.bf16.mxu1 %v1729_v24  ;;  %v1749_v38 = vld [vmem:[%s1938_s10 + $0x158] ss:$12 sps:$4 sm:$0xff]   ;;  %v1731_v40 = vld [vmem:[%s1938_s10 + $0xdc] ss:$12 sps:$4 sm:$0xff]   ;;  %v1736_v44 = vld [vmem:[%s1938_s10 + $0xf4] ss:$12 sps:$4 sm:$0xff]  }
  0x34   : > { %967 = vmatprep.subr.bf16.mxu0 %v1707_v15  ;;  %v1750_v41 = vld [vmem:[%s1938_s10 + $0x98] ss:$12 sps:$4 sm:$0xff]   ;;  %v1754_v42 = vld [vmem:[%s1938_s10 + $0x170] ss:$12 sps:$4 sm:$0xff]   ;;  %v1762_v47 = vld [vmem:[%s1938_s10 + $0x248] ss:$12 sps:$4 sm:$0xff]  }
  0x35   : > { %v1733_v43 = vld [vmem:[%s1938_s10 + $0xd8] ss:$12 sps:$4 sm:$0xff]   ;;  %v1755_v45 = vld [vmem:[%s1938_s10 + $0xb0] ss:$12 sps:$4 sm:$0xff]   ;;  %v1763_v51 = vld [vmem:[%s1938_s10 + $0x188] ss:$12 sps:$4 sm:$0xff]  }
  0x36   : > { %1612 = vmatpush3.bf16.msra.mxu1 %v1730_v25  ;;  %v1761_v46 = vld [vmem:[%s1940_s11 + $0x4] ss:$16 sps:$4 sm:$0xff]   ;;  %v1738_v48 = vld [vmem:[%s1938_s10 + $0xf0] ss:$12 sps:$4 sm:$0xff]   ;;  %v1741_v49 = vld [vmem:[%s1938_s10 + $0x10c] ss:$12 sps:$4 sm:$0xff]  }
  0x37   : > { %968 = vmatpush1.bf16.msra.mxu0 %v1709_v16  ;;  %1613 = vmatprep.subr.bf16.mxu1 %v1734_v28  ;;  %v1759_v50 = vld [vmem:[%s1940_s11] ss:$16 sps:$4 sm:$0xff]   ;;  %v1743_v53 = vld [vmem:[%s1938_s10 + $0x108] ss:$12 sps:$4 sm:$0xff]   ;;  %v1772_v56 = vld [vmem:[%s1938_s10 + $0x278] ss:$12 sps:$4 sm:$0xff]  }
  0x38   : > { %969 = vmatprep.subr.bf16.mxu0 %v1710_v19  ;;  %1099 = vmatprep.mubr.bf16.mxu1 %v1761_v46  ;;  %v1767_v52 = vld [vmem:[%s1938_s10 + $0x260] ss:$12 sps:$4 sm:$0xff]   ;;  %v1746_v54 = vld [vmem:[%s1938_s10 + $0x124] ss:$12 sps:$4 sm:$0xff]   ;;  %v1751_v58 = vld [vmem:[%s1938_s10 + $0x13c] ss:$12 sps:$4 sm:$0xff]  }
  0x39   : > { %993 = vmatprep.mubr.bf16.mxu0 %v1761_v46  ;;  %v1768_v55 = vld [vmem:[%s1938_s10 + $0x1a0] ss:$12 sps:$4 sm:$0xff]   ;;  %v1773_v59 = vld [vmem:[%s1938_s10 + $0x1b8] ss:$12 sps:$4 sm:$0xff]   ;;  %v1777_v60 = vld [vmem:[%s1938_s10 + $0x290] ss:$12 sps:$4 sm:$0xff]  }
  0x3a   : > { %1614 = vmatpush3.bf16.msra.mxu1 %v1735_v29  ;;  %v1748_v57 = vld [vmem:[%s1938_s10 + $0x120] ss:$12 sps:$4 sm:$0xff]   ;;  %v1753_v61 = vld [vmem:[%s1938_s10 + $0x138] ss:$12 sps:$4 sm:$0xff]   ;;  %v1758_v63 = vld [vmem:[%s1938_s10 + $0x150] ss:$12 sps:$4 sm:$0xff]  }
  0x3b   : > { %970 = vmatpush1.bf16.msra.mxu0 %v1712_v22  ;;  %1615 = vmatprep.subr.bf16.mxu1 %v1739_v31  ;;  %v1756_v62 = vld [vmem:[%s1938_s10 + $0x154] ss:$12 sps:$4 sm:$0xff]   ;;  %v1778_v0 = vld [vmem:[%s1938_s10 + $0x1d0] ss:$12 sps:$4 sm:$0xff]   ;;  %v1764_v2 = vld [vmem:[%s1938_s10 + $0x16c] ss:$12 sps:$4 sm:$0xff]  }
  0x3c   : > { %971 = vmatprep.subr.bf16.mxu0 %v1713_v23  ;;  %v1782_v1 = vld [vmem:[%s1938_s10 + $0x2a8] ss:$12 sps:$4 sm:$0xff]   ;;  %v1787_v4 = vld [vmem:[%s1938_s10 + $0x2c0] ss:$12 sps:$4 sm:$0xff]   ;;  %v1771_v8 = vld [vmem:[%s1938_s10 + $0x184] ss:$12 sps:$4 sm:$0xff]  }
  0x3d   : > { %v1783_v3 = vld [vmem:[%s1938_s10 + $0x1e8] ss:$12 sps:$4 sm:$0xff]   ;;  %v1794_v6 = vld [vmem:[%s1940_s11 + $0x20] ss:$16 sps:$4 sm:$0xff]   ;;  %v1795_v10 = vld [vmem:[%s1938_s10 + $0x2d8] ss:$12 sps:$4 sm:$0xff]  }
  0x3e   : > { %1616 = vmatpush3.bf16.msra.mxu1 %v1740_v33  ;;  %v1792_v5 = vld [vmem:[%s1940_s11 + $0x24] ss:$16 sps:$4 sm:$0xff]   ;;  %v1788_v9 = vld [vmem:[%s1938_s10 + $0x200] ss:$12 sps:$4 sm:$0xff]   ;;  %v1776_v12 = vld [vmem:[%s1938_s10 + $0x19c] ss:$12 sps:$4 sm:$0xff]  }
  0x3f   : > { %972 = vmatpush1.bf16.msra.mxu0 %v1715_v26  ;;  %1617 = vmatprep.subr.bf16.mxu1 %v1744_v34  ;;  %v1766_v7 = vld [vmem:[%s1938_s10 + $0x168] ss:$12 sps:$4 sm:$0xff]   ;;  %v1769_v11 = vld [vmem:[%s1938_s10 + $0x180] ss:$12 sps:$4 sm:$0xff]   ;;  %v1796_v13 = vld [vmem:[%s1938_s10 + $0x218] ss:$12 sps:$4 sm:$0xff]  }
  0x40   : > { %973 = vmatprep.subr.bf16.mxu0 %v1716_v27  ;;  %v1800_v14 = vld [vmem:[%s1938_s10 + $0x2f0] ss:$12 sps:$4 sm:$0xff]   ;;  %v1774_v16 = vld [vmem:[%s1938_s10 + $0x198] ss:$12 sps:$4 sm:$0xff]   ;;  %v1781_v17 = vld [vmem:[%s1938_s10 + $0x1b4] ss:$12 sps:$4 sm:$0xff]  }
  0x41   : > { %v1807_v15 = vld [vmem:[%s1940_s11 + $0xc] ss:$16 sps:$4 sm:$0xff]   ;;  %v1805_v21 = vld [vmem:[%s1940_s11 + $0x8] ss:$16 sps:$4 sm:$0xff]   ;;  %v1791_v24 = vld [vmem:[%s1938_s10 + $0x1e4] ss:$12 sps:$4 sm:$0xff]  }
  0x42   : > { %1618 = vmatpush3.bf16.msra.mxu1 %v1745_v37  ;;  %v1801_v18 = vld [vmem:[%s1938_s10 + $0x230] ss:$12 sps:$4 sm:$0xff]   ;;  %v1786_v20 = vld [vmem:[%s1938_s10 + $0x1cc] ss:$12 sps:$4 sm:$0xff]   ;;  %v1784_v22 = vld [vmem:[%s1938_s10 + $0x1c8] ss:$12 sps:$4 sm:$0xff]  }
  0x43   : > { %974 = vmatpush1.bf16.msra.mxu0 %v1718_v30  ;;  %1619 = vmatprep.subr.bf16.mxu1 %v1749_v38  ;;  %v1779_v19 = vld [vmem:[%s1938_s10 + $0x1b0] ss:$12 sps:$4 sm:$0xff]   ;;  %v1789_v25 = vld [vmem:[%s1938_s10 + $0x1e0] ss:$12 sps:$4 sm:$0xff]   ;;  %v1828_v27 = vld [vmem:[%s1940_s11 + $0x28] ss:$16 sps:$4 sm:$0xff]  }
  0x44   : > { %975 = vmatprep.subr.bf16.mxu0 %v1721_v32  ;;  %v1826_v23 = vld [vmem:[%s1940_s11 + $0x2c] ss:$16 sps:$4 sm:$0xff]   ;;  %v1797_v28 = vld [vmem:[%s1938_s10 + $0x1f8] ss:$12 sps:$4 sm:$0xff]   ;;  %v1804_v29 = vld [vmem:[%s1938_s10 + $0x214] ss:$12 sps:$4 sm:$0xff]  }
  0x45   : > { %v1799_v26 = vld [vmem:[%s1938_s10 + $0x1fc] ss:$12 sps:$4 sm:$0xff]   ;;  %v1810_v31 = vld [vmem:[%s1938_s10 + $0x22c] ss:$12 sps:$4 sm:$0xff]   ;;  %v1813_v33 = vld [vmem:[%s1938_s10 + $0x244] ss:$12 sps:$4 sm:$0xff]  }
  0x46   : > { %1620 = vmatpush3.bf16.msra.mxu1 %v1750_v41  ;;  %v1802_v30 = vld [vmem:[%s1938_s10 + $0x210] ss:$12 sps:$4 sm:$0xff]   ;;  %v1808_v32 = vld [vmem:[%s1938_s10 + $0x228] ss:$12 sps:$4 sm:$0xff]   ;;  %v1811_v34 = vld [vmem:[%s1938_s10 + $0x240] ss:$12 sps:$4 sm:$0xff]  }
  0x47   : > { %976 = vmatpush1.bf16.msra.mxu0 %v1723_v35  ;;  %1621 = vmatprep.subr.bf16.mxu1 %v1754_v42  ;;  %v1816_v35 = vld [vmem:[%s1938_s10 + $0x25c] ss:$12 sps:$4 sm:$0xff]   ;;  %v1819_v37 = vld [vmem:[%s1938_s10 + $0x274] ss:$12 sps:$4 sm:$0xff]   ;;  %v1825_v41 = vld [vmem:[%s1938_s10 + $0x2a4] ss:$12 sps:$4 sm:$0xff]  }
  0x48   : > { %977 = vmatprep.subr.bf16.mxu0 %v1726_v36  ;;  %v1814_v36 = vld [vmem:[%s1938_s10 + $0x258] ss:$12 sps:$4 sm:$0xff]   ;;  %v1817_v38 = vld [vmem:[%s1938_s10 + $0x270] ss:$12 sps:$4 sm:$0xff]   ;;  %v1823_v42 = vld [vmem:[%s1938_s10 + $0x2a0] ss:$12 sps:$4 sm:$0xff]  }
  0x49   : > { %v1832_v46 = vld [vmem:[%s1938_s10 + $0x2d0] ss:$12 sps:$4 sm:$0xff]   ;;  %vm1179_vm1 = vcmask 523264   ;;  %p1603_p10 = scmp.ne.s32.totalorder %s1911_s18, 5 }
  0x4a   : > { %1622 = vmatpush3.bf16.msra.mxu1 %v1755_v45  ;;  %v1834_v45 = vld [vmem:[%s1938_s10 + $0x2d4] ss:$12 sps:$4 sm:$0xff]  }
  0x4b   : > { %978 = vmatpush1.bf16.msra.mxu0 %v1728_v39  ;;  %1635 = vmatprep.subr.bf16.mxu1 %v1762_v47  ;;  %v1822_v39 = vld [vmem:[%s1938_s10 + $0x28c] ss:$12 sps:$4 sm:$0xff]  }
  0x4c   : > { %979 = vmatprep.subr.bf16.mxu0 %v1731_v40  ;;  %v1820_v40 = vld [vmem:[%s1938_s10 + $0x288] ss:$12 sps:$4 sm:$0xff]   ;;  %v1837_v47 = vld [vmem:[%s1938_s10 + $0x2ec] ss:$12 sps:$4 sm:$0xff]  }
  0x4d   : > { %1100 = vmatmul.mubr.bf16.vlgmr.msra.gmra.mrb[0].mxu1 %v1759_v50 }
  0x4e   : > { %1636 = vmatpush3.bf16.msra.mxu1 %v1763_v51  ;;  %1107 = vmatprep.mubr.bf16.mxu1 %v1792_v5 }
  0x4f   : > { %980 = vmatpush1.bf16.msra.mxu0 %v1733_v43  ;;  %1637 = vmatprep.subr.bf16.mxu1 %v1767_v52  ;;  %v1831_v43 = vld [vmem:[%s1938_s10 + $0x2bc] ss:$12 sps:$4 sm:$0xff]  }
  0x50   : > { %981 = vmatprep.subr.bf16.mxu0 %v1736_v44  ;;  %v1829_v44 = vld [vmem:[%s1938_s10 + $0x2b8] ss:$12 sps:$4 sm:$0xff]  }
  0x52   : > { %1638 = vmatpush3.bf16.msra.mxu1 %v1768_v55 }
  0x53   : > { %982 = vmatpush1.bf16.msra.mxu0 %v1738_v48  ;;  %1639 = vmatprep.subr.bf16.mxu1 %v1772_v56  ;;  %v1835_v48 = vld [vmem:[%s1938_s10 + $0x2e8] ss:$12 sps:$4 sm:$0xff]  }
  0x54   : > { %983 = vmatprep.subr.bf16.mxu0 %v1741_v49 }
  0x55   : > { %1108 = vmatmul.mubr.bf16.gmra.mrb[4].mxu1 %v1794_v6 }
  0x56   : > { %1640 = vmatpush3.bf16.msra.mxu1 %v1773_v59  ;;  %1148 = vmatprep.mubr.bf16.mxu1 %v1807_v15 }
  0x57   : > { %984 = vmatpush1.bf16.msra.mxu0 %v1743_v53  ;;  %1641 = vmatprep.subr.bf16.mxu1 %v1777_v60 }
  0x58   : > { %985 = vmatprep.subr.bf16.mxu0 %v1746_v54 }
  0x5a   : > { %1642 = vmatpush3.bf16.msra.mxu1 %v1778_v0 }
  0x5b   : > { %986 = vmatpush1.bf16.msra.mxu0 %v1748_v57  ;;  %1643 = vmatprep.subr.bf16.mxu1 %v1782_v1  ;;  %v263_v1 = vld [vmem:[#allocation2 + $0x10] sm:$0xff] }
  0x5c   : > { %987 = vmatprep.subr.bf16.mxu0 %v1751_v58 }
  0x5e   : > { %1644 = vmatpush3.bf16.msra.mxu1 %v1783_v3 }
  0x5f   : > { %988 = vmatpush1.bf16.msra.mxu0 %v1753_v61  ;;  %1645 = vmatprep.subr.bf16.mxu1 %v1787_v4 }
  0x60   : > { %989 = vmatprep.subr.bf16.mxu0 %v1756_v62 }
  0x62   : > { %1646 = vmatpush3.bf16.msra.mxu1 %v1788_v9 }
  0x63   : > { %990 = vmatpush1.bf16.msra.mxu0 %v1758_v63  ;;  %1647 = vmatprep.subr.bf16.mxu1 %v1795_v10 }
  0x64   : > { %991 = vmatprep.subr.bf16.mxu0 %v1764_v2 }
  0x66   : > { %1648 = vmatpush3.bf16.msra.mxu1 %v1796_v13  ;;  %v269_v13 = vld [vmem:[#allocation2 + $0x40] sm:$0xff] }
  0x67   : > { %992 = vmatpush1.bf16.msra.mxu0 %v1766_v7  ;;  %1649 = vmatprep.subr.bf16.mxu1 %v1800_v14 }
  0x68   : > { %1014 = vmatprep.subr.bf16.mxu0 %v1771_v8 }
  0x6a   : > { %994 = vmatmul.mubr.bf16.vlgmr.msra.gmra.mrb[0].mxu0 %v1759_v50  ;;  %1650 = vmatpush3.bf16.msra.mxu1 %v1801_v18 }
  0x6b   : > { %1015 = vmatpush1.bf16.msra.mxu0 %v1769_v11  ;;  %1003 = vmatprep.mubr.bf16.mxu0 %v1792_v5  ;;  %v266_v5 = vld [vmem:[#allocation2 + $0x28] sm:$0xff] }
  0x6c   : > { %1016 = vmatprep.subr.bf16.mxu0 %v1776_v12 }
  0x6d   : > { %1149 = vmatmul.mubr.bf16.vlgmr.msra.gmra.mrb[8].mxu1 %v1805_v21 }
  0x6e   : > { %1156 = vmatprep.mubr.bf16.mxu1 %v1826_v23 }
  0x6f   : > { %1017 = vmatpush1.bf16.msra.mxu0 %v1774_v16 }
  0x70   : > { %1018 = vmatprep.subr.bf16.mxu0 %v1781_v17  ;;  %v272_v17 = vld [vmem:[#allocation2 + $0x58] sm:$0xff] }
  0x72   : > { %1004 = vmatmul.mubr.bf16.gmra.mrb[4].mxu0 %v1794_v6 }
  0x73   : > { %1019 = vmatpush1.bf16.msra.mxu0 %v1779_v19  ;;  %1046 = vmatprep.mubr.bf16.mxu0 %v1807_v15 }
  0x74   : > { %1020 = vmatprep.subr.bf16.mxu0 %v1786_v20 }
  0x75   : > { %1157 = vmatmul.mubr.bf16.gmra.mrb[12].mxu1 %v1828_v27 }
  0x77   : > { %1021 = vmatpush1.bf16.msra.mxu0 %v1784_v22  ;;  %v262_v22 = vld [vmem:[#allocation2 + $0x8] sm:$0xff] }
  0x78   : > { %1022 = vmatprep.subr.bf16.mxu0 %v1791_v24  ;;  %v264_v24 = vld [vmem:[#allocation2 + $0x18] sm:$0xff] }
  0x7b   : > { %1023 = vmatpush1.bf16.msra.mxu0 %v1789_v25 }
  0x7c   : > { %1024 = vmatprep.subr.bf16.mxu0 %v1799_v26 }
  0x7f   : > { %1025 = vmatpush1.bf16.msra.mxu0 %v1797_v28 }
  0x80   : > { %1026 = vmatprep.subr.bf16.mxu0 %v1804_v29 }
  0x83   : > { %1027 = vmatpush1.bf16.msra.mxu0 %v1802_v30 }
  0x84   : > { %1028 = vmatprep.subr.bf16.mxu0 %v1810_v31 }
  0x87   : > { %1029 = vmatpush1.bf16.msra.mxu0 %v1808_v32 }
  0x88   : > { %1030 = vmatprep.subr.bf16.mxu0 %v1813_v33  ;;  %v267_v33 = vld [vmem:[#allocation2 + $0x30] sm:$0xff] }
  0x8b   : > { %1031 = vmatpush1.bf16.msra.mxu0 %v1811_v34  ;;  %v268_v34 = vld [vmem:[#allocation2 + $0x38] sm:$0xff] }
  0x8c   : > { %1032 = vmatprep.subr.bf16.mxu0 %v1816_v35 }
  0x8f   : > { %1033 = vmatpush1.bf16.msra.mxu0 %v1814_v36  ;;  %v270_v36 = vld [vmem:[#allocation2 + $0x48] sm:$0xff] }
  0x90   : > { %1034 = vmatprep.subr.bf16.mxu0 %v1819_v37 }
  0x93   : > { %1035 = vmatpush1.bf16.msra.mxu0 %v1817_v38 }
  0x94   : > { %1036 = vmatprep.subr.bf16.mxu0 %v1822_v39  ;;  %v271_v39 = vld [vmem:[#allocation2 + $0x50] sm:$0xff] }
  0x97   : > { %1037 = vmatpush1.bf16.msra.mxu0 %v1820_v40 }
  0x98   : > { %1038 = vmatprep.subr.bf16.mxu0 %v1825_v41 }
  0x9b   : > { %1039 = vmatpush1.bf16.msra.mxu0 %v1823_v42 }
  0x9c   : > { %1040 = vmatprep.subr.bf16.mxu0 %v1831_v43 }
  0x9f   : > { %1041 = vmatpush1.bf16.msra.mxu0 %v1829_v44 }
  0xa0   : > { %1042 = vmatprep.subr.bf16.mxu0 %v1834_v45 }
  0xa3   : > { %1043 = vmatpush1.bf16.msra.mxu0 %v1832_v46 }
  0xa4   : > { %1044 = vmatprep.subr.bf16.mxu0 %v1837_v47 }
  0xa7   : > { %1045 = vmatpush1.bf16.msra.mxu0 %v1835_v48 }
  0xaa   : > { %1047 = vmatmul.mubr.bf16.vlgmr.msra.gmra.mrb[0].mxu0 %v1805_v21  ;;  %v261_v21 = vld [vmem:[#allocation2] sm:$0xff] }
  0xab   : > { %1056 = vmatprep.mubr.bf16.mxu0 %v1826_v23 }
  0xb2   : > { %1057 = vmatmul.mubr.bf16.gmra.mrb[4].mxu0 %v1828_v27  ;;  %v265_v27 = vld [vmem:[#allocation2 + $0x20] sm:$0xff] }
 0x120   : > { %v1623_v49 = vpop.f32.mrb[0].mxu1 }
 0x121   : > { %v1624_v50 = vpop.f32.mrb[1].mxu1 }
 0x122   : > { %v1625_v51 = vadd.f32 %v1624_v50, %v1623_v49  ;;  %v1626_v52 = vpop.f32.mrb[2].mxu1 }
 0x123   : > { %v1627_v53 = vpop.f32.mrb[3].mxu1 }
 0x124   : > { %v1628_v54 = vadd.f32 %v1627_v53, %v1626_v52 }
 0x128   : > { %v1629_v55 = vpop.f32.mrb[4].mxu1 }
 0x129   : > { %v1630_v56 = vpop.f32.mrb[5].mxu1 }
 0x12a   : > { %v1631_v57 = vadd.f32 %v1630_v56, %v1629_v55  ;;  %v1632_v58 = vpop.f32.mrb[6].mxu1 }
 0x12b   : > { %v1633_v59 = vpop.f32.mrb[7].mxu1 }
 0x12c   : > { %v1634_v60 = vadd.f32 %v1633_v59, %v1632_v58 }
 0x140   : > { %v1651_v61 = vpop.f32.mrb[8].mxu1 }
 0x141   : > { %v1652_v62 = vpop.f32.mrb[9].mxu1 }
 0x142   : > { %v1653_v63 = vadd.f32 %v1652_v62, %v1651_v61  ;;  %v1654_v0 = vpop.f32.mrb[10].mxu1 }
 0x143   : > { %v1655_v2 = vpop.f32.mrb[11].mxu1 }
 0x144   : > { %v1151_v3 = vadd.f32 %v1653_v63, %v1625_v51  ;;  %v1656_v4 = vadd.f32 %v1655_v2, %v1654_v0 }
 0x146   : > { %v1167_v6 = vadd.f32 %v1151_v3, %v263_v1  ;;  %v1154_v7 = vadd.f32 %v1656_v4, %v1628_v54 }
 0x148   : > { %1180 = vst.msk [vmem:[#allocation2 + $0x10] sm:$0xff] %vm1179_vm1, %v1167_v6  ;;  %v1170_v8 = vadd.f32 %v1154_v7, %v266_v5  ;;  %v1657_v9 = vpop.f32.mrb[12].mxu1 }
 0x149   : > { %v1658_v10 = vpop.f32.mrb[13].mxu1 }
 0x14a   : > { %1183 = vst.msk [vmem:[#allocation2 + $0x28] sm:$0xff] %vm1179_vm1, %v1170_v8  ;;  %v1659_v11 = vadd.f32 %v1658_v10, %v1657_v9  ;;  %v1660_v12 = vpop.f32.mrb[14].mxu1 }
 0x14b   : > { %v1661_v14 = vpop.f32.mrb[15].mxu1 }
 0x14c   : > { %v1159_v15 = vadd.f32 %v1659_v11, %v1631_v57  ;;  %v1662_v16 = vadd.f32 %v1661_v14, %v1660_v12 }
 0x14e   : > { %v1173_v18 = vadd.f32 %v1159_v15, %v269_v13  ;;  %v1162_v19 = vadd.f32 %v1662_v16, %v1634_v60 }
 0x14f   : > { %v2056_v47 = vld [vmem:[#allocation2 + $0x10] sm:$0xff] (!%p1603_p10) }
 0x150   : > { %1186 = vst.msk [vmem:[#allocation2 + $0x40] sm:$0xff] %vm1179_vm1, %v1173_v18  ;;  %v1176_v20 = vadd.f32 %v1162_v19, %v272_v17  ;;  %v1224_v51 = vsel (!%p1603_p10), %vm1179_vm1, %v2056_v47, 0.0  ;;  %v1239_v54 = vmul.f32 (!%p1603_p10), %v2056_v47, %v2056_v47 }
 0x151   : > { %v2062_v50 = vld [vmem:[#allocation2 + $0x28] sm:$0xff] (!%p1603_p10) }
 0x152   : > { %1189 = vst.msk [vmem:[#allocation2 + $0x58] sm:$0xff] %vm1179_vm1, %v1176_v20  ;;  %v1225_v60 = vsel (!%p1603_p10), %vm1179_vm1, %v2062_v50, 0.0  ;;  %v1242_v4 = vmul.f32 (!%p1603_p10), %v2062_v50, %v2062_v50  ;;  %v1267_v20 = vsel (!%p1603_p10), %vm1179_vm1, %v1239_v54, 0.0 }
 0x153   : > { %v1226_v1 = vadd.f32 (!%p1603_p10), %v1225_v60, %v1224_v51 }
 0x157   : > { %v2076_v57 = vld [vmem:[#allocation2 + $0x40] sm:$0xff] (!%p1603_p10) }
 0x158   : > { %v1227_v2 = vsel (!%p1603_p10), %vm1179_vm1, %v2076_v57, 0.0  ;;  %v1245_v11 = vmul.f32 (!%p1603_p10), %v2076_v57, %v2076_v57 }
 0x159   : > { %v2090_v0 = vld [vmem:[#allocation2 + $0x58] sm:$0xff] (!%p1603_p10)  ;;  %v1228_v9 = vadd.f32 (!%p1603_p10), %v1227_v2, %v1226_v1 }
 0x15a   : > { %v1229_v7 = vsel (!%p1603_p10), %vm1179_vm1, %v2090_v0, 0.0  ;;  %v1248_v16 = vmul.f32 (!%p1603_p10), %v2090_v0, %v2090_v0 }
 0x15b   : > { %v1230_v17 = vadd.f32 (!%p1603_p10), %v1229_v7, %v1228_v9 }
 0x17d   : > { %v1048_v23 = vpop.f32.mrb[0].mxu0 }
 0x17e   : > { %v1165_v25 = vadd.f32 %v1048_v23, %v261_v21  ;;  %v1050_v26 = vpop.f32.mrb[1].mxu0  ;;  %v1268_v23 = vsel (!%p1603_p10), %vm1179_vm1, %v1242_v4, 0.0 }
 0x17f   : > { %v1166_v28 = vadd.f32 %v1050_v26, %v262_v22  ;;  %v1052_v29 = vpop.f32.mrb[2].mxu0 }
 0x180   : > { %1177 = vst [vmem:[#allocation2] sm:$0xff] %v1165_v25  ;;  %v1168_v30 = vadd.f32 %v1052_v29, %v264_v24  ;;  %v1054_v31 = vpop.f32.mrb[3].mxu0  ;;  %v1270_v24 = vsel (!%p1603_p10), %vm1179_vm1, %v1245_v11, 0.0  ;;  %v1231_v25 = vrot.slane (!%p1603_p10), %v1230_v17, 4 }
 0x181   : > { %1178 = vst [vmem:[#allocation2 + $0x8] sm:$0xff] %v1166_v28  ;;  %v1169_v32 = vadd.f32 %v1054_v31, %v265_v27  ;;  %v1269_v28 = vadd.f32 (!%p1603_p10), %v1268_v23, %v1267_v20  ;;  %v1272_v31 = vsel (!%p1603_p10), %vm1179_vm1, %v1248_v16, 0.0 }
 0x182   : > { %1181 = vst [vmem:[#allocation2 + $0x18] sm:$0xff] %v1168_v30 }
 0x183   : > { %1182 = vst [vmem:[#allocation2 + $0x20] sm:$0xff] %v1169_v32  ;;  %v1232_v32 = vadd.f32 (!%p1603_p10), %v1231_v25, %v1230_v17 }
 0x185   : > { %v1058_v35 = vpop.f32.mrb[4].mxu0  ;;  %1193 = sbr.rel (%p1603_p10) target bundleno = 474 (0x1da), region = 67 }
 0x186   : > { %v1171_v37 = vadd.f32 %v1058_v35, %v267_v33  ;;  %v1060_v38 = vpop.f32.mrb[5].mxu0  ;;  %v1271_v35 = vadd.f32 (!%p1603_p10), %v1270_v24, %v1269_v28 }
 0x187   : > { %v1172_v40 = vadd.f32 %v1060_v38, %v268_v34  ;;  %v1062_v41 = vpop.f32.mrb[6].mxu0  ;;  %v2052_v45 = vld [vmem:[#allocation2] sm:$0xff] (!%p1603_p10)  ;;  %v1233_v38 = vrot.slane (!%p1603_p10), %v1232_v32, 2 }
 0x188   : > { %1184 = vst [vmem:[#allocation2 + $0x30] sm:$0xff] %v1171_v37  ;;  %v1174_v42 = vadd.f32 %v1062_v41, %v270_v36  ;;  %v1064_v43 = vpop.f32.mrb[7].mxu0  ;;  %v2054_v46 = vld [vmem:[#allocation2 + $0x8] sm:$0xff] (!%p1603_p10)  ;;  %v1237_v52 = vmul.f32 (!%p1603_p10), %v2052_v45, %v2052_v45  ;;  %v1273_v41 = vadd.f32 (!%p1603_p10), %v1272_v31, %v1271_v35  ;;  %v1309_v35 = vlaneseq (!%p1603_p10) }
 0x189   : > { %1185 = vst [vmem:[#allocation2 + $0x38] sm:$0xff] %v1172_v40  ;;  %v1175_v44 = vadd.f32 %v1064_v43, %v271_v39  ;;  %v2058_v48 = vld [vmem:[#allocation2 + $0x18] sm:$0xff] (!%p1603_p10)  ;;  %v1238_v53 = vmul.f32 (!%p1603_p10), %v2054_v46, %v2054_v46 }
 0x18a   : > { %1187 = vst [vmem:[#allocation2 + $0x48] sm:$0xff] %v1174_v42  ;;  %v2060_v49 = vld [vmem:[#allocation2 + $0x20] sm:$0xff] (!%p1603_p10)  ;;  %v1206_v58 = vadd.f32 (!%p1603_p10), %v2058_v48, %v2052_v45  ;;  %v1240_v61 = vmul.f32 (!%p1603_p10), %v2058_v48, %v2058_v48 }
 0x18b   : > { %1188 = vst [vmem:[#allocation2 + $0x50] sm:$0xff] %v1175_v44  ;;  %v1215_v59 = vadd.f32 (!%p1603_p10), %v2060_v49, %v2054_v46  ;;  %v1241_v3 = vmul.f32 (!%p1603_p10), %v2060_v49, %v2060_v49  ;;  %v1234_v44 = vadd.f32 (!%p1603_p10), %v1233_v38, %v1232_v32 }
 0x18c   : > { %v1249_v18 = vadd.f32 %v1240_v61, %v1237_v52 }
 0x18d   : > { %v1258_v19 = vadd.f32 %v1241_v3, %v1238_v53  ;;  %v1274_v53 = vrot.slane %v1273_v41, 4 }
 0x18f   : > { %v2072_v55 = vld [vmem:[#allocation2 + $0x30] sm:$0xff]  ;;  %v1275_v1 = vadd.f32 %v1274_v53, %v1273_v41 }
 0x190   : > { %v2074_v56 = vld [vmem:[#allocation2 + $0x38] sm:$0xff]  ;;  %v1207_v5 = vadd.f32 %v1206_v58, %v2072_v55  ;;  %v1243_v8 = vmul.f32 %v2072_v55, %v2072_v55 }
 0x191   : > { %v2086_v62 = vld [vmem:[#allocation2 + $0x48] sm:$0xff]  ;;  %v1216_v6 = vadd.f32 %v1215_v59, %v2074_v56  ;;  %v1244_v10 = vmul.f32 %v2074_v56, %v2074_v56  ;;  %v1235_v59 = vrot.slane %v1234_v44, 1  ;;  %v1276_v7 = vrot.slane %v1275_v1, 2 }
 0x192   : > { %v2088_v63 = vld [vmem:[#allocation2 + $0x50] sm:$0xff]  ;;  %v1246_v12 = vmul.f32 %v2086_v62, %v2086_v62  ;;  %v1208_v13 = vadd.f32 %v1207_v5, %v2086_v62  ;;  %v1250_v26 = vadd.f32 %v1249_v18, %v1243_v8 }
 0x193   : > { %v1217_v14 = vadd.f32 %v1216_v6, %v2088_v63  ;;  %v1247_v15 = vmul.f32 %v2088_v63, %v2088_v63  ;;  %v1259_v27 = vadd.f32 %v1258_v19, %v1244_v10  ;;  %v1236_v4 = vadd.f32 %v1235_v59, %v1234_v44 }
 0x194   : > { %v1209_v21 = vrot.slane %v1208_v13, 4  ;;  %v1251_v33 = vadd.f32 %v1250_v26, %v1246_v12  ;;  %v1277_v12 = vadd.f32 %v1276_v7, %v1275_v1 }
 0x195   : > { %v1218_v22 = vrot.slane %v1217_v14, 4  ;;  %v1260_v34 = vadd.f32 %v1259_v27, %v1247_v15 }
 0x196   : > { %v1210_v29 = vadd.f32 %v1209_v21, %v1208_v13  ;;  %v1252_v39 = vrot.slane %v1251_v33, 4  ;;  %v1282_v13 = vmul.f32 0.03125, %v1236_v4  ;;  %v1278_v17 = vrot.slane %v1277_v12, 1 }
 0x197   : > { %v1219_v30 = vadd.f32 %v1218_v22, %v1217_v14  ;;  %v1261_v40 = vrot.slane %v1260_v34, 4 }
 0x198   : > { %v1211_v36 = vrot.slane %v1210_v29, 2  ;;  %v1253_v51 = vadd.f32 %v1252_v39, %v1251_v33  ;;  %v1279_v19 = vadd.f32 %v1278_v17, %v1277_v12  ;;  %v1288_v22 = vmul.f32 %v1282_v13, %v1282_v13  ;;  %v1330_v12 = vld [vmem:[%s2191_s3] sm:$0x7] }
 0x199   : > { %v1220_v37 = vrot.slane %v1219_v30, 2  ;;  %v1262_v52 = vadd.f32 %v1261_v40, %v1260_v34  ;;  %v1869_v33 = vmov 1966171168  }
 0x19a   : > { %v1212_v42 = vadd.f32 %v1211_v36, %v1210_v29  ;;  %v1254_v60 = vrot.slane %v1253_v51, 2  ;;  %v1285_v23 = vmul.f32 0.03125, %v1279_v19  ;;  %v1307_v34 = vunpack.c.l.s4 %v1869_v33 }
 0x19b   : > { %v1221_v43 = vadd.f32 %v1220_v37, %v1219_v30  ;;  %v1263_v61 = vrot.slane %v1262_v52, 2  ;;  %v1310_v37 = vshrl.u32 %v1309_v35, 7 }
 0x19c   : > { %v1213_v54 = vrot.slane %v1212_v42, 1  ;;  %v1255_v5 = vadd.f32 %v1254_v60, %v1253_v51  ;;  %v1291_v26 = vsub.f32 %v1285_v23, %v1288_v22  ;;  %v1308_v36 = vunpack.c.0.s8 %v1307_v34 }
 0x19d   : > { %v1222_v58 = vrot.slane %v1221_v43, 1  ;;  %v1264_v6 = vadd.f32 %v1263_v61, %v1262_v52  ;;  %v1295_v52 = vld [vmem:[%s2190_s2] sm:$0x7]  ;;  %v1342_v59 = vsub.s32 2, %v1310_v37 }
 0x19e   : > { %v1214_v2 = vadd.f32 %v1213_v54, %v1212_v42  ;;  %v1256_v10 = vrot.slane %v1255_v5, 1  ;;  %v1294_v29 = vmax.f32 %v1291_v26, 0.0  ;;  %v1311_v38 = vsub.s32 %v1308_v36, %v1310_v37 }
 0x19f   : > { %v1223_v3 = vadd.f32 %v1222_v58, %v1221_v43  ;;  %v1265_v11 = vrot.slane %v1264_v6, 1  ;;  %v1334_v54 = vsub.s32 0, %v1310_v37  ;;  %v1338_v58 = vsub.s32 1, %v1310_v37 }
 0x1a0   : > { %v1280_v8 = vmul.f32 0.03125, %v1214_v2  ;;  %v1257_v15 = vadd.f32 %v1256_v10, %v1255_v5  ;;  %v1298_v32 = vadd.f32 0.001, %v1294_v29 }
 0x1a1   : > { %v1281_v9 = vmul.f32 0.03125, %v1223_v3  ;;  %v1266_v16 = vadd.f32 %v1265_v11, %v1264_v6 }
 0x1a2   : > { %v1286_v14 = vmul.f32 %v1280_v8, %v1280_v8  ;;  %v1283_v20 = vmul.f32 0.03125, %v1257_v15 }
 0x1a3   : > { %v1287_v18 = vmul.f32 %v1281_v9, %v1281_v9  ;;  %v1284_v21 = vmul.f32 0.03125, %v1266_v16 }
 0x1a4   : > { %v1289_v24 = vsub.f32 %v1283_v20, %v1286_v14 }
 0x1a5   : > { %v1290_v25 = vsub.f32 %v1284_v21, %v1287_v18 }
 0x1a6   : > { %v1292_v27 = vmax.f32 %v1289_v24, 0.0 }
 0x1a7   : > { %v1293_v28 = vmax.f32 %v1290_v25, 0.0 }
 0x1a8   : > { %v1296_v30 = vadd.f32 0.001, %v1292_v27 }
 0x1a9   : > { %v1297_v31 = vadd.f32 0.001, %v1293_v28 }
 0x1aa   : > { %1838 = vrsqrt.f32 %v1296_v30 }
 0x1ab   : > { %1840 = vrsqrt.f32 %v1297_v31 }
 0x1ac   : > { %1842 = vrsqrt.f32 %v1298_v32 }
 0x1b4   : > { %v1839_v39 = vpop.eup %1838 }
 0x1b5   : > { %v1841_v40 = vpop.eup %1840 }
 0x1b6   : > { %v1843_v41 = vpop.eup %1842  ;;  %v1305_v42 = vcombine.low %v1839_v39, %v1841_v40 }
 0x1b7   : > { %v1319_v43 = vrot.slane %v1843_v41, %v1311_v38 }
 0x1b8   : > { %v1312_v44 = vrot.slane %v1305_v42, %v1311_v38 }
 0x1ba   : > { %v1320_v51 = vcombine.low %v1312_v44, %v1319_v43 }
 0x1bc   : > { %v1327_v53 = vrot.slane %v1320_v51, %v1311_v38 }
 0x1be   : > { %v1329_v60 = vmul.f32 %v1327_v53, %v1295_v52 }
 0x1c0   : > { %v1335_v61 = vrot.slane %v1329_v60, %v1334_v54  ;;  %v1339_v1 = vrot.slane %v1329_v60, %v1338_v58  ;;  %v1343_v2 = vrot.slane %v1329_v60, %v1342_v59 }
 0x1c2   : > { %v1347_v3 = vmul.f32 %v1335_v61, %v1280_v8  ;;  %v1348_v4 = vmul.f32 %v1339_v1, %v1281_v9  ;;  %v1349_v5 = vmul.f32 %v1343_v2, %v1282_v13  ;;  %v1378_v15 = vmul.f32 %v1335_v61, %v2052_v45 }
 0x1c3   : > { %v1379_v17 = vmul.f32 %v1339_v1, %v2054_v46  ;;  %v1380_v18 = vmul.f32 %v1343_v2, %v2056_v47  ;;  %v1381_v8 = vmul.f32 %v1335_v61, %v2058_v48  ;;  %v1382_v9 = vmul.f32 %v1339_v1, %v2060_v49 }
 0x1c4   : > { %v1353_v6 = vcombine.low %v1347_v3, %v1348_v4  ;;  %v1367_v7 = vrot.slane %v1349_v5, %v1311_v38  ;;  %v1383_v13 = vmul.f32 %v1343_v2, %v2062_v50  ;;  %v1384_v19 = vmul.f32 %v1335_v61, %v2072_v55 }
 0x1c5   : > { %v1385_v20 = vmul.f32 %v1339_v1, %v2074_v56  ;;  %v1386_v45 = vmul.f32 %v1343_v2, %v2076_v57  ;;  %v1387_v24 = vmul.f32 %v1335_v61, %v2086_v62  ;;  %v1388_v46 = vmul.f32 %v1339_v1, %v2088_v63 }
 0x1c6   : > { %v1360_v10 = vrot.slane %v1353_v6, %v1311_v38  ;;  %v1389_v47 = vmul.f32 %v1343_v2, %v2090_v0 }
 0x1c8   : > { %v1368_v11 = vcombine.low %v1360_v10, %v1367_v7 }
 0x1ca   : > { %v1375_v14 = vrot.slane %v1368_v11, %v1311_v38 }
 0x1cc   : > { %v1377_v16 = vsub.f32 %v1330_v12, %v1375_v14 }
 0x1ce   : > { %v1394_v21 = vrot.slane %v1377_v16, %v1334_v54  ;;  %v1398_v22 = vrot.slane %v1377_v16, %v1338_v58  ;;  %v1402_v23 = vrot.slane %v1377_v16, %v1342_v59 }
 0x1d0   : > { %v1406_v48 = vadd.f32 %v1394_v21, %v1378_v15  ;;  %v1407_v25 = vadd.f32 %v1398_v22, %v1379_v17  ;;  %v1408_v49 = vadd.f32 %v1402_v23, %v1380_v18  ;;  %v1409_v26 = vadd.f32 %v1394_v21, %v1381_v8 }
 0x1d1   : > { %v1410_v50 = vadd.f32 %v1398_v22, %v1382_v9  ;;  %v1411_v27 = vadd.f32 %v1402_v23, %v1383_v13  ;;  %v1412_v55 = vadd.f32 %v1394_v21, %v1384_v19  ;;  %v1413_v28 = vadd.f32 %v1398_v22, %v1385_v20 }
 0x1d2   : > { %v1418_v56 = vmax.f32 %v1406_v48, 0.0  ;;  %v1419_v29 = vmax.f32 %v1407_v25, 0.0  ;;  %v1420_v30 = vmax.f32 %v1408_v49, 0.0  ;;  %v1421_v31 = vmax.f32 %v1409_v26, 0.0 }
 0x1d3   : > { %v1422_v32 = vmax.f32 %v1410_v50, 0.0  ;;  %v1423_v57 = vmax.f32 %v1411_v27, 0.0  ;;  %v1424_v33 = vmax.f32 %v1412_v55, 0.0  ;;  %v1425_v62 = vmax.f32 %v1413_v28, 0.0 }
 0x1d4   : > { %1430 = vst [vmem:[%s2192_s4] sm:$0xff] %v1418_v56  ;;  %1431 = vst [vmem:[%s2192_s4 + $0x8] sm:$0xff] %v1419_v29  ;;  %v1414_v63 = vadd.f32 %v1402_v23, %v1386_v45  ;;  %v1415_v0 = vadd.f32 %v1394_v21, %v1387_v24  ;;  %v1416_v34 = vadd.f32 %v1398_v22, %v1388_v46 }
 0x1d5   : > { %1432 = vst.msk [vmem:[%s2192_s4 + $0x10] sm:$0xff] %vm1179_vm1, %v1420_v30  ;;  %1433 = vst [vmem:[%s2192_s4 + $0x18] sm:$0xff] %v1421_v31  ;;  %v1417_v35 = vadd.f32 %v1402_v23, %v1389_v47 }
 0x1d6   : > { %1434 = vst [vmem:[%s2192_s4 + $0x20] sm:$0xff] %v1422_v32  ;;  %1435 = vst.msk [vmem:[%s2192_s4 + $0x28] sm:$0xff] %vm1179_vm1, %v1423_v57  ;;  %v1426_v36 = vmax.f32 %v1414_v63, 0.0  ;;  %v1427_v37 = vmax.f32 %v1415_v0, 0.0  ;;  %v1428_v38 = vmax.f32 %v1416_v34, 0.0 }
 0x1d7   : > { %1436 = vst [vmem:[%s2192_s4 + $0x30] sm:$0xff] %v1424_v33  ;;  %1437 = vst [vmem:[%s2192_s4 + $0x38] sm:$0xff] %v1425_v62  ;;  %v1429_v39 = vmax.f32 %v1417_v35, 0.0 }
 0x1d8   : > { %1438 = vst.msk [vmem:[%s2192_s4 + $0x40] sm:$0xff] %vm1179_vm1, %v1426_v36  ;;  %1439 = vst [vmem:[%s2192_s4 + $0x48] sm:$0xff] %v1427_v37 }
 0x1d9   : > { %1440 = vst [vmem:[%s2192_s4 + $0x50] sm:$0xff] %v1428_v38  ;;  %1441 = vst.msk [vmem:[%s2192_s4 + $0x58] sm:$0xff] %vm1179_vm1, %v1429_v39 }
 0x1da PF: > { %p11_p11 = scmp.ge.s32.totalorder %s1914_s19, 8   ;;  %s2193_s15 = smov %s1862_s16 }
 0x1db   : > { %s2194_s16 = smov %s1923_s22  ;;  %s2195_s17 = smov %s1914_s19 }
 0x1dc   :  { %13 = sbr.rel (!%p11_p11) target bundleno = 2 (0x2), region = 101 }

// kernel: reduction_b_forward.11
= control target key start
LH: loop header
LB: loop body
LE: loop exit
PB: predicated region body
PF: predicated region fallthrough
CT: control target
= control target key end

     0   :  { %s1822_s0 = inlined_call_operand.vmem [shape: f32[9,32,1024], index: 0, kind: input, shape index: {}]   ;;  %s1823_s1 = inlined_call_operand.vmem [shape: f32[32,1024], index: 1, kind: output, shape index: {}]  }
   0x1   :  { %v8_v0 = vld [vmem:[%s1822_s0] sm:$0xff]  ;;  %v9_v6 = vld [vmem:[%s1822_s0 + $0x8] sm:$0xff]  ;;  %v10_v15 = vld [vmem:[%s1822_s0 + $0x10] sm:$0xff] }
   0x2   :  { %v596_v1 = vld [vmem:[%s1822_s0 + $0x100] sm:$0xff]  ;;  %v597_v7 = vld [vmem:[%s1822_s0 + $0x108] sm:$0xff]  ;;  %v598_v16 = vld [vmem:[%s1822_s0 + $0x110] sm:$0xff] }
   0x3   :  { %v628_v2 = vld [vmem:[%s1822_s0 + $0x200] sm:$0xff]  ;;  %v73_v3 = vmax.f32 %v8_v0, %v596_v1  ;;  %v629_v8 = vld [vmem:[%s1822_s0 + $0x208] sm:$0xff]  ;;  %v74_v10 = vmax.f32 %v9_v6, %v597_v7  ;;  %v630_v17 = vld [vmem:[%s1822_s0 + $0x210] sm:$0xff]  ;;  %v75_v20 = vmax.f32 %v10_v15, %v598_v16 }
   0x4   :  { %v660_v4 = vld [vmem:[%s1822_s0 + $0x300] sm:$0xff]  ;;  %v661_v13 = vld [vmem:[%s1822_s0 + $0x308] sm:$0xff]  ;;  %v662_v24 = vld [vmem:[%s1822_s0 + $0x310] sm:$0xff] }
   0x5   :  { %v138_v5 = vmax.f32 %v73_v3, %v628_v2  ;;  %v692_v9 = vld [vmem:[%s1822_s0 + $0x400] sm:$0xff]  ;;  %v139_v14 = vmax.f32 %v74_v10, %v629_v8  ;;  %v693_v19 = vld [vmem:[%s1822_s0 + $0x408] sm:$0xff]  ;;  %v140_v26 = vmax.f32 %v75_v20, %v630_v17  ;;  %v11_v27 = vld [vmem:[%s1822_s0 + $0x18] sm:$0xff] }
   0x6   :  { %v724_v12 = vld [vmem:[%s1822_s0 + $0x500] sm:$0xff]  ;;  %v725_v23 = vld [vmem:[%s1822_s0 + $0x508] sm:$0xff]  ;;  %v599_v28 = vld [vmem:[%s1822_s0 + $0x118] sm:$0xff] }
   0x7   :  { %v203_v11 = vmax.f32 %v138_v5, %v660_v4  ;;  %v756_v21 = vld [vmem:[%s1822_s0 + $0x600] sm:$0xff]  ;;  %v204_v22 = vmax.f32 %v139_v14, %v661_v13  ;;  %v631_v29 = vld [vmem:[%s1822_s0 + $0x218] sm:$0xff]  ;;  %v694_v33 = vld [vmem:[%s1822_s0 + $0x410] sm:$0xff]  ;;  %v76_v34 = vmax.f32 %v11_v27, %v599_v28  ;;  %v205_v37 = vmax.f32 %v140_v26, %v662_v24 }
   0x8   :  { %v788_v30 = vld [vmem:[%s1822_s0 + $0x700] sm:$0xff]  ;;  %v757_v36 = vld [vmem:[%s1822_s0 + $0x608] sm:$0xff]  ;;  %v726_v38 = vld [vmem:[%s1822_s0 + $0x510] sm:$0xff] }
   0x9   :  { %v268_v18 = vmax.f32 %v203_v11, %v692_v9  ;;  %v820_v31 = vld [vmem:[%s1822_s0 + $0x800] sm:$0xff]  ;;  %v269_v32 = vmax.f32 %v204_v22, %v693_v19  ;;  %v663_v39 = vld [vmem:[%s1822_s0 + $0x318] sm:$0xff]  ;;  %v141_v41 = vmax.f32 %v76_v34, %v631_v29  ;;  %v789_v46 = vld [vmem:[%s1822_s0 + $0x708] sm:$0xff]  ;;  %v270_v48 = vmax.f32 %v205_v37, %v694_v33 }
   0xa   :  { %v12_v42 = vld [vmem:[%s1822_s0 + $0x20] sm:$0xff]  ;;  %v821_v47 = vld [vmem:[%s1822_s0 + $0x808] sm:$0xff]  ;;  %v695_v49 = vld [vmem:[%s1822_s0 + $0x418] sm:$0xff] }
   0xb   :  { %v333_v25 = vmax.f32 %v268_v18, %v724_v12  ;;  %v334_v40 = vmax.f32 %v269_v32, %v725_v23  ;;  %v600_v43 = vld [vmem:[%s1822_s0 + $0x120] sm:$0xff]  ;;  %v758_v52 = vld [vmem:[%s1822_s0 + $0x610] sm:$0xff]  ;;  %v206_v53 = vmax.f32 %v141_v41, %v663_v39  ;;  %v727_v54 = vld [vmem:[%s1822_s0 + $0x518] sm:$0xff]  ;;  %v335_v57 = vmax.f32 %v270_v48, %v726_v38 }
   0xc   :  { %v632_v44 = vld [vmem:[%s1822_s0 + $0x220] sm:$0xff]  ;;  %v77_v50 = vmax.f32 %v12_v42, %v600_v43  ;;  %v13_v59 = vld [vmem:[%s1822_s0 + $0x28] sm:$0xff]  ;;  %v790_v63 = vld [vmem:[%s1822_s0 + $0x710] sm:$0xff] }
   0xd   :  { %v398_v35 = vmax.f32 %v333_v25, %v756_v21  ;;  %v399_v51 = vmax.f32 %v334_v40, %v757_v36  ;;  %v664_v55 = vld [vmem:[%s1822_s0 + $0x320] sm:$0xff]  ;;  %v601_v60 = vld [vmem:[%s1822_s0 + $0x128] sm:$0xff]  ;;  %v822_v0 = vld [vmem:[%s1822_s0 + $0x810] sm:$0xff]  ;;  %v271_v1 = vmax.f32 %v206_v53, %v695_v49  ;;  %v400_v4 = vmax.f32 %v335_v57, %v758_v52 }
   0xe   :  { %v142_v58 = vmax.f32 %v77_v50, %v632_v44  ;;  %v633_v61 = vld [vmem:[%s1822_s0 + $0x228] sm:$0xff]  ;;  %v696_v2 = vld [vmem:[%s1822_s0 + $0x420] sm:$0xff]  ;;  %v78_v3 = vmax.f32 %v13_v59, %v601_v60  ;;  %v759_v5 = vld [vmem:[%s1822_s0 + $0x618] sm:$0xff] }
   0xf   :  { %v463_v45 = vmax.f32 %v398_v35, %v788_v30  ;;  %v464_v62 = vmax.f32 %v399_v51, %v789_v46  ;;  %v728_v7 = vld [vmem:[%s1822_s0 + $0x520] sm:$0xff]  ;;  %v665_v8 = vld [vmem:[%s1822_s0 + $0x328] sm:$0xff]  ;;  %v336_v10 = vmax.f32 %v271_v1, %v727_v54  ;;  %v14_v12 = vld [vmem:[%s1822_s0 + $0x30] sm:$0xff]  ;;  %v465_v15 = vmax.f32 %v400_v4, %v790_v63 }
  0x10   :  { %v207_v6 = vmax.f32 %v142_v58, %v664_v55  ;;  %v143_v11 = vmax.f32 %v78_v3, %v633_v61  ;;  %v602_v13 = vld [vmem:[%s1822_s0 + $0x130] sm:$0xff]  ;;  %v791_v16 = vld [vmem:[%s1822_s0 + $0x718] sm:$0xff]  ;;  %v697_v19 = vld [vmem:[%s1822_s0 + $0x428] sm:$0xff] }
  0x11   :  { %v528_v56 = vmax.f32 %v463_v45, %v820_v31  ;;  %v529_v9 = vmax.f32 %v464_v62, %v821_v47  ;;  %v634_v14 = vld [vmem:[%s1822_s0 + $0x230] sm:$0xff]  ;;  %v823_v17 = vld [vmem:[%s1822_s0 + $0x818] sm:$0xff]  ;;  %v79_v20 = vmax.f32 %v14_v12, %v602_v13  ;;  %v401_v21 = vmax.f32 %v336_v10, %v759_v5  ;;  %v760_v22 = vld [vmem:[%s1822_s0 + $0x620] sm:$0xff] }
  0x12   :  { %v272_v18 = vmax.f32 %v207_v6, %v696_v2  ;;  %v208_v23 = vmax.f32 %v143_v11, %v665_v8  ;;  %v729_v24 = vld [vmem:[%s1822_s0 + $0x528] sm:$0xff]  ;;  %v666_v25 = vld [vmem:[%s1822_s0 + $0x330] sm:$0xff]  ;;  %v530_v26 = vmax.f32 %v465_v15, %v822_v0  ;;  %v15_v29 = vld [vmem:[%s1822_s0 + $0x38] sm:$0xff] }
  0x13   :  { %560 = vst [vmem:[%s1823_s1] sm:$0xff] %v528_v56  ;;  %561 = vst [vmem:[%s1823_s1 + $0x8] sm:$0xff] %v529_v9  ;;  %v144_v28 = vmax.f32 %v79_v20, %v634_v14  ;;  %v603_v30 = vld [vmem:[%s1822_s0 + $0x138] sm:$0xff]  ;;  %v466_v32 = vmax.f32 %v401_v21, %v791_v16  ;;  %v792_v33 = vld [vmem:[%s1822_s0 + $0x720] sm:$0xff] }
  0x14   :  { %v337_v27 = vmax.f32 %v272_v18, %v728_v7  ;;  %v635_v31 = vld [vmem:[%s1822_s0 + $0x238] sm:$0xff]  ;;  %v824_v34 = vld [vmem:[%s1822_s0 + $0x820] sm:$0xff]  ;;  %v273_v35 = vmax.f32 %v208_v23, %v697_v19  ;;  %v698_v36 = vld [vmem:[%s1822_s0 + $0x430] sm:$0xff]  ;;  %v80_v37 = vmax.f32 %v15_v29, %v603_v30  ;;  %562 = vst [vmem:[%s1823_s1 + $0x10] sm:$0xff] %v530_v26 }
  0x15   :  { %v761_v39 = vld [vmem:[%s1822_s0 + $0x628] sm:$0xff]  ;;  %v209_v40 = vmax.f32 %v144_v28, %v666_v25  ;;  %v730_v41 = vld [vmem:[%s1822_s0 + $0x530] sm:$0xff]  ;;  %v667_v42 = vld [vmem:[%s1822_s0 + $0x338] sm:$0xff]  ;;  %v531_v43 = vmax.f32 %v466_v32, %v823_v17 }
  0x16   :  { %v402_v38 = vmax.f32 %v337_v27, %v760_v22  ;;  %v338_v44 = vmax.f32 %v273_v35, %v729_v24  ;;  %v145_v45 = vmax.f32 %v80_v37, %v635_v31  ;;  %v16_v46 = vld [vmem:[%s1822_s0 + $0x40] sm:$0xff]  ;;  %v793_v50 = vld [vmem:[%s1822_s0 + $0x728] sm:$0xff]  ;;  %v699_v53 = vld [vmem:[%s1822_s0 + $0x438] sm:$0xff] }
  0x17   :  { %v604_v47 = vld [vmem:[%s1822_s0 + $0x140] sm:$0xff]  ;;  %v825_v51 = vld [vmem:[%s1822_s0 + $0x828] sm:$0xff]  ;;  %v274_v52 = vmax.f32 %v209_v40, %v698_v36  ;;  %563 = vst [vmem:[%s1823_s1 + $0x18] sm:$0xff] %v531_v43  ;;  %v762_v56 = vld [vmem:[%s1822_s0 + $0x630] sm:$0xff] }
  0x18   :  { %v636_v48 = vld [vmem:[%s1822_s0 + $0x240] sm:$0xff]  ;;  %v467_v49 = vmax.f32 %v402_v38, %v792_v33  ;;  %v81_v54 = vmax.f32 %v16_v46, %v604_v47  ;;  %v403_v55 = vmax.f32 %v338_v44, %v761_v39  ;;  %v210_v57 = vmax.f32 %v145_v45, %v667_v42  ;;  %v731_v58 = vld [vmem:[%s1822_s0 + $0x538] sm:$0xff]  ;;  %v17_v63 = vld [vmem:[%s1822_s0 + $0x48] sm:$0xff] }
  0x19   :  { %v668_v59 = vld [vmem:[%s1822_s0 + $0x340] sm:$0xff]  ;;  %v339_v61 = vmax.f32 %v274_v52, %v730_v41  ;;  %v605_v0 = vld [vmem:[%s1822_s0 + $0x148] sm:$0xff]  ;;  %v794_v3 = vld [vmem:[%s1822_s0 + $0x730] sm:$0xff] }
  0x1a   :  { %v532_v60 = vmax.f32 %v467_v49, %v824_v34  ;;  %v146_v62 = vmax.f32 %v81_v54, %v636_v48  ;;  %v637_v1 = vld [vmem:[%s1822_s0 + $0x248] sm:$0xff]  ;;  %v468_v2 = vmax.f32 %v403_v55, %v793_v50  ;;  %v826_v4 = vld [vmem:[%s1822_s0 + $0x830] sm:$0xff]  ;;  %v275_v5 = vmax.f32 %v210_v57, %v699_v53  ;;  %v700_v6 = vld [vmem:[%s1822_s0 + $0x440] sm:$0xff] }
  0x1b   :  { %v82_v7 = vmax.f32 %v17_v63, %v605_v0  ;;  %v404_v8 = vmax.f32 %v339_v61, %v762_v56  ;;  %v763_v9 = vld [vmem:[%s1822_s0 + $0x638] sm:$0xff]  ;;  %v732_v11 = vld [vmem:[%s1822_s0 + $0x540] sm:$0xff]  ;;  %v669_v12 = vld [vmem:[%s1822_s0 + $0x348] sm:$0xff] }
  0x1c   :  { %564 = vst [vmem:[%s1823_s1 + $0x20] sm:$0xff] %v532_v60  ;;  %v211_v10 = vmax.f32 %v146_v62, %v668_v59  ;;  %v533_v13 = vmax.f32 %v468_v2, %v825_v51  ;;  %v340_v14 = vmax.f32 %v275_v5, %v731_v58  ;;  %v18_v16 = vld [vmem:[%s1822_s0 + $0x50] sm:$0xff]  ;;  %v795_v20 = vld [vmem:[%s1822_s0 + $0x738] sm:$0xff]  ;;  %v701_v23 = vld [vmem:[%s1822_s0 + $0x448] sm:$0xff] }
  0x1d   :  { %v147_v15 = vmax.f32 %v82_v7, %v637_v1  ;;  %v606_v17 = vld [vmem:[%s1822_s0 + $0x150] sm:$0xff]  ;;  %v469_v19 = vmax.f32 %v404_v8, %v794_v3  ;;  %v827_v21 = vld [vmem:[%s1822_s0 + $0x838] sm:$0xff]  ;;  %v764_v26 = vld [vmem:[%s1822_s0 + $0x640] sm:$0xff] }
  0x1e   :  { %v638_v18 = vld [vmem:[%s1822_s0 + $0x250] sm:$0xff]  ;;  %v276_v22 = vmax.f32 %v211_v10, %v700_v6  ;;  %v83_v24 = vmax.f32 %v18_v16, %v606_v17  ;;  %565 = vst [vmem:[%s1823_s1 + $0x28] sm:$0xff] %v533_v13  ;;  %v405_v25 = vmax.f32 %v340_v14, %v763_v9  ;;  %v733_v28 = vld [vmem:[%s1822_s0 + $0x548] sm:$0xff]  ;;  %v19_v33 = vld [vmem:[%s1822_s0 + $0x58] sm:$0xff] }
  0x1f   :  { %v212_v27 = vmax.f32 %v147_v15, %v669_v12  ;;  %v670_v29 = vld [vmem:[%s1822_s0 + $0x350] sm:$0xff]  ;;  %v534_v30 = vmax.f32 %v469_v19, %v826_v4  ;;  %v607_v34 = vld [vmem:[%s1822_s0 + $0x158] sm:$0xff]  ;;  %v796_v37 = vld [vmem:[%s1822_s0 + $0x740] sm:$0xff] }
  0x20   :  { %v341_v31 = vmax.f32 %v276_v22, %v732_v11  ;;  %v148_v32 = vmax.f32 %v83_v24, %v638_v18  ;;  %v639_v35 = vld [vmem:[%s1822_s0 + $0x258] sm:$0xff]  ;;  %v470_v36 = vmax.f32 %v405_v25, %v795_v20  ;;  %v828_v38 = vld [vmem:[%s1822_s0 + $0x840] sm:$0xff]  ;;  %v702_v40 = vld [vmem:[%s1822_s0 + $0x450] sm:$0xff]  ;;  %v84_v41 = vmax.f32 %v19_v33, %v607_v34 }
  0x21   :  { %v277_v39 = vmax.f32 %v212_v27, %v701_v23  ;;  %566 = vst [vmem:[%s1823_s1 + $0x30] sm:$0xff] %v534_v30  ;;  %v765_v43 = vld [vmem:[%s1822_s0 + $0x648] sm:$0xff]  ;;  %v734_v45 = vld [vmem:[%s1822_s0 + $0x550] sm:$0xff]  ;;  %v671_v46 = vld [vmem:[%s1822_s0 + $0x358] sm:$0xff] }
  0x22   :  { %v406_v42 = vmax.f32 %v341_v31, %v764_v26  ;;  %v213_v44 = vmax.f32 %v148_v32, %v670_v29  ;;  %v535_v47 = vmax.f32 %v470_v36, %v827_v21  ;;  %v149_v49 = vmax.f32 %v84_v41, %v639_v35  ;;  %v20_v50 = vld [vmem:[%s1822_s0 + $0x60] sm:$0xff]  ;;  %v797_v54 = vld [vmem:[%s1822_s0 + $0x748] sm:$0xff]  ;;  %v703_v57 = vld [vmem:[%s1822_s0 + $0x458] sm:$0xff] }
  0x23   :  { %v342_v48 = vmax.f32 %v277_v39, %v733_v28  ;;  %v608_v51 = vld [vmem:[%s1822_s0 + $0x160] sm:$0xff]  ;;  %v829_v55 = vld [vmem:[%s1822_s0 + $0x848] sm:$0xff]  ;;  %v766_v60 = vld [vmem:[%s1822_s0 + $0x650] sm:$0xff] }
  0x24   :  { %v640_v52 = vld [vmem:[%s1822_s0 + $0x260] sm:$0xff]  ;;  %v471_v53 = vmax.f32 %v406_v42, %v796_v37  ;;  %v278_v56 = vmax.f32 %v213_v44, %v702_v40  ;;  %v85_v58 = vmax.f32 %v20_v50, %v608_v51  ;;  %567 = vst [vmem:[%s1823_s1 + $0x38] sm:$0xff] %v535_v47  ;;  %v214_v61 = vmax.f32 %v149_v49, %v671_v46  ;;  %v735_v62 = vld [vmem:[%s1822_s0 + $0x558] sm:$0xff]  ;;  %v21_v3 = vld [vmem:[%s1822_s0 + $0x68] sm:$0xff] }
  0x25   :  { %v407_v59 = vmax.f32 %v342_v48, %v765_v43  ;;  %v672_v63 = vld [vmem:[%s1822_s0 + $0x360] sm:$0xff]  ;;  %v609_v4 = vld [vmem:[%s1822_s0 + $0x168] sm:$0xff]  ;;  %v798_v7 = vld [vmem:[%s1822_s0 + $0x750] sm:$0xff] }
  0x26   :  { %v536_v0 = vmax.f32 %v471_v53, %v828_v38  ;;  %v343_v1 = vmax.f32 %v278_v56, %v734_v45  ;;  %v150_v2 = vmax.f32 %v85_v58, %v640_v52  ;;  %v641_v5 = vld [vmem:[%s1822_s0 + $0x268] sm:$0xff]  ;;  %v830_v8 = vld [vmem:[%s1822_s0 + $0x850] sm:$0xff]  ;;  %v279_v9 = vmax.f32 %v214_v61, %v703_v57  ;;  %v704_v10 = vld [vmem:[%s1822_s0 + $0x460] sm:$0xff] }
  0x27   :  { %v472_v6 = vmax.f32 %v407_v59, %v797_v54  ;;  %v86_v11 = vmax.f32 %v21_v3, %v609_v4  ;;  %v767_v13 = vld [vmem:[%s1822_s0 + $0x658] sm:$0xff]  ;;  %v736_v15 = vld [vmem:[%s1822_s0 + $0x560] sm:$0xff]  ;;  %v673_v16 = vld [vmem:[%s1822_s0 + $0x368] sm:$0xff] }
  0x28   :  { %568 = vst [vmem:[%s1823_s1 + $0x40] sm:$0xff] %v536_v0  ;;  %v408_v12 = vmax.f32 %v343_v1, %v766_v60  ;;  %v215_v14 = vmax.f32 %v150_v2, %v672_v63  ;;  %v344_v18 = vmax.f32 %v279_v9, %v735_v62  ;;  %v22_v20 = vld [vmem:[%s1822_s0 + $0x70] sm:$0xff]  ;;  %v799_v24 = vld [vmem:[%s1822_s0 + $0x758] sm:$0xff]  ;;  %v705_v27 = vld [vmem:[%s1822_s0 + $0x468] sm:$0xff] }
  0x29   :  { %v537_v17 = vmax.f32 %v472_v6, %v829_v55  ;;  %v151_v19 = vmax.f32 %v86_v11, %v641_v5  ;;  %v610_v21 = vld [vmem:[%s1822_s0 + $0x170] sm:$0xff]  ;;  %v831_v25 = vld [vmem:[%s1822_s0 + $0x858] sm:$0xff]  ;;  %v768_v30 = vld [vmem:[%s1822_s0 + $0x660] sm:$0xff] }
  0x2a   :  { %v642_v22 = vld [vmem:[%s1822_s0 + $0x270] sm:$0xff]  ;;  %v473_v23 = vmax.f32 %v408_v12, %v798_v7  ;;  %v280_v26 = vmax.f32 %v215_v14, %v704_v10  ;;  %v87_v28 = vmax.f32 %v22_v20, %v610_v21  ;;  %v409_v29 = vmax.f32 %v344_v18, %v767_v13  ;;  %v737_v32 = vld [vmem:[%s1822_s0 + $0x568] sm:$0xff]  ;;  %v23_v37 = vld [vmem:[%s1822_s0 + $0x78] sm:$0xff] }
  0x2b   :  { %569 = vst [vmem:[%s1823_s1 + $0x48] sm:$0xff] %v537_v17  ;;  %v216_v31 = vmax.f32 %v151_v19, %v673_v16  ;;  %v674_v33 = vld [vmem:[%s1822_s0 + $0x370] sm:$0xff]  ;;  %v611_v38 = vld [vmem:[%s1822_s0 + $0x178] sm:$0xff]  ;;  %v800_v41 = vld [vmem:[%s1822_s0 + $0x760] sm:$0xff] }
  0x2c   :  { %v538_v34 = vmax.f32 %v473_v23, %v830_v8  ;;  %v345_v35 = vmax.f32 %v280_v26, %v736_v15  ;;  %v152_v36 = vmax.f32 %v87_v28, %v642_v22  ;;  %v643_v39 = vld [vmem:[%s1822_s0 + $0x278] sm:$0xff]  ;;  %v474_v40 = vmax.f32 %v409_v29, %v799_v24  ;;  %v832_v42 = vld [vmem:[%s1822_s0 + $0x860] sm:$0xff]  ;;  %v706_v44 = vld [vmem:[%s1822_s0 + $0x470] sm:$0xff] }
  0x2d   :  { %v281_v43 = vmax.f32 %v216_v31, %v705_v27  ;;  %v88_v45 = vmax.f32 %v23_v37, %v611_v38  ;;  %v769_v47 = vld [vmem:[%s1822_s0 + $0x668] sm:$0xff]  ;;  %v738_v49 = vld [vmem:[%s1822_s0 + $0x570] sm:$0xff]  ;;  %v675_v50 = vld [vmem:[%s1822_s0 + $0x378] sm:$0xff] }
  0x2e   :  { %570 = vst [vmem:[%s1823_s1 + $0x50] sm:$0xff] %v538_v34  ;;  %v410_v46 = vmax.f32 %v345_v35, %v768_v30  ;;  %v217_v48 = vmax.f32 %v152_v36, %v674_v33  ;;  %v539_v51 = vmax.f32 %v474_v40, %v831_v25  ;;  %v24_v54 = vld [vmem:[%s1822_s0 + $0x80] sm:$0xff]  ;;  %v801_v58 = vld [vmem:[%s1822_s0 + $0x768] sm:$0xff]  ;;  %v707_v61 = vld [vmem:[%s1822_s0 + $0x478] sm:$0xff] }
  0x2f   :  { %v346_v52 = vmax.f32 %v281_v43, %v737_v32  ;;  %v153_v53 = vmax.f32 %v88_v45, %v643_v39  ;;  %v612_v55 = vld [vmem:[%s1822_s0 + $0x180] sm:$0xff]  ;;  %v833_v59 = vld [vmem:[%s1822_s0 + $0x868] sm:$0xff]  ;;  %v770_v0 = vld [vmem:[%s1822_s0 + $0x670] sm:$0xff] }
  0x30   :  { %v644_v56 = vld [vmem:[%s1822_s0 + $0x280] sm:$0xff]  ;;  %v475_v57 = vmax.f32 %v410_v46, %v800_v41  ;;  %v282_v60 = vmax.f32 %v217_v48, %v706_v44  ;;  %v89_v62 = vmax.f32 %v24_v54, %v612_v55  ;;  %571 = vst [vmem:[%s1823_s1 + $0x58] sm:$0xff] %v539_v51  ;;  %v739_v2 = vld [vmem:[%s1822_s0 + $0x578] sm:$0xff]  ;;  %v25_v7 = vld [vmem:[%s1822_s0 + $0x88] sm:$0xff] }
  0x31   :  { %v411_v63 = vmax.f32 %v346_v52, %v769_v47  ;;  %v218_v1 = vmax.f32 %v153_v53, %v675_v50  ;;  %v676_v3 = vld [vmem:[%s1822_s0 + $0x380] sm:$0xff]  ;;  %v613_v8 = vld [vmem:[%s1822_s0 + $0x188] sm:$0xff]  ;;  %v802_v11 = vld [vmem:[%s1822_s0 + $0x770] sm:$0xff] }
  0x32   :  { %v540_v4 = vmax.f32 %v475_v57, %v832_v42  ;;  %v347_v5 = vmax.f32 %v282_v60, %v738_v49  ;;  %v154_v6 = vmax.f32 %v89_v62, %v644_v56  ;;  %v645_v9 = vld [vmem:[%s1822_s0 + $0x288] sm:$0xff]  ;;  %v834_v12 = vld [vmem:[%s1822_s0 + $0x870] sm:$0xff]  ;;  %v708_v14 = vld [vmem:[%s1822_s0 + $0x480] sm:$0xff]  ;;  %v90_v15 = vmax.f32 %v25_v7, %v613_v8 }
  0x33   :  { %v476_v10 = vmax.f32 %v411_v63, %v801_v58  ;;  %v283_v13 = vmax.f32 %v218_v1, %v707_v61  ;;  %v771_v17 = vld [vmem:[%s1822_s0 + $0x678] sm:$0xff]  ;;  %v740_v19 = vld [vmem:[%s1822_s0 + $0x580] sm:$0xff]  ;;  %v677_v20 = vld [vmem:[%s1822_s0 + $0x388] sm:$0xff] }
  0x34   :  { %572 = vst [vmem:[%s1823_s1 + $0x60] sm:$0xff] %v540_v4  ;;  %v412_v16 = vmax.f32 %v347_v5, %v770_v0  ;;  %v219_v18 = vmax.f32 %v154_v6, %v676_v3  ;;  %v155_v23 = vmax.f32 %v90_v15, %v645_v9  ;;  %v26_v24 = vld [vmem:[%s1822_s0 + $0x90] sm:$0xff]  ;;  %v803_v28 = vld [vmem:[%s1822_s0 + $0x778] sm:$0xff]  ;;  %v709_v31 = vld [vmem:[%s1822_s0 + $0x488] sm:$0xff] }
  0x35   :  { %v541_v21 = vmax.f32 %v476_v10, %v833_v59  ;;  %v348_v22 = vmax.f32 %v283_v13, %v739_v2  ;;  %v614_v25 = vld [vmem:[%s1822_s0 + $0x190] sm:$0xff]  ;;  %v835_v29 = vld [vmem:[%s1822_s0 + $0x878] sm:$0xff]  ;;  %v772_v34 = vld [vmem:[%s1822_s0 + $0x680] sm:$0xff] }
  0x36   :  { %v646_v26 = vld [vmem:[%s1822_s0 + $0x290] sm:$0xff]  ;;  %v477_v27 = vmax.f32 %v412_v16, %v802_v11  ;;  %v284_v30 = vmax.f32 %v219_v18, %v708_v14  ;;  %v91_v32 = vmax.f32 %v26_v24, %v614_v25  ;;  %v220_v35 = vmax.f32 %v155_v23, %v677_v20  ;;  %v741_v36 = vld [vmem:[%s1822_s0 + $0x588] sm:$0xff]  ;;  %v27_v41 = vld [vmem:[%s1822_s0 + $0x98] sm:$0xff] }
  0x37   :  { %573 = vst [vmem:[%s1823_s1 + $0x68] sm:$0xff] %v541_v21  ;;  %v413_v33 = vmax.f32 %v348_v22, %v771_v17  ;;  %v678_v37 = vld [vmem:[%s1822_s0 + $0x390] sm:$0xff]  ;;  %v615_v42 = vld [vmem:[%s1822_s0 + $0x198] sm:$0xff]  ;;  %v804_v45 = vld [vmem:[%s1822_s0 + $0x780] sm:$0xff] }
  0x38   :  { %v542_v38 = vmax.f32 %v477_v27, %v834_v12  ;;  %v349_v39 = vmax.f32 %v284_v30, %v740_v19  ;;  %v156_v40 = vmax.f32 %v91_v32, %v646_v26  ;;  %v647_v43 = vld [vmem:[%s1822_s0 + $0x298] sm:$0xff]  ;;  %v836_v46 = vld [vmem:[%s1822_s0 + $0x880] sm:$0xff]  ;;  %v285_v47 = vmax.f32 %v220_v35, %v709_v31  ;;  %v710_v48 = vld [vmem:[%s1822_s0 + $0x490] sm:$0xff] }
  0x39   :  { %v478_v44 = vmax.f32 %v413_v33, %v803_v28  ;;  %v92_v49 = vmax.f32 %v27_v41, %v615_v42  ;;  %v773_v51 = vld [vmem:[%s1822_s0 + $0x688] sm:$0xff]  ;;  %v742_v53 = vld [vmem:[%s1822_s0 + $0x590] sm:$0xff]  ;;  %v679_v54 = vld [vmem:[%s1822_s0 + $0x398] sm:$0xff] }
  0x3a   :  { %574 = vst [vmem:[%s1823_s1 + $0x70] sm:$0xff] %v542_v38  ;;  %v414_v50 = vmax.f32 %v349_v39, %v772_v34  ;;  %v221_v52 = vmax.f32 %v156_v40, %v678_v37  ;;  %v350_v56 = vmax.f32 %v285_v47, %v741_v36  ;;  %v28_v58 = vld [vmem:[%s1822_s0 + $0xa0] sm:$0xff]  ;;  %v805_v62 = vld [vmem:[%s1822_s0 + $0x788] sm:$0xff]  ;;  %v711_v1 = vld [vmem:[%s1822_s0 + $0x498] sm:$0xff] }
  0x3b   :  { %v543_v55 = vmax.f32 %v478_v44, %v835_v29  ;;  %v157_v57 = vmax.f32 %v92_v49, %v647_v43  ;;  %v616_v59 = vld [vmem:[%s1822_s0 + $0x1a0] sm:$0xff]  ;;  %v837_v63 = vld [vmem:[%s1822_s0 + $0x888] sm:$0xff]  ;;  %v774_v4 = vld [vmem:[%s1822_s0 + $0x690] sm:$0xff] }
  0x3c   :  { %v648_v60 = vld [vmem:[%s1822_s0 + $0x2a0] sm:$0xff]  ;;  %v479_v61 = vmax.f32 %v414_v50, %v804_v45  ;;  %v286_v0 = vmax.f32 %v221_v52, %v710_v48  ;;  %v93_v2 = vmax.f32 %v28_v58, %v616_v59  ;;  %v415_v3 = vmax.f32 %v350_v56, %v773_v51  ;;  %v743_v6 = vld [vmem:[%s1822_s0 + $0x598] sm:$0xff]  ;;  %v29_v11 = vld [vmem:[%s1822_s0 + $0xa8] sm:$0xff] }
  0x3d   :  { %575 = vst [vmem:[%s1823_s1 + $0x78] sm:$0xff] %v543_v55  ;;  %v222_v5 = vmax.f32 %v157_v57, %v679_v54  ;;  %v680_v7 = vld [vmem:[%s1822_s0 + $0x3a0] sm:$0xff]  ;;  %v617_v12 = vld [vmem:[%s1822_s0 + $0x1a8] sm:$0xff]  ;;  %v806_v15 = vld [vmem:[%s1822_s0 + $0x790] sm:$0xff] }
  0x3e   :  { %v544_v8 = vmax.f32 %v479_v61, %v836_v46  ;;  %v351_v9 = vmax.f32 %v286_v0, %v742_v53  ;;  %v158_v10 = vmax.f32 %v93_v2, %v648_v60  ;;  %v649_v13 = vld [vmem:[%s1822_s0 + $0x2a8] sm:$0xff]  ;;  %v480_v14 = vmax.f32 %v415_v3, %v805_v62  ;;  %v838_v16 = vld [vmem:[%s1822_s0 + $0x890] sm:$0xff]  ;;  %v712_v18 = vld [vmem:[%s1822_s0 + $0x4a0] sm:$0xff] }
  0x3f   :  { %v287_v17 = vmax.f32 %v222_v5, %v711_v1  ;;  %v94_v19 = vmax.f32 %v29_v11, %v617_v12  ;;  %v775_v21 = vld [vmem:[%s1822_s0 + $0x698] sm:$0xff]  ;;  %v744_v23 = vld [vmem:[%s1822_s0 + $0x5a0] sm:$0xff]  ;;  %v681_v24 = vld [vmem:[%s1822_s0 + $0x3a8] sm:$0xff] }
  0x40   :  { %576 = vst [vmem:[%s1823_s1 + $0x80] sm:$0xff] %v544_v8  ;;  %v416_v20 = vmax.f32 %v351_v9, %v774_v4  ;;  %v223_v22 = vmax.f32 %v158_v10, %v680_v7  ;;  %v545_v25 = vmax.f32 %v480_v14, %v837_v63  ;;  %v30_v28 = vld [vmem:[%s1822_s0 + $0xb0] sm:$0xff]  ;;  %v807_v32 = vld [vmem:[%s1822_s0 + $0x798] sm:$0xff]  ;;  %v713_v35 = vld [vmem:[%s1822_s0 + $0x4a8] sm:$0xff] }
  0x41   :  { %v352_v26 = vmax.f32 %v287_v17, %v743_v6  ;;  %v159_v27 = vmax.f32 %v94_v19, %v649_v13  ;;  %v618_v29 = vld [vmem:[%s1822_s0 + $0x1b0] sm:$0xff]  ;;  %v839_v33 = vld [vmem:[%s1822_s0 + $0x898] sm:$0xff]  ;;  %v776_v38 = vld [vmem:[%s1822_s0 + $0x6a0] sm:$0xff] }
  0x42   :  { %v650_v30 = vld [vmem:[%s1822_s0 + $0x2b0] sm:$0xff]  ;;  %v481_v31 = vmax.f32 %v416_v20, %v806_v15  ;;  %v288_v34 = vmax.f32 %v223_v22, %v712_v18  ;;  %v95_v36 = vmax.f32 %v30_v28, %v618_v29  ;;  %577 = vst [vmem:[%s1823_s1 + $0x88] sm:$0xff] %v545_v25  ;;  %v745_v40 = vld [vmem:[%s1822_s0 + $0x5a8] sm:$0xff]  ;;  %v31_v45 = vld [vmem:[%s1822_s0 + $0xb8] sm:$0xff] }
  0x43   :  { %v417_v37 = vmax.f32 %v352_v26, %v775_v21  ;;  %v224_v39 = vmax.f32 %v159_v27, %v681_v24  ;;  %v682_v41 = vld [vmem:[%s1822_s0 + $0x3b0] sm:$0xff]  ;;  %v619_v46 = vld [vmem:[%s1822_s0 + $0x1b8] sm:$0xff]  ;;  %v808_v49 = vld [vmem:[%s1822_s0 + $0x7a0] sm:$0xff] }
  0x44   :  { %v546_v42 = vmax.f32 %v481_v31, %v838_v16  ;;  %v353_v43 = vmax.f32 %v288_v34, %v744_v23  ;;  %v160_v44 = vmax.f32 %v95_v36, %v650_v30  ;;  %v651_v47 = vld [vmem:[%s1822_s0 + $0x2b8] sm:$0xff]  ;;  %v840_v50 = vld [vmem:[%s1822_s0 + $0x8a0] sm:$0xff]  ;;  %v714_v52 = vld [vmem:[%s1822_s0 + $0x4b0] sm:$0xff]  ;;  %v96_v53 = vmax.f32 %v31_v45, %v619_v46 }
  0x45   :  { %v482_v48 = vmax.f32 %v417_v37, %v807_v32  ;;  %v289_v51 = vmax.f32 %v224_v39, %v713_v35  ;;  %v777_v55 = vld [vmem:[%s1822_s0 + $0x6a8] sm:$0xff]  ;;  %v746_v57 = vld [vmem:[%s1822_s0 + $0x5b0] sm:$0xff]  ;;  %v683_v58 = vld [vmem:[%s1822_s0 + $0x3b8] sm:$0xff] }
  0x46   :  { %578 = vst [vmem:[%s1823_s1 + $0x90] sm:$0xff] %v546_v42  ;;  %v418_v54 = vmax.f32 %v353_v43, %v776_v38  ;;  %v225_v56 = vmax.f32 %v160_v44, %v682_v41  ;;  %v161_v61 = vmax.f32 %v96_v53, %v651_v47  ;;  %v32_v62 = vld [vmem:[%s1822_s0 + $0xc0] sm:$0xff]  ;;  %v809_v2 = vld [vmem:[%s1822_s0 + $0x7a8] sm:$0xff]  ;;  %v715_v5 = vld [vmem:[%s1822_s0 + $0x4b8] sm:$0xff] }
  0x47   :  { %v547_v59 = vmax.f32 %v482_v48, %v839_v33  ;;  %v354_v60 = vmax.f32 %v289_v51, %v745_v40  ;;  %v620_v63 = vld [vmem:[%s1822_s0 + $0x1c0] sm:$0xff]  ;;  %v841_v3 = vld [vmem:[%s1822_s0 + $0x8a8] sm:$0xff]  ;;  %v778_v8 = vld [vmem:[%s1822_s0 + $0x6b0] sm:$0xff] }
  0x48   :  { %v652_v0 = vld [vmem:[%s1822_s0 + $0x2c0] sm:$0xff]  ;;  %v483_v1 = vmax.f32 %v418_v54, %v808_v49  ;;  %v290_v4 = vmax.f32 %v225_v56, %v714_v52  ;;  %v97_v6 = vmax.f32 %v32_v62, %v620_v63  ;;  %v226_v9 = vmax.f32 %v161_v61, %v683_v58  ;;  %v747_v10 = vld [vmem:[%s1822_s0 + $0x5b8] sm:$0xff]  ;;  %v33_v15 = vld [vmem:[%s1822_s0 + $0xc8] sm:$0xff] }
  0x49   :  { %579 = vst [vmem:[%s1823_s1 + $0x98] sm:$0xff] %v547_v59  ;;  %v419_v7 = vmax.f32 %v354_v60, %v777_v55  ;;  %v684_v11 = vld [vmem:[%s1822_s0 + $0x3c0] sm:$0xff]  ;;  %v621_v16 = vld [vmem:[%s1822_s0 + $0x1c8] sm:$0xff]  ;;  %v810_v19 = vld [vmem:[%s1822_s0 + $0x7b0] sm:$0xff] }
  0x4a   :  { %v548_v12 = vmax.f32 %v483_v1, %v840_v50  ;;  %v355_v13 = vmax.f32 %v290_v4, %v746_v57  ;;  %v162_v14 = vmax.f32 %v97_v6, %v652_v0  ;;  %v653_v17 = vld [vmem:[%s1822_s0 + $0x2c8] sm:$0xff]  ;;  %v842_v20 = vld [vmem:[%s1822_s0 + $0x8b0] sm:$0xff]  ;;  %v291_v21 = vmax.f32 %v226_v9, %v715_v5  ;;  %v716_v22 = vld [vmem:[%s1822_s0 + $0x4c0] sm:$0xff] }
  0x4b   :  { %v484_v18 = vmax.f32 %v419_v7, %v809_v2  ;;  %v98_v23 = vmax.f32 %v33_v15, %v621_v16  ;;  %v779_v25 = vld [vmem:[%s1822_s0 + $0x6b8] sm:$0xff]  ;;  %v748_v27 = vld [vmem:[%s1822_s0 + $0x5c0] sm:$0xff]  ;;  %v685_v28 = vld [vmem:[%s1822_s0 + $0x3c8] sm:$0xff] }
  0x4c   :  { %580 = vst [vmem:[%s1823_s1 + $0xa0] sm:$0xff] %v548_v12  ;;  %v420_v24 = vmax.f32 %v355_v13, %v778_v8  ;;  %v227_v26 = vmax.f32 %v162_v14, %v684_v11  ;;  %v356_v30 = vmax.f32 %v291_v21, %v747_v10  ;;  %v34_v32 = vld [vmem:[%s1822_s0 + $0xd0] sm:$0xff]  ;;  %v811_v36 = vld [vmem:[%s1822_s0 + $0x7b8] sm:$0xff]  ;;  %v717_v39 = vld [vmem:[%s1822_s0 + $0x4c8] sm:$0xff] }
  0x4d   :  { %v549_v29 = vmax.f32 %v484_v18, %v841_v3  ;;  %v163_v31 = vmax.f32 %v98_v23, %v653_v17  ;;  %v622_v33 = vld [vmem:[%s1822_s0 + $0x1d0] sm:$0xff]  ;;  %v843_v37 = vld [vmem:[%s1822_s0 + $0x8b8] sm:$0xff]  ;;  %v780_v42 = vld [vmem:[%s1822_s0 + $0x6c0] sm:$0xff] }
  0x4e   :  { %v654_v34 = vld [vmem:[%s1822_s0 + $0x2d0] sm:$0xff]  ;;  %v485_v35 = vmax.f32 %v420_v24, %v810_v19  ;;  %v292_v38 = vmax.f32 %v227_v26, %v716_v22  ;;  %v99_v40 = vmax.f32 %v34_v32, %v622_v33  ;;  %v421_v41 = vmax.f32 %v356_v30, %v779_v25  ;;  %v749_v44 = vld [vmem:[%s1822_s0 + $0x5c8] sm:$0xff]  ;;  %v35_v49 = vld [vmem:[%s1822_s0 + $0xd8] sm:$0xff] }
  0x4f   :  { %581 = vst [vmem:[%s1823_s1 + $0xa8] sm:$0xff] %v549_v29  ;;  %v228_v43 = vmax.f32 %v163_v31, %v685_v28  ;;  %v686_v45 = vld [vmem:[%s1822_s0 + $0x3d0] sm:$0xff]  ;;  %v623_v50 = vld [vmem:[%s1822_s0 + $0x1d8] sm:$0xff]  ;;  %v812_v53 = vld [vmem:[%s1822_s0 + $0x7c0] sm:$0xff] }
  0x50   :  { %v550_v46 = vmax.f32 %v485_v35, %v842_v20  ;;  %v357_v47 = vmax.f32 %v292_v38, %v748_v27  ;;  %v164_v48 = vmax.f32 %v99_v40, %v654_v34  ;;  %v655_v51 = vld [vmem:[%s1822_s0 + $0x2d8] sm:$0xff]  ;;  %v486_v52 = vmax.f32 %v421_v41, %v811_v36  ;;  %v844_v54 = vld [vmem:[%s1822_s0 + $0x8c0] sm:$0xff]  ;;  %v718_v56 = vld [vmem:[%s1822_s0 + $0x4d0] sm:$0xff] }
  0x51   :  { %v293_v55 = vmax.f32 %v228_v43, %v717_v39  ;;  %v100_v57 = vmax.f32 %v35_v49, %v623_v50  ;;  %v781_v59 = vld [vmem:[%s1822_s0 + $0x6c8] sm:$0xff]  ;;  %v750_v61 = vld [vmem:[%s1822_s0 + $0x5d0] sm:$0xff]  ;;  %v687_v62 = vld [vmem:[%s1822_s0 + $0x3d8] sm:$0xff] }
  0x52   :  { %582 = vst [vmem:[%s1823_s1 + $0xb0] sm:$0xff] %v550_v46  ;;  %v422_v58 = vmax.f32 %v357_v47, %v780_v42  ;;  %v229_v60 = vmax.f32 %v164_v48, %v686_v45  ;;  %v551_v63 = vmax.f32 %v486_v52, %v843_v37  ;;  %v36_v2 = vld [vmem:[%s1822_s0 + $0xe0] sm:$0xff]  ;;  %v813_v6 = vld [vmem:[%s1822_s0 + $0x7c8] sm:$0xff]  ;;  %v719_v9 = vld [vmem:[%s1822_s0 + $0x4d8] sm:$0xff] }
  0x53   :  { %v358_v0 = vmax.f32 %v293_v55, %v749_v44  ;;  %v165_v1 = vmax.f32 %v100_v57, %v655_v51  ;;  %v624_v3 = vld [vmem:[%s1822_s0 + $0x1e0] sm:$0xff]  ;;  %v845_v7 = vld [vmem:[%s1822_s0 + $0x8c8] sm:$0xff]  ;;  %v782_v12 = vld [vmem:[%s1822_s0 + $0x6d0] sm:$0xff] }
  0x54   :  { %v656_v4 = vld [vmem:[%s1822_s0 + $0x2e0] sm:$0xff]  ;;  %v487_v5 = vmax.f32 %v422_v58, %v812_v53  ;;  %v294_v8 = vmax.f32 %v229_v60, %v718_v56  ;;  %v101_v10 = vmax.f32 %v36_v2, %v624_v3  ;;  %583 = vst [vmem:[%s1823_s1 + $0xb8] sm:$0xff] %v551_v63  ;;  %v751_v14 = vld [vmem:[%s1822_s0 + $0x5d8] sm:$0xff]  ;;  %v37_v19 = vld [vmem:[%s1822_s0 + $0xe8] sm:$0xff] }
  0x55   :  { %v423_v11 = vmax.f32 %v358_v0, %v781_v59  ;;  %v230_v13 = vmax.f32 %v165_v1, %v687_v62  ;;  %v688_v15 = vld [vmem:[%s1822_s0 + $0x3e0] sm:$0xff]  ;;  %v625_v20 = vld [vmem:[%s1822_s0 + $0x1e8] sm:$0xff]  ;;  %v814_v23 = vld [vmem:[%s1822_s0 + $0x7d0] sm:$0xff] }
  0x56   :  { %v552_v16 = vmax.f32 %v487_v5, %v844_v54  ;;  %v359_v17 = vmax.f32 %v294_v8, %v750_v61  ;;  %v166_v18 = vmax.f32 %v101_v10, %v656_v4  ;;  %v657_v21 = vld [vmem:[%s1822_s0 + $0x2e8] sm:$0xff]  ;;  %v846_v24 = vld [vmem:[%s1822_s0 + $0x8d0] sm:$0xff]  ;;  %v720_v26 = vld [vmem:[%s1822_s0 + $0x4e0] sm:$0xff]  ;;  %v102_v27 = vmax.f32 %v37_v19, %v625_v20 }
  0x57   :  { %v488_v22 = vmax.f32 %v423_v11, %v813_v6  ;;  %v295_v25 = vmax.f32 %v230_v13, %v719_v9  ;;  %v783_v29 = vld [vmem:[%s1822_s0 + $0x6d8] sm:$0xff]  ;;  %v752_v31 = vld [vmem:[%s1822_s0 + $0x5e0] sm:$0xff]  ;;  %v689_v32 = vld [vmem:[%s1822_s0 + $0x3e8] sm:$0xff] }
  0x58   :  { %584 = vst [vmem:[%s1823_s1 + $0xc0] sm:$0xff] %v552_v16  ;;  %v424_v28 = vmax.f32 %v359_v17, %v782_v12  ;;  %v231_v30 = vmax.f32 %v166_v18, %v688_v15  ;;  %v167_v35 = vmax.f32 %v102_v27, %v657_v21  ;;  %v38_v36 = vld [vmem:[%s1822_s0 + $0xf0] sm:$0xff]  ;;  %v815_v40 = vld [vmem:[%s1822_s0 + $0x7d8] sm:$0xff]  ;;  %v721_v43 = vld [vmem:[%s1822_s0 + $0x4e8] sm:$0xff] }
  0x59   :  { %v553_v33 = vmax.f32 %v488_v22, %v845_v7  ;;  %v360_v34 = vmax.f32 %v295_v25, %v751_v14  ;;  %v626_v37 = vld [vmem:[%s1822_s0 + $0x1f0] sm:$0xff]  ;;  %v847_v41 = vld [vmem:[%s1822_s0 + $0x8d8] sm:$0xff]  ;;  %v784_v46 = vld [vmem:[%s1822_s0 + $0x6e0] sm:$0xff] }
  0x5a   :  { %v658_v38 = vld [vmem:[%s1822_s0 + $0x2f0] sm:$0xff]  ;;  %v489_v39 = vmax.f32 %v424_v28, %v814_v23  ;;  %v296_v42 = vmax.f32 %v231_v30, %v720_v26  ;;  %v103_v44 = vmax.f32 %v38_v36, %v626_v37  ;;  %v232_v47 = vmax.f32 %v167_v35, %v689_v32  ;;  %v753_v48 = vld [vmem:[%s1822_s0 + $0x5e8] sm:$0xff]  ;;  %v39_v53 = vld [vmem:[%s1822_s0 + $0xf8] sm:$0xff] }
  0x5b   :  { %585 = vst [vmem:[%s1823_s1 + $0xc8] sm:$0xff] %v553_v33  ;;  %v425_v45 = vmax.f32 %v360_v34, %v783_v29  ;;  %v690_v49 = vld [vmem:[%s1822_s0 + $0x3f0] sm:$0xff]  ;;  %v627_v54 = vld [vmem:[%s1822_s0 + $0x1f8] sm:$0xff]  ;;  %v816_v57 = vld [vmem:[%s1822_s0 + $0x7e0] sm:$0xff] }
  0x5c   :  { %v554_v50 = vmax.f32 %v489_v39, %v846_v24  ;;  %v361_v51 = vmax.f32 %v296_v42, %v752_v31  ;;  %v168_v52 = vmax.f32 %v103_v44, %v658_v38  ;;  %v659_v55 = vld [vmem:[%s1822_s0 + $0x2f8] sm:$0xff]  ;;  %v297_v58 = vmax.f32 %v232_v47, %v721_v43  ;;  %v722_v59 = vld [vmem:[%s1822_s0 + $0x4f0] sm:$0xff]  ;;  %v785_v62 = vld [vmem:[%s1822_s0 + $0x6e8] sm:$0xff] }
  0x5d   :  { %v490_v56 = vmax.f32 %v425_v45, %v815_v40  ;;  %v104_v60 = vmax.f32 %v39_v53, %v627_v54  ;;  %v691_v0 = vld [vmem:[%s1822_s0 + $0x3f8] sm:$0xff]  ;;  %v848_v2 = vld [vmem:[%s1822_s0 + $0x8e0] sm:$0xff]  ;;  %v754_v4 = vld [vmem:[%s1822_s0 + $0x5f0] sm:$0xff] }
  0x5e   :  { %586 = vst [vmem:[%s1823_s1 + $0xd0] sm:$0xff] %v554_v50  ;;  %v426_v61 = vmax.f32 %v361_v51, %v784_v46  ;;  %v233_v63 = vmax.f32 %v168_v52, %v690_v49  ;;  %v362_v3 = vmax.f32 %v297_v58, %v753_v48  ;;  %v817_v7 = vld [vmem:[%s1822_s0 + $0x7e8] sm:$0xff]  ;;  %v723_v9 = vld [vmem:[%s1822_s0 + $0x4f8] sm:$0xff]  ;;  %v786_v11 = vld [vmem:[%s1822_s0 + $0x6f0] sm:$0xff] }
  0x5f   :  { %v555_v1 = vmax.f32 %v490_v56, %v847_v41  ;;  %v169_v5 = vmax.f32 %v104_v60, %v659_v55  ;;  %v849_v14 = vld [vmem:[%s1822_s0 + $0x8e8] sm:$0xff]  ;;  %v755_v16 = vld [vmem:[%s1822_s0 + $0x5f8] sm:$0xff]  ;;  %v818_v18 = vld [vmem:[%s1822_s0 + $0x7f0] sm:$0xff] }
  0x60   :  { %v491_v6 = vmax.f32 %v426_v61, %v816_v57  ;;  %v298_v8 = vmax.f32 %v233_v63, %v722_v59  ;;  %v427_v10 = vmax.f32 %v362_v3, %v785_v62  ;;  %v787_v21 = vld [vmem:[%s1822_s0 + $0x6f8] sm:$0xff]  ;;  %v850_v23 = vld [vmem:[%s1822_s0 + $0x8f0] sm:$0xff] }
  0x61   :  { %587 = vst [vmem:[%s1823_s1 + $0xd8] sm:$0xff] %v555_v1  ;;  %v234_v12 = vmax.f32 %v169_v5, %v691_v0  ;;  %v819_v26 = vld [vmem:[%s1822_s0 + $0x7f8] sm:$0xff] }
  0x62   :  { %v556_v13 = vmax.f32 %v491_v6, %v848_v2  ;;  %v363_v15 = vmax.f32 %v298_v8, %v754_v4  ;;  %v492_v17 = vmax.f32 %v427_v10, %v817_v7  ;;  %v851_v29 = vld [vmem:[%s1822_s0 + $0x8f8] sm:$0xff] }
  0x63   :  { %v299_v19 = vmax.f32 %v234_v12, %v723_v9 }
  0x64   :  { %588 = vst [vmem:[%s1823_s1 + $0xe0] sm:$0xff] %v556_v13  ;;  %v428_v20 = vmax.f32 %v363_v15, %v786_v11  ;;  %v557_v22 = vmax.f32 %v492_v17, %v849_v14 }
  0x65   :  { %v364_v24 = vmax.f32 %v299_v19, %v755_v16 }
  0x66   :  { %v493_v25 = vmax.f32 %v428_v20, %v818_v18  ;;  %589 = vst [vmem:[%s1823_s1 + $0xe8] sm:$0xff] %v557_v22 }
  0x67   :  { %v429_v27 = vmax.f32 %v364_v24, %v787_v21 }
  0x68   :  { %v558_v28 = vmax.f32 %v493_v25, %v850_v23 }
  0x69   :  { %v494_v30 = vmax.f32 %v429_v27, %v819_v26 }
  0x6a   :  { %590 = vst [vmem:[%s1823_s1 + $0xf0] sm:$0xff] %v558_v28 }
  0x6b   :  { %v559_v31 = vmax.f32 %v494_v30, %v851_v29 }
  0x6d   :  { %591 = vst [vmem:[%s1823_s1 + $0xf8] sm:$0xff] %v559_v31 }

</bundles_post_ra>
